<compile_context>
chip_gen: v7x
topology: tpu7x:2x2x1
jax: 0.10.0
libtpu: 0.0.40
codegen_flags: <defaults>
</compile_context>

<pallas_src>
import math

import jax
import jax.numpy as jnp
import numpy as np
from jax.experimental import pallas as pl
from jax.experimental.pallas import tpu as pltpu


# ----------------------- per-generation tuning knobs ----------------------- #

def _tpu_physical_vmem_bytes():
    """Physical VMEM per TensorCore: 128 MiB on v4/v5/v6, 64 MiB on v7x."""
    try:
        kind = jax.devices()[0].device_kind.lower()
    except Exception:
        kind = ""
    if any(v in kind for v in ("v4", "v5", "v6")):
        return 128 * 1024 * 1024
    return 64 * 1024 * 1024          # v7x (and unknown): conservative


_VMEM_PHYS = _tpu_physical_vmem_bytes()
_VMEM_LIMIT = (3 * _VMEM_PHYS) // 4            # 96 MiB on v5e/v6e, 48 MiB on v7x
_TM_MAX = 1024 if _VMEM_PHYS >= 128 * 1024 * 1024 else 512   # conv M-tile cap
_ROW_TILE_MAX = _TM_MAX                                       # FC/head row-tile cap

_COMPILER_PARAMS = pltpu.CompilerParams(
    dimension_semantics=("parallel",),   # megacore split on v7x; no-op on v5e/v6e
    vmem_limit_bytes=_VMEM_LIMIT,
)


def _m_tile(m, tm_max):
    """Row tile: sublane-aligned multiple of 8, >=2 grid steps when possible."""
    if m >= 2 * tm_max:
        return tm_max
    half = -(-m // 2)
    return max(8, min(-(-half // 8) * 8, tm_max))


def _pad_rows(x, t):
    n = x.shape[0]
    n_pad = -(-n // t) * t
    if n_pad > n:
        x = jnp.pad(x, ((0, n_pad - n), (0, 0)))
    return x, n_pad


# ----------------------------- Pallas kernels ------------------------------ #

def _conv_relu_pool_kernel(xa_ref, xb_ref, xc_ref, xd_ref, v0_ref, v1_ref,
                           b_ref, o_ref):
    """Fused 3x3 conv (pad=1) + bias + ReLU + 2x2 max-pool on a tile of rows.

    xa..xd : (TM, Kp) bf16 -- padded image rows 2h', 2h'+1, 2h'+2, 2h'+3 for each
             pooled output row (lanes = (wp, cin), zero-padded to Kp).
    v0/v1  : (3, Kp, Lq) bf16 -- width-Toeplitz conv weights per kh, for the pool
             taps dw=0 / dw=1; columns in pooled (w', cout) order.
    b_ref  : (1, Lq) f32 (bias tiled over w').
    o_ref  : (TM, Lq) bf16 -- pooled output, lane order (w', cout) == NHWC.
    """
    xa, xb, xc, xd = xa_ref[...], xb_ref[...], xc_ref[...], xd_ref[...]

    def conv_row(r0, r1, r2, v_ref):            # one conv output row (fixed dh,dw)
        z = jnp.dot(r0, v_ref[0], preferred_element_type=jnp.float32)
        z = z + jnp.dot(r1, v_ref[1], preferred_element_type=jnp.float32)
        z = z + jnp.dot(r2, v_ref[2], preferred_element_type=jnp.float32)
        return z

    # 4 pool taps: (dh, dw) in {0,1}^2.  bias+ReLU hoisted after the max (exact).
    zmax = jnp.maximum(
        jnp.maximum(conv_row(xa, xb, xc, v0_ref), conv_row(xa, xb, xc, v1_ref)),
        jnp.maximum(conv_row(xb, xc, xd, v0_ref), conv_row(xb, xc, xd, v1_ref)))
    o_ref[...] = jnp.maximum(zmax + b_ref[...], 0.0).astype(o_ref.dtype)


def _conv_relu_kernel(xa_ref, xb_ref, xc_ref, t_ref, b_ref, o_ref):
    """Fused 3x3 conv (pad=1) + bias + ReLU, no pooling (only when H or W < 2)."""
    z = jnp.dot(xa_ref[...], t_ref[0], preferred_element_type=jnp.float32)
    z = z + jnp.dot(xb_ref[...], t_ref[1], preferred_element_type=jnp.float32)
    z = z + jnp.dot(xc_ref[...], t_ref[2], preferred_element_type=jnp.float32)
    o_ref[...] = jnp.maximum(z + b_ref[...], 0.0).astype(o_ref.dtype)


def _matmul_bias_relu_kernel(x_ref, w_ref, b_ref, o_ref):
    """o = relu(x @ w + b) -- hidden FCs beyond the first (linear_layers > 1)."""
    y = jnp.dot(x_ref[...], w_ref[...], preferred_element_type=jnp.float32) + b_ref[...]
    o_ref[...] = jnp.maximum(y, 0.0).astype(o_ref.dtype)


def _mlp_head_kernel(x_ref, w1_ref, b1_ref, w2_ref, b2_ref, o_ref):
    """o = log_softmax(relu(x @ w1 + b1) @ w2 + b2), fused."""
    h = jnp.dot(x_ref[...], w1_ref[...], preferred_element_type=jnp.float32) + b1_ref[...]
    h = jnp.maximum(h, 0.0)
    logits = jnp.dot(h.astype(w2_ref.dtype), w2_ref[...],
                     preferred_element_type=jnp.float32) + b2_ref[...]
    m = jnp.max(logits, axis=-1, keepdims=True)
    s = logits - m
    o_ref[...] = s - jnp.log(jnp.sum(jnp.exp(s), axis=-1, keepdims=True))


def _relu_linear_logsoftmax_kernel(x_ref, w_ref, b_ref, o_ref):
    """o = log_softmax(relu(x) @ w + b) -- head when linear_layers == 0."""
    h = jnp.maximum(x_ref[...], 0).astype(w_ref.dtype)
    logits = jnp.dot(h, w_ref[...], preferred_element_type=jnp.float32) + b_ref[...]
    m = jnp.max(logits, axis=-1, keepdims=True)
    s = logits - m
    o_ref[...] = s - jnp.log(jnp.sum(jnp.exp(s), axis=-1, keepdims=True))


# -------------------- init-time Toeplitz weight expansion ------------------- #

def _pooled_conv_toeplitz(w, W, Kpad):
    """Expand (3,3,Cin,Cout) into per-(dw,kh) width-Toeplitz matmul weights.

    Returns (2, 3, Kpad, Wo*Cout) f32: V[dw, kh] maps one padded image row
    (lane = (wp, cin)) to the conv output row at pooled width positions
    (lane = (w', cout)), where the conv column is w = 2*w' + dw.
    """
    Cin, Cout = w.shape[2], w.shape[3]
    Wp, Wo = W + 2, W // 2
    V = np.zeros((2, 3, Wp, Cin, Wo, Cout), np.float32)
    wo = np.arange(Wo)
    for dw in range(2):
        for kh in range(3):
            for kw in range(3):
                V[dw, kh, 2 * wo + dw + kw, :, wo, :] += w[kh, kw]
    V = V.reshape(2, 3, Wp * Cin, Wo * Cout)
    if Kpad > Wp * Cin:
        V = np.pad(V, ((0, 0), (0, 0), (0, Kpad - Wp * Cin), (0, 0)))
    return V


def _conv_toeplitz(w, W, Kpad):
    """Expand (3,3,Cin,Cout) into 3 per-kh width-Toeplitz matrices (Kpad, W*Cout)."""
    Cin, Cout = w.shape[2], w.shape[3]
    Wp = W + 2
    T = np.zeros((3, Wp, Cin, W, Cout), np.float32)
    wi = np.arange(W)
    for kh in range(3):
        for kw in range(3):
            T[kh, wi + kw, :, wi, :] += w[kh, kw]
    T = T.reshape(3, Wp * Cin, W * Cout)
    if Kpad > Wp * Cin:
        T = np.pad(T, ((0, 0), (0, Kpad - Wp * Cin), (0, 0)))
    return T


# ----------------------------- kernel wrappers ----------------------------- #

def _conv_layer(x, blk):
    """Apply one fused conv(+pool) Pallas layer to an NHWC bf16 activation."""
    N, H, W, Cin = x.shape
    Cout = blk["cout"]
    K = (W + 2) * Cin
    Kp = blk["kpad"]

    xp = jnp.pad(x, ((0, 0), (1, 1), (1, 1), (0, 0))).reshape(N, H + 2, K)
    if Kp > K:
        xp = jnp.pad(xp, ((0, 0), (0, 0), (0, Kp - K)))     # lane-dense K (conv1)

    if blk["pool"]:
        Ho, Wo = H // 2, W // 2
        Lq = Wo * Cout
        M = N * Ho
        tm = _m_tile(M, _TM_MAX)
        Mp = -(-M // tm) * tm

        def view(off):                       # padded row (2h'+off) per pooled row
            v = xp[:, off:off + 2 * Ho:2, :].reshape(M, Kp)
            if Mp > M:
                v = jnp.pad(v, ((0, Mp - M), (0, 0)))
            return v

        xa, xb, xc, xd = view(0), view(1), view(2), view(3)
        out = pl.pallas_call(
            _conv_relu_pool_kernel,
            out_shape=jax.ShapeDtypeStruct((Mp, Lq), jnp.bfloat16),
            grid=(Mp // tm,),
            in_specs=[pl.BlockSpec((tm, Kp), lambda i: (i, 0)),
                      pl.BlockSpec((tm, Kp), lambda i: (i, 0)),
                      pl.BlockSpec((tm, Kp), lambda i: (i, 0)),
                      pl.BlockSpec((tm, Kp), lambda i: (i, 0)),
                      # block-invariant weight slabs (per-kh split keeps them small,
                      # so default double-buffering is a negligible VMEM cost)
                      pl.BlockSpec((3, Kp, Lq), lambda i: (0, 0, 0)),
                      pl.BlockSpec((3, Kp, Lq), lambda i: (0, 0, 0)),
                      pl.BlockSpec((1, Lq), lambda i: (0, 0))],
            out_specs=pl.BlockSpec((tm, Lq), lambda i: (i, 0)),
            compiler_params=_COMPILER_PARAMS,
            cost_estimate=pl.CostEstimate(
                flops=24 * Mp * Kp * Lq, transcendentals=0,
                bytes_accessed=2 * (4 * Mp * Kp + 6 * Kp * Lq + Mp * Lq) + 4 * Lq),
        )(xa, xb, xc, xd, blk["v0"], blk["v1"], blk["bias"])
        return out[:M].reshape(N, Ho, Wo, Cout)

    # no-pooling branch (only when H or W < 2, i.e. very deep conv stacks)
    Lq = W * Cout
    M = N * H
    tm = _m_tile(M, _TM_MAX)
    Mp = -(-M // tm) * tm

    def view(off):
        v = xp[:, off:off + H, :].reshape(M, Kp)
        if Mp > M:
            v = jnp.pad(v, ((0, Mp - M), (0, 0)))
        return v

    xa, xb, xc = view(0), view(1), view(2)
    out = pl.pallas_call(
        _conv_relu_kernel,
        out_shape=jax.ShapeDtypeStruct((Mp, Lq), jnp.bfloat16),
        grid=(Mp // tm,),
        in_specs=[pl.BlockSpec((tm, Kp), lambda i: (i, 0)),
                  pl.BlockSpec((tm, Kp), lambda i: (i, 0)),
                  pl.BlockSpec((tm, Kp), lambda i: (i, 0)),
                  pl.BlockSpec((3, Kp, Lq), lambda i: (0, 0, 0)),
                  pl.BlockSpec((1, Lq), lambda i: (0, 0))],
        out_specs=pl.BlockSpec((tm, Lq), lambda i: (i, 0)),
        compiler_params=_COMPILER_PARAMS,
        cost_estimate=pl.CostEstimate(
            flops=6 * Mp * Kp * Lq, transcendentals=0,
            bytes_accessed=2 * (3 * Mp * Kp + 3 * Kp * Lq + Mp * Lq) + 4 * Lq),
    )(xa, xb, xc, blk["t"], blk["bias"])
    return out[:M].reshape(N, H, W, Cout)


def matmul_bias_relu(x, w, b):
    n, k = x.shape
    m = w.shape[1]
    t = _m_tile(n, _ROW_TILE_MAX)
    xpad, npad = _pad_rows(x, t)
    out = pl.pallas_call(
        _matmul_bias_relu_kernel,
        out_shape=jax.ShapeDtypeStruct((npad, m), jnp.bfloat16),
        grid=(npad // t,),
        in_specs=[pl.BlockSpec((t, k), lambda i: (i, 0)),
                  pl.BlockSpec((k, m), lambda i: (0, 0)),
                  pl.BlockSpec((1, m), lambda i: (0, 0))],
        out_specs=pl.BlockSpec((t, m), lambda i: (i, 0)),
        compiler_params=_COMPILER_PARAMS,
        cost_estimate=pl.CostEstimate(
            flops=2 * npad * k * m, transcendentals=0,
            bytes_accessed=2 * (npad * k + k * m + npad * m) + 4 * m),
    )(xpad, w, b)
    return out[:n]


def mlp_head(x, w1, b1, w2, b2):
    n, f = x.shape
    hid, c = w1.shape[1], w2.shape[1]
    t = _m_tile(n, _ROW_TILE_MAX)
    xpad, npad = _pad_rows(x, t)
    out = pl.pallas_call(
        _mlp_head_kernel,
        out_shape=jax.ShapeDtypeStruct((npad, c), jnp.float32),
        grid=(npad // t,),
        in_specs=[pl.BlockSpec((t, f), lambda i: (i, 0)),
                  pl.BlockSpec((f, hid), lambda i: (0, 0)),
                  pl.BlockSpec((1, hid), lambda i: (0, 0)),
                  pl.BlockSpec((hid, c), lambda i: (0, 0)),
                  pl.BlockSpec((1, c), lambda i: (0, 0))],
        out_specs=pl.BlockSpec((t, c), lambda i: (i, 0)),
        compiler_params=_COMPILER_PARAMS,
        cost_estimate=pl.CostEstimate(
            flops=2 * npad * (f * hid + hid * c), transcendentals=npad * c,
            bytes_accessed=2 * (npad * f + f * hid + hid * c) + 4 * (npad * c + hid + c)),
    )(xpad, w1, b1, w2, b2)
    return out[:n]


def relu_linear_logsoftmax(x, w, b):
    n, f = x.shape
    c = w.shape[1]
    t = _m_tile(n, _ROW_TILE_MAX)
    xpad, npad = _pad_rows(x, t)
    out = pl.pallas_call(
        _relu_linear_logsoftmax_kernel,
        out_shape=jax.ShapeDtypeStruct((npad, c), jnp.float32),
        grid=(npad // t,),
        in_specs=[pl.BlockSpec((t, f), lambda i: (i, 0)),
                  pl.BlockSpec((f, c), lambda i: (0, 0)),
                  pl.BlockSpec((1, c), lambda i: (0, 0))],
        out_specs=pl.BlockSpec((t, c), lambda i: (i, 0)),
        compiler_params=_COMPILER_PARAMS,
        cost_estimate=pl.CostEstimate(
            flops=2 * npad * f * c, transcendentals=npad * c,
            bytes_accessed=2 * (npad * f + f * c) + 4 * (npad * c + c)),
    )(xpad, w, b)
    return out[:n]


# ------------------------------- the model --------------------------------- #

def _round_bf16(a):
    return np.asarray(jnp.asarray(a, jnp.bfloat16).astype(jnp.float32))


class FlexibleCNNPallas:
    """Pallas re-implementation of FlexibleCNN's forward pass (inference)."""

    def __init__(self, conv_layers, linear_layers, dropout_rate, hidden_units, key):
        self.dropout_rate = dropout_rate        # nn.Dropout is identity at inference
        self.conv_blocks = []
        in_ch, H, W = 1, 28, 28
        for i in range(conv_layers):
            out_ch = 32 * (i + 1)
            key, kw, kb = jax.random.split(key, 3)
            w = np.asarray(jax.random.normal(kw, (3, 3, in_ch, out_ch), jnp.float32))
            w = _round_bf16(w / math.sqrt(9 * in_ch))        # conv weights live in bf16
            b = np.asarray(jax.random.normal(kb, (out_ch,), jnp.float32)) * 0.01
            pool = H >= 2 and W >= 2
            K = (W + 2) * in_ch
            Kp = K if K >= 128 else 128          # lane-dense K for the tiny first layer
            blk = dict(pool=pool, cout=out_ch, kpad=Kp,
                       w_ref=jnp.asarray(w), b_ref=jnp.asarray(b))   # kept for validation
            if pool:
                Wo = W // 2
                V = _pooled_conv_toeplitz(w, W, Kp)          # (2, 3, Kp, Wo*out_ch)
                blk["v0"] = jnp.asarray(V[0], jnp.bfloat16)
                blk["v1"] = jnp.asarray(V[1], jnp.bfloat16)
                blk["bias"] = jnp.asarray(np.tile(b, Wo)[None, :], jnp.float32)
                H, W = H // 2, Wo
            else:
                blk["t"] = jnp.asarray(_conv_toeplitz(w, W, Kp), jnp.bfloat16)
                blk["bias"] = jnp.asarray(np.tile(b, W)[None, :], jnp.float32)
            self.conv_blocks.append(blk)
            in_ch = out_ch
        self.flat_dim = in_ch * H * W

        # PyTorch flattens NCHW (.view); our conv output flattens NHWC.  Fold the
        # permutation between the two orders into the first dense weight's rows.
        perm = np.arange(self.flat_dim).reshape(in_ch, H, W).transpose(1, 2, 0).reshape(-1)

        # hidden dim zero-padded to a lane-dense multiple of 128 (exact: padded
        # w1 columns / b1 entries are zero -> padded h columns are zero -> they
        # hit zero rows of the next weight).
        hid_pad = max(128, -(-hidden_units // 128) * 128) if linear_layers > 0 else 0

        self.fc = []
        feat_real, feat_pad = self.flat_dim, self.flat_dim
        for li in range(linear_layers):
            key, kw, kb = jax.random.split(key, 3)
            w = np.asarray(jax.random.normal(kw, (feat_real, hidden_units),
                                             jnp.float32)) / math.sqrt(feat_real)
            if li == 0:
                w = w[perm, :]
            wp = np.zeros((feat_pad, hid_pad), np.float32)
            wp[:feat_real, :hidden_units] = w
            bp = np.zeros((1, hid_pad), np.float32)
            bp[:, :hidden_units] = np.asarray(
                jax.random.normal(kb, (1, hidden_units), jnp.float32)) * 0.01
            self.fc.append((jnp.asarray(wp, jnp.bfloat16), jnp.asarray(bp)))
            feat_real, feat_pad = hidden_units, hid_pad

        key, kw, kb = jax.random.split(key, 3)
        wf = np.asarray(jax.random.normal(kw, (feat_real, 10),
                                          jnp.float32)) / math.sqrt(feat_real)
        if linear_layers == 0:
            wf = wf[perm, :]
        wfp = np.zeros((feat_pad, 10), np.float32)
        wfp[:feat_real, :] = wf
        bf = np.asarray(jax.random.normal(kb, (1, 10), jnp.float32)) * 0.01
        self.final_w = jnp.asarray(wfp, jnp.bfloat16)
        self.final_b = jnp.asarray(bf, jnp.float32)

    def __call__(self, x_nchw):
        n = x_nchw.shape[0]
        x = jnp.transpose(x_nchw, (0, 2, 3, 1)).astype(jnp.bfloat16)   # NHWC bf16
        for blk in self.conv_blocks:
            x = _conv_layer(x, blk)
        flat = x.reshape(n, self.flat_dim)      # NHWC flatten; NCHW perm in weights
        # TODO(synk): nn.Dropout is identity at inference; no train-mode RNG mask here.
        if not self.fc:
            return relu_linear_logsoftmax(flat, self.final_w, self.final_b)
        h = flat
        for (w, b) in self.fc[:-1]:             # extra hidden FCs (linear_layers > 1)
            h = matmul_bias_relu(h, w, b)
        w1, b1 = self.fc[-1]                    # last FC fused with final layer + log_softmax
        return mlp_head(h, w1, b1, self.final_w, self.final_b)


# --------------------- pure-JAX reference (validation) ---------------------- #

def _reference_forward(model, x_nchw):
    """XLA forward with the same bf16-input / f32-accumulate dtype path."""
    x = jnp.transpose(x_nchw, (0, 2, 3, 1)).astype(jnp.bfloat16)
    for blk in model.conv_blocks:
        y = jax.lax.conv_general_dilated(
            x, blk["w_ref"].astype(jnp.bfloat16), (1, 1), "SAME",
            dimension_numbers=("NHWC", "HWIO", "NHWC"),
            preferred_element_type=jnp.float32)
        y = jnp.maximum(y + blk["b_ref"][None, None, None, :], 0.0)
        if blk["pool"]:
            N, H, W, C = y.shape
            ho, wo = H // 2, W // 2
            y = y[:, :2 * ho, :2 * wo, :].reshape(N, ho, 2, wo, 2, C).max(axis=(2, 4))
        x = y.astype(jnp.bfloat16)
    h = x.reshape(x.shape[0], -1)
    for (w, b) in model.fc:
        z = jnp.dot(h.astype(jnp.bfloat16), w, preferred_element_type=jnp.float32) + b
        h = jnp.maximum(z, 0.0)
    h = jnp.maximum(h, 0.0)
    logits = jnp.dot(h.astype(jnp.bfloat16), model.final_w,
                     preferred_element_type=jnp.float32) + model.final_b
    return jax.nn.log_softmax(logits, axis=-1)


# --------------------------------- driver ----------------------------------- #

if __name__ == "__main__":
    key = jax.random.PRNGKey(0)
    kx, kp = jax.random.split(key)
    x = jax.random.normal(kx, (2, 1, 28, 28), jnp.float32)   # FashionMNIST-shaped batch

    model = FlexibleCNNPallas(conv_layers=2, linear_layers=1,
                              dropout_rate=0.0, hidden_units=32, key=kp)
    fwd = jax.jit(model.__call__)
    out = jax.block_until_ready(fwd(x))

    assert out.shape == (2, 10) and out.dtype == jnp.float32
    # log_softmax rows must normalize: logsumexp(row) == 0
    assert bool(jnp.all(jnp.abs(jax.scipy.special.logsumexp(out, axis=1)) < 1e-4))
    # cross-check against a pure-JAX (XLA) forward on the same bf16 dtype path
    ref = _reference_forward(model, x)
    err = float(jnp.max(jnp.abs(out - ref)))
    assert err < 0.05, f"mismatch vs XLA reference: {err}"
    print("KERNEL_OK")
</pallas_src>

<mosaic_0001>
module attributes {stable_mosaic.version = 11 : i64} {
  func.func @_conv_relu_pool_kernel(%arg0: i32, %arg1: memref<16x128xbf16, #tpu.memory_space<vmem>>, %arg2: memref<16x128xbf16, #tpu.memory_space<vmem>>, %arg3: memref<16x128xbf16, #tpu.memory_space<vmem>>, %arg4: memref<16x128xbf16, #tpu.memory_space<vmem>>, %arg5: memref<3x128x448xbf16, #tpu.memory_space<vmem>>, %arg6: memref<3x128x448xbf16, #tpu.memory_space<vmem>>, %arg7: memref<1x448xf32, #tpu.memory_space<vmem>>, %arg8: memref<16x448xbf16, #tpu.memory_space<vmem>>) attributes {dimension_semantics = [#tpu.dimension_semantics<parallel>], iteration_bounds = array<i64: 2>, scalar_prefetch = 0 : i64, scratch_operands = 0 : i64, tpu.core_type = #tpu.core_type<tc>, window_params = [{transform_indices = @transform_0, window_bounds = array<i64: 16, 128>}, {transform_indices = @transform_1, window_bounds = array<i64: 16, 128>}, {transform_indices = @transform_2, window_bounds = array<i64: 16, 128>}, {transform_indices = @transform_3, window_bounds = array<i64: 16, 128>}, {pipeline_mode = #tpu.pipeline_mode<synchronous>, transform_indices = @transform_4, window_bounds = array<i64: 3, 128, 448>}, {pipeline_mode = #tpu.pipeline_mode<synchronous>, transform_indices = @transform_5, window_bounds = array<i64: 3, 128, 448>}, {pipeline_mode = #tpu.pipeline_mode<synchronous>, transform_indices = @transform_6, window_bounds = array<i64: 1, 448>}, {transform_indices = @transform_7, window_bounds = array<i64: 16, 448>}]} {
    %c0 = arith.constant 0 : index
    %c0_0 = arith.constant 0 : index
    %0 = vector.load %arg1[%c0, %c0_0] : memref<16x128xbf16, #tpu.memory_space<vmem>>, vector<16x128xbf16>
    %c0_1 = arith.constant 0 : index
    %c0_2 = arith.constant 0 : index
    %1 = vector.load %arg2[%c0_1, %c0_2] : memref<16x128xbf16, #tpu.memory_space<vmem>>, vector<16x128xbf16>
    %c0_3 = arith.constant 0 : index
    %c0_4 = arith.constant 0 : index
    %2 = vector.load %arg3[%c0_3, %c0_4] : memref<16x128xbf16, #tpu.memory_space<vmem>>, vector<16x128xbf16>
    %c0_5 = arith.constant 0 : index
    %c0_6 = arith.constant 0 : index
    %3 = vector.load %arg4[%c0_5, %c0_6] : memref<16x128xbf16, #tpu.memory_space<vmem>>, vector<16x128xbf16>
    %c0_7 = arith.constant 0 : index
    %c0_8 = arith.constant 0 : index
    %c0_9 = arith.constant 0 : index
    %4 = vector.load %arg5[%c0_7, %c0_8, %c0_9] : memref<3x128x448xbf16, #tpu.memory_space<vmem>>, vector<1x128x448xbf16>
    %5 = vector.shape_cast %4 : vector<1x128x448xbf16> to vector<128x448xbf16>
    %cst = arith.constant dense<0.000000e+00> : vector<16x448xf32>
    %6 = tpu.matmul %0, %5, %cst {dimension_numbers = #tpu.dot_dimension_numbers<[1], [0], [0], [1], [0, 0, 1, 1], [], []>} : vector<16x128xbf16>, vector<128x448xbf16>, vector<16x448xf32> -> vector<16x448xf32>
    %c1 = arith.constant 1 : index
    %c0_10 = arith.constant 0 : index
    %c0_11 = arith.constant 0 : index
    %7 = vector.load %arg5[%c1, %c0_10, %c0_11] : memref<3x128x448xbf16, #tpu.memory_space<vmem>>, vector<1x128x448xbf16>
    %8 = vector.shape_cast %7 : vector<1x128x448xbf16> to vector<128x448xbf16>
    %cst_12 = arith.constant dense<0.000000e+00> : vector<16x448xf32>
    %9 = tpu.matmul %1, %8, %cst_12 {dimension_numbers = #tpu.dot_dimension_numbers<[1], [0], [0], [1], [0, 0, 1, 1], [], []>} : vector<16x128xbf16>, vector<128x448xbf16>, vector<16x448xf32> -> vector<16x448xf32>
    %10 = arith.addf %6, %9 : vector<16x448xf32>
    %c2 = arith.constant 2 : index
    %c0_13 = arith.constant 0 : index
    %c0_14 = arith.constant 0 : index
    %11 = vector.load %arg5[%c2, %c0_13, %c0_14] : memref<3x128x448xbf16, #tpu.memory_space<vmem>>, vector<1x128x448xbf16>
    %12 = vector.shape_cast %11 : vector<1x128x448xbf16> to vector<128x448xbf16>
    %cst_15 = arith.constant dense<0.000000e+00> : vector<16x448xf32>
    %13 = tpu.matmul %2, %12, %cst_15 {dimension_numbers = #tpu.dot_dimension_numbers<[1], [0], [0], [1], [0, 0, 1, 1], [], []>} : vector<16x128xbf16>, vector<128x448xbf16>, vector<16x448xf32> -> vector<16x448xf32>
    %14 = arith.addf %10, %13 : vector<16x448xf32>
    %c0_16 = arith.constant 0 : index
    %c0_17 = arith.constant 0 : index
    %c0_18 = arith.constant 0 : index
    %15 = vector.load %arg6[%c0_16, %c0_17, %c0_18] : memref<3x128x448xbf16, #tpu.memory_space<vmem>>, vector<1x128x448xbf16>
    %16 = vector.shape_cast %15 : vector<1x128x448xbf16> to vector<128x448xbf16>
    %cst_19 = arith.constant dense<0.000000e+00> : vector<16x448xf32>
    %17 = tpu.matmul %0, %16, %cst_19 {dimension_numbers = #tpu.dot_dimension_numbers<[1], [0], [0], [1], [0, 0, 1, 1], [], []>} : vector<16x128xbf16>, vector<128x448xbf16>, vector<16x448xf32> -> vector<16x448xf32>
    %c1_20 = arith.constant 1 : index
    %c0_21 = arith.constant 0 : index
    %c0_22 = arith.constant 0 : index
    %18 = vector.load %arg6[%c1_20, %c0_21, %c0_22] : memref<3x128x448xbf16, #tpu.memory_space<vmem>>, vector<1x128x448xbf16>
    %19 = vector.shape_cast %18 : vector<1x128x448xbf16> to vector<128x448xbf16>
    %cst_23 = arith.constant dense<0.000000e+00> : vector<16x448xf32>
    %20 = tpu.matmul %1, %19, %cst_23 {dimension_numbers = #tpu.dot_dimension_numbers<[1], [0], [0], [1], [0, 0, 1, 1], [], []>} : vector<16x128xbf16>, vector<128x448xbf16>, vector<16x448xf32> -> vector<16x448xf32>
    %21 = arith.addf %17, %20 : vector<16x448xf32>
    %c2_24 = arith.constant 2 : index
    %c0_25 = arith.constant 0 : index
    %c0_26 = arith.constant 0 : index
    %22 = vector.load %arg6[%c2_24, %c0_25, %c0_26] : memref<3x128x448xbf16, #tpu.memory_space<vmem>>, vector<1x128x448xbf16>
    %23 = vector.shape_cast %22 : vector<1x128x448xbf16> to vector<128x448xbf16>
    %cst_27 = arith.constant dense<0.000000e+00> : vector<16x448xf32>
    %24 = tpu.matmul %2, %23, %cst_27 {dimension_numbers = #tpu.dot_dimension_numbers<[1], [0], [0], [1], [0, 0, 1, 1], [], []>} : vector<16x128xbf16>, vector<128x448xbf16>, vector<16x448xf32> -> vector<16x448xf32>
    %25 = arith.addf %21, %24 : vector<16x448xf32>
    %26 = arith.maximumf %14, %25 : vector<16x448xf32>
    %c0_28 = arith.constant 0 : index
    %c0_29 = arith.constant 0 : index
    %c0_30 = arith.constant 0 : index
    %27 = vector.load %arg5[%c0_28, %c0_29, %c0_30] : memref<3x128x448xbf16, #tpu.memory_space<vmem>>, vector<1x128x448xbf16>
    %28 = vector.shape_cast %27 : vector<1x128x448xbf16> to vector<128x448xbf16>
    %cst_31 = arith.constant dense<0.000000e+00> : vector<16x448xf32>
    %29 = tpu.matmul %1, %28, %cst_31 {dimension_numbers = #tpu.dot_dimension_numbers<[1], [0], [0], [1], [0, 0, 1, 1], [], []>} : vector<16x128xbf16>, vector<128x448xbf16>, vector<16x448xf32> -> vector<16x448xf32>
    %c1_32 = arith.constant 1 : index
    %c0_33 = arith.constant 0 : index
    %c0_34 = arith.constant 0 : index
    %30 = vector.load %arg5[%c1_32, %c0_33, %c0_34] : memref<3x128x448xbf16, #tpu.memory_space<vmem>>, vector<1x128x448xbf16>
    %31 = vector.shape_cast %30 : vector<1x128x448xbf16> to vector<128x448xbf16>
    %cst_35 = arith.constant dense<0.000000e+00> : vector<16x448xf32>
    %32 = tpu.matmul %2, %31, %cst_35 {dimension_numbers = #tpu.dot_dimension_numbers<[1], [0], [0], [1], [0, 0, 1, 1], [], []>} : vector<16x128xbf16>, vector<128x448xbf16>, vector<16x448xf32> -> vector<16x448xf32>
    %33 = arith.addf %29, %32 : vector<16x448xf32>
    %c2_36 = arith.constant 2 : index
    %c0_37 = arith.constant 0 : index
    %c0_38 = arith.constant 0 : index
    %34 = vector.load %arg5[%c2_36, %c0_37, %c0_38] : memref<3x128x448xbf16, #tpu.memory_space<vmem>>, vector<1x128x448xbf16>
    %35 = vector.shape_cast %34 : vector<1x128x448xbf16> to vector<128x448xbf16>
    %cst_39 = arith.constant dense<0.000000e+00> : vector<16x448xf32>
    %36 = tpu.matmul %3, %35, %cst_39 {dimension_numbers = #tpu.dot_dimension_numbers<[1], [0], [0], [1], [0, 0, 1, 1], [], []>} : vector<16x128xbf16>, vector<128x448xbf16>, vector<16x448xf32> -> vector<16x448xf32>
    %37 = arith.addf %33, %36 : vector<16x448xf32>
    %c0_40 = arith.constant 0 : index
    %c0_41 = arith.constant 0 : index
    %c0_42 = arith.constant 0 : index
    %38 = vector.load %arg6[%c0_40, %c0_41, %c0_42] : memref<3x128x448xbf16, #tpu.memory_space<vmem>>, vector<1x128x448xbf16>
    %39 = vector.shape_cast %38 : vector<1x128x448xbf16> to vector<128x448xbf16>
    %cst_43 = arith.constant dense<0.000000e+00> : vector<16x448xf32>
    %40 = tpu.matmul %1, %39, %cst_43 {dimension_numbers = #tpu.dot_dimension_numbers<[1], [0], [0], [1], [0, 0, 1, 1], [], []>} : vector<16x128xbf16>, vector<128x448xbf16>, vector<16x448xf32> -> vector<16x448xf32>
    %c1_44 = arith.constant 1 : index
    %c0_45 = arith.constant 0 : index
    %c0_46 = arith.constant 0 : index
    %41 = vector.load %arg6[%c1_44, %c0_45, %c0_46] : memref<3x128x448xbf16, #tpu.memory_space<vmem>>, vector<1x128x448xbf16>
    %42 = vector.shape_cast %41 : vector<1x128x448xbf16> to vector<128x448xbf16>
    %cst_47 = arith.constant dense<0.000000e+00> : vector<16x448xf32>
    %43 = tpu.matmul %2, %42, %cst_47 {dimension_numbers = #tpu.dot_dimension_numbers<[1], [0], [0], [1], [0, 0, 1, 1], [], []>} : vector<16x128xbf16>, vector<128x448xbf16>, vector<16x448xf32> -> vector<16x448xf32>
    %44 = arith.addf %40, %43 : vector<16x448xf32>
    %c2_48 = arith.constant 2 : index
    %c0_49 = arith.constant 0 : index
    %c0_50 = arith.constant 0 : index
    %45 = vector.load %arg6[%c2_48, %c0_49, %c0_50] : memref<3x128x448xbf16, #tpu.memory_space<vmem>>, vector<1x128x448xbf16>
    %46 = vector.shape_cast %45 : vector<1x128x448xbf16> to vector<128x448xbf16>
    %cst_51 = arith.constant dense<0.000000e+00> : vector<16x448xf32>
    %47 = tpu.matmul %3, %46, %cst_51 {dimension_numbers = #tpu.dot_dimension_numbers<[1], [0], [0], [1], [0, 0, 1, 1], [], []>} : vector<16x128xbf16>, vector<128x448xbf16>, vector<16x448xf32> -> vector<16x448xf32>
    %48 = arith.addf %44, %47 : vector<16x448xf32>
    %49 = arith.maximumf %37, %48 : vector<16x448xf32>
    %50 = arith.maximumf %26, %49 : vector<16x448xf32>
    %c0_52 = arith.constant 0 : index
    %c0_53 = arith.constant 0 : index
    %51 = vector.load %arg7[%c0_52, %c0_53] : memref<1x448xf32, #tpu.memory_space<vmem>>, vector<1x448xf32>
    %52 = vector.broadcast %51 : vector<1x448xf32> to vector<16x448xf32>
    %53 = arith.addf %50, %52 : vector<16x448xf32>
    %cst_54 = arith.constant 0.000000e+00 : f32
    %54 = vector.broadcast %cst_54 : f32 to vector<16x448xf32>
    %55 = arith.maximumf %53, %54 : vector<16x448xf32>
    %56 = arith.truncf %55 : vector<16x448xf32> to vector<16x448xbf16>
    %c0_55 = arith.constant 0 : index
    %c0_56 = arith.constant 0 : index
    %57 = vector.load %arg8[%c0_55, %c0_56] : memref<16x448xbf16, #tpu.memory_space<vmem>>, vector<16x448xbf16>
    tpu.vector_store %arg8[%c0_55, %c0_56], %56 {strides = array<i32>} : memref<16x448xbf16, #tpu.memory_space<vmem>>, vector<16x448xbf16>,
    return
  }
  func.func @transform_0(%arg0: i32) -> (i32, i32) {
    %c0_i32 = arith.constant 0 : i32
    %c0_i32_0 = arith.constant 0 : i32
    return %arg0, %c0_i32 : i32, i32
  }
  func.func @transform_1(%arg0: i32) -> (i32, i32) {
    %c0_i32 = arith.constant 0 : i32
    %c0_i32_0 = arith.constant 0 : i32
    return %arg0, %c0_i32 : i32, i32
  }
  func.func @transform_2(%arg0: i32) -> (i32, i32) {
    %c0_i32 = arith.constant 0 : i32
    %c0_i32_0 = arith.constant 0 : i32
    return %arg0, %c0_i32 : i32, i32
  }
  func.func @transform_3(%arg0: i32) -> (i32, i32) {
    %c0_i32 = arith.constant 0 : i32
    %c0_i32_0 = arith.constant 0 : i32
    return %arg0, %c0_i32 : i32, i32
  }
  func.func @transform_4(%arg0: i32) -> (i32, i32, i32) {
    %c0_i32 = arith.constant 0 : i32
    %c0_i32_0 = arith.constant 0 : i32
    %c0_i32_1 = arith.constant 0 : i32
    %c0_i32_2 = arith.constant 0 : i32
    return %c0_i32, %c0_i32_0, %c0_i32_1 : i32, i32, i32
  }
  func.func @transform_5(%arg0: i32) -> (i32, i32, i32) {
    %c0_i32 = arith.constant 0 : i32
    %c0_i32_0 = arith.constant 0 : i32
    %c0_i32_1 = arith.constant 0 : i32
    %c0_i32_2 = arith.constant 0 : i32
    return %c0_i32, %c0_i32_0, %c0_i32_1 : i32, i32, i32
  }
  func.func @transform_6(%arg0: i32) -> (i32, i32) {
    %c0_i32 = arith.constant 0 : i32
    %c0_i32_0 = arith.constant 0 : i32
    %c0_i32_1 = arith.constant 0 : i32
    return %c0_i32, %c0_i32_0 : i32, i32
  }
  func.func @transform_7(%arg0: i32) -> (i32, i32) {
    %c0_i32 = arith.constant 0 : i32
    %c0_i32_0 = arith.constant 0 : i32
    return %arg0, %c0_i32 : i32, i32
  }
}

module attributes {stable_mosaic.version = 11 : i64} {
  func.func @_conv_relu_pool_kernel(%arg0: i32, %arg1: memref<8x512xbf16, #tpu.memory_space<vmem>>, %arg2: memref<8x512xbf16, #tpu.memory_space<vmem>>, %arg3: memref<8x512xbf16, #tpu.memory_space<vmem>>, %arg4: memref<8x512xbf16, #tpu.memory_space<vmem>>, %arg5: memref<3x512x448xbf16, #tpu.memory_space<vmem>>, %arg6: memref<3x512x448xbf16, #tpu.memory_space<vmem>>, %arg7: memref<1x448xf32, #tpu.memory_space<vmem>>, %arg8: memref<8x448xbf16, #tpu.memory_space<vmem>>) attributes {dimension_semantics = [#tpu.dimension_semantics<parallel>], iteration_bounds = array<i64: 2>, scalar_prefetch = 0 : i64, scratch_operands = 0 : i64, tpu.core_type = #tpu.core_type<tc>, window_params = [{transform_indices = @transform_0, window_bounds = array<i64: 8, 512>}, {transform_indices = @transform_1, window_bounds = array<i64: 8, 512>}, {transform_indices = @transform_2, window_bounds = array<i64: 8, 512>}, {transform_indices = @transform_3, window_bounds = array<i64: 8, 512>}, {pipeline_mode = #tpu.pipeline_mode<synchronous>, transform_indices = @transform_4, window_bounds = array<i64: 3, 512, 448>}, {pipeline_mode = #tpu.pipeline_mode<synchronous>, transform_indices = @transform_5, window_bounds = array<i64: 3, 512, 448>}, {pipeline_mode = #tpu.pipeline_mode<synchronous>, transform_indices = @transform_6, window_bounds = array<i64: 1, 448>}, {transform_indices = @transform_7, window_bounds = array<i64: 8, 448>}]} {
    %c0 = arith.constant 0 : index
    %c0_0 = arith.constant 0 : index
    %0 = vector.load %arg1[%c0, %c0_0] : memref<8x512xbf16, #tpu.memory_space<vmem>>, vector<8x512xbf16>
    %c0_1 = arith.constant 0 : index
    %c0_2 = arith.constant 0 : index
    %1 = vector.load %arg2[%c0_1, %c0_2] : memref<8x512xbf16, #tpu.memory_space<vmem>>, vector<8x512xbf16>
    %c0_3 = arith.constant 0 : index
    %c0_4 = arith.constant 0 : index
    %2 = vector.load %arg3[%c0_3, %c0_4] : memref<8x512xbf16, #tpu.memory_space<vmem>>, vector<8x512xbf16>
    %c0_5 = arith.constant 0 : index
    %c0_6 = arith.constant 0 : index
    %3 = vector.load %arg4[%c0_5, %c0_6] : memref<8x512xbf16, #tpu.memory_space<vmem>>, vector<8x512xbf16>
    %c0_7 = arith.constant 0 : index
    %c0_8 = arith.constant 0 : index
    %c0_9 = arith.constant 0 : index
    %4 = vector.load %arg5[%c0_7, %c0_8, %c0_9] : memref<3x512x448xbf16, #tpu.memory_space<vmem>>, vector<1x512x448xbf16>
    %5 = vector.shape_cast %4 : vector<1x512x448xbf16> to vector<512x448xbf16>
    %cst = arith.constant dense<0.000000e+00> : vector<8x448xf32>
    %6 = tpu.matmul %0, %5, %cst {dimension_numbers = #tpu.dot_dimension_numbers<[1], [0], [0], [1], [0, 0, 1, 1], [], []>} : vector<8x512xbf16>, vector<512x448xbf16>, vector<8x448xf32> -> vector<8x448xf32>
    %c1 = arith.constant 1 : index
    %c0_10 = arith.constant 0 : index
    %c0_11 = arith.constant 0 : index
    %7 = vector.load %arg5[%c1, %c0_10, %c0_11] : memref<3x512x448xbf16, #tpu.memory_space<vmem>>, vector<1x512x448xbf16>
    %8 = vector.shape_cast %7 : vector<1x512x448xbf16> to vector<512x448xbf16>
    %cst_12 = arith.constant dense<0.000000e+00> : vector<8x448xf32>
    %9 = tpu.matmul %1, %8, %cst_12 {dimension_numbers = #tpu.dot_dimension_numbers<[1], [0], [0], [1], [0, 0, 1, 1], [], []>} : vector<8x512xbf16>, vector<512x448xbf16>, vector<8x448xf32> -> vector<8x448xf32>
    %10 = arith.addf %6, %9 : vector<8x448xf32>
    %c2 = arith.constant 2 : index
    %c0_13 = arith.constant 0 : index
    %c0_14 = arith.constant 0 : index
    %11 = vector.load %arg5[%c2, %c0_13, %c0_14] : memref<3x512x448xbf16, #tpu.memory_space<vmem>>, vector<1x512x448xbf16>
    %12 = vector.shape_cast %11 : vector<1x512x448xbf16> to vector<512x448xbf16>
    %cst_15 = arith.constant dense<0.000000e+00> : vector<8x448xf32>
    %13 = tpu.matmul %2, %12, %cst_15 {dimension_numbers = #tpu.dot_dimension_numbers<[1], [0], [0], [1], [0, 0, 1, 1], [], []>} : vector<8x512xbf16>, vector<512x448xbf16>, vector<8x448xf32> -> vector<8x448xf32>
    %14 = arith.addf %10, %13 : vector<8x448xf32>
    %c0_16 = arith.constant 0 : index
    %c0_17 = arith.constant 0 : index
    %c0_18 = arith.constant 0 : index
    %15 = vector.load %arg6[%c0_16, %c0_17, %c0_18] : memref<3x512x448xbf16, #tpu.memory_space<vmem>>, vector<1x512x448xbf16>
    %16 = vector.shape_cast %15 : vector<1x512x448xbf16> to vector<512x448xbf16>
    %cst_19 = arith.constant dense<0.000000e+00> : vector<8x448xf32>
    %17 = tpu.matmul %0, %16, %cst_19 {dimension_numbers = #tpu.dot_dimension_numbers<[1], [0], [0], [1], [0, 0, 1, 1], [], []>} : vector<8x512xbf16>, vector<512x448xbf16>, vector<8x448xf32> -> vector<8x448xf32>
    %c1_20 = arith.constant 1 : index
    %c0_21 = arith.constant 0 : index
    %c0_22 = arith.constant 0 : index
    %18 = vector.load %arg6[%c1_20, %c0_21, %c0_22] : memref<3x512x448xbf16, #tpu.memory_space<vmem>>, vector<1x512x448xbf16>
    %19 = vector.shape_cast %18 : vector<1x512x448xbf16> to vector<512x448xbf16>
    %cst_23 = arith.constant dense<0.000000e+00> : vector<8x448xf32>
    %20 = tpu.matmul %1, %19, %cst_23 {dimension_numbers = #tpu.dot_dimension_numbers<[1], [0], [0], [1], [0, 0, 1, 1], [], []>} : vector<8x512xbf16>, vector<512x448xbf16>, vector<8x448xf32> -> vector<8x448xf32>
    %21 = arith.addf %17, %20 : vector<8x448xf32>
    %c2_24 = arith.constant 2 : index
    %c0_25 = arith.constant 0 : index
    %c0_26 = arith.constant 0 : index
    %22 = vector.load %arg6[%c2_24, %c0_25, %c0_26] : memref<3x512x448xbf16, #tpu.memory_space<vmem>>, vector<1x512x448xbf16>
    %23 = vector.shape_cast %22 : vector<1x512x448xbf16> to vector<512x448xbf16>
    %cst_27 = arith.constant dense<0.000000e+00> : vector<8x448xf32>
    %24 = tpu.matmul %2, %23, %cst_27 {dimension_numbers = #tpu.dot_dimension_numbers<[1], [0], [0], [1], [0, 0, 1, 1], [], []>} : vector<8x512xbf16>, vector<512x448xbf16>, vector<8x448xf32> -> vector<8x448xf32>
    %25 = arith.addf %21, %24 : vector<8x448xf32>
    %26 = arith.maximumf %14, %25 : vector<8x448xf32>
    %c0_28 = arith.constant 0 : index
    %c0_29 = arith.constant 0 : index
    %c0_30 = arith.constant 0 : index
    %27 = vector.load %arg5[%c0_28, %c0_29, %c0_30] : memref<3x512x448xbf16, #tpu.memory_space<vmem>>, vector<1x512x448xbf16>
    %28 = vector.shape_cast %27 : vector<1x512x448xbf16> to vector<512x448xbf16>
    %cst_31 = arith.constant dense<0.000000e+00> : vector<8x448xf32>
    %29 = tpu.matmul %1, %28, %cst_31 {dimension_numbers = #tpu.dot_dimension_numbers<[1], [0], [0], [1], [0, 0, 1, 1], [], []>} : vector<8x512xbf16>, vector<512x448xbf16>, vector<8x448xf32> -> vector<8x448xf32>
    %c1_32 = arith.constant 1 : index
    %c0_33 = arith.constant 0 : index
    %c0_34 = arith.constant 0 : index
    %30 = vector.load %arg5[%c1_32, %c0_33, %c0_34] : memref<3x512x448xbf16, #tpu.memory_space<vmem>>, vector<1x512x448xbf16>
    %31 = vector.shape_cast %30 : vector<1x512x448xbf16> to vector<512x448xbf16>
    %cst_35 = arith.constant dense<0.000000e+00> : vector<8x448xf32>
    %32 = tpu.matmul %2, %31, %cst_35 {dimension_numbers = #tpu.dot_dimension_numbers<[1], [0], [0], [1], [0, 0, 1, 1], [], []>} : vector<8x512xbf16>, vector<512x448xbf16>, vector<8x448xf32> -> vector<8x448xf32>
    %33 = arith.addf %29, %32 : vector<8x448xf32>
    %c2_36 = arith.constant 2 : index
    %c0_37 = arith.constant 0 : index
    %c0_38 = arith.constant 0 : index
    %34 = vector.load %arg5[%c2_36, %c0_37, %c0_38] : memref<3x512x448xbf16, #tpu.memory_space<vmem>>, vector<1x512x448xbf16>
    %35 = vector.shape_cast %34 : vector<1x512x448xbf16> to vector<512x448xbf16>
    %cst_39 = arith.constant dense<0.000000e+00> : vector<8x448xf32>
    %36 = tpu.matmul %3, %35, %cst_39 {dimension_numbers = #tpu.dot_dimension_numbers<[1], [0], [0], [1], [0, 0, 1, 1], [], []>} : vector<8x512xbf16>, vector<512x448xbf16>, vector<8x448xf32> -> vector<8x448xf32>
    %37 = arith.addf %33, %36 : vector<8x448xf32>
    %c0_40 = arith.constant 0 : index
    %c0_41 = arith.constant 0 : index
    %c0_42 = arith.constant 0 : index
    %38 = vector.load %arg6[%c0_40, %c0_41, %c0_42] : memref<3x512x448xbf16, #tpu.memory_space<vmem>>, vector<1x512x448xbf16>
    %39 = vector.shape_cast %38 : vector<1x512x448xbf16> to vector<512x448xbf16>
    %cst_43 = arith.constant dense<0.000000e+00> : vector<8x448xf32>
    %40 = tpu.matmul %1, %39, %cst_43 {dimension_numbers = #tpu.dot_dimension_numbers<[1], [0], [0], [1], [0, 0, 1, 1], [], []>} : vector<8x512xbf16>, vector<512x448xbf16>, vector<8x448xf32> -> vector<8x448xf32>
    %c1_44 = arith.constant 1 : index
    %c0_45 = arith.constant 0 : index
    %c0_46 = arith.constant 0 : index
    %41 = vector.load %arg6[%c1_44, %c0_45, %c0_46] : memref<3x512x448xbf16, #tpu.memory_space<vmem>>, vector<1x512x448xbf16>
    %42 = vector.shape_cast %41 : vector<1x512x448xbf16> to vector<512x448xbf16>
    %cst_47 = arith.constant dense<0.000000e+00> : vector<8x448xf32>
    %43 = tpu.matmul %2, %42, %cst_47 {dimension_numbers = #tpu.dot_dimension_numbers<[1], [0], [0], [1], [0, 0, 1, 1], [], []>} : vector<8x512xbf16>, vector<512x448xbf16>, vector<8x448xf32> -> vector<8x448xf32>
    %44 = arith.addf %40, %43 : vector<8x448xf32>
    %c2_48 = arith.constant 2 : index
    %c0_49 = arith.constant 0 : index
    %c0_50 = arith.constant 0 : index
    %45 = vector.load %arg6[%c2_48, %c0_49, %c0_50] : memref<3x512x448xbf16, #tpu.memory_space<vmem>>, vector<1x512x448xbf16>
    %46 = vector.shape_cast %45 : vector<1x512x448xbf16> to vector<512x448xbf16>
    %cst_51 = arith.constant dense<0.000000e+00> : vector<8x448xf32>
    %47 = tpu.matmul %3, %46, %cst_51 {dimension_numbers = #tpu.dot_dimension_numbers<[1], [0], [0], [1], [0, 0, 1, 1], [], []>} : vector<8x512xbf16>, vector<512x448xbf16>, vector<8x448xf32> -> vector<8x448xf32>
    %48 = arith.addf %44, %47 : vector<8x448xf32>
    %49 = arith.maximumf %37, %48 : vector<8x448xf32>
    %50 = arith.maximumf %26, %49 : vector<8x448xf32>
    %c0_52 = arith.constant 0 : index
    %c0_53 = arith.constant 0 : index
    %51 = vector.load %arg7[%c0_52, %c0_53] : memref<1x448xf32, #tpu.memory_space<vmem>>, vector<1x448xf32>
    %52 = vector.broadcast %51 : vector<1x448xf32> to vector<8x448xf32>
    %53 = arith.addf %50, %52 : vector<8x448xf32>
    %cst_54 = arith.constant 0.000000e+00 : f32
    %54 = vector.broadcast %cst_54 : f32 to vector<8x448xf32>
    %55 = arith.maximumf %53, %54 : vector<8x448xf32>
    %56 = arith.truncf %55 : vector<8x448xf32> to vector<8x448xbf16>
    %c0_55 = arith.constant 0 : index
    %c0_56 = arith.constant 0 : index
    %57 = vector.load %arg8[%c0_55, %c0_56] : memref<8x448xbf16, #tpu.memory_space<vmem>>, vector<8x448xbf16>
    tpu.vector_store %arg8[%c0_55, %c0_56], %56 {strides = array<i32>} : memref<8x448xbf16, #tpu.memory_space<vmem>>, vector<8x448xbf16>,
    return
  }
  func.func @transform_0(%arg0: i32) -> (i32, i32) {
    %c0_i32 = arith.constant 0 : i32
    %c0_i32_0 = arith.constant 0 : i32
    return %arg0, %c0_i32 : i32, i32
  }
  func.func @transform_1(%arg0: i32) -> (i32, i32) {
    %c0_i32 = arith.constant 0 : i32
    %c0_i32_0 = arith.constant 0 : i32
    return %arg0, %c0_i32 : i32, i32
  }
  func.func @transform_2(%arg0: i32) -> (i32, i32) {
    %c0_i32 = arith.constant 0 : i32
    %c0_i32_0 = arith.constant 0 : i32
    return %arg0, %c0_i32 : i32, i32
  }
  func.func @transform_3(%arg0: i32) -> (i32, i32) {
    %c0_i32 = arith.constant 0 : i32
    %c0_i32_0 = arith.constant 0 : i32
    return %arg0, %c0_i32 : i32, i32
  }
  func.func @transform_4(%arg0: i32) -> (i32, i32, i32) {
    %c0_i32 = arith.constant 0 : i32
    %c0_i32_0 = arith.constant 0 : i32
    %c0_i32_1 = arith.constant 0 : i32
    %c0_i32_2 = arith.constant 0 : i32
    return %c0_i32, %c0_i32_0, %c0_i32_1 : i32, i32, i32
  }
  func.func @transform_5(%arg0: i32) -> (i32, i32, i32) {
    %c0_i32 = arith.constant 0 : i32
    %c0_i32_0 = arith.constant 0 : i32
    %c0_i32_1 = arith.constant 0 : i32
    %c0_i32_2 = arith.constant 0 : i32
    return %c0_i32, %c0_i32_0, %c0_i32_1 : i32, i32, i32
  }
  func.func @transform_6(%arg0: i32) -> (i32, i32) {
    %c0_i32 = arith.constant 0 : i32
    %c0_i32_0 = arith.constant 0 : i32
    %c0_i32_1 = arith.constant 0 : i32
    return %c0_i32, %c0_i32_0 : i32, i32
  }
  func.func @transform_7(%arg0: i32) -> (i32, i32) {
    %c0_i32 = arith.constant 0 : i32
    %c0_i32_0 = arith.constant 0 : i32
    return %arg0, %c0_i32 : i32, i32
  }
}

module attributes {stable_mosaic.version = 11 : i64} {
  func.func @_mlp_head_kernel(%arg0: i32, %arg1: memref<8x3136xbf16, #tpu.memory_space<vmem>>, %arg2: memref<3136x128xbf16, #tpu.memory_space<vmem>>, %arg3: memref<1x128xf32, #tpu.memory_space<vmem>>, %arg4: memref<128x10xbf16, #tpu.memory_space<vmem>>, %arg5: memref<1x10xf32, #tpu.memory_space<vmem>>, %arg6: memref<8x10xf32, #tpu.memory_space<vmem>>) attributes {dimension_semantics = [#tpu.dimension_semantics<parallel>], iteration_bounds = array<i64: 1>, scalar_prefetch = 0 : i64, scratch_operands = 0 : i64, tpu.core_type = #tpu.core_type<tc>, window_params = [{transform_indices = @transform_0, window_bounds = array<i64: 8, 3136>}, {pipeline_mode = #tpu.pipeline_mode<synchronous>, transform_indices = @transform_1, window_bounds = array<i64: 3136, 128>}, {pipeline_mode = #tpu.pipeline_mode<synchronous>, transform_indices = @transform_2, window_bounds = array<i64: 1, 128>}, {pipeline_mode = #tpu.pipeline_mode<synchronous>, transform_indices = @transform_3, window_bounds = array<i64: 128, 10>}, {pipeline_mode = #tpu.pipeline_mode<synchronous>, transform_indices = @transform_4, window_bounds = array<i64: 1, 10>}, {transform_indices = @transform_5, window_bounds = array<i64: 8, 10>}]} {
    %c0 = arith.constant 0 : index
    %c0_0 = arith.constant 0 : index
    %0 = vector.load %arg1[%c0, %c0_0] : memref<8x3136xbf16, #tpu.memory_space<vmem>>, vector<8x3136xbf16>
    %c0_1 = arith.constant 0 : index
    %c0_2 = arith.constant 0 : index
    %1 = vector.load %arg2[%c0_1, %c0_2] : memref<3136x128xbf16, #tpu.memory_space<vmem>>, vector<3136x128xbf16>
    %cst = arith.constant dense<0.000000e+00> : vector<8x128xf32>
    %2 = tpu.matmul %0, %1, %cst {dimension_numbers = #tpu.dot_dimension_numbers<[1], [0], [0], [1], [0, 0, 1, 1], [], []>} : vector<8x3136xbf16>, vector<3136x128xbf16>, vector<8x128xf32> -> vector<8x128xf32>
    %c0_3 = arith.constant 0 : index
    %c0_4 = arith.constant 0 : index
    %3 = vector.load %arg3[%c0_3, %c0_4] : memref<1x128xf32, #tpu.memory_space<vmem>>, vector<1x128xf32>
    %4 = vector.broadcast %3 : vector<1x128xf32> to vector<8x128xf32>
    %5 = arith.addf %2, %4 : vector<8x128xf32>
    %cst_5 = arith.constant 0.000000e+00 : f32
    %6 = vector.broadcast %cst_5 : f32 to vector<8x128xf32>
    %7 = arith.maximumf %5, %6 : vector<8x128xf32>
    %8 = arith.truncf %7 : vector<8x128xf32> to vector<8x128xbf16>
    %c0_6 = arith.constant 0 : index
    %c0_7 = arith.constant 0 : index
    %9 = vector.load %arg4[%c0_6, %c0_7] : memref<128x10xbf16, #tpu.memory_space<vmem>>, vector<128x10xbf16>
    %cst_8 = arith.constant dense<0.000000e+00> : vector<8x10xf32>
    %10 = tpu.matmul %8, %9, %cst_8 {dimension_numbers = #tpu.dot_dimension_numbers<[1], [0], [0], [1], [0, 0, 1, 1], [], []>} : vector<8x128xbf16>, vector<128x10xbf16>, vector<8x10xf32> -> vector<8x10xf32>
    %c0_9 = arith.constant 0 : index
    %c0_10 = arith.constant 0 : index
    %11 = vector.load %arg5[%c0_9, %c0_10] : memref<1x10xf32, #tpu.memory_space<vmem>>, vector<1x10xf32>
    %12 = vector.broadcast %11 : vector<1x10xf32> to vector<8x10xf32>
    %13 = arith.addf %10, %12 : vector<8x10xf32>
    %cst_11 = arith.constant dense<0xFF800000> : vector<8xf32>
    %14 = vector.multi_reduction <maximumf>, %13, %cst_11 [1] : vector<8x10xf32> to vector<8xf32>
    %15 = vector.shape_cast %14 : vector<8xf32> to vector<8x1xf32>
    %16 = vector.broadcast %15 : vector<8x1xf32> to vector<8x10xf32>
    %17 = arith.subf %13, %16 : vector<8x10xf32>
    %18 = math.exp %17 : vector<8x10xf32>
    %cst_12 = arith.constant dense<0.000000e+00> : vector<8xf32>
    %19 = vector.multi_reduction <add>, %18, %cst_12 [1] : vector<8x10xf32> to vector<8xf32>
    %20 = vector.shape_cast %19 : vector<8xf32> to vector<8x1xf32>
    %21 = math.log %20 : vector<8x1xf32>
    %22 = vector.broadcast %21 : vector<8x1xf32> to vector<8x10xf32>
    %23 = arith.subf %17, %22 : vector<8x10xf32>
    %c0_13 = arith.constant 0 : index
    %c0_14 = arith.constant 0 : index
    %24 = vector.load %arg6[%c0_13, %c0_14] : memref<8x10xf32, #tpu.memory_space<vmem>>, vector<8x10xf32>
    tpu.vector_store %arg6[%c0_13, %c0_14], %23 {strides = array<i32>} : memref<8x10xf32, #tpu.memory_space<vmem>>, vector<8x10xf32>,
    return
  }
  func.func @transform_0(%arg0: i32) -> (i32, i32) {
    %c0_i32 = arith.constant 0 : i32
    %c0_i32_0 = arith.constant 0 : i32
    return %arg0, %c0_i32 : i32, i32
  }
  func.func @transform_1(%arg0: i32) -> (i32, i32) {
    %c0_i32 = arith.constant 0 : i32
    %c0_i32_0 = arith.constant 0 : i32
    %c0_i32_1 = arith.constant 0 : i32
    return %c0_i32, %c0_i32_0 : i32, i32
  }
  func.func @transform_2(%arg0: i32) -> (i32, i32) {
    %c0_i32 = arith.constant 0 : i32
    %c0_i32_0 = arith.constant 0 : i32
    %c0_i32_1 = arith.constant 0 : i32
    return %c0_i32, %c0_i32_0 : i32, i32
  }
  func.func @transform_3(%arg0: i32) -> (i32, i32) {
    %c0_i32 = arith.constant 0 : i32
    %c0_i32_0 = arith.constant 0 : i32
    %c0_i32_1 = arith.constant 0 : i32
    return %c0_i32, %c0_i32_0 : i32, i32
  }
  func.func @transform_4(%arg0: i32) -> (i32, i32) {
    %c0_i32 = arith.constant 0 : i32
    %c0_i32_0 = arith.constant 0 : i32
    %c0_i32_1 = arith.constant 0 : i32
    return %c0_i32, %c0_i32_0 : i32, i32
  }
  func.func @transform_5(%arg0: i32) -> (i32, i32) {
    %c0_i32 = arith.constant 0 : i32
    %c0_i32_0 = arith.constant 0 : i32
    return %arg0, %c0_i32 : i32, i32
  }
}

</mosaic_0001>

<bundles_post_ra>
// kernel: a_call__.3
= control target key start
LH: loop header
LB: loop body
LE: loop exit
PB: predicated region body
PF: predicated region fallthrough
CT: control target
= control target key end

     0   :  { %s3601_s24 = smov 0   ;;  %s5044_s0 = inlined_call_operand.vmem [shape: bf16[32,128], index: 0, kind: input, shape index: {}]   ;;  %s5045_s1 = inlined_call_operand.vmem [shape: bf16[32,128], index: 1, kind: input, shape index: {}]   ;;  %s5046_s2 = inlined_call_operand.vmem [shape: bf16[32,128], index: 2, kind: input, shape index: {}]   ;;  %s5047_s3 = inlined_call_operand.vmem [shape: bf16[32,128], index: 3, kind: input, shape index: {}]   ;;  %s5048_s4 = inlined_call_operand.vmem [shape: bf16[3,128,448], index: 4, kind: input, shape index: {}]   ;;  %s5049_s5 = inlined_call_operand.vmem [shape: bf16[3,128,448], index: 5, kind: input, shape index: {}]   ;;  %s5050_s6 = inlined_call_operand.vmem [shape: f32[1,448], index: 6, kind: input, shape index: {}]   ;;  %s5051_s7 = inlined_call_operand.vmem [shape: bf16[32,448], index: 7, kind: output, shape index: {}]  }
   0x1 LB: > { %s2790_s25 = sadd.s32 4294967295, %s3558_s24   ;;  %p2794_p0 = scmp.ge.s32.totalorder %s3558_s24, 1  ;;  %s3558_s24 = sphi %s3601_s24, %s17_s24  }
   0x2   : > { %p271_p1 = scmp.lt.s32.totalorder %s3558_s24, 3 }
   0x4   : > { %p272_p2 = pnand %p2794_p0, %p271_p1 }
   0x6   : > { %275 = sbr.rel (%p272_p2) target bundleno = 625 (0x271), region = 48 }
   0xd   : > { %v3214_v0 = vld [vmem:[%s5048_s4 + $0x104] ss:$16 sps:$4 sm:$0xff]   ;;  %v3216_v1 = vld [vmem:[%s5048_s4 + $0x10c] ss:$16 sps:$4 sm:$0xff]   ;;  %v5052_v2 = vmov 0   ;;  %s2795_s10 = sshll.u32 %s2790_s25, 1 }
   0xe   : > { %622 = vmatprep.mubr.bf16.mxu0 %v5052_v2  ;;  %665 = vmatprep.mubr.bf16.mxu1 %v5052_v2  ;;  %v3218_v3 = vld [vmem:[%s5048_s4 + $0x100] ss:$16 sps:$4 sm:$0xff]   ;;  %v3219_v4 = vld [vmem:[%s5048_s4 + $0x108] ss:$16 sps:$4 sm:$0xff]   ;;  %v3220_v5 = vld [vmem:[%s5048_s4 + $0x124] ss:$16 sps:$4 sm:$0xff]  }
   0xf   : > { %590 = vmatprep.subr.bf16.mxu0 %v3214_v0  ;;  %633 = vmatprep.subr.bf16.mxu1 %v3216_v1  ;;  %v3222_v6 = vld [vmem:[%s5048_s4 + $0x12c] ss:$16 sps:$4 sm:$0xff]   ;;  %v3224_v7 = vld [vmem:[%s5048_s4 + $0x120] ss:$16 sps:$4 sm:$0xff]   ;;  %v3225_v8 = vld [vmem:[%s5048_s4 + $0x128] ss:$16 sps:$4 sm:$0xff]  }
  0x10   : > { %591 = vmatpush1.bf16.msra.mxu0 %v3218_v3  ;;  %634 = vmatpush1.bf16.msra.mxu1 %v3219_v4  ;;  %v3226_v9 = vld [vmem:[%s5048_s4 + $0x144] ss:$16 sps:$4 sm:$0xff]   ;;  %v3228_v10 = vld [vmem:[%s5048_s4 + $0x14c] ss:$16 sps:$4 sm:$0xff]   ;;  %v3230_v11 = vld [vmem:[%s5048_s4 + $0x140] ss:$16 sps:$4 sm:$0xff]  }
  0x11   : > { %592 = vmatprep.subr.bf16.mxu0 %v3220_v5  ;;  %635 = vmatprep.subr.bf16.mxu1 %v3222_v6  ;;  %v3231_v12 = vld [vmem:[%s5048_s4 + $0x148] ss:$16 sps:$4 sm:$0xff]   ;;  %v3232_v13 = vld [vmem:[%s5048_s4 + $0x164] ss:$16 sps:$4 sm:$0xff]   ;;  %v3234_v14 = vld [vmem:[%s5048_s4 + $0x16c] ss:$16 sps:$4 sm:$0xff]  }
  0x12   : > { %v3236_v15 = vld [vmem:[%s5048_s4 + $0x160] ss:$16 sps:$4 sm:$0xff]   ;;  %v3237_v16 = vld [vmem:[%s5048_s4 + $0x168] ss:$16 sps:$4 sm:$0xff]   ;;  %v3238_v17 = vld [vmem:[%s5048_s4 + $0x184] ss:$16 sps:$4 sm:$0xff]  }
  0x13   : > { %p320_p3 = scmp.lt.s32.totalorder %s2795_s10, 3  ;;  %v3240_v18 = vld [vmem:[%s5048_s4 + $0x18c] ss:$16 sps:$4 sm:$0xff]   ;;  %v3242_v19 = vld [vmem:[%s5048_s4 + $0x180] ss:$16 sps:$4 sm:$0xff]   ;;  %vm2690_vm0 = vcmask 1043456  }
  0x14   : > { %593 = vmatpush1.bf16.msra.mxu0 %v3224_v7  ;;  %636 = vmatpush1.bf16.msra.mxu1 %v3225_v8  ;;  %v3243_v20 = vld [vmem:[%s5048_s4 + $0x188] ss:$16 sps:$4 sm:$0xff]   ;;  %v3244_v21 = vld [vmem:[%s5048_s4 + $0x1a4] ss:$16 sps:$4 sm:$0xff]   ;;  %v3246_v22 = vld [vmem:[%s5048_s4 + $0x1ac] ss:$16 sps:$4 sm:$0xff]  }
  0x15   : > { %594 = vmatprep.subr.bf16.mxu0 %v3226_v9  ;;  %637 = vmatprep.subr.bf16.mxu1 %v3228_v10  ;;  %s5326_s10 = smov (!%p320_p3, %s2795_s10), 3  ;;  %v3248_v23 = vld [vmem:[%s5048_s4 + $0x1a0] ss:$16 sps:$4 sm:$0xff]   ;;  %v3249_v24 = vld [vmem:[%s5048_s4 + $0x1a8] ss:$16 sps:$4 sm:$0xff]   ;;  %vm2691_vm1 = vcmask 523268  }
  0x16   : > { %v3250_v25 = vld [vmem:[%s5048_s4 + $0x1c4] ss:$16 sps:$4 sm:$0xff]   ;;  %s3691_s12 = sshll.u32 %s5326_s10, 2  ;;  %v3252_v26 = vld [vmem:[%s5048_s4 + $0x1cc] ss:$16 sps:$4 sm:$0xff]   ;;  %s3136_s29 = sshll.u32 %s5326_s10, 4  ;;  %vm2692_vm2 = vmor %vm2691_vm1, %vm2690_vm0 }
  0x17   : > { %v3254_v27 = vld [vmem:[%s5048_s4 + $0x1c0] ss:$16 sps:$4 sm:$0xff]   ;;  %v3255_v28 = vld [vmem:[%s5048_s4 + $0x1c8] ss:$16 sps:$4 sm:$0xff]   ;;  %s3706_s20 = scalar_lea.vmem %s5045_s1, %s3691_s12  ;;  %v3256_v29 = vld [vmem:[%s5048_s4 + $0x1e4] ss:$16 sps:$4 sm:$0xff]   ;;  %s323_s8 = scalar_lea.vmem %s5044_s0, %s3691_s12 }
  0x18   : > { %595 = vmatpush1.bf16.msra.mxu0 %v3230_v11  ;;  %638 = vmatpush1.bf16.msra.mxu1 %v3231_v12  ;;  %v3258_v30 = vld [vmem:[%s5048_s4 + $0x1ec] ss:$16 sps:$4 sm:$0xff]   ;;  %v3260_v31 = vld [vmem:[%s5048_s4 + $0x1e0] ss:$16 sps:$4 sm:$0xff]   ;;  %v3261_v32 = vld [vmem:[%s5048_s4 + $0x1e8] ss:$16 sps:$4 sm:$0xff]   ;;  %s335_s18 = scalar_lea.vmem %s5046_s2, %s3691_s12  ;;  %s341_s28 = scalar_lea.vmem %s5047_s3, %s3691_s12 }
  0x19   : > { %596 = vmatprep.subr.bf16.mxu0 %v3232_v13  ;;  %639 = vmatprep.subr.bf16.mxu1 %v3234_v14  ;;  %v3264_v33 = vld [vmem:[%s5048_s4 + $0x4] ss:$16 sps:$4 sm:$0xff]   ;;  %v3267_v34 = vld [vmem:[%s5048_s4 + $0xc] ss:$16 sps:$4 sm:$0xff]   ;;  %v3262_v35 = vld [vmem:[%s5048_s4] ss:$16 sps:$4 sm:$0xff]   ;;  %s348_s11 = scalar_lea.vmem %s5051_s7, %s3136_s29 }
  0x1a   : > { %v3730_v36 = vld [vmem:[%s3706_s20] sm:$0xff]   ;;  %v3265_v37 = vld [vmem:[%s5048_s4 + $0x8] ss:$16 sps:$4 sm:$0xff]   ;;  %v3274_v39 = vld [vmem:[%s5048_s4 + $0x2c] ss:$16 sps:$4 sm:$0xff]  }
  0x1b   : > { %v3271_v38 = vld [vmem:[%s5048_s4 + $0x24] ss:$16 sps:$4 sm:$0xff]   ;;  %v3269_v40 = vld [vmem:[%s5048_s4 + $0x20] ss:$16 sps:$4 sm:$0xff]   ;;  %v3272_v41 = vld [vmem:[%s5048_s4 + $0x28] ss:$16 sps:$4 sm:$0xff]  }
  0x1c   : > { %597 = vmatpush1.bf16.msra.mxu0 %v3236_v15  ;;  %640 = vmatpush1.bf16.msra.mxu1 %v3237_v16  ;;  %v3277_v42 = vld [vmem:[%s5048_s4 + $0x44] ss:$16 sps:$4 sm:$0xff]   ;;  %v3280_v43 = vld [vmem:[%s5048_s4 + $0x4c] ss:$16 sps:$4 sm:$0xff]   ;;  %v3275_v44 = vld [vmem:[%s5048_s4 + $0x40] ss:$16 sps:$4 sm:$0xff]  }
  0x1d   : > { %598 = vmatprep.subr.bf16.mxu0 %v3238_v17  ;;  %641 = vmatprep.subr.bf16.mxu1 %v3240_v18  ;;  %v3278_v45 = vld [vmem:[%s5048_s4 + $0x48] ss:$16 sps:$4 sm:$0xff]   ;;  %v3283_v46 = vld [vmem:[%s5048_s4 + $0x64] ss:$16 sps:$4 sm:$0xff]   ;;  %v3769_v47 = vld [vmem:[%s5048_s4 + $0x6c] ss:$16 sps:$4 sm:$0xff]  }
  0x1e   : > { %v3774_v48 = vld [vmem:[%s5048_s4 + $0x60] ss:$16 sps:$4 sm:$0xff]   ;;  %v3779_v49 = vld [vmem:[%s5048_s4 + $0x68] ss:$16 sps:$4 sm:$0xff]   ;;  %v3784_v50 = vld [vmem:[%s5048_s4 + $0x84] ss:$16 sps:$4 sm:$0xff]  }
  0x1f   : > { %v3790_v51 = vld [vmem:[%s5048_s4 + $0x8c] ss:$16 sps:$4 sm:$0xff]   ;;  %v3801_v52 = vld [vmem:[%s5048_s4 + $0x80] ss:$16 sps:$4 sm:$0xff]   ;;  %v3806_v53 = vld [vmem:[%s5048_s4 + $0x88] ss:$16 sps:$4 sm:$0xff]  }
  0x20   : > { %599 = vmatpush1.bf16.msra.mxu0 %v3242_v19  ;;  %642 = vmatpush1.bf16.msra.mxu1 %v3243_v20  ;;  %v3813_v54 = vld [vmem:[%s5048_s4 + $0xa4] ss:$16 sps:$4 sm:$0xff]   ;;  %v3818_v55 = vld [vmem:[%s5048_s4 + $0xac] ss:$16 sps:$4 sm:$0xff]   ;;  %v3825_v56 = vld [vmem:[%s5048_s4 + $0xa0] ss:$16 sps:$4 sm:$0xff]  }
  0x21   : > { %600 = vmatprep.subr.bf16.mxu0 %v3244_v21  ;;  %643 = vmatprep.subr.bf16.mxu1 %v3246_v22  ;;  %v3830_v57 = vld [vmem:[%s5048_s4 + $0xa8] ss:$16 sps:$4 sm:$0xff]   ;;  %v3837_v58 = vld [vmem:[%s5048_s4 + $0xc4] ss:$16 sps:$4 sm:$0xff]   ;;  %v3842_v59 = vld [vmem:[%s5048_s4 + $0xcc] ss:$16 sps:$4 sm:$0xff]  }
  0x22   : > { %v3849_v60 = vld [vmem:[%s5048_s4 + $0xc0] ss:$16 sps:$4 sm:$0xff]   ;;  %v3854_v61 = vld [vmem:[%s5048_s4 + $0xc8] ss:$16 sps:$4 sm:$0xff]   ;;  %v3861_v62 = vld [vmem:[%s5048_s4 + $0xe4] ss:$16 sps:$4 sm:$0xff]  }
  0x23   : > { %v3866_v63 = vld [vmem:[%s5048_s4 + $0xec] ss:$16 sps:$4 sm:$0xff]   ;;  %v3873_v0 = vld [vmem:[%s5048_s4 + $0xe0] ss:$16 sps:$4 sm:$0xff]   ;;  %v3878_v1 = vld [vmem:[%s5048_s4 + $0xe8] ss:$16 sps:$4 sm:$0xff]  }
  0x24   : > { %601 = vmatpush1.bf16.msra.mxu0 %v3248_v23  ;;  %644 = vmatpush1.bf16.msra.mxu1 %v3249_v24  ;;  %v3885_v3 = vld [vmem:[%s5048_s4 + $0x204] ss:$16 sps:$4 sm:$0xff]   ;;  %v3890_v4 = vld [vmem:[%s5048_s4 + $0x20c] ss:$16 sps:$4 sm:$0xff]   ;;  %v3904_v6 = vld [vmem:[%s5048_s4 + $0x200] ss:$16 sps:$4 sm:$0xff]  }
  0x25   : > { %602 = vmatprep.subr.bf16.mxu0 %v3250_v25  ;;  %645 = vmatprep.subr.bf16.mxu1 %v3252_v26  ;;  %v3897_v5 = vld [vmem:[%s323_s8] sm:$0xff]   ;;  %v3909_v7 = vld [vmem:[%s5048_s4 + $0x208] ss:$16 sps:$4 sm:$0xff]   ;;  %v3921_v9 = vld [vmem:[%s5048_s4 + $0x22c] ss:$16 sps:$4 sm:$0xff]  }
  0x26   : > { %v3916_v8 = vld [vmem:[%s5048_s4 + $0x224] ss:$16 sps:$4 sm:$0xff]   ;;  %v3932_v10 = vld [vmem:[%s5048_s4 + $0x220] ss:$16 sps:$4 sm:$0xff]   ;;  %v3939_v11 = vld [vmem:[%s5048_s4 + $0x228] ss:$16 sps:$4 sm:$0xff]  }
  0x27   : > { %v3946_v12 = vld [vmem:[%s5048_s4 + $0x244] ss:$16 sps:$4 sm:$0xff]   ;;  %v3951_v13 = vld [vmem:[%s5048_s4 + $0x24c] ss:$16 sps:$4 sm:$0xff]   ;;  %v3958_v14 = vld [vmem:[%s5048_s4 + $0x240] ss:$16 sps:$4 sm:$0xff]  }
  0x28   : > { %603 = vmatpush1.bf16.msra.mxu0 %v3254_v27  ;;  %646 = vmatpush1.bf16.msra.mxu1 %v3255_v28  ;;  %v3965_v15 = vld [vmem:[%s5048_s4 + $0x248] ss:$16 sps:$4 sm:$0xff]   ;;  %v3972_v16 = vld [vmem:[%s5048_s4 + $0x264] ss:$16 sps:$4 sm:$0xff]   ;;  %v3977_v17 = vld [vmem:[%s5048_s4 + $0x26c] ss:$16 sps:$4 sm:$0xff]  }
  0x29   : > { %604 = vmatprep.subr.bf16.mxu0 %v3256_v29  ;;  %647 = vmatprep.subr.bf16.mxu1 %v3258_v30  ;;  %v3982_v18 = vld [vmem:[%s5048_s4 + $0x260] ss:$16 sps:$4 sm:$0xff]   ;;  %v3989_v19 = vld [vmem:[%s5048_s4 + $0x268] ss:$16 sps:$4 sm:$0xff]   ;;  %v3996_v20 = vld [vmem:[%s5048_s4 + $0x284] ss:$16 sps:$4 sm:$0xff]  }
  0x2a   : > { %v4001_v21 = vld [vmem:[%s5048_s4 + $0x28c] ss:$16 sps:$4 sm:$0xff]   ;;  %v4006_v22 = vld [vmem:[%s5048_s4 + $0x280] ss:$16 sps:$4 sm:$0xff]   ;;  %v4013_v23 = vld [vmem:[%s5048_s4 + $0x288] ss:$16 sps:$4 sm:$0xff]  }
  0x2b   : > { %v4020_v24 = vld [vmem:[%s5048_s4 + $0x2a4] ss:$16 sps:$4 sm:$0xff]   ;;  %v4025_v25 = vld [vmem:[%s5048_s4 + $0x2ac] ss:$16 sps:$4 sm:$0xff]   ;;  %v4030_v26 = vld [vmem:[%s5048_s4 + $0x2a0] ss:$16 sps:$4 sm:$0xff]  }
  0x2c   : > { %605 = vmatpush1.bf16.msra.mxu0 %v3260_v31  ;;  %648 = vmatpush1.bf16.msra.mxu1 %v3261_v32  ;;  %v4037_v27 = vld [vmem:[%s5048_s4 + $0x2a8] ss:$16 sps:$4 sm:$0xff]   ;;  %v4044_v28 = vld [vmem:[%s5048_s4 + $0x2c4] ss:$16 sps:$4 sm:$0xff]   ;;  %v4049_v29 = vld [vmem:[%s5048_s4 + $0x2cc] ss:$16 sps:$4 sm:$0xff]  }
  0x2d   : > { %842 = vmatprep.subr.bf16.mxu0 %v3264_v33  ;;  %885 = vmatprep.subr.bf16.mxu1 %v3267_v34  ;;  %v4054_v30 = vld [vmem:[%s5048_s4 + $0x2c0] ss:$16 sps:$4 sm:$0xff]   ;;  %v4061_v31 = vld [vmem:[%s5048_s4 + $0x2c8] ss:$16 sps:$4 sm:$0xff]   ;;  %v4068_v32 = vld [vmem:[%s5048_s4 + $0x2e4] ss:$16 sps:$4 sm:$0xff]  }
  0x2e   : > { %v4073_v33 = vld [vmem:[%s5048_s4 + $0x2ec] ss:$16 sps:$4 sm:$0xff]   ;;  %v4078_v34 = vld [vmem:[%s5048_s4 + $0x2e0] ss:$16 sps:$4 sm:$0xff]  }
  0x2f   : > { %623 = vmatmul.mubr.bf16.vlgmr.msra.gmra.mrb[0].mxu0 %v3730_v36  ;;  %666 = vmatmul.mubr.bf16.vlgmr.msra.gmra.mrb[0].mxu1 %v3730_v36 }
  0x30   : > { %843 = vmatpush1.bf16.msra.mxu0 %v3262_v35  ;;  %886 = vmatpush1.bf16.msra.mxu1 %v3265_v37  ;;  %v4085_v35 = vld [vmem:[%s5048_s4 + $0x2e8] ss:$16 sps:$4 sm:$0xff]   ;;  %v4092_v37 = vld [vmem:[%s5049_s5 + $0x104] ss:$16 sps:$4 sm:$0xff]  }
  0x31   : > { %844 = vmatprep.subr.bf16.mxu0 %v3271_v38  ;;  %887 = vmatprep.subr.bf16.mxu1 %v3274_v39  ;;  %v4097_v38 = vld [vmem:[%s5049_s5 + $0x10c] ss:$16 sps:$4 sm:$0xff]   ;;  %v4104_v39 = vld [vmem:[%s335_s18] sm:$0xff]  }
  0x32   : > { %874 = vmatprep.mubr.bf16.mxu0 %v5052_v2  ;;  %917 = vmatprep.mubr.bf16.mxu1 %v5052_v2 }
  0x34   : > { %845 = vmatpush1.bf16.msra.mxu0 %v3269_v40  ;;  %888 = vmatpush1.bf16.msra.mxu1 %v3272_v41  ;;  %v4109_v40 = vld [vmem:[%s5049_s5 + $0x100] ss:$16 sps:$4 sm:$0xff]   ;;  %v4116_v41 = vld [vmem:[%s5049_s5 + $0x108] ss:$16 sps:$4 sm:$0xff]  }
  0x35   : > { %846 = vmatprep.subr.bf16.mxu0 %v3277_v42  ;;  %889 = vmatprep.subr.bf16.mxu1 %v3280_v43  ;;  %5144 = vst [vmem:[#allocation2_spill] sm:$0xff] %v4109_v40  ;;  %5145 = vst [vmem:[#allocation3_spill] sm:$0xff] %v4116_v41  ;;  %v4123_v42 = vld [vmem:[%s5049_s5 + $0x124] ss:$16 sps:$4 sm:$0xff]   ;;  %v4128_v43 = vld [vmem:[%s5049_s5 + $0x12c] ss:$16 sps:$4 sm:$0xff]  }
  0x36   : > { %5146 = vst [vmem:[#allocation4_spill] sm:$0xff] %v4123_v42  ;;  %5147 = vst [vmem:[#allocation5_spill] sm:$0xff] %v4128_v43 }
  0x38   : > { %847 = vmatpush1.bf16.msra.mxu0 %v3275_v44  ;;  %890 = vmatpush1.bf16.msra.mxu1 %v3278_v45  ;;  %v4135_v44 = vld [vmem:[%s5049_s5 + $0x120] ss:$16 sps:$4 sm:$0xff]   ;;  %v4142_v45 = vld [vmem:[%s5049_s5 + $0x128] ss:$16 sps:$4 sm:$0xff]  }
  0x39   : > { %848 = vmatprep.subr.bf16.mxu0 %v3283_v46  ;;  %891 = vmatprep.subr.bf16.mxu1 %v3769_v47  ;;  %5148 = vst [vmem:[#allocation6_spill] sm:$0xff] %v4135_v44  ;;  %5149 = vst [vmem:[#allocation7_spill] sm:$0xff] %v4142_v45  ;;  %v4149_v46 = vld [vmem:[%s5049_s5 + $0x144] ss:$16 sps:$4 sm:$0xff]  }
  0x3a   : > { %5150 = vst [vmem:[#allocation8_spill] sm:$0xff] %v4149_v46 }
  0x3c   : > { %849 = vmatpush1.bf16.msra.mxu0 %v3774_v48  ;;  %892 = vmatpush1.bf16.msra.mxu1 %v3779_v49 }
  0x3d   : > { %850 = vmatprep.subr.bf16.mxu0 %v3784_v50  ;;  %893 = vmatprep.subr.bf16.mxu1 %v3790_v51 }
  0x40   : > { %851 = vmatpush1.bf16.msra.mxu0 %v3801_v52  ;;  %894 = vmatpush1.bf16.msra.mxu1 %v3806_v53 }
  0x41   : > { %852 = vmatprep.subr.bf16.mxu0 %v3813_v54  ;;  %895 = vmatprep.subr.bf16.mxu1 %v3818_v55 }
  0x44   : > { %853 = vmatpush1.bf16.msra.mxu0 %v3825_v56  ;;  %896 = vmatpush1.bf16.msra.mxu1 %v3830_v57 }
  0x45   : > { %854 = vmatprep.subr.bf16.mxu0 %v3837_v58  ;;  %897 = vmatprep.subr.bf16.mxu1 %v3842_v59 }
  0x48   : > { %855 = vmatpush1.bf16.msra.mxu0 %v3849_v60  ;;  %898 = vmatpush1.bf16.msra.mxu1 %v3854_v61 }
  0x49   : > { %856 = vmatprep.subr.bf16.mxu0 %v3861_v62  ;;  %899 = vmatprep.subr.bf16.mxu1 %v3866_v63 }
  0x4c   : > { %857 = vmatpush1.bf16.msra.mxu0 %v3873_v0  ;;  %900 = vmatpush1.bf16.msra.mxu1 %v3878_v1 }
  0x4d   : > { %1127 = vmatprep.subr.bf16.mxu0 %v3885_v3  ;;  %1170 = vmatprep.subr.bf16.mxu1 %v3890_v4 }
  0x4f   : > { %875 = vmatmul.mubr.bf16.vlgmr.msra.gmra.mrb[0].mxu0 %v3897_v5  ;;  %918 = vmatmul.mubr.bf16.vlgmr.msra.gmra.mrb[0].mxu1 %v3897_v5 }
  0x50   : > { %1128 = vmatpush1.bf16.msra.mxu0 %v3904_v6  ;;  %1171 = vmatpush1.bf16.msra.mxu1 %v3909_v7 }
  0x51   : > { %1129 = vmatprep.subr.bf16.mxu0 %v3916_v8  ;;  %1172 = vmatprep.subr.bf16.mxu1 %v3921_v9 }
  0x52   : > { %1159 = vmatprep.mubr.bf16.mxu0 %v5052_v2  ;;  %1202 = vmatprep.mubr.bf16.mxu1 %v5052_v2  ;;  %v4154_v2 = vld [vmem:[%s5049_s5 + $0x14c] ss:$16 sps:$4 sm:$0xff]  }
  0x53   : > { %5151 = vst [vmem:[#allocation9_spill] sm:$0xff] %v4154_v2 }
  0x54   : > { %1130 = vmatpush1.bf16.msra.mxu0 %v3932_v10  ;;  %1173 = vmatpush1.bf16.msra.mxu1 %v3939_v11 }
  0x55   : > { %1131 = vmatprep.subr.bf16.mxu0 %v3946_v12  ;;  %1174 = vmatprep.subr.bf16.mxu1 %v3951_v13 }
  0x58   : > { %1132 = vmatpush1.bf16.msra.mxu0 %v3958_v14  ;;  %1175 = vmatpush1.bf16.msra.mxu1 %v3965_v15 }
  0x59   : > { %1133 = vmatprep.subr.bf16.mxu0 %v3972_v16  ;;  %1176 = vmatprep.subr.bf16.mxu1 %v3977_v17 }
  0x5c   : > { %1134 = vmatpush1.bf16.msra.mxu0 %v3982_v18  ;;  %1177 = vmatpush1.bf16.msra.mxu1 %v3989_v19 }
  0x5d   : > { %1135 = vmatprep.subr.bf16.mxu0 %v3996_v20  ;;  %1178 = vmatprep.subr.bf16.mxu1 %v4001_v21 }
  0x60   : > { %1136 = vmatpush1.bf16.msra.mxu0 %v4006_v22  ;;  %1179 = vmatpush1.bf16.msra.mxu1 %v4013_v23 }
  0x61   : > { %1137 = vmatprep.subr.bf16.mxu0 %v4020_v24  ;;  %1180 = vmatprep.subr.bf16.mxu1 %v4025_v25 }
  0x64   : > { %1138 = vmatpush1.bf16.msra.mxu0 %v4030_v26  ;;  %1181 = vmatpush1.bf16.msra.mxu1 %v4037_v27 }
  0x65   : > { %1139 = vmatprep.subr.bf16.mxu0 %v4044_v28  ;;  %1182 = vmatprep.subr.bf16.mxu1 %v4049_v29 }
  0x68   : > { %1140 = vmatpush1.bf16.msra.mxu0 %v4054_v30  ;;  %1183 = vmatpush1.bf16.msra.mxu1 %v4061_v31 }
  0x69   : > { %1141 = vmatprep.subr.bf16.mxu0 %v4068_v32  ;;  %1184 = vmatprep.subr.bf16.mxu1 %v4073_v33 }
  0x6c   : > { %1142 = vmatpush1.bf16.msra.mxu0 %v4078_v34  ;;  %1185 = vmatpush1.bf16.msra.mxu1 %v4085_v35 }
  0x6d   : > { %1446 = vmatprep.subr.bf16.mxu0 %v4092_v37  ;;  %1489 = vmatprep.subr.bf16.mxu1 %v4097_v38 }
  0x6f   : > { %1160 = vmatmul.mubr.bf16.vlgmr.msra.gmra.mrb[0].mxu0 %v4104_v39  ;;  %1203 = vmatmul.mubr.bf16.vlgmr.msra.gmra.mrb[0].mxu1 %v4104_v39 }
  0x70   : > { %1447 = vmatpush1.bf16.msra.mxu0 %v4109_v40  ;;  %1490 = vmatpush1.bf16.msra.mxu1 %v4116_v41  ;;  %v5152_v41 = vmov 0   ;;  %v4175_v40 = vld [vmem:[%s5049_s5 + $0x164] ss:$16 sps:$4 sm:$0xff]  }
  0x71   : > { %1448 = vmatprep.subr.bf16.mxu0 %v4123_v42  ;;  %1491 = vmatprep.subr.bf16.mxu1 %v4128_v43  ;;  %v4161_v42 = vld [vmem:[%s5049_s5 + $0x140] ss:$16 sps:$4 sm:$0xff]   ;;  %v4168_v43 = vld [vmem:[%s5049_s5 + $0x148] ss:$16 sps:$4 sm:$0xff]   ;;  %5155 = vst [vmem:[#allocation12_spill] sm:$0xff] %v4175_v40 }
  0x72   : > { %1478 = vmatprep.mubr.bf16.mxu0 %v5152_v41  ;;  %1521 = vmatprep.mubr.bf16.mxu1 %v5152_v41  ;;  %5153 = vst [vmem:[#allocation10_spill] sm:$0xff] %v4161_v42  ;;  %5154 = vst [vmem:[#allocation11_spill] sm:$0xff] %v4168_v43 }
  0x74   : > { %1449 = vmatpush1.bf16.msra.mxu0 %v4135_v44  ;;  %1492 = vmatpush1.bf16.msra.mxu1 %v4142_v45  ;;  %v4180_v44 = vld [vmem:[%s5049_s5 + $0x16c] ss:$16 sps:$4 sm:$0xff]   ;;  %v4185_v45 = vld [vmem:[%s5049_s5 + $0x160] ss:$16 sps:$4 sm:$0xff]  }
  0x75   : > { %1450 = vmatprep.subr.bf16.mxu0 %v4149_v46  ;;  %1493 = vmatprep.subr.bf16.mxu1 %v4154_v2  ;;  %5156 = vst [vmem:[#allocation13_spill] sm:$0xff] %v4180_v44  ;;  %5157 = vst [vmem:[#allocation14_spill] sm:$0xff] %v4185_v45  ;;  %v4192_v2 = vld [vmem:[%s5049_s5 + $0x168] ss:$16 sps:$4 sm:$0xff]   ;;  %v4199_v46 = vld [vmem:[%s5049_s5 + $0x184] ss:$16 sps:$4 sm:$0xff]  }
  0x76   : > { %5158 = vst [vmem:[#allocation15_spill] sm:$0xff] %v4192_v2  ;;  %5159 = vst [vmem:[#allocation16_spill] sm:$0xff] %v4199_v46 }
  0x78   : > { %1451 = vmatpush1.bf16.msra.mxu0 %v4161_v42  ;;  %1494 = vmatpush1.bf16.msra.mxu1 %v4168_v43  ;;  %v4204_v42 = vld [vmem:[%s5049_s5 + $0x18c] ss:$16 sps:$4 sm:$0xff]   ;;  %v4209_v43 = vld [vmem:[%s5049_s5 + $0x180] ss:$16 sps:$4 sm:$0xff]  }
  0x79   : > { %1452 = vmatprep.subr.bf16.mxu0 %v4175_v40  ;;  %1495 = vmatprep.subr.bf16.mxu1 %v4180_v44  ;;  %5160 = vst [vmem:[#allocation17_spill] sm:$0xff] %v4204_v42  ;;  %5161 = vst [vmem:[#allocation18_spill] sm:$0xff] %v4209_v43  ;;  %v4216_v44 = vld [vmem:[%s5049_s5 + $0x188] ss:$16 sps:$4 sm:$0xff]   ;;  %v4223_v40 = vld [vmem:[%s5049_s5 + $0x1a4] ss:$16 sps:$4 sm:$0xff]  }
  0x7a   : > { %5162 = vst [vmem:[#allocation19_spill] sm:$0xff] %v4216_v44  ;;  %5163 = vst [vmem:[#allocation20_spill] sm:$0xff] %v4223_v40 }
  0x7c   : > { %1453 = vmatpush1.bf16.msra.mxu0 %v4185_v45  ;;  %1496 = vmatpush1.bf16.msra.mxu1 %v4192_v2  ;;  %v4228_v45 = vld [vmem:[%s5049_s5 + $0x1ac] ss:$16 sps:$4 sm:$0xff]   ;;  %v4233_v2 = vld [vmem:[%s5049_s5 + $0x1a0] ss:$16 sps:$4 sm:$0xff]  }
  0x7d   : > { %1454 = vmatprep.subr.bf16.mxu0 %v4199_v46  ;;  %1497 = vmatprep.subr.bf16.mxu1 %v4204_v42  ;;  %5164 = vst [vmem:[#allocation21_spill] sm:$0xff] %v4228_v45  ;;  %5165 = vst [vmem:[#allocation22_spill] sm:$0xff] %v4233_v2  ;;  %v4240_v42 = vld [vmem:[%s5049_s5 + $0x1a8] ss:$16 sps:$4 sm:$0xff]   ;;  %v4247_v46 = vld [vmem:[%s5049_s5 + $0x1c4] ss:$16 sps:$4 sm:$0xff]  }
  0x7e   : > { %5166 = vst [vmem:[#allocation23_spill] sm:$0xff] %v4240_v42  ;;  %5167 = vst [vmem:[#allocation24_spill] sm:$0xff] %v4247_v46 }
  0x80   : > { %1455 = vmatpush1.bf16.msra.mxu0 %v4209_v43  ;;  %1498 = vmatpush1.bf16.msra.mxu1 %v4216_v44  ;;  %v4252_v43 = vld [vmem:[%s5049_s5 + $0x1cc] ss:$16 sps:$4 sm:$0xff]   ;;  %v4257_v44 = vld [vmem:[%s5049_s5 + $0x1c0] ss:$16 sps:$4 sm:$0xff]  }
  0x81   : > { %1456 = vmatprep.subr.bf16.mxu0 %v4223_v40  ;;  %1499 = vmatprep.subr.bf16.mxu1 %v4228_v45  ;;  %5168 = vst [vmem:[#allocation25_spill] sm:$0xff] %v4252_v43  ;;  %5169 = vst [vmem:[#allocation26_spill] sm:$0xff] %v4257_v44  ;;  %v4264_v45 = vld [vmem:[%s5049_s5 + $0x1c8] ss:$16 sps:$4 sm:$0xff]   ;;  %v4271_v40 = vld [vmem:[%s5049_s5 + $0x1e4] ss:$16 sps:$4 sm:$0xff]  }
  0x82   : > { %5170 = vst [vmem:[#allocation27_spill] sm:$0xff] %v4264_v45  ;;  %5171 = vst [vmem:[#allocation28_spill] sm:$0xff] %v4271_v40 }
  0x84   : > { %1457 = vmatpush1.bf16.msra.mxu0 %v4233_v2  ;;  %1500 = vmatpush1.bf16.msra.mxu1 %v4240_v42  ;;  %v4276_v2 = vld [vmem:[%s5049_s5 + $0x1ec] ss:$16 sps:$4 sm:$0xff]   ;;  %v4281_v42 = vld [vmem:[%s5049_s5 + $0x1e0] ss:$16 sps:$4 sm:$0xff]  }
  0x85   : > { %1458 = vmatprep.subr.bf16.mxu0 %v4247_v46  ;;  %1501 = vmatprep.subr.bf16.mxu1 %v4252_v43  ;;  %5172 = vst [vmem:[#allocation29_spill] sm:$0xff] %v4276_v2  ;;  %5173 = vst [vmem:[#allocation30_spill] sm:$0xff] %v4281_v42  ;;  %v4288_v43 = vld [vmem:[%s5049_s5 + $0x1e8] ss:$16 sps:$4 sm:$0xff]   ;;  %v4295_v46 = vld [vmem:[%s5049_s5 + $0x4] ss:$16 sps:$4 sm:$0xff]  }
  0x86   : > { %5174 = vst [vmem:[#allocation31_spill] sm:$0xff] %v4295_v46 }
  0x88   : > { %1459 = vmatpush1.bf16.msra.mxu0 %v4257_v44  ;;  %1502 = vmatpush1.bf16.msra.mxu1 %v4264_v45  ;;  %v4300_v44 = vld [vmem:[%s5049_s5 + $0xc] ss:$16 sps:$4 sm:$0xff]   ;;  %v4305_v45 = vld [vmem:[%s5049_s5] ss:$16 sps:$4 sm:$0xff]  }
  0x89   : > { %1460 = vmatprep.subr.bf16.mxu0 %v4271_v40  ;;  %1503 = vmatprep.subr.bf16.mxu1 %v4276_v2  ;;  %5175 = vst [vmem:[#allocation32_spill] sm:$0xff] %v4300_v44  ;;  %5176 = vst [vmem:[#allocation33_spill] sm:$0xff] %v4305_v45  ;;  %v4312_v2 = vld [vmem:[%s5049_s5 + $0x8] ss:$16 sps:$4 sm:$0xff]   ;;  %v4319_v40 = vld [vmem:[%s5049_s5 + $0x24] ss:$16 sps:$4 sm:$0xff]  }
  0x8a   : > { %5177 = vst [vmem:[#allocation34_spill] sm:$0xff] %v4312_v2  ;;  %5178 = vst [vmem:[#allocation35_spill] sm:$0xff] %v4319_v40 }
  0x8c   : > { %1461 = vmatpush1.bf16.msra.mxu0 %v4281_v42  ;;  %1504 = vmatpush1.bf16.msra.mxu1 %v4288_v43  ;;  %v4324_v42 = vld [vmem:[%s5049_s5 + $0x2c] ss:$16 sps:$4 sm:$0xff]  }
  0x8d   : > { %1692 = vmatprep.subr.bf16.mxu0 %v4295_v46  ;;  %1735 = vmatprep.subr.bf16.mxu1 %v4300_v44  ;;  %5179 = vst [vmem:[#allocation36_spill] sm:$0xff] %v4324_v42  ;;  %v4333_v44 = vld [vmem:[%s5049_s5 + $0x20] ss:$16 sps:$4 sm:$0xff]   ;;  %v4338_v46 = vld [vmem:[%s5049_s5 + $0x28] ss:$16 sps:$4 sm:$0xff]  }
  0x8e   : > { %5180 = vst [vmem:[#allocation37_spill] sm:$0xff] %v4333_v44  ;;  %5181 = vst [vmem:[#allocation38_spill] sm:$0xff] %v4338_v46 }
  0x8f   : > { %1479 = vmatmul.mubr.bf16.vlgmr.msra.gmra.mrb[4].mxu0 %v3730_v36  ;;  %1522 = vmatmul.mubr.bf16.vlgmr.msra.gmra.mrb[4].mxu1 %v3730_v36  ;;  %v4345_v36 = vld [vmem:[%s5049_s5 + $0x44] ss:$16 sps:$4 sm:$0xff]  }
  0x90   : > { %1693 = vmatpush1.bf16.msra.mxu0 %v4305_v45  ;;  %1736 = vmatpush1.bf16.msra.mxu1 %v4312_v2  ;;  %5182 = vst [vmem:[#allocation39_spill] sm:$0xff] %v4345_v36  ;;  %v4350_v2 = vld [vmem:[%s5049_s5 + $0x4c] ss:$16 sps:$4 sm:$0xff]   ;;  %v4513_v45 = vld [vmem:[%s5049_s5 + $0x224] ss:$16 sps:$4 sm:$0xff]  }
  0x91   : > { %1694 = vmatprep.subr.bf16.mxu0 %v4319_v40  ;;  %1737 = vmatprep.subr.bf16.mxu1 %v4324_v42  ;;  %5183 = vst [vmem:[#allocation40_spill] sm:$0xff] %v4350_v2  ;;  %v4359_v42 = vld [vmem:[%s5049_s5 + $0x40] ss:$16 sps:$4 sm:$0xff]   ;;  %v4364_v40 = vld [vmem:[%s5049_s5 + $0x48] ss:$16 sps:$4 sm:$0xff]   ;;  %5208 = vst [vmem:[#allocation65_spill] sm:$0xff] %v4513_v45 }
  0x92   : > { %1724 = vmatprep.mubr.bf16.mxu0 %v5152_v41  ;;  %1767 = vmatprep.mubr.bf16.mxu1 %v5152_v41  ;;  %5184 = vst [vmem:[#allocation41_spill] sm:$0xff] %v4359_v42  ;;  %5185 = vst [vmem:[#allocation42_spill] sm:$0xff] %v4364_v40 }
  0x94   : > { %1695 = vmatpush1.bf16.msra.mxu0 %v4333_v44  ;;  %1738 = vmatpush1.bf16.msra.mxu1 %v4338_v46  ;;  %v4371_v44 = vld [vmem:[%s5049_s5 + $0x64] ss:$16 sps:$4 sm:$0xff]   ;;  %v4376_v46 = vld [vmem:[%s5049_s5 + $0x6c] ss:$16 sps:$4 sm:$0xff]  }
  0x95   : > { %1696 = vmatprep.subr.bf16.mxu0 %v4345_v36  ;;  %1739 = vmatprep.subr.bf16.mxu1 %v4350_v2  ;;  %5186 = vst [vmem:[#allocation43_spill] sm:$0xff] %v4371_v44  ;;  %5187 = vst [vmem:[#allocation44_spill] sm:$0xff] %v4376_v46  ;;  %v4383_v36 = vld [vmem:[%s5049_s5 + $0x60] ss:$16 sps:$4 sm:$0xff]   ;;  %v4388_v2 = vld [vmem:[%s5049_s5 + $0x68] ss:$16 sps:$4 sm:$0xff]  }
  0x96   : > { %5188 = vst [vmem:[#allocation45_spill] sm:$0xff] %v4383_v36  ;;  %5189 = vst [vmem:[#allocation46_spill] sm:$0xff] %v4388_v2 }
  0x98   : > { %1697 = vmatpush1.bf16.msra.mxu0 %v4359_v42  ;;  %1740 = vmatpush1.bf16.msra.mxu1 %v4364_v40  ;;  %v4395_v42 = vld [vmem:[%s5049_s5 + $0x84] ss:$16 sps:$4 sm:$0xff]   ;;  %v4400_v40 = vld [vmem:[%s5049_s5 + $0x8c] ss:$16 sps:$4 sm:$0xff]  }
  0x99   : > { %1698 = vmatprep.subr.bf16.mxu0 %v4371_v44  ;;  %1741 = vmatprep.subr.bf16.mxu1 %v4376_v46  ;;  %5190 = vst [vmem:[#allocation47_spill] sm:$0xff] %v4395_v42  ;;  %5191 = vst [vmem:[#allocation48_spill] sm:$0xff] %v4400_v40  ;;  %v4407_v44 = vld [vmem:[%s5049_s5 + $0x80] ss:$16 sps:$4 sm:$0xff]   ;;  %v4412_v46 = vld [vmem:[%s5049_s5 + $0x88] ss:$16 sps:$4 sm:$0xff]  }
  0x9a   : > { %5192 = vst [vmem:[#allocation49_spill] sm:$0xff] %v4407_v44  ;;  %5193 = vst [vmem:[#allocation50_spill] sm:$0xff] %v4412_v46 }
  0x9c   : > { %1699 = vmatpush1.bf16.msra.mxu0 %v4383_v36  ;;  %1742 = vmatpush1.bf16.msra.mxu1 %v4388_v2  ;;  %v4419_v36 = vld [vmem:[%s5049_s5 + $0xa4] ss:$16 sps:$4 sm:$0xff]   ;;  %v4424_v2 = vld [vmem:[%s5049_s5 + $0xac] ss:$16 sps:$4 sm:$0xff]  }
  0x9d   : > { %1700 = vmatprep.subr.bf16.mxu0 %v4395_v42  ;;  %1743 = vmatprep.subr.bf16.mxu1 %v4400_v40  ;;  %5194 = vst [vmem:[#allocation51_spill] sm:$0xff] %v4419_v36  ;;  %5195 = vst [vmem:[#allocation52_spill] sm:$0xff] %v4424_v2  ;;  %v4431_v42 = vld [vmem:[%s5049_s5 + $0xa0] ss:$16 sps:$4 sm:$0xff]   ;;  %v4436_v40 = vld [vmem:[%s5049_s5 + $0xa8] ss:$16 sps:$4 sm:$0xff]  }
  0x9e   : > { %5196 = vst [vmem:[#allocation53_spill] sm:$0xff] %v4431_v42  ;;  %5197 = vst [vmem:[#allocation54_spill] sm:$0xff] %v4436_v40 }
  0xa0   : > { %1701 = vmatpush1.bf16.msra.mxu0 %v4407_v44  ;;  %1744 = vmatpush1.bf16.msra.mxu1 %v4412_v46  ;;  %v4443_v44 = vld [vmem:[%s5049_s5 + $0xc4] ss:$16 sps:$4 sm:$0xff]   ;;  %v4448_v46 = vld [vmem:[%s5049_s5 + $0xcc] ss:$16 sps:$4 sm:$0xff]  }
  0xa1   : > { %1702 = vmatprep.subr.bf16.mxu0 %v4419_v36  ;;  %1745 = vmatprep.subr.bf16.mxu1 %v4424_v2  ;;  %5198 = vst [vmem:[#allocation55_spill] sm:$0xff] %v4443_v44  ;;  %5199 = vst [vmem:[#allocation56_spill] sm:$0xff] %v4448_v46  ;;  %v4455_v36 = vld [vmem:[%s5049_s5 + $0xc0] ss:$16 sps:$4 sm:$0xff]   ;;  %v4460_v2 = vld [vmem:[%s5049_s5 + $0xc8] ss:$16 sps:$4 sm:$0xff]  }
  0xa2   : > { %5200 = vst [vmem:[#allocation57_spill] sm:$0xff] %v4455_v36  ;;  %5201 = vst [vmem:[#allocation58_spill] sm:$0xff] %v4460_v2 }
  0xa4   : > { %1703 = vmatpush1.bf16.msra.mxu0 %v4431_v42  ;;  %1746 = vmatpush1.bf16.msra.mxu1 %v4436_v40  ;;  %v4467_v42 = vld [vmem:[%s5049_s5 + $0xe4] ss:$16 sps:$4 sm:$0xff]   ;;  %v4472_v40 = vld [vmem:[%s5049_s5 + $0xec] ss:$16 sps:$4 sm:$0xff]  }
  0xa5   : > { %1704 = vmatprep.subr.bf16.mxu0 %v4443_v44  ;;  %1747 = vmatprep.subr.bf16.mxu1 %v4448_v46  ;;  %5202 = vst [vmem:[#allocation59_spill] sm:$0xff] %v4467_v42  ;;  %5203 = vst [vmem:[#allocation60_spill] sm:$0xff] %v4472_v40  ;;  %v4479_v44 = vld [vmem:[%s5049_s5 + $0xe0] ss:$16 sps:$4 sm:$0xff]   ;;  %v4484_v46 = vld [vmem:[%s5049_s5 + $0xe8] ss:$16 sps:$4 sm:$0xff]  }
  0xa6   : > { %5204 = vst [vmem:[#allocation61_spill] sm:$0xff] %v4479_v44  ;;  %5205 = vst [vmem:[#allocation62_spill] sm:$0xff] %v4484_v46 }
  0xa8   : > { %1705 = vmatpush1.bf16.msra.mxu0 %v4455_v36  ;;  %1748 = vmatpush1.bf16.msra.mxu1 %v4460_v2  ;;  %v4491_v36 = vld [vmem:[%s5049_s5 + $0x204] ss:$16 sps:$4 sm:$0xff]   ;;  %v4496_v2 = vld [vmem:[%s5049_s5 + $0x20c] ss:$16 sps:$4 sm:$0xff]  }
  0xa9   : > { %1706 = vmatprep.subr.bf16.mxu0 %v4467_v42  ;;  %1749 = vmatprep.subr.bf16.mxu1 %v4472_v40  ;;  %5206 = vst [vmem:[#allocation63_spill] sm:$0xff] %v4496_v2  ;;  %v4503_v42 = vld [vmem:[%s5049_s5 + $0x200] ss:$16 sps:$4 sm:$0xff]   ;;  %v4508_v40 = vld [vmem:[%s5049_s5 + $0x208] ss:$16 sps:$4 sm:$0xff]  }
  0xaa   : > { %5207 = vst [vmem:[#allocation64_spill] sm:$0xff] %v4508_v40 }
  0xac   : > { %1707 = vmatpush1.bf16.msra.mxu0 %v4479_v44  ;;  %1750 = vmatpush1.bf16.msra.mxu1 %v4484_v46  ;;  %v4524_v46 = vld [vmem:[%s5049_s5 + $0x22c] ss:$16 sps:$4 sm:$0xff]   ;;  %v4533_v44 = vld [vmem:[%s5049_s5 + $0x220] ss:$16 sps:$4 sm:$0xff]  }
  0xad   : > { %1971 = vmatprep.subr.bf16.mxu0 %v4491_v36  ;;  %2014 = vmatprep.subr.bf16.mxu1 %v4496_v2  ;;  %5209 = vst [vmem:[#allocation66_spill] sm:$0xff] %v4524_v46  ;;  %5210 = vst [vmem:[#allocation67_spill] sm:$0xff] %v4533_v44  ;;  %v4538_v2 = vld [vmem:[%s5049_s5 + $0x228] ss:$16 sps:$4 sm:$0xff]  }
  0xae   : > { %5211 = vst [vmem:[#allocation68_spill] sm:$0xff] %v4538_v2 }
  0xaf   : > { %1725 = vmatmul.mubr.bf16.vlgmr.msra.gmra.mrb[4].mxu0 %v3897_v5  ;;  %1768 = vmatmul.mubr.bf16.vlgmr.msra.gmra.mrb[4].mxu1 %v3897_v5  ;;  %v4545_v5 = vld [vmem:[%s5049_s5 + $0x244] ss:$16 sps:$4 sm:$0xff]  }
  0xb0   : > { %1972 = vmatpush1.bf16.msra.mxu0 %v4503_v42  ;;  %2015 = vmatpush1.bf16.msra.mxu1 %v4508_v40  ;;  %5212 = vst [vmem:[#allocation69_spill] sm:$0xff] %v4545_v5  ;;  %v4550_v40 = vld [vmem:[%s5049_s5 + $0x24c] ss:$16 sps:$4 sm:$0xff]  }
  0xb1   : > { %1973 = vmatprep.subr.bf16.mxu0 %v4513_v45  ;;  %2016 = vmatprep.subr.bf16.mxu1 %v4524_v46  ;;  %5213 = vst [vmem:[#allocation70_spill] sm:$0xff] %v4550_v40  ;;  %v4559_v46 = vld [vmem:[%s5049_s5 + $0x240] ss:$16 sps:$4 sm:$0xff]   ;;  %v4564_v45 = vld [vmem:[%s5049_s5 + $0x248] ss:$16 sps:$4 sm:$0xff]  }
  0xb2   : > { %2003 = vmatprep.mubr.bf16.mxu0 %v5152_v41  ;;  %2046 = vmatprep.mubr.bf16.mxu1 %v5152_v41  ;;  %5214 = vst [vmem:[#allocation71_spill] sm:$0xff] %v4559_v46  ;;  %5215 = vst [vmem:[#allocation72_spill] sm:$0xff] %v4564_v45 }
  0xb4   : > { %1974 = vmatpush1.bf16.msra.mxu0 %v4533_v44  ;;  %2017 = vmatpush1.bf16.msra.mxu1 %v4538_v2  ;;  %v4571_v44 = vld [vmem:[%s5049_s5 + $0x264] ss:$16 sps:$4 sm:$0xff]   ;;  %v4576_v2 = vld [vmem:[%s5049_s5 + $0x26c] ss:$16 sps:$4 sm:$0xff]  }
  0xb5   : > { %1975 = vmatprep.subr.bf16.mxu0 %v4545_v5  ;;  %2018 = vmatprep.subr.bf16.mxu1 %v4550_v40  ;;  %5216 = vst [vmem:[#allocation73_spill] sm:$0xff] %v4571_v44  ;;  %5217 = vst [vmem:[#allocation74_spill] sm:$0xff] %v4576_v2  ;;  %v4583_v5 = vld [vmem:[%s5049_s5 + $0x260] ss:$16 sps:$4 sm:$0xff]   ;;  %v4588_v40 = vld [vmem:[%s5049_s5 + $0x268] ss:$16 sps:$4 sm:$0xff]  }
  0xb6   : > { %5218 = vst [vmem:[#allocation75_spill] sm:$0xff] %v4583_v5  ;;  %5219 = vst [vmem:[#allocation76_spill] sm:$0xff] %v4588_v40 }
  0xb8   : > { %1976 = vmatpush1.bf16.msra.mxu0 %v4559_v46  ;;  %2019 = vmatpush1.bf16.msra.mxu1 %v4564_v45  ;;  %v4595_v46 = vld [vmem:[%s5049_s5 + $0x284] ss:$16 sps:$4 sm:$0xff]   ;;  %v4600_v45 = vld [vmem:[%s5049_s5 + $0x28c] ss:$16 sps:$4 sm:$0xff]  }
  0xb9   : > { %1977 = vmatprep.subr.bf16.mxu0 %v4571_v44  ;;  %2020 = vmatprep.subr.bf16.mxu1 %v4576_v2  ;;  %5220 = vst [vmem:[#allocation77_spill] sm:$0xff] %v4595_v46  ;;  %5221 = vst [vmem:[#allocation78_spill] sm:$0xff] %v4600_v45  ;;  %v4607_v44 = vld [vmem:[%s5049_s5 + $0x280] ss:$16 sps:$4 sm:$0xff]   ;;  %v4612_v2 = vld [vmem:[%s5049_s5 + $0x288] ss:$16 sps:$4 sm:$0xff]  }
  0xba   : > { %5222 = vst [vmem:[#allocation79_spill] sm:$0xff] %v4607_v44  ;;  %5223 = vst [vmem:[#allocation80_spill] sm:$0xff] %v4612_v2 }
  0xbc   : > { %1978 = vmatpush1.bf16.msra.mxu0 %v4583_v5  ;;  %2021 = vmatpush1.bf16.msra.mxu1 %v4588_v40  ;;  %v4619_v5 = vld [vmem:[%s5049_s5 + $0x2a4] ss:$16 sps:$4 sm:$0xff]   ;;  %v4624_v40 = vld [vmem:[%s5049_s5 + $0x2ac] ss:$16 sps:$4 sm:$0xff]  }
  0xbd   : > { %1979 = vmatprep.subr.bf16.mxu0 %v4595_v46  ;;  %2022 = vmatprep.subr.bf16.mxu1 %v4600_v45  ;;  %5224 = vst [vmem:[#allocation81_spill] sm:$0xff] %v4619_v5  ;;  %5225 = vst [vmem:[#allocation82_spill] sm:$0xff] %v4624_v40  ;;  %v4631_v46 = vld [vmem:[%s5049_s5 + $0x2a0] ss:$16 sps:$4 sm:$0xff]   ;;  %v4636_v45 = vld [vmem:[%s5049_s5 + $0x2a8] ss:$16 sps:$4 sm:$0xff]  }
  0xbe   : > { %5226 = vst [vmem:[#allocation83_spill] sm:$0xff] %v4631_v46  ;;  %5227 = vst [vmem:[#allocation84_spill] sm:$0xff] %v4636_v45 }
  0xc0   : > { %1980 = vmatpush1.bf16.msra.mxu0 %v4607_v44  ;;  %2023 = vmatpush1.bf16.msra.mxu1 %v4612_v2  ;;  %v4643_v44 = vld [vmem:[%s5049_s5 + $0x2c4] ss:$16 sps:$4 sm:$0xff]   ;;  %v4648_v2 = vld [vmem:[%s5049_s5 + $0x2cc] ss:$16 sps:$4 sm:$0xff]  }
  0xc1   : > { %1981 = vmatprep.subr.bf16.mxu0 %v4619_v5  ;;  %2024 = vmatprep.subr.bf16.mxu1 %v4624_v40  ;;  %5228 = vst [vmem:[#allocation85_spill] sm:$0xff] %v4643_v44  ;;  %5229 = vst [vmem:[#allocation86_spill] sm:$0xff] %v4648_v2  ;;  %v4655_v5 = vld [vmem:[%s5049_s5 + $0x2c0] ss:$16 sps:$4 sm:$0xff]   ;;  %v4660_v40 = vld [vmem:[%s5049_s5 + $0x2c8] ss:$16 sps:$4 sm:$0xff]  }
  0xc2   : > { %5230 = vst [vmem:[#allocation87_spill] sm:$0xff] %v4655_v5  ;;  %5231 = vst [vmem:[#allocation88_spill] sm:$0xff] %v4660_v40 }
  0xc4   : > { %1982 = vmatpush1.bf16.msra.mxu0 %v4631_v46  ;;  %2025 = vmatpush1.bf16.msra.mxu1 %v4636_v45  ;;  %v4667_v46 = vld [vmem:[%s5049_s5 + $0x2e4] ss:$16 sps:$4 sm:$0xff]   ;;  %v4672_v45 = vld [vmem:[%s5049_s5 + $0x2ec] ss:$16 sps:$4 sm:$0xff]  }
  0xc5   : > { %1983 = vmatprep.subr.bf16.mxu0 %v4643_v44  ;;  %2026 = vmatprep.subr.bf16.mxu1 %v4648_v2  ;;  %5232 = vst [vmem:[#allocation89_spill] sm:$0xff] %v4672_v45  ;;  %v4679_v44 = vld [vmem:[%s5049_s5 + $0x2e0] ss:$16 sps:$4 sm:$0xff]   ;;  %v4684_v2 = vld [vmem:[%s5049_s5 + $0x2e8] ss:$16 sps:$4 sm:$0xff]  }
  0xc6   : > { %5233 = vst [vmem:[#allocation90_spill] sm:$0xff] %v4679_v44  ;;  %5234 = vst [vmem:[#allocation91_spill] sm:$0xff] %v4684_v2 }
  0xc8   : > { %1984 = vmatpush1.bf16.msra.mxu0 %v4655_v5  ;;  %2027 = vmatpush1.bf16.msra.mxu1 %v4660_v40  ;;  %v3506_v40 = vld [vmem:[%s5048_s4 + $0x104] ss:$16 sps:$4 sm:$0xff]   ;;  %v3507_v5 = vld [vmem:[%s5048_s4 + $0x10c] ss:$16 sps:$4 sm:$0xff]  }
  0xc9   : > { %1985 = vmatprep.subr.bf16.mxu0 %v4667_v46  ;;  %2028 = vmatprep.subr.bf16.mxu1 %v4672_v45  ;;  %v3516_v45 = vld [vmem:[%s5048_s4 + $0x140] ss:$16 sps:$4 sm:$0xff]  }
  0xcc   : > { %1986 = vmatpush1.bf16.msra.mxu0 %v4679_v44  ;;  %2029 = vmatpush1.bf16.msra.mxu1 %v4684_v2  ;;  %v3508_v44 = vld [vmem:[%s5048_s4 + $0x100] ss:$16 sps:$4 sm:$0xff]   ;;  %v3509_v2 = vld [vmem:[%s5048_s4 + $0x108] ss:$16 sps:$4 sm:$0xff]  }
  0xcd   : > { %2073 = vmatprep.subr.bf16.mxu0 %v3506_v40  ;;  %2116 = vmatprep.subr.bf16.mxu1 %v3507_v5  ;;  %v3510_v40 = vld [vmem:[%s5048_s4 + $0x124] ss:$16 sps:$4 sm:$0xff]   ;;  %v3511_v5 = vld [vmem:[%s5048_s4 + $0x12c] ss:$16 sps:$4 sm:$0xff]  }
  0xcf   : > { %2004 = vmatmul.mubr.bf16.vlgmr.msra.gmra.mrb[4].mxu0 %v4104_v39  ;;  %2047 = vmatmul.mubr.bf16.vlgmr.msra.gmra.mrb[4].mxu1 %v4104_v39 }
  0xd0   : > { %2074 = vmatpush1.bf16.msra.mxu0 %v3508_v44  ;;  %2117 = vmatpush1.bf16.msra.mxu1 %v3509_v2  ;;  %v3512_v44 = vld [vmem:[%s5048_s4 + $0x120] ss:$16 sps:$4 sm:$0xff]   ;;  %v3513_v2 = vld [vmem:[%s5048_s4 + $0x128] ss:$16 sps:$4 sm:$0xff]  }
  0xd1   : > { %2075 = vmatprep.subr.bf16.mxu0 %v3510_v40  ;;  %2118 = vmatprep.subr.bf16.mxu1 %v3511_v5  ;;  %v3514_v40 = vld [vmem:[%s5048_s4 + $0x144] ss:$16 sps:$4 sm:$0xff]   ;;  %v3515_v5 = vld [vmem:[%s5048_s4 + $0x14c] ss:$16 sps:$4 sm:$0xff]  }
  0xd2   : > { %2105 = vmatprep.mubr.bf16.mxu0 %v5152_v41  ;;  %2148 = vmatprep.mubr.bf16.mxu1 %v5152_v41 }
  0xd4   : > { %2076 = vmatpush1.bf16.msra.mxu0 %v3512_v44  ;;  %2119 = vmatpush1.bf16.msra.mxu1 %v3513_v2  ;;  %v3517_v44 = vld [vmem:[%s5048_s4 + $0x148] ss:$16 sps:$4 sm:$0xff]   ;;  %v3518_v2 = vld [vmem:[%s5048_s4 + $0x164] ss:$16 sps:$4 sm:$0xff]  }
  0xd5   : > { %2077 = vmatprep.subr.bf16.mxu0 %v3514_v40  ;;  %2120 = vmatprep.subr.bf16.mxu1 %v3515_v5  ;;  %v3519_v40 = vld [vmem:[%s5048_s4 + $0x16c] ss:$16 sps:$4 sm:$0xff]   ;;  %v3520_v5 = vld [vmem:[%s5048_s4 + $0x160] ss:$16 sps:$4 sm:$0xff]  }
  0xd8   : > { %2078 = vmatpush1.bf16.msra.mxu0 %v3516_v45  ;;  %2121 = vmatpush1.bf16.msra.mxu1 %v3517_v44  ;;  %v3521_v45 = vld [vmem:[%s5048_s4 + $0x168] ss:$16 sps:$4 sm:$0xff]   ;;  %v3522_v44 = vld [vmem:[%s5048_s4 + $0x184] ss:$16 sps:$4 sm:$0xff]  }
  0xd9   : > { %2079 = vmatprep.subr.bf16.mxu0 %v3518_v2  ;;  %2122 = vmatprep.subr.bf16.mxu1 %v3519_v40  ;;  %v3523_v2 = vld [vmem:[%s5048_s4 + $0x18c] ss:$16 sps:$4 sm:$0xff]   ;;  %v3524_v40 = vld [vmem:[%s5048_s4 + $0x180] ss:$16 sps:$4 sm:$0xff]  }
  0xdc   : > { %2080 = vmatpush1.bf16.msra.mxu0 %v3520_v5  ;;  %2123 = vmatpush1.bf16.msra.mxu1 %v3521_v45  ;;  %v3525_v5 = vld [vmem:[%s5048_s4 + $0x188] ss:$16 sps:$4 sm:$0xff]   ;;  %v3526_v45 = vld [vmem:[%s5048_s4 + $0x1a4] ss:$16 sps:$4 sm:$0xff]  }
  0xdd   : > { %2081 = vmatprep.subr.bf16.mxu0 %v3522_v44  ;;  %2124 = vmatprep.subr.bf16.mxu1 %v3523_v2  ;;  %v3527_v44 = vld [vmem:[%s5048_s4 + $0x1ac] ss:$16 sps:$4 sm:$0xff]   ;;  %v3528_v2 = vld [vmem:[%s5048_s4 + $0x1a0] ss:$16 sps:$4 sm:$0xff]  }
  0xe0   : > { %2082 = vmatpush1.bf16.msra.mxu0 %v3524_v40  ;;  %2125 = vmatpush1.bf16.msra.mxu1 %v3525_v5  ;;  %v3529_v40 = vld [vmem:[%s5048_s4 + $0x1a8] ss:$16 sps:$4 sm:$0xff]   ;;  %v3530_v5 = vld [vmem:[%s5048_s4 + $0x1c4] ss:$16 sps:$4 sm:$0xff]  }
  0xe1   : > { %2083 = vmatprep.subr.bf16.mxu0 %v3526_v45  ;;  %2126 = vmatprep.subr.bf16.mxu1 %v3527_v44  ;;  %v3531_v45 = vld [vmem:[%s5048_s4 + $0x1cc] ss:$16 sps:$4 sm:$0xff]   ;;  %v3532_v44 = vld [vmem:[%s5048_s4 + $0x1c0] ss:$16 sps:$4 sm:$0xff]  }
  0xe4   : > { %2084 = vmatpush1.bf16.msra.mxu0 %v3528_v2  ;;  %2127 = vmatpush1.bf16.msra.mxu1 %v3529_v40  ;;  %v3533_v2 = vld [vmem:[%s5048_s4 + $0x1c8] ss:$16 sps:$4 sm:$0xff]   ;;  %v3534_v40 = vld [vmem:[%s5048_s4 + $0x1e4] ss:$16 sps:$4 sm:$0xff]  }
  0xe5   : > { %2085 = vmatprep.subr.bf16.mxu0 %v3530_v5  ;;  %2128 = vmatprep.subr.bf16.mxu1 %v3531_v45  ;;  %v3535_v5 = vld [vmem:[%s5048_s4 + $0x1ec] ss:$16 sps:$4 sm:$0xff]   ;;  %v3536_v45 = vld [vmem:[%s5048_s4 + $0x1e0] ss:$16 sps:$4 sm:$0xff]  }
  0xe8   : > { %2086 = vmatpush1.bf16.msra.mxu0 %v3532_v44  ;;  %2129 = vmatpush1.bf16.msra.mxu1 %v3533_v2  ;;  %v3537_v44 = vld [vmem:[%s5048_s4 + $0x1e8] ss:$16 sps:$4 sm:$0xff]   ;;  %v3538_v2 = vld [vmem:[%s5048_s4 + $0x4] ss:$16 sps:$4 sm:$0xff]  }
  0xe9   : > { %2087 = vmatprep.subr.bf16.mxu0 %v3534_v40  ;;  %2130 = vmatprep.subr.bf16.mxu1 %v3535_v5  ;;  %v3539_v40 = vld [vmem:[%s5048_s4 + $0xc] ss:$16 sps:$4 sm:$0xff]   ;;  %v3540_v5 = vld [vmem:[%s5048_s4] ss:$16 sps:$4 sm:$0xff]  }
  0xec   : > { %2088 = vmatpush1.bf16.msra.mxu0 %v3536_v45  ;;  %2131 = vmatpush1.bf16.msra.mxu1 %v3537_v44  ;;  %v3541_v45 = vld [vmem:[%s5048_s4 + $0x8] ss:$16 sps:$4 sm:$0xff]   ;;  %v3542_v44 = vld [vmem:[%s5048_s4 + $0x24] ss:$16 sps:$4 sm:$0xff]  }
  0xed   : > { %2159 = vmatprep.subr.bf16.mxu0 %v3538_v2  ;;  %2202 = vmatprep.subr.bf16.mxu1 %v3539_v40  ;;  %v3543_v2 = vld [vmem:[%s5048_s4 + $0x2c] ss:$16 sps:$4 sm:$0xff]   ;;  %v3544_v40 = vld [vmem:[%s5048_s4 + $0x20] ss:$16 sps:$4 sm:$0xff]  }
  0xef   : > { %2106 = vmatmul.mubr.bf16.vlgmr.msra.gmra.mrb[8].mxu0 %v4104_v39  ;;  %2149 = vmatmul.mubr.bf16.vlgmr.msra.gmra.mrb[8].mxu1 %v4104_v39 }
  0xf0   : > { %2160 = vmatpush1.bf16.msra.mxu0 %v3540_v5  ;;  %2203 = vmatpush1.bf16.msra.mxu1 %v3541_v45  ;;  %v3545_v5 = vld [vmem:[%s5048_s4 + $0x28] ss:$16 sps:$4 sm:$0xff]   ;;  %v3546_v45 = vld [vmem:[%s5048_s4 + $0x44] ss:$16 sps:$4 sm:$0xff]  }
  0xf1   : > { %2161 = vmatprep.subr.bf16.mxu0 %v3542_v44  ;;  %2204 = vmatprep.subr.bf16.mxu1 %v3543_v2  ;;  %v3547_v44 = vld [vmem:[%s5048_s4 + $0x4c] ss:$16 sps:$4 sm:$0xff]   ;;  %v3548_v2 = vld [vmem:[%s5048_s4 + $0x40] ss:$16 sps:$4 sm:$0xff]  }
  0xf2   : > { %2191 = vmatprep.mubr.bf16.mxu0 %v5152_v41  ;;  %2234 = vmatprep.mubr.bf16.mxu1 %v5152_v41 }
  0xf4   : > { %2162 = vmatpush1.bf16.msra.mxu0 %v3544_v40  ;;  %2205 = vmatpush1.bf16.msra.mxu1 %v3545_v5  ;;  %v3549_v40 = vld [vmem:[%s5048_s4 + $0x48] ss:$16 sps:$4 sm:$0xff]   ;;  %v3550_v5 = vld [vmem:[%s5048_s4 + $0x64] ss:$16 sps:$4 sm:$0xff]  }
  0xf5   : > { %2163 = vmatprep.subr.bf16.mxu0 %v3546_v45  ;;  %2206 = vmatprep.subr.bf16.mxu1 %v3547_v44  ;;  %v5280_v45 = vld [vmem:[#allocation47_spill] sm:$0xff]  ;;  %v5281_v44 = vld [vmem:[#allocation48_spill] sm:$0xff] }
  0xf8   : > { %2164 = vmatpush1.bf16.msra.mxu0 %v3548_v2  ;;  %2207 = vmatpush1.bf16.msra.mxu1 %v3549_v40  ;;  %v5282_v2 = vld [vmem:[#allocation49_spill] sm:$0xff]  ;;  %v5283_v40 = vld [vmem:[#allocation50_spill] sm:$0xff] }
  0xf9   : > { %2165 = vmatprep.subr.bf16.mxu0 %v3550_v5  ;;  %2208 = vmatprep.subr.bf16.mxu1 %v3769_v47  ;;  %v4855_v47 = vld [vmem:[%s3706_s20] sm:$0xff]   ;;  %v5284_v5 = vld [vmem:[#allocation51_spill] sm:$0xff] }
  0xfc   : > { %2166 = vmatpush1.bf16.msra.mxu0 %v3774_v48  ;;  %2209 = vmatpush1.bf16.msra.mxu1 %v3779_v49  ;;  %v4894_v48 = vld [vmem:[%s341_s28] sm:$0xff]  }
  0xfd   : > { %2167 = vmatprep.subr.bf16.mxu0 %v3784_v50  ;;  %2210 = vmatprep.subr.bf16.mxu1 %v3790_v51  ;;  %v5235_v49 = vld [vmem:[#allocation2_spill] sm:$0xff]  ;;  %v5236_v50 = vld [vmem:[#allocation3_spill] sm:$0xff]  ;;  %v5237_v51 = vld [vmem:[#allocation4_spill] sm:$0xff] }
 0x100   : > { %2168 = vmatpush1.bf16.msra.mxu0 %v3801_v52  ;;  %2211 = vmatpush1.bf16.msra.mxu1 %v3806_v53  ;;  %v5238_v52 = vld [vmem:[#allocation5_spill] sm:$0xff]  ;;  %v5239_v53 = vld [vmem:[#allocation6_spill] sm:$0xff] }
 0x101   : > { %2169 = vmatprep.subr.bf16.mxu0 %v3813_v54  ;;  %2212 = vmatprep.subr.bf16.mxu1 %v3818_v55  ;;  %v5240_v54 = vld [vmem:[#allocation7_spill] sm:$0xff]  ;;  %v5241_v55 = vld [vmem:[#allocation8_spill] sm:$0xff] }
 0x104   : > { %2170 = vmatpush1.bf16.msra.mxu0 %v3825_v56  ;;  %2213 = vmatpush1.bf16.msra.mxu1 %v3830_v57  ;;  %v5242_v56 = vld [vmem:[#allocation9_spill] sm:$0xff]  ;;  %v5243_v57 = vld [vmem:[#allocation10_spill] sm:$0xff] }
 0x105   : > { %2171 = vmatprep.subr.bf16.mxu0 %v3837_v58  ;;  %2214 = vmatprep.subr.bf16.mxu1 %v3842_v59  ;;  %v5244_v58 = vld [vmem:[#allocation11_spill] sm:$0xff]  ;;  %v5245_v59 = vld [vmem:[#allocation12_spill] sm:$0xff] }
 0x108   : > { %2172 = vmatpush1.bf16.msra.mxu0 %v3849_v60  ;;  %2215 = vmatpush1.bf16.msra.mxu1 %v3854_v61  ;;  %v5246_v60 = vld [vmem:[#allocation13_spill] sm:$0xff]  ;;  %v5247_v61 = vld [vmem:[#allocation14_spill] sm:$0xff] }
 0x109   : > { %2173 = vmatprep.subr.bf16.mxu0 %v3861_v62  ;;  %2216 = vmatprep.subr.bf16.mxu1 %v3866_v63  ;;  %v5248_v62 = vld [vmem:[#allocation15_spill] sm:$0xff]  ;;  %v5249_v63 = vld [vmem:[#allocation16_spill] sm:$0xff] }
 0x10c   : > { %2174 = vmatpush1.bf16.msra.mxu0 %v3873_v0  ;;  %2217 = vmatpush1.bf16.msra.mxu1 %v3878_v1  ;;  %v5250_v0 = vld [vmem:[#allocation17_spill] sm:$0xff]  ;;  %v5251_v1 = vld [vmem:[#allocation18_spill] sm:$0xff] }
 0x10d   : > { %2251 = vmatprep.subr.bf16.mxu0 %v3885_v3  ;;  %2294 = vmatprep.subr.bf16.mxu1 %v3890_v4  ;;  %v5252_v3 = vld [vmem:[#allocation19_spill] sm:$0xff]  ;;  %v5253_v4 = vld [vmem:[#allocation20_spill] sm:$0xff] }
 0x10f   : > { %2192 = vmatmul.mubr.bf16.vlgmr.msra.gmra.mrb[8].mxu0 %v4855_v47  ;;  %2235 = vmatmul.mubr.bf16.vlgmr.msra.gmra.mrb[8].mxu1 %v4855_v47 }
 0x110   : > { %2252 = vmatpush1.bf16.msra.mxu0 %v3904_v6  ;;  %2295 = vmatpush1.bf16.msra.mxu1 %v3909_v7  ;;  %v5254_v6 = vld [vmem:[#allocation21_spill] sm:$0xff] }
 0x111   : > { %2253 = vmatprep.subr.bf16.mxu0 %v3916_v8  ;;  %2296 = vmatprep.subr.bf16.mxu1 %v3921_v9 }
 0x112   : > { %2283 = vmatprep.mubr.bf16.mxu0 %v5152_v41  ;;  %2326 = vmatprep.mubr.bf16.mxu1 %v5152_v41 }
 0x114   : > { %2254 = vmatpush1.bf16.msra.mxu0 %v3932_v10  ;;  %2297 = vmatpush1.bf16.msra.mxu1 %v3939_v11 }
 0x115   : > { %2255 = vmatprep.subr.bf16.mxu0 %v3946_v12  ;;  %2298 = vmatprep.subr.bf16.mxu1 %v3951_v13  ;;  %v5255_v13 = vld [vmem:[#allocation22_spill] sm:$0xff] }
 0x118   : > { %2256 = vmatpush1.bf16.msra.mxu0 %v3958_v14  ;;  %2299 = vmatpush1.bf16.msra.mxu1 %v3965_v15  ;;  %v5256_v14 = vld [vmem:[#allocation23_spill] sm:$0xff] }
 0x119   : > { %2257 = vmatprep.subr.bf16.mxu0 %v3972_v16  ;;  %2300 = vmatprep.subr.bf16.mxu1 %v3977_v17  ;;  %v5257_v17 = vld [vmem:[#allocation24_spill] sm:$0xff] }
 0x11c   : > { %2258 = vmatpush1.bf16.msra.mxu0 %v3982_v18  ;;  %2301 = vmatpush1.bf16.msra.mxu1 %v3989_v19  ;;  %v5258_v18 = vld [vmem:[#allocation25_spill] sm:$0xff]  ;;  %v5259_v19 = vld [vmem:[#allocation26_spill] sm:$0xff] }
 0x11d   : > { %2259 = vmatprep.subr.bf16.mxu0 %v3996_v20  ;;  %2302 = vmatprep.subr.bf16.mxu1 %v4001_v21  ;;  %v5260_v20 = vld [vmem:[#allocation27_spill] sm:$0xff]  ;;  %v5261_v21 = vld [vmem:[#allocation28_spill] sm:$0xff] }
 0x120   : > { %2260 = vmatpush1.bf16.msra.mxu0 %v4006_v22  ;;  %2303 = vmatpush1.bf16.msra.mxu1 %v4013_v23  ;;  %v5262_v22 = vld [vmem:[#allocation29_spill] sm:$0xff]  ;;  %v5263_v23 = vld [vmem:[#allocation30_spill] sm:$0xff] }
 0x121   : > { %2261 = vmatprep.subr.bf16.mxu0 %v4020_v24  ;;  %2304 = vmatprep.subr.bf16.mxu1 %v4025_v25  ;;  %v5264_v24 = vld [vmem:[#allocation31_spill] sm:$0xff]  ;;  %v5265_v25 = vld [vmem:[#allocation32_spill] sm:$0xff] }
 0x124   : > { %2262 = vmatpush1.bf16.msra.mxu0 %v4030_v26  ;;  %2305 = vmatpush1.bf16.msra.mxu1 %v4037_v27  ;;  %v5266_v26 = vld [vmem:[#allocation33_spill] sm:$0xff]  ;;  %v5267_v27 = vld [vmem:[#allocation34_spill] sm:$0xff] }
 0x125   : > { %2263 = vmatprep.subr.bf16.mxu0 %v4044_v28  ;;  %2306 = vmatprep.subr.bf16.mxu1 %v4049_v29  ;;  %v5268_v28 = vld [vmem:[#allocation35_spill] sm:$0xff]  ;;  %v5269_v29 = vld [vmem:[#allocation36_spill] sm:$0xff] }
 0x128   : > { %2264 = vmatpush1.bf16.msra.mxu0 %v4054_v30  ;;  %2307 = vmatpush1.bf16.msra.mxu1 %v4061_v31  ;;  %v5270_v30 = vld [vmem:[#allocation37_spill] sm:$0xff]  ;;  %v5271_v31 = vld [vmem:[#allocation38_spill] sm:$0xff] }
 0x129   : > { %2265 = vmatprep.subr.bf16.mxu0 %v4068_v32  ;;  %2308 = vmatprep.subr.bf16.mxu1 %v4073_v33  ;;  %v5272_v32 = vld [vmem:[#allocation39_spill] sm:$0xff]  ;;  %v5273_v33 = vld [vmem:[#allocation40_spill] sm:$0xff] }
 0x12c   : > { %2266 = vmatpush1.bf16.msra.mxu0 %v4078_v34  ;;  %2309 = vmatpush1.bf16.msra.mxu1 %v4085_v35  ;;  %v5274_v34 = vld [vmem:[#allocation41_spill] sm:$0xff]  ;;  %v5275_v35 = vld [vmem:[#allocation42_spill] sm:$0xff] }
 0x12d   : > { %2345 = vmatprep.subr.bf16.mxu0 %v4092_v37  ;;  %2388 = vmatprep.subr.bf16.mxu1 %v4097_v38  ;;  %v5276_v37 = vld [vmem:[#allocation43_spill] sm:$0xff]  ;;  %v5277_v38 = vld [vmem:[#allocation44_spill] sm:$0xff] }
 0x12f   : > { %2284 = vmatmul.mubr.bf16.vlgmr.msra.gmra.mrb[8].mxu0 %v4894_v48  ;;  %2327 = vmatmul.mubr.bf16.vlgmr.msra.gmra.mrb[8].mxu1 %v4894_v48 }
 0x130   : > { %2346 = vmatpush1.bf16.msra.mxu0 %v5235_v49  ;;  %2389 = vmatpush1.bf16.msra.mxu1 %v5236_v50  ;;  %v5285_v49 = vld [vmem:[#allocation52_spill] sm:$0xff]  ;;  %v5286_v50 = vld [vmem:[#allocation53_spill] sm:$0xff] }
 0x131   : > { %2347 = vmatprep.subr.bf16.mxu0 %v5237_v51  ;;  %2390 = vmatprep.subr.bf16.mxu1 %v5238_v52  ;;  %v5287_v51 = vld [vmem:[#allocation54_spill] sm:$0xff]  ;;  %v5288_v52 = vld [vmem:[#allocation55_spill] sm:$0xff] }
 0x132   : > { %2377 = vmatprep.mubr.bf16.mxu0 %v5152_v41  ;;  %2420 = vmatprep.mubr.bf16.mxu1 %v5152_v41 }
 0x134   : > { %2348 = vmatpush1.bf16.msra.mxu0 %v5239_v53  ;;  %2391 = vmatpush1.bf16.msra.mxu1 %v5240_v54  ;;  %v5289_v53 = vld [vmem:[#allocation56_spill] sm:$0xff]  ;;  %v5290_v54 = vld [vmem:[#allocation57_spill] sm:$0xff] }
 0x135   : > { %2349 = vmatprep.subr.bf16.mxu0 %v5241_v55  ;;  %2392 = vmatprep.subr.bf16.mxu1 %v5242_v56  ;;  %v5291_v55 = vld [vmem:[#allocation58_spill] sm:$0xff]  ;;  %v5292_v56 = vld [vmem:[#allocation59_spill] sm:$0xff] }
 0x138   : > { %2350 = vmatpush1.bf16.msra.mxu0 %v5243_v57  ;;  %2393 = vmatpush1.bf16.msra.mxu1 %v5244_v58  ;;  %v5293_v57 = vld [vmem:[#allocation60_spill] sm:$0xff]  ;;  %v5294_v58 = vld [vmem:[#allocation61_spill] sm:$0xff] }
 0x139   : > { %2351 = vmatprep.subr.bf16.mxu0 %v5245_v59  ;;  %2394 = vmatprep.subr.bf16.mxu1 %v5246_v60  ;;  %v5295_v59 = vld [vmem:[#allocation62_spill] sm:$0xff]  ;;  %v5296_v60 = vld [vmem:[#allocation63_spill] sm:$0xff] }
 0x13c   : > { %2352 = vmatpush1.bf16.msra.mxu0 %v5247_v61  ;;  %2395 = vmatpush1.bf16.msra.mxu1 %v5248_v62  ;;  %v5297_v61 = vld [vmem:[#allocation64_spill] sm:$0xff]  ;;  %v5298_v62 = vld [vmem:[#allocation65_spill] sm:$0xff] }
 0x13d   : > { %2353 = vmatprep.subr.bf16.mxu0 %v5249_v63  ;;  %2396 = vmatprep.subr.bf16.mxu1 %v5250_v0  ;;  %v5299_v63 = vld [vmem:[#allocation66_spill] sm:$0xff]  ;;  %v5300_v0 = vld [vmem:[#allocation67_spill] sm:$0xff] }
 0x140   : > { %2354 = vmatpush1.bf16.msra.mxu0 %v5251_v1  ;;  %2397 = vmatpush1.bf16.msra.mxu1 %v5252_v3  ;;  %v5302_v1 = vld [vmem:[#allocation69_spill] sm:$0xff]  ;;  %v5303_v3 = vld [vmem:[#allocation70_spill] sm:$0xff] }
 0x141   : > { %2355 = vmatprep.subr.bf16.mxu0 %v5253_v4  ;;  %2398 = vmatprep.subr.bf16.mxu1 %v5254_v6  ;;  %v5306_v4 = vld [vmem:[#allocation73_spill] sm:$0xff]  ;;  %v5307_v6 = vld [vmem:[#allocation74_spill] sm:$0xff] }
 0x142   : > { %v4924_v7 = vpop.f32.mrb[0].mxu0  ;;  %v4926_v8 = vpop.f32.mrb[0].mxu1 }
 0x143   : > { %v4928_v9 = vpop.f32.mrb[1].mxu0  ;;  %v4930_v10 = vpop.f32.mrb[1].mxu1 }
 0x144   : > { %v4932_v11 = vpop.f32.mrb[2].mxu0  ;;  %v4934_v12 = vpop.f32.mrb[2].mxu1  ;;  %2356 = vmatpush1.bf16.msra.mxu0 %v5255_v13  ;;  %2399 = vmatpush1.bf16.msra.mxu1 %v5256_v14  ;;  %v5308_v13 = vld [vmem:[#allocation75_spill] sm:$0xff]  ;;  %v5309_v14 = vld [vmem:[#allocation76_spill] sm:$0xff] }
 0x145   : > { %v4938_v15 = vpop.f32.mrb[3].mxu0  ;;  %v4940_v16 = vpop.f32.mrb[3].mxu1  ;;  %2357 = vmatprep.subr.bf16.mxu0 %v5257_v17  ;;  %2400 = vmatprep.subr.bf16.mxu1 %v5258_v18  ;;  %v5311_v17 = vld [vmem:[#allocation78_spill] sm:$0xff]  ;;  %v5312_v18 = vld [vmem:[#allocation79_spill] sm:$0xff] }
 0x148   : > { %2358 = vmatpush1.bf16.msra.mxu0 %v5259_v19  ;;  %2401 = vmatpush1.bf16.msra.mxu1 %v5260_v20  ;;  %v5313_v19 = vld [vmem:[#allocation80_spill] sm:$0xff]  ;;  %v5314_v20 = vld [vmem:[#allocation81_spill] sm:$0xff] }
 0x149   : > { %2359 = vmatprep.subr.bf16.mxu0 %v5261_v21  ;;  %2402 = vmatprep.subr.bf16.mxu1 %v5262_v22  ;;  %v5315_v21 = vld [vmem:[#allocation82_spill] sm:$0xff]  ;;  %v5316_v22 = vld [vmem:[#allocation83_spill] sm:$0xff] }
 0x14c   : > { %2360 = vmatpush1.bf16.msra.mxu0 %v5263_v23  ;;  %2403 = vmatpush1.bf16.msra.mxu1 %v4288_v43  ;;  %v5279_v43 = vld [vmem:[#allocation46_spill] sm:$0xff]  ;;  %v5317_v23 = vld [vmem:[#allocation84_spill] sm:$0xff] }
 0x14d   : > { %2431 = vmatprep.subr.bf16.mxu0 %v5264_v24  ;;  %2474 = vmatprep.subr.bf16.mxu1 %v5265_v25  ;;  %v5318_v24 = vld [vmem:[#allocation85_spill] sm:$0xff]  ;;  %v5319_v25 = vld [vmem:[#allocation86_spill] sm:$0xff] }
 0x14f   : > { %2378 = vmatmul.mubr.bf16.vlgmr.msra.gmra.mrb[12].mxu0 %v4104_v39  ;;  %2421 = vmatmul.mubr.bf16.vlgmr.msra.gmra.mrb[12].mxu1 %v4104_v39  ;;  %v5278_v39 = vld [vmem:[#allocation45_spill] sm:$0xff] }
 0x150   : > { %2432 = vmatpush1.bf16.msra.mxu0 %v5266_v26  ;;  %2475 = vmatpush1.bf16.msra.mxu1 %v5267_v27  ;;  %v5320_v26 = vld [vmem:[#allocation87_spill] sm:$0xff]  ;;  %v5321_v27 = vld [vmem:[#allocation88_spill] sm:$0xff] }
 0x151   : > { %2433 = vmatprep.subr.bf16.mxu0 %v5268_v28  ;;  %2476 = vmatprep.subr.bf16.mxu1 %v5269_v29  ;;  %v5322_v28 = vld [vmem:[#allocation89_spill] sm:$0xff]  ;;  %v5323_v29 = vld [vmem:[#allocation90_spill] sm:$0xff] }
 0x152   : > { %2463 = vmatprep.mubr.bf16.mxu0 %v5152_v41  ;;  %2506 = vmatprep.mubr.bf16.mxu1 %v5152_v41 }
 0x154   : > { %2434 = vmatpush1.bf16.msra.mxu0 %v5270_v30  ;;  %2477 = vmatpush1.bf16.msra.mxu1 %v5271_v31  ;;  %v5324_v30 = vld [vmem:[#allocation91_spill] sm:$0xff] }
 0x155   : > { %2435 = vmatprep.subr.bf16.mxu0 %v5272_v32  ;;  %2478 = vmatprep.subr.bf16.mxu1 %v5273_v33 }
 0x158   : > { %2436 = vmatpush1.bf16.msra.mxu0 %v5274_v34  ;;  %2479 = vmatpush1.bf16.msra.mxu1 %v5275_v35 }
 0x159   : > { %2437 = vmatprep.subr.bf16.mxu0 %v5276_v37  ;;  %2480 = vmatprep.subr.bf16.mxu1 %v5277_v38 }
 0x15c   : > { %2438 = vmatpush1.bf16.msra.mxu0 %v5278_v39  ;;  %2481 = vmatpush1.bf16.msra.mxu1 %v5279_v43 }
 0x15d   : > { %2439 = vmatprep.subr.bf16.mxu0 %v5280_v45  ;;  %2482 = vmatprep.subr.bf16.mxu1 %v5281_v44 }
 0x160   : > { %2440 = vmatpush1.bf16.msra.mxu0 %v5282_v2  ;;  %2483 = vmatpush1.bf16.msra.mxu1 %v5283_v40 }
 0x161   : > { %2441 = vmatprep.subr.bf16.mxu0 %v5284_v5  ;;  %2484 = vmatprep.subr.bf16.mxu1 %v5285_v49 }
 0x164   : > { %2442 = vmatpush1.bf16.msra.mxu0 %v5286_v50  ;;  %2485 = vmatpush1.bf16.msra.mxu1 %v5287_v51 }
 0x165   : > { %2443 = vmatprep.subr.bf16.mxu0 %v5288_v52  ;;  %2486 = vmatprep.subr.bf16.mxu1 %v5289_v53  ;;  %v2629_v53 = vlaneseq }
 0x168   : > { %2444 = vmatpush1.bf16.msra.mxu0 %v5290_v54  ;;  %2487 = vmatpush1.bf16.msra.mxu1 %v5291_v55  ;;  %v2630_v54 = vshrl.u32 %v2629_v53, 7 }
 0x169   : > { %2445 = vmatprep.subr.bf16.mxu0 %v5292_v56  ;;  %2488 = vmatprep.subr.bf16.mxu1 %v5293_v57 }
 0x16a   : > { %v2631_v55 = vsub.s32 0, %v2630_v54  ;;  %v2635_v56 = vsub.s32 1, %v2630_v54 }
 0x16c   : > { %2446 = vmatpush1.bf16.msra.mxu0 %v5294_v58  ;;  %2489 = vmatpush1.bf16.msra.mxu1 %v5295_v59 }
 0x16d   : > { %2517 = vmatprep.subr.bf16.mxu0 %v4491_v36  ;;  %2560 = vmatprep.subr.bf16.mxu1 %v5296_v60  ;;  %v5301_v36 = vld [vmem:[#allocation68_spill] sm:$0xff] }
 0x16f   : > { %2464 = vmatmul.mubr.bf16.vlgmr.msra.gmra.mrb[12].mxu0 %v4855_v47  ;;  %2507 = vmatmul.mubr.bf16.vlgmr.msra.gmra.mrb[12].mxu1 %v4855_v47  ;;  %v5304_v47 = vld [vmem:[#allocation71_spill] sm:$0xff] }
 0x170   : > { %2518 = vmatpush1.bf16.msra.mxu0 %v4503_v42  ;;  %2561 = vmatpush1.bf16.msra.mxu1 %v5297_v61  ;;  %v5305_v42 = vld [vmem:[#allocation72_spill] sm:$0xff] }
 0x171   : > { %2519 = vmatprep.subr.bf16.mxu0 %v5298_v62  ;;  %2562 = vmatprep.subr.bf16.mxu1 %v5299_v63 }
 0x172   : > { %2549 = vmatprep.mubr.bf16.mxu0 %v5152_v41  ;;  %2592 = vmatprep.mubr.bf16.mxu1 %v5152_v41  ;;  %v5310_v41 = vld [vmem:[#allocation77_spill] sm:$0xff] }
 0x174   : > { %2520 = vmatpush1.bf16.msra.mxu0 %v5300_v0  ;;  %2563 = vmatpush1.bf16.msra.mxu1 %v5301_v36 }
 0x175   : > { %2521 = vmatprep.subr.bf16.mxu0 %v5302_v1  ;;  %2564 = vmatprep.subr.bf16.mxu1 %v5303_v3 }
 0x178   : > { %2522 = vmatpush1.bf16.msra.mxu0 %v5304_v47  ;;  %2565 = vmatpush1.bf16.msra.mxu1 %v5305_v42 }
 0x179   : > { %2523 = vmatprep.subr.bf16.mxu0 %v5306_v4  ;;  %2566 = vmatprep.subr.bf16.mxu1 %v5307_v6 }
 0x17c   : > { %2524 = vmatpush1.bf16.msra.mxu0 %v5308_v13  ;;  %2567 = vmatpush1.bf16.msra.mxu1 %v5309_v14 }
 0x17d   : > { %2525 = vmatprep.subr.bf16.mxu0 %v5310_v41  ;;  %2568 = vmatprep.subr.bf16.mxu1 %v5311_v17 }
 0x180   : > { %2526 = vmatpush1.bf16.msra.mxu0 %v5312_v18  ;;  %2569 = vmatpush1.bf16.msra.mxu1 %v5313_v19 }
 0x181   : > { %2527 = vmatprep.subr.bf16.mxu0 %v5314_v20  ;;  %2570 = vmatprep.subr.bf16.mxu1 %v5315_v21 }
 0x184   : > { %2528 = vmatpush1.bf16.msra.mxu0 %v5316_v22  ;;  %2571 = vmatpush1.bf16.msra.mxu1 %v5317_v23 }
 0x185   : > { %2529 = vmatprep.subr.bf16.mxu0 %v5318_v24  ;;  %2572 = vmatprep.subr.bf16.mxu1 %v5319_v25 }
 0x188   : > { %2530 = vmatpush1.bf16.msra.mxu0 %v5320_v26  ;;  %2573 = vmatpush1.bf16.msra.mxu1 %v5321_v27 }
 0x189   : > { %2531 = vmatprep.subr.bf16.mxu0 %v4667_v46  ;;  %2574 = vmatprep.subr.bf16.mxu1 %v5322_v28 }
 0x18c   : > { %2532 = vmatpush1.bf16.msra.mxu0 %v5323_v29  ;;  %2575 = vmatpush1.bf16.msra.mxu1 %v5324_v30 }
 0x18f   : > { %2550 = vmatmul.mubr.bf16.vlgmr.msra.gmra.mrb[12].mxu0 %v4894_v48  ;;  %2593 = vmatmul.mubr.bf16.vlgmr.msra.gmra.mrb[12].mxu1 %v4894_v48 }
 0x1a2   : > { %v2005_v31 = vpop.f32.mrb[4].mxu0  ;;  %v2048_v32 = vpop.f32.mrb[4].mxu1 }
 0x1a3   : > { %v2065_v33 = vmax.f32 %v4924_v7, %v2005_v31  ;;  %v2067_v34 = vmax.f32 %v4926_v8, %v2048_v32  ;;  %v2007_v35 = vpop.f32.mrb[5].mxu0  ;;  %v2050_v37 = vpop.f32.mrb[5].mxu1 }
 0x1a4   : > { %v2066_v46 = vmax.f32 %v4928_v9, %v2007_v35  ;;  %v2068_v38 = vmax.f32 %v4930_v10, %v2050_v37  ;;  %v2009_v39 = vpop.f32.mrb[6].mxu0  ;;  %v2052_v43 = vpop.f32.mrb[6].mxu1 }
 0x1a5   : > { %v2069_v45 = vmax.f32 %v4932_v11, %v2009_v39  ;;  %v2071_v44 = vmax.f32 %v4934_v12, %v2052_v43  ;;  %v2011_v2 = vpop.f32.mrb[7].mxu0  ;;  %v2054_v48 = vpop.f32.mrb[7].mxu1  ;;  %v2639_v11 = vsub.s32 2, %v2630_v54  ;;  %v2627_v12 = vld [vmem:[%s5050_s6] sm:$0xf] }
 0x1a6   : > { %v2070_v40 = vmax.f32 %v4938_v15, %v2011_v2  ;;  %v2072_v7 = vmax.f32 %v4940_v16, %v2054_v48  ;;  %v2643_v15 = vsub.s32 3, %v2630_v54  ;;  %v2632_v16 = vrot.slane %v2627_v12, %v2631_v55 }
 0x1a7   : > { %v2640_v59 = vrot.slane %v2627_v12, %v2639_v11  ;;  %v2636_v63 = vrot.slane %v2627_v12, %v2635_v56 }
 0x1a8   : > { %v2644_v36 = vrot.slane %v2627_v12, %v2643_v15 }
 0x202   : > { %v2285_v5 = vpop.f32.mrb[8].mxu0  ;;  %v2328_v8 = vpop.f32.mrb[8].mxu1 }
 0x203   : > { %v2287_v49 = vpop.f32.mrb[9].mxu0  ;;  %v2330_v50 = vpop.f32.mrb[9].mxu1 }
 0x204   : > { %v2289_v51 = vpop.f32.mrb[10].mxu0  ;;  %v2332_v9 = vpop.f32.mrb[10].mxu1 }
 0x205   : > { %v2291_v52 = vpop.f32.mrb[11].mxu0  ;;  %v2334_v10 = vpop.f32.mrb[11].mxu1 }
 0x262   : > { %v2551_v57 = vpop.f32.mrb[12].mxu0  ;;  %v2594_v58 = vpop.f32.mrb[12].mxu1 }
 0x263   : > { %v2611_v60 = vmax.f32 %v2285_v5, %v2551_v57  ;;  %v2613_v61 = vmax.f32 %v2328_v8, %v2594_v58  ;;  %v2553_v62 = vpop.f32.mrb[13].mxu0  ;;  %v2596_v0 = vpop.f32.mrb[13].mxu1 }
 0x264   : > { %v2612_v1 = vmax.f32 %v2287_v49, %v2553_v62  ;;  %v2614_v3 = vmax.f32 %v2330_v50, %v2596_v0  ;;  %v2555_v47 = vpop.f32.mrb[14].mxu0  ;;  %v2598_v42 = vpop.f32.mrb[14].mxu1 }
 0x265   : > { %v2619_v4 = vmax.f32 %v2065_v33, %v2611_v60  ;;  %v2621_v6 = vmax.f32 %v2067_v34, %v2613_v61  ;;  %v2615_v13 = vmax.f32 %v2289_v51, %v2555_v47  ;;  %v2617_v14 = vmax.f32 %v2332_v9, %v2598_v42  ;;  %v2557_v41 = vpop.f32.mrb[15].mxu0  ;;  %v2600_v17 = vpop.f32.mrb[15].mxu1 }
 0x266   : > { %v2620_v18 = vmax.f32 %v2066_v46, %v2612_v1  ;;  %v2622_v19 = vmax.f32 %v2068_v38, %v2614_v3  ;;  %v2616_v20 = vmax.f32 %v2291_v52, %v2557_v41  ;;  %v2618_v21 = vmax.f32 %v2334_v10, %v2600_v17 }
 0x267   : > { %v2649_v22 = vadd.f32 %v2632_v16, %v2619_v4  ;;  %v2651_v23 = vadd.f32 %v2640_v59, %v2621_v6  ;;  %v2623_v24 = vmax.f32 %v2069_v45, %v2615_v13  ;;  %v2625_v25 = vmax.f32 %v2071_v44, %v2617_v14 }
 0x268   : > { %v2650_v26 = vadd.f32 %v2636_v63, %v2620_v18  ;;  %v2652_v27 = vadd.f32 %v2644_v36, %v2622_v19  ;;  %v2624_v28 = vmax.f32 %v2070_v40, %v2616_v20  ;;  %v2626_v29 = vmax.f32 %v2072_v7, %v2618_v21 }
 0x269   : > { %v2657_v30 = vmax.f32 %v2649_v22, 0.0  ;;  %v2659_v31 = vmax.f32 %v2651_v23, 0.0  ;;  %v2653_v32 = vadd.f32 %v2632_v16, %v2623_v24  ;;  %v2655_v33 = vadd.f32 %v2640_v59, %v2625_v25 }
 0x26a   : > { %v2658_v34 = vmax.f32 %v2650_v26, 0.0  ;;  %v2660_v35 = vmax.f32 %v2652_v27, 0.0  ;;  %v2654_v37 = vadd.f32 %v2636_v63, %v2624_v28  ;;  %v2656_v46 = vadd.f32 %v2644_v36, %v2626_v29 }
 0x26b   : > { %v2661_v38 = vmax.f32 %v2653_v32, 0.0  ;;  %v2663_v39 = vmax.f32 %v2655_v33, 0.0 }
 0x26c   : > { %v3137_v43 = vpack.c.bf16 %v2658_v34, %v2657_v30  ;;  %v3138_v45 = vpack.c.bf16 %v2660_v35, %v2659_v31  ;;  %v2662_v44 = vmax.f32 %v2654_v37, 0.0  ;;  %v2664_v2 = vmax.f32 %v2656_v46, 0.0 }
 0x26e   : > { %2689 = vst [vmem:[%s348_s11] sm:$0xff] %v3137_v43  ;;  %2693 = vst.msk [vmem:[%s348_s11 + $0x8] sm:$0xff] %vm2692_vm2, %v3138_v45  ;;  %v3139_v48 = vpack.c.bf16 %v2662_v44, %v2661_v38  ;;  %v3140_v40 = vpack.c.bf16 %v2664_v2, %v2663_v39 }
 0x270   : > { %2694 = vst [vmem:[%s348_s11 + $0x10] sm:$0xff] %v3139_v48  ;;  %2695 = vst.msk [vmem:[%s348_s11 + $0x18] sm:$0xff] %vm2692_vm2, %v3140_v40 }
 0x271 PF: > { %s17_s24 = sadd.s32 1, %s3558_s24  }
 0x272   : > { %p14_p4 = scmp.ge.s32.totalorder %s17_s24, 4  }
 0x274   :  { %16 = sbr.rel (!%p14_p4) target bundleno = 1 (0x1), region = 91 }

// kernel: a_call__.5
= control target key start
LH: loop header
LB: loop body
LE: loop exit
PB: predicated region body
PF: predicated region fallthrough
CT: control target
= control target key end

     0   :  { %vm3129_vm0 = vmmov 0   ;;  %vm1696_vm1 = vcmask 523264   ;;  %vm2333_vm2 = vcmask 80896   ;;  %s3837_s1 = inlined_call_operand.vmem [shape: bf16[3136,128], index: 1, kind: input, shape index: {}]   ;;  %s3838_s0 = inlined_call_operand.vmem [shape: bf16[8,3136], index: 0, kind: input, shape index: {}]   ;;  %s3839_s2 = inlined_call_operand.vmem [shape: f32[1,128], index: 2, kind: input, shape index: {}]   ;;  %s3840_s3 = inlined_call_operand.vmem [shape: bf16[128,10], index: 3, kind: input, shape index: {}]   ;;  %s3841_s4 = inlined_call_operand.vmem [shape: f32[1,10], index: 4, kind: input, shape index: {}]   ;;  %s3842_s5 = inlined_call_operand.vmem [shape: f32[8,10], index: 5, kind: output, shape index: {}]  }
   0x1   :  { %v2895_v0 = vld [vmem:[%s3837_s1 + $0x40] sm:$0xff]   ;;  %v2899_v4 = vld [vmem:[%s3837_s1 + $0x48] sm:$0xff]   ;;  %v2903_v8 = vld [vmem:[%s3837_s1 + $0x50] sm:$0xff]  }
   0x2   :  { %v2896_v1 = vld [vmem:[%s3837_s1] sm:$0xff]   ;;  %2583 = vmatprep.subr.bf16.mxu0 %v2895_v0  ;;  %v2900_v5 = vld [vmem:[%s3837_s1 + $0x8] sm:$0xff]   ;;  %v2904_v9 = vld [vmem:[%s3837_s1 + $0x10] sm:$0xff]  }
   0x3   :  { %v2897_v2 = vld [vmem:[%s3837_s1 + $0xc0] sm:$0xff]   ;;  %2584 = vmatpush3.bf16.msra.mxu0 %v2896_v1  ;;  %v2901_v6 = vld [vmem:[%s3837_s1 + $0xc8] sm:$0xff]   ;;  %v2905_v10 = vld [vmem:[%s3837_s1 + $0xd0] sm:$0xff]  }
   0x4   :  { %v2898_v3 = vld [vmem:[%s3837_s1 + $0x80] sm:$0xff]   ;;  %2605 = vmatprep.subr.bf16.mxu1 %v2897_v2  ;;  %2585 = vmatprep.subr.bf16.mxu0 %v2899_v4  ;;  %v2902_v7 = vld [vmem:[%s3837_s1 + $0x88] sm:$0xff]   ;;  %v2906_v11 = vld [vmem:[%s3837_s1 + $0x90] sm:$0xff]  }
   0x5   :  { %2606 = vmatpush3.bf16.msra.mxu1 %v2898_v3  ;;  %v2907_v12 = vld [vmem:[%s3837_s1 + $0x58] sm:$0xff]   ;;  %v2911_v16 = vld [vmem:[%s3837_s1 + $0x60] sm:$0xff]   ;;  %v2915_v20 = vld [vmem:[%s3837_s1 + $0x68] sm:$0xff]  }
   0x6   :  { %2607 = vmatprep.subr.bf16.mxu1 %v2901_v6  ;;  %v2908_v13 = vld [vmem:[%s3837_s1 + $0x18] sm:$0xff]   ;;  %v2912_v17 = vld [vmem:[%s3837_s1 + $0x20] sm:$0xff]   ;;  %v2916_v21 = vld [vmem:[%s3837_s1 + $0x28] sm:$0xff]  }
   0x7   :  { %2586 = vmatpush3.bf16.msra.mxu0 %v2900_v5  ;;  %v2909_v14 = vld [vmem:[%s3837_s1 + $0xd8] sm:$0xff]   ;;  %v2913_v18 = vld [vmem:[%s3837_s1 + $0xe0] sm:$0xff]   ;;  %v2917_v22 = vld [vmem:[%s3837_s1 + $0xe8] sm:$0xff]  }
   0x8   :  { %2587 = vmatprep.subr.bf16.mxu0 %v2903_v8  ;;  %v2910_v15 = vld [vmem:[%s3837_s1 + $0x98] sm:$0xff]   ;;  %v2914_v19 = vld [vmem:[%s3837_s1 + $0xa0] sm:$0xff]   ;;  %v2918_v23 = vld [vmem:[%s3837_s1 + $0xa8] sm:$0xff]  }
   0x9   :  { %2608 = vmatpush3.bf16.msra.mxu1 %v2902_v7  ;;  %v2919_v24 = vld [vmem:[%s3837_s1 + $0x70] sm:$0xff]   ;;  %v2923_v28 = vld [vmem:[%s3837_s1 + $0x78] sm:$0xff]   ;;  %v21_v31 = vld [vmem:[%s3838_s0] sm:$0xff] }
   0xa   :  { %2609 = vmatprep.subr.bf16.mxu1 %v2905_v10  ;;  %v2920_v25 = vld [vmem:[%s3837_s1 + $0x30] sm:$0xff]   ;;  %v2924_v29 = vld [vmem:[%s3837_s1 + $0x38] sm:$0xff]   ;;  %v2352_v32 = vcombine.low %v21_v31, %v21_v31  ;;  %v2353_v33 = vcombine.high %v21_v31, %v21_v31  ;;  %v2929_v35 = vld [vmem:[%s3837_s1 + $0x140] sm:$0xff]  }
   0xb   :  { %2588 = vmatpush3.bf16.msra.mxu0 %v2904_v9  ;;  %v2921_v26 = vld [vmem:[%s3837_s1 + $0xf0] sm:$0xff]   ;;  %v2925_v30 = vld [vmem:[%s3837_s1 + $0xf8] sm:$0xff]   ;;  %v22_v36 = vld [vmem:[%s3838_s0 + $0x8] sm:$0xff] }
   0xc   :  { %2589 = vmatprep.subr.bf16.mxu0 %v2907_v12  ;;  %v2922_v27 = vld [vmem:[%s3837_s1 + $0xb0] sm:$0xff]   ;;  %v2928_v34 = vld [vmem:[%s3837_s1 + $0xb8] sm:$0xff]   ;;  %1732 = vmatprep.mubr.bf16.mxu0 %v2353_v33  ;;  %v2354_v37 = vcombine.low %v22_v36, %v22_v36  ;;  %v2355_v38 = vcombine.high %v22_v36, %v22_v36  ;;  %v2932_v39 = vld [vmem:[%s3837_s1 + $0x100] sm:$0xff]  }
   0xd   :  { %2610 = vmatpush3.bf16.msra.mxu1 %v2906_v11  ;;  %v2933_v40 = vld [vmem:[%s3837_s1 + $0x1c0] sm:$0xff]   ;;  %v2935_v42 = vld [vmem:[%s3837_s1 + $0x148] sm:$0xff]   ;;  %v2939_v46 = vld [vmem:[%s3837_s1 + $0x150] sm:$0xff]  }
   0xe   :  { %2611 = vmatprep.subr.bf16.mxu1 %v2909_v14  ;;  %1772 = vmatprep.mubr.bf16.mxu1 %v2355_v38  ;;  %v2934_v41 = vld [vmem:[%s3837_s1 + $0x180] sm:$0xff]   ;;  %v2936_v43 = vld [vmem:[%s3837_s1 + $0x108] sm:$0xff]   ;;  %v2940_v47 = vld [vmem:[%s3837_s1 + $0x110] sm:$0xff]  }
   0xf   :  { %2590 = vmatpush3.bf16.msra.mxu0 %v2908_v13  ;;  %v2937_v44 = vld [vmem:[%s3837_s1 + $0x1c8] sm:$0xff]   ;;  %v2941_v48 = vld [vmem:[%s3837_s1 + $0x1d0] sm:$0xff]   ;;  %v2943_v50 = vld [vmem:[%s3837_s1 + $0x158] sm:$0xff]  }
  0x10   :  { %2591 = vmatprep.subr.bf16.mxu0 %v2911_v16  ;;  %v2938_v45 = vld [vmem:[%s3837_s1 + $0x188] sm:$0xff]   ;;  %v2942_v49 = vld [vmem:[%s3837_s1 + $0x190] sm:$0xff]   ;;  %v2944_v51 = vld [vmem:[%s3837_s1 + $0x118] sm:$0xff]  }
  0x11   :  { %2612 = vmatpush3.bf16.msra.mxu1 %v2910_v15  ;;  %v2945_v52 = vld [vmem:[%s3837_s1 + $0x1d8] sm:$0xff]   ;;  %v2947_v54 = vld [vmem:[%s3837_s1 + $0x160] sm:$0xff]   ;;  %v2951_v58 = vld [vmem:[%s3837_s1 + $0x168] sm:$0xff]  }
  0x12   :  { %2613 = vmatprep.subr.bf16.mxu1 %v2913_v18  ;;  %v2946_v53 = vld [vmem:[%s3837_s1 + $0x198] sm:$0xff]   ;;  %v2948_v55 = vld [vmem:[%s3837_s1 + $0x120] sm:$0xff]   ;;  %v2952_v59 = vld [vmem:[%s3837_s1 + $0x128] sm:$0xff]  }
  0x13   :  { %2592 = vmatpush3.bf16.msra.mxu0 %v2912_v17  ;;  %v2949_v56 = vld [vmem:[%s3837_s1 + $0x1e0] sm:$0xff]   ;;  %v2953_v60 = vld [vmem:[%s3837_s1 + $0x1e8] sm:$0xff]   ;;  %v2955_v62 = vld [vmem:[%s3837_s1 + $0x170] sm:$0xff]  }
  0x14   :  { %2593 = vmatprep.subr.bf16.mxu0 %v2915_v20  ;;  %v2950_v57 = vld [vmem:[%s3837_s1 + $0x1a0] sm:$0xff]   ;;  %v2954_v61 = vld [vmem:[%s3837_s1 + $0x1a8] sm:$0xff]   ;;  %v2956_v63 = vld [vmem:[%s3837_s1 + $0x130] sm:$0xff]  }
  0x15   :  { %2614 = vmatpush3.bf16.msra.mxu1 %v2914_v19  ;;  %v2957_v0 = vld [vmem:[%s3837_s1 + $0x1f0] sm:$0xff]   ;;  %v2959_v2 = vld [vmem:[%s3837_s1 + $0x178] sm:$0xff]   ;;  %v2965_v9 = vld [vmem:[%s3837_s1 + $0x240] sm:$0xff]  }
  0x16   :  { %2615 = vmatprep.subr.bf16.mxu1 %v2917_v22  ;;  %v2958_v1 = vld [vmem:[%s3837_s1 + $0x1b0] sm:$0xff]   ;;  %v2960_v3 = vld [vmem:[%s3837_s1 + $0x138] sm:$0xff]   ;;  %v2968_v13 = vld [vmem:[%s3837_s1 + $0x200] sm:$0xff]  }
  0x17   :  { %2594 = vmatpush3.bf16.msra.mxu0 %v2916_v21  ;;  %v2961_v4 = vld [vmem:[%s3837_s1 + $0x1f8] sm:$0xff]   ;;  %v23_v5 = vld [vmem:[%s3838_s0 + $0x10] sm:$0xff]  ;;  %v2969_v14 = vld [vmem:[%s3837_s1 + $0x2c0] sm:$0xff]  }
  0x18   :  { %2595 = vmatprep.subr.bf16.mxu0 %v2919_v24  ;;  %v2356_v6 = vcombine.low %v23_v5, %v23_v5  ;;  %v2357_v7 = vcombine.high %v23_v5, %v23_v5  ;;  %v2964_v8 = vld [vmem:[%s3837_s1 + $0x1b8] sm:$0xff]   ;;  %v2970_v15 = vld [vmem:[%s3837_s1 + $0x280] sm:$0xff]   ;;  %v2971_v16 = vld [vmem:[%s3837_s1 + $0x248] sm:$0xff]  }
  0x19   :  { %2616 = vmatpush3.bf16.msra.mxu1 %v2918_v23  ;;  %v24_v10 = vld [vmem:[%s3838_s0 + $0x18] sm:$0xff]  ;;  %v2972_v17 = vld [vmem:[%s3837_s1 + $0x208] sm:$0xff]   ;;  %v2975_v20 = vld [vmem:[%s3837_s1 + $0x250] sm:$0xff]  }
  0x1a   :  { %2617 = vmatprep.subr.bf16.mxu1 %v2921_v26  ;;  %v2358_v11 = vcombine.low %v24_v10, %v24_v10  ;;  %v2359_v12 = vcombine.high %v24_v10, %v24_v10  ;;  %v2973_v18 = vld [vmem:[%s3837_s1 + $0x2c8] sm:$0xff]   ;;  %v2976_v21 = vld [vmem:[%s3837_s1 + $0x210] sm:$0xff]   ;;  %v2979_v24 = vld [vmem:[%s3837_s1 + $0x258] sm:$0xff]  }
  0x1b   :  { %2596 = vmatpush3.bf16.msra.mxu0 %v2920_v25  ;;  %v2974_v19 = vld [vmem:[%s3837_s1 + $0x288] sm:$0xff]   ;;  %v2977_v22 = vld [vmem:[%s3837_s1 + $0x2d0] sm:$0xff]   ;;  %v2980_v25 = vld [vmem:[%s3837_s1 + $0x218] sm:$0xff]  }
  0x1c   :  { %2597 = vmatprep.subr.bf16.mxu0 %v2923_v28  ;;  %v2978_v23 = vld [vmem:[%s3837_s1 + $0x290] sm:$0xff]   ;;  %v2981_v26 = vld [vmem:[%s3837_s1 + $0x2d8] sm:$0xff]   ;;  %v2983_v28 = vld [vmem:[%s3837_s1 + $0x260] sm:$0xff]  }
  0x1d   :  { %2618 = vmatpush3.bf16.msra.mxu1 %v2922_v27  ;;  %v2982_v27 = vld [vmem:[%s3837_s1 + $0x298] sm:$0xff]   ;;  %v2986_v31 = vld [vmem:[%s3837_s1 + $0x2a0] sm:$0xff]   ;;  %v2988_v33 = vld [vmem:[%s3837_s1 + $0x228] sm:$0xff]  }
  0x1e   :  { %2619 = vmatprep.subr.bf16.mxu1 %v2925_v30  ;;  %v2985_v30 = vld [vmem:[%s3837_s1 + $0x2e0] sm:$0xff]   ;;  %v2991_v36 = vld [vmem:[%s3837_s1 + $0x270] sm:$0xff]  }
  0x1f   :  { %2598 = vmatpush3.bf16.msra.mxu0 %v2924_v29  ;;  %v2984_v29 = vld [vmem:[%s3837_s1 + $0x220] sm:$0xff]   ;;  %v2993_v38 = vld [vmem:[%s3837_s1 + $0x2f0] sm:$0xff]  }
  0x20   :  { %2627 = vmatprep.subr.bf16.mxu0 %v2929_v35  ;;  %v2990_v35 = vld [vmem:[%s3837_s1 + $0x2a8] sm:$0xff]   ;;  %v3022_v5 = vld [vmem:[%s3837_s1 + $0x3a0] sm:$0xff]   ;;  %v3027_v10 = vld [vmem:[%s3837_s1 + $0x370] sm:$0xff]  }
  0x21   :  { %2620 = vmatpush3.bf16.msra.mxu1 %v2928_v34  ;;  %v2989_v34 = vld [vmem:[%s3837_s1 + $0x2e8] sm:$0xff]  }
  0x22   :  { %1733 = vmatmul.mubr.bf16.vlgmr.msra.gmra.mrb[0].mxu0 %v2352_v32  ;;  %2649 = vmatprep.subr.bf16.mxu1 %v2933_v40  ;;  %v2987_v32 = vld [vmem:[%s3837_s1 + $0x268] sm:$0xff]   ;;  %v2995_v40 = vld [vmem:[%s3837_s1 + $0x278] sm:$0xff]  }
  0x23   :  { %2628 = vmatpush3.bf16.msra.mxu0 %v2932_v39  ;;  %1812 = vmatprep.mubr.bf16.mxu0 %v2357_v7  ;;  %v2994_v39 = vld [vmem:[%s3837_s1 + $0x2b0] sm:$0xff]   ;;  %v3024_v7 = vld [vmem:[%s3837_s1 + $0x328] sm:$0xff]  }
  0x24   :  { %1773 = vmatmul.mubr.bf16.vlgmr.msra.gmra.mrb[0].mxu1 %v2354_v37  ;;  %2629 = vmatprep.subr.bf16.mxu0 %v2935_v42  ;;  %v2992_v37 = vld [vmem:[%s3837_s1 + $0x230] sm:$0xff]   ;;  %v2997_v42 = vld [vmem:[%s3837_s1 + $0x2f8] sm:$0xff]  }
  0x25   :  { %2650 = vmatpush3.bf16.msra.mxu1 %v2934_v41  ;;  %1852 = vmatprep.mubr.bf16.mxu1 %v2359_v12  ;;  %v2996_v41 = vld [vmem:[%s3837_s1 + $0x238] sm:$0xff]   ;;  %v3029_v12 = vld [vmem:[%s3837_s1 + $0x3f0] sm:$0xff]  }
  0x26   :  { %2651 = vmatprep.subr.bf16.mxu1 %v2937_v44 }
  0x27   :  { %2630 = vmatpush3.bf16.msra.mxu0 %v2936_v43  ;;  %v25_v43 = vld [vmem:[%s3838_s0 + $0x20] sm:$0xff] }
  0x28   :  { %2631 = vmatprep.subr.bf16.mxu0 %v2939_v46  ;;  %v2360_v44 = vcombine.low %v25_v43, %v25_v43  ;;  %v3000_v46 = vld [vmem:[%s3837_s1 + $0x2b8] sm:$0xff]  }
  0x29   :  { %2652 = vmatpush3.bf16.msra.mxu1 %v2938_v45  ;;  %v2361_v45 = vcombine.high %v25_v43, %v25_v43  ;;  %v3058_v43 = vld [vmem:[%s3837_s1 + $0x4a0] sm:$0xff]  }
  0x2a   :  { %2653 = vmatprep.subr.bf16.mxu1 %v2941_v48  ;;  %v26_v48 = vld [vmem:[%s3838_s0 + $0x28] sm:$0xff] }
  0x2b   :  { %2632 = vmatpush3.bf16.msra.mxu0 %v2940_v47  ;;  %v3001_v47 = vld [vmem:[%s3837_s1 + $0x340] sm:$0xff]  }
  0x2c   :  { %2633 = vmatprep.subr.bf16.mxu0 %v2943_v50  ;;  %v2363_v50 = vcombine.high %v26_v48, %v26_v48 }
  0x2d   :  { %2654 = vmatpush3.bf16.msra.mxu1 %v2942_v49  ;;  %v2362_v49 = vcombine.low %v26_v48, %v26_v48  ;;  %v3063_v48 = vld [vmem:[%s3837_s1 + $0x470] sm:$0xff]  }
  0x2e   :  { %2655 = vmatprep.subr.bf16.mxu1 %v2945_v52  ;;  %v3005_v52 = vld [vmem:[%s3837_s1 + $0x3c0] sm:$0xff]  }
  0x2f   :  { %2634 = vmatpush3.bf16.msra.mxu0 %v2944_v51  ;;  %v3004_v51 = vld [vmem:[%s3837_s1 + $0x300] sm:$0xff]  }
  0x30   :  { %2635 = vmatprep.subr.bf16.mxu0 %v2947_v54  ;;  %v3007_v54 = vld [vmem:[%s3837_s1 + $0x348] sm:$0xff]  }
  0x31   :  { %2656 = vmatpush3.bf16.msra.mxu1 %v2946_v53  ;;  %v3006_v53 = vld [vmem:[%s3837_s1 + $0x380] sm:$0xff]  }
  0x32   :  { %2657 = vmatprep.subr.bf16.mxu1 %v2949_v56  ;;  %v3009_v56 = vld [vmem:[%s3837_s1 + $0x3c8] sm:$0xff]  }
  0x33   :  { %2636 = vmatpush3.bf16.msra.mxu0 %v2948_v55  ;;  %v3008_v55 = vld [vmem:[%s3837_s1 + $0x308] sm:$0xff]  }
  0x34   :  { %2637 = vmatprep.subr.bf16.mxu0 %v2951_v58  ;;  %v3011_v58 = vld [vmem:[%s3837_s1 + $0x350] sm:$0xff]  }
  0x35   :  { %2658 = vmatpush3.bf16.msra.mxu1 %v2950_v57  ;;  %v3010_v57 = vld [vmem:[%s3837_s1 + $0x388] sm:$0xff]  }
  0x36   :  { %2659 = vmatprep.subr.bf16.mxu1 %v2953_v60  ;;  %v3013_v60 = vld [vmem:[%s3837_s1 + $0x3d0] sm:$0xff]  }
  0x37   :  { %2638 = vmatpush3.bf16.msra.mxu0 %v2952_v59  ;;  %v3012_v59 = vld [vmem:[%s3837_s1 + $0x310] sm:$0xff]  }
  0x38   :  { %2639 = vmatprep.subr.bf16.mxu0 %v2955_v62  ;;  %v3015_v62 = vld [vmem:[%s3837_s1 + $0x358] sm:$0xff]  }
  0x39   :  { %2660 = vmatpush3.bf16.msra.mxu1 %v2954_v61  ;;  %v3014_v61 = vld [vmem:[%s3837_s1 + $0x390] sm:$0xff]  }
  0x3a   :  { %2661 = vmatprep.subr.bf16.mxu1 %v2957_v0  ;;  %v3017_v0 = vld [vmem:[%s3837_s1 + $0x3d8] sm:$0xff]  }
  0x3b   :  { %2640 = vmatpush3.bf16.msra.mxu0 %v2956_v63  ;;  %v3016_v63 = vld [vmem:[%s3837_s1 + $0x318] sm:$0xff]  }
  0x3c   :  { %2641 = vmatprep.subr.bf16.mxu0 %v2959_v2  ;;  %v3019_v2 = vld [vmem:[%s3837_s1 + $0x360] sm:$0xff]  }
  0x3d   :  { %2662 = vmatpush3.bf16.msra.mxu1 %v2958_v1  ;;  %v3018_v1 = vld [vmem:[%s3837_s1 + $0x398] sm:$0xff]  }
  0x3e   :  { %2663 = vmatprep.subr.bf16.mxu1 %v2961_v4  ;;  %v3021_v4 = vld [vmem:[%s3837_s1 + $0x3e0] sm:$0xff]  }
  0x3f   :  { %2642 = vmatpush3.bf16.msra.mxu0 %v2960_v3  ;;  %v3020_v3 = vld [vmem:[%s3837_s1 + $0x320] sm:$0xff]  }
  0x40   :  { %2671 = vmatprep.subr.bf16.mxu0 %v2965_v9  ;;  %v3026_v9 = vld [vmem:[%s3837_s1 + $0x3a8] sm:$0xff]  }
  0x41   :  { %2664 = vmatpush3.bf16.msra.mxu1 %v2964_v8  ;;  %v3025_v8 = vld [vmem:[%s3837_s1 + $0x3e8] sm:$0xff]  }
  0x42   :  { %1813 = vmatmul.mubr.bf16.vlgmr.msra.gmra.mrb[4].mxu0 %v2356_v6  ;;  %2693 = vmatprep.subr.bf16.mxu1 %v2969_v14  ;;  %v3023_v6 = vld [vmem:[%s3837_s1 + $0x368] sm:$0xff]   ;;  %v3031_v14 = vld [vmem:[%s3837_s1 + $0x378] sm:$0xff]  }
  0x43   :  { %2672 = vmatpush3.bf16.msra.mxu0 %v2968_v13  ;;  %1892 = vmatprep.mubr.bf16.mxu0 %v2361_v45  ;;  %v3030_v13 = vld [vmem:[%s3837_s1 + $0x3b0] sm:$0xff]   ;;  %v3060_v45 = vld [vmem:[%s3837_s1 + $0x428] sm:$0xff]  }
  0x44   :  { %1853 = vmatmul.mubr.bf16.vlgmr.msra.gmra.mrb[4].mxu1 %v2358_v11  ;;  %2673 = vmatprep.subr.bf16.mxu0 %v2971_v16  ;;  %v3028_v11 = vld [vmem:[%s3837_s1 + $0x330] sm:$0xff]   ;;  %v3033_v16 = vld [vmem:[%s3837_s1 + $0x3f8] sm:$0xff]  }
  0x45   :  { %2694 = vmatpush3.bf16.msra.mxu1 %v2970_v15  ;;  %1932 = vmatprep.mubr.bf16.mxu1 %v2363_v50  ;;  %v3032_v15 = vld [vmem:[%s3837_s1 + $0x338] sm:$0xff]   ;;  %v3065_v50 = vld [vmem:[%s3837_s1 + $0x4f0] sm:$0xff]  }
  0x46   :  { %2695 = vmatprep.subr.bf16.mxu1 %v2973_v18 }
  0x47   :  { %2674 = vmatpush3.bf16.msra.mxu0 %v2972_v17  ;;  %v27_v17 = vld [vmem:[%s3838_s0 + $0x30] sm:$0xff] }
  0x48   :  { %2675 = vmatprep.subr.bf16.mxu0 %v2975_v20  ;;  %v2364_v18 = vcombine.low %v27_v17, %v27_v17  ;;  %v3036_v20 = vld [vmem:[%s3837_s1 + $0x3b8] sm:$0xff]  }
  0x49   :  { %2696 = vmatpush3.bf16.msra.mxu1 %v2974_v19  ;;  %v2365_v19 = vcombine.high %v27_v17, %v27_v17  ;;  %v3094_v17 = vld [vmem:[%s3837_s1 + $0x5a0] sm:$0xff]  }
  0x4a   :  { %2697 = vmatprep.subr.bf16.mxu1 %v2977_v22  ;;  %v28_v22 = vld [vmem:[%s3838_s0 + $0x38] sm:$0xff] }
  0x4b   :  { %2676 = vmatpush3.bf16.msra.mxu0 %v2976_v21  ;;  %v3037_v21 = vld [vmem:[%s3837_s1 + $0x440] sm:$0xff]  }
  0x4c   :  { %2677 = vmatprep.subr.bf16.mxu0 %v2979_v24  ;;  %v2367_v24 = vcombine.high %v28_v22, %v28_v22 }
  0x4d   :  { %2698 = vmatpush3.bf16.msra.mxu1 %v2978_v23  ;;  %v2366_v23 = vcombine.low %v28_v22, %v28_v22  ;;  %v3099_v22 = vld [vmem:[%s3837_s1 + $0x570] sm:$0xff]  }
  0x4e   :  { %2699 = vmatprep.subr.bf16.mxu1 %v2981_v26  ;;  %v3041_v26 = vld [vmem:[%s3837_s1 + $0x4c0] sm:$0xff]  }
  0x4f   :  { %2678 = vmatpush3.bf16.msra.mxu0 %v2980_v25  ;;  %v3040_v25 = vld [vmem:[%s3837_s1 + $0x400] sm:$0xff]  }
  0x50   :  { %2679 = vmatprep.subr.bf16.mxu0 %v2983_v28  ;;  %v3043_v28 = vld [vmem:[%s3837_s1 + $0x448] sm:$0xff]  }
  0x51   :  { %2700 = vmatpush3.bf16.msra.mxu1 %v2982_v27  ;;  %v3042_v27 = vld [vmem:[%s3837_s1 + $0x480] sm:$0xff]  }
  0x52   :  { %2701 = vmatprep.subr.bf16.mxu1 %v2985_v30  ;;  %v3045_v30 = vld [vmem:[%s3837_s1 + $0x4c8] sm:$0xff]  }
  0x53   :  { %2680 = vmatpush3.bf16.msra.mxu0 %v2984_v29  ;;  %v3044_v29 = vld [vmem:[%s3837_s1 + $0x408] sm:$0xff]  }
  0x54   :  { %2681 = vmatprep.subr.bf16.mxu0 %v2987_v32  ;;  %v3047_v32 = vld [vmem:[%s3837_s1 + $0x450] sm:$0xff]  }
  0x55   :  { %2702 = vmatpush3.bf16.msra.mxu1 %v2986_v31  ;;  %v3046_v31 = vld [vmem:[%s3837_s1 + $0x488] sm:$0xff]  }
  0x56   :  { %2703 = vmatprep.subr.bf16.mxu1 %v2989_v34  ;;  %v3049_v34 = vld [vmem:[%s3837_s1 + $0x4d0] sm:$0xff]  }
  0x57   :  { %2682 = vmatpush3.bf16.msra.mxu0 %v2988_v33  ;;  %v3048_v33 = vld [vmem:[%s3837_s1 + $0x410] sm:$0xff]  }
  0x58   :  { %2683 = vmatprep.subr.bf16.mxu0 %v2991_v36  ;;  %v3051_v36 = vld [vmem:[%s3837_s1 + $0x458] sm:$0xff]  }
  0x59   :  { %2704 = vmatpush3.bf16.msra.mxu1 %v2990_v35  ;;  %v3050_v35 = vld [vmem:[%s3837_s1 + $0x490] sm:$0xff]  }
  0x5a   :  { %2705 = vmatprep.subr.bf16.mxu1 %v2993_v38  ;;  %v3053_v38 = vld [vmem:[%s3837_s1 + $0x4d8] sm:$0xff]  }
  0x5b   :  { %2684 = vmatpush3.bf16.msra.mxu0 %v2992_v37  ;;  %v3052_v37 = vld [vmem:[%s3837_s1 + $0x418] sm:$0xff]  }
  0x5c   :  { %2685 = vmatprep.subr.bf16.mxu0 %v2995_v40  ;;  %v3055_v40 = vld [vmem:[%s3837_s1 + $0x460] sm:$0xff]  }
  0x5d   :  { %2706 = vmatpush3.bf16.msra.mxu1 %v2994_v39  ;;  %v3054_v39 = vld [vmem:[%s3837_s1 + $0x498] sm:$0xff]  }
  0x5e   :  { %2707 = vmatprep.subr.bf16.mxu1 %v2997_v42  ;;  %v3057_v42 = vld [vmem:[%s3837_s1 + $0x4e0] sm:$0xff]  }
  0x5f   :  { %2686 = vmatpush3.bf16.msra.mxu0 %v2996_v41  ;;  %v3056_v41 = vld [vmem:[%s3837_s1 + $0x420] sm:$0xff]  }
  0x60   :  { %2715 = vmatprep.subr.bf16.mxu0 %v3001_v47  ;;  %v3062_v47 = vld [vmem:[%s3837_s1 + $0x4a8] sm:$0xff]  }
  0x61   :  { %2708 = vmatpush3.bf16.msra.mxu1 %v3000_v46  ;;  %v3061_v46 = vld [vmem:[%s3837_s1 + $0x4e8] sm:$0xff]  }
  0x62   :  { %1893 = vmatmul.mubr.bf16.vlgmr.msra.gmra.mrb[8].mxu0 %v2360_v44  ;;  %2737 = vmatprep.subr.bf16.mxu1 %v3005_v52  ;;  %v3059_v44 = vld [vmem:[%s3837_s1 + $0x468] sm:$0xff]   ;;  %v3067_v52 = vld [vmem:[%s3837_s1 + $0x478] sm:$0xff]  }
  0x63   :  { %2716 = vmatpush3.bf16.msra.mxu0 %v3004_v51  ;;  %1972 = vmatprep.mubr.bf16.mxu0 %v2365_v19  ;;  %v3066_v51 = vld [vmem:[%s3837_s1 + $0x4b0] sm:$0xff]   ;;  %v3096_v19 = vld [vmem:[%s3837_s1 + $0x528] sm:$0xff]  }
  0x64   :  { %1933 = vmatmul.mubr.bf16.vlgmr.msra.gmra.mrb[8].mxu1 %v2362_v49  ;;  %2717 = vmatprep.subr.bf16.mxu0 %v3007_v54  ;;  %v3064_v49 = vld [vmem:[%s3837_s1 + $0x430] sm:$0xff]   ;;  %v3069_v54 = vld [vmem:[%s3837_s1 + $0x4f8] sm:$0xff]  }
  0x65   :  { %2738 = vmatpush3.bf16.msra.mxu1 %v3006_v53  ;;  %2012 = vmatprep.mubr.bf16.mxu1 %v2367_v24  ;;  %v3068_v53 = vld [vmem:[%s3837_s1 + $0x438] sm:$0xff]   ;;  %v3101_v24 = vld [vmem:[%s3837_s1 + $0x5f0] sm:$0xff]  }
  0x66   :  { %2739 = vmatprep.subr.bf16.mxu1 %v3009_v56 }
  0x67   :  { %2718 = vmatpush3.bf16.msra.mxu0 %v3008_v55  ;;  %v29_v55 = vld [vmem:[%s3838_s0 + $0x40] sm:$0xff] }
  0x68   :  { %2719 = vmatprep.subr.bf16.mxu0 %v3011_v58  ;;  %v2368_v56 = vcombine.low %v29_v55, %v29_v55  ;;  %v3072_v58 = vld [vmem:[%s3837_s1 + $0x4b8] sm:$0xff]  }
  0x69   :  { %2740 = vmatpush3.bf16.msra.mxu1 %v3010_v57  ;;  %v2369_v57 = vcombine.high %v29_v55, %v29_v55  ;;  %v3116_v55 = vld [vmem:[%s3840_s3] sm:$0xff]  }
  0x6a   :  { %2741 = vmatprep.subr.bf16.mxu1 %v3013_v60  ;;  %v30_v60 = vld [vmem:[%s3838_s0 + $0x48] sm:$0xff] }
  0x6b   :  { %2720 = vmatpush3.bf16.msra.mxu0 %v3012_v59  ;;  %v3073_v59 = vld [vmem:[%s3837_s1 + $0x540] sm:$0xff]  }
  0x6c   :  { %2721 = vmatprep.subr.bf16.mxu0 %v3015_v62  ;;  %v2371_v62 = vcombine.high %v30_v60, %v30_v60 }
  0x6d   :  { %2742 = vmatpush3.bf16.msra.mxu1 %v3014_v61  ;;  %v2370_v61 = vcombine.low %v30_v60, %v30_v60 }
  0x6e   :  { %2743 = vmatprep.subr.bf16.mxu1 %v3017_v0  ;;  %v3077_v0 = vld [vmem:[%s3837_s1 + $0x5c0] sm:$0xff]  }
  0x6f   :  { %2722 = vmatpush3.bf16.msra.mxu0 %v3016_v63  ;;  %v3076_v63 = vld [vmem:[%s3837_s1 + $0x500] sm:$0xff]  }
  0x70   :  { %2723 = vmatprep.subr.bf16.mxu0 %v3019_v2  ;;  %v3079_v2 = vld [vmem:[%s3837_s1 + $0x548] sm:$0xff]  }
  0x71   :  { %2744 = vmatpush3.bf16.msra.mxu1 %v3018_v1  ;;  %v3078_v1 = vld [vmem:[%s3837_s1 + $0x580] sm:$0xff]  }
  0x72   :  { %2745 = vmatprep.subr.bf16.mxu1 %v3021_v4  ;;  %v3081_v4 = vld [vmem:[%s3837_s1 + $0x5c8] sm:$0xff]  }
  0x73   :  { %2724 = vmatpush3.bf16.msra.mxu0 %v3020_v3  ;;  %v3080_v3 = vld [vmem:[%s3837_s1 + $0x508] sm:$0xff]  }
  0x74   :  { %2725 = vmatprep.subr.bf16.mxu0 %v3023_v6  ;;  %v3083_v6 = vld [vmem:[%s3837_s1 + $0x550] sm:$0xff]  }
  0x75   :  { %2746 = vmatpush3.bf16.msra.mxu1 %v3022_v5  ;;  %v3082_v5 = vld [vmem:[%s3837_s1 + $0x588] sm:$0xff]  }
  0x76   :  { %2747 = vmatprep.subr.bf16.mxu1 %v3025_v8  ;;  %v3085_v8 = vld [vmem:[%s3837_s1 + $0x5d0] sm:$0xff]  }
  0x77   :  { %2726 = vmatpush3.bf16.msra.mxu0 %v3024_v7  ;;  %v3084_v7 = vld [vmem:[%s3837_s1 + $0x510] sm:$0xff]  }
  0x78   :  { %2727 = vmatprep.subr.bf16.mxu0 %v3027_v10  ;;  %v3087_v10 = vld [vmem:[%s3837_s1 + $0x558] sm:$0xff]  }
  0x79   :  { %2748 = vmatpush3.bf16.msra.mxu1 %v3026_v9  ;;  %v3086_v9 = vld [vmem:[%s3837_s1 + $0x590] sm:$0xff]  }
  0x7a   :  { %2749 = vmatprep.subr.bf16.mxu1 %v3029_v12  ;;  %v3089_v12 = vld [vmem:[%s3837_s1 + $0x5d8] sm:$0xff]  }
  0x7b   :  { %2728 = vmatpush3.bf16.msra.mxu0 %v3028_v11  ;;  %v3088_v11 = vld [vmem:[%s3837_s1 + $0x518] sm:$0xff]  }
  0x7c   :  { %2729 = vmatprep.subr.bf16.mxu0 %v3031_v14  ;;  %v3091_v14 = vld [vmem:[%s3837_s1 + $0x560] sm:$0xff]  }
  0x7d   :  { %2750 = vmatpush3.bf16.msra.mxu1 %v3030_v13  ;;  %v3090_v13 = vld [vmem:[%s3837_s1 + $0x598] sm:$0xff]  }
  0x7e   :  { %2751 = vmatprep.subr.bf16.mxu1 %v3033_v16  ;;  %v3093_v16 = vld [vmem:[%s3837_s1 + $0x5e0] sm:$0xff]  }
  0x7f   :  { %2730 = vmatpush3.bf16.msra.mxu0 %v3032_v15  ;;  %v3092_v15 = vld [vmem:[%s3837_s1 + $0x520] sm:$0xff]  }
  0x80   :  { %2759 = vmatprep.subr.bf16.mxu0 %v3037_v21  ;;  %v3098_v21 = vld [vmem:[%s3837_s1 + $0x5a8] sm:$0xff]  }
  0x81   :  { %2752 = vmatpush3.bf16.msra.mxu1 %v3036_v20  ;;  %v3097_v20 = vld [vmem:[%s3837_s1 + $0x5e8] sm:$0xff]  }
  0x82   :  { %1973 = vmatmul.mubr.bf16.vlgmr.msra.gmra.mrb[12].mxu0 %v2364_v18  ;;  %2781 = vmatprep.subr.bf16.mxu1 %v3041_v26  ;;  %v3095_v18 = vld [vmem:[%s3837_s1 + $0x568] sm:$0xff]   ;;  %v3103_v26 = vld [vmem:[%s3837_s1 + $0x578] sm:$0xff]  }
  0x83   :  { %2760 = vmatpush3.bf16.msra.mxu0 %v3040_v25  ;;  %2052 = vmatprep.mubr.bf16.mxu0 %v2369_v57  ;;  %v3102_v25 = vld [vmem:[%s3837_s1 + $0x5b0] sm:$0xff]  }
  0x84   :  { %2013 = vmatmul.mubr.bf16.vlgmr.msra.gmra.mrb[12].mxu1 %v2366_v23  ;;  %2761 = vmatprep.subr.bf16.mxu0 %v3043_v28  ;;  %v3100_v23 = vld [vmem:[%s3837_s1 + $0x530] sm:$0xff]   ;;  %v3105_v28 = vld [vmem:[%s3837_s1 + $0x5f8] sm:$0xff]  }
  0x85   :  { %2782 = vmatpush3.bf16.msra.mxu1 %v3042_v27  ;;  %2092 = vmatprep.mubr.bf16.mxu1 %v2371_v62  ;;  %v3104_v27 = vld [vmem:[%s3837_s1 + $0x538] sm:$0xff]  }
  0x86   :  { %2783 = vmatprep.subr.bf16.mxu1 %v3045_v30 }
  0x87   :  { %2762 = vmatpush3.bf16.msra.mxu0 %v3044_v29  ;;  %v31_v29 = vld [vmem:[%s3838_s0 + $0x50] sm:$0xff] }
  0x88   :  { %2763 = vmatprep.subr.bf16.mxu0 %v3047_v32  ;;  %v2372_v30 = vcombine.low %v31_v29, %v31_v29  ;;  %v3108_v32 = vld [vmem:[%s3837_s1 + $0x5b8] sm:$0xff]  }
  0x89   :  { %2784 = vmatpush3.bf16.msra.mxu1 %v3046_v31  ;;  %v2373_v31 = vcombine.high %v31_v29, %v31_v29 }
  0x8a   :  { %2785 = vmatprep.subr.bf16.mxu1 %v3049_v34  ;;  %v3128_v34 = vmov 0.0  }
  0x8b   :  { %2764 = vmatpush3.bf16.msra.mxu0 %v3048_v33  ;;  %v32_v33 = vld [vmem:[%s3838_s0 + $0x58] sm:$0xff] }
  0x8c   :  { %2765 = vmatprep.subr.bf16.mxu0 %v3051_v36  ;;  %v2375_v36 = vcombine.high %v32_v33, %v32_v33 }
  0x8d   :  { %2786 = vmatpush3.bf16.msra.mxu1 %v3050_v35  ;;  %v2374_v35 = vcombine.low %v32_v33, %v32_v33 }
  0x8e   :  { %2787 = vmatprep.subr.bf16.mxu1 %v3053_v38  ;;  %v3112_v38 = vld [vmem:[%s3837_s1 + $0x608] sm:$0xff]  }
  0x8f   :  { %2766 = vmatpush3.bf16.msra.mxu0 %v3052_v37  ;;  %v3111_v37 = vld [vmem:[%s3837_s1 + $0x600] sm:$0xff]  }
  0x90   :  { %2767 = vmatprep.subr.bf16.mxu0 %v3055_v40  ;;  %v3114_v40 = vld [vmem:[%s3837_s1 + $0x618] sm:$0xff]  }
  0x91   :  { %2788 = vmatpush3.bf16.msra.mxu1 %v3054_v39  ;;  %v3113_v39 = vld [vmem:[%s3837_s1 + $0x610] sm:$0xff]  }
  0x92   :  { %2789 = vmatprep.subr.bf16.mxu1 %v3057_v42 }
  0x93   :  { %2768 = vmatpush3.bf16.msra.mxu0 %v3056_v41  ;;  %v3115_v41 = vld [vmem:[%s3838_s0 + $0x60] ss:$0 sps:$4 sm:$0xff]  }
  0x94   :  { %2769 = vmatprep.subr.bf16.mxu0 %v3059_v44 }
  0x95   :  { %2790 = vmatpush3.bf16.msra.mxu1 %v3058_v43  ;;  %v2351_v43 = vld [vmem:[%s3839_s2] ss:$0 sm:$0xff] }
  0x96   :  { %2791 = vmatprep.subr.bf16.mxu1 %v3061_v46 }
  0x97   :  { %2770 = vmatpush3.bf16.msra.mxu0 %v3060_v45 }
  0x98   :  { %2771 = vmatprep.subr.bf16.mxu0 %v3063_v48 }
  0x99   :  { %2792 = vmatpush3.bf16.msra.mxu1 %v3062_v47 }
  0x9a   :  { %2793 = vmatprep.subr.bf16.mxu1 %v3065_v50 }
  0x9b   :  { %2772 = vmatpush3.bf16.msra.mxu0 %v3064_v49 }
  0x9c   :  { %2773 = vmatprep.subr.bf16.mxu0 %v3067_v52 }
  0x9d   :  { %2794 = vmatpush3.bf16.msra.mxu1 %v3066_v51 }
  0x9e   :  { %2795 = vmatprep.subr.bf16.mxu1 %v3069_v54 }
  0x9f   :  { %2774 = vmatpush3.bf16.msra.mxu0 %v3068_v53 }
  0xa0   :  { %2803 = vmatprep.subr.bf16.mxu0 %v3073_v59  ;;  %v3118_v59 = vld [vmem:[%s3840_s3 + $0x10] sm:$0xff]  }
  0xa1   :  { %2796 = vmatpush3.bf16.msra.mxu1 %v3072_v58 }
  0xa2   :  { %2053 = vmatmul.mubr.bf16.vlgmr.msra.gmra.mrb[16].mxu0 %v2368_v56  ;;  %2825 = vmatprep.subr.bf16.mxu1 %v3077_v0  ;;  %v3117_v56 = vld [vmem:[%s3840_s3 + $0x8] sm:$0xff]  }
  0xa3   :  { %2804 = vmatpush3.bf16.msra.mxu0 %v3076_v63  ;;  %2132 = vmatprep.mubr.bf16.mxu0 %v2373_v31 }
  0xa4   :  { %2093 = vmatmul.mubr.bf16.vlgmr.msra.gmra.mrb[16].mxu1 %v2370_v61  ;;  %2805 = vmatprep.subr.bf16.mxu0 %v3079_v2 }
  0xa5   :  { %2826 = vmatpush3.bf16.msra.mxu1 %v3078_v1  ;;  %2172 = vmatprep.mubr.bf16.mxu1 %v2375_v36 }
  0xa6   :  { %2827 = vmatprep.subr.bf16.mxu1 %v3081_v4  ;;  %v3119_v4 = vld [vmem:[%s3840_s3 + $0x18] sm:$0xff]  }
  0xa7   :  { %2806 = vmatpush3.bf16.msra.mxu0 %v3080_v3 }
  0xa8   :  { %2807 = vmatprep.subr.bf16.mxu0 %v3083_v6 }
  0xa9   :  { %2828 = vmatpush3.bf16.msra.mxu1 %v3082_v5 }
  0xaa   :  { %2829 = vmatprep.subr.bf16.mxu1 %v3085_v8  ;;  %v3121_v8 = vld [vmem:[%s3840_s3 + $0x28] sm:$0xff]  }
  0xab   :  { %2808 = vmatpush3.bf16.msra.mxu0 %v3084_v7  ;;  %v3120_v7 = vld [vmem:[%s3840_s3 + $0x20] sm:$0xff]  }
  0xac   :  { %2809 = vmatprep.subr.bf16.mxu0 %v3087_v10  ;;  %v3123_v10 = vld [vmem:[%s3840_s3 + $0x38] sm:$0xff]  }
  0xad   :  { %2830 = vmatpush3.bf16.msra.mxu1 %v3086_v9  ;;  %v3122_v9 = vld [vmem:[%s3840_s3 + $0x30] sm:$0xff]  }
  0xae   :  { %2831 = vmatprep.subr.bf16.mxu1 %v3089_v12 }
  0xaf   :  { %2810 = vmatpush3.bf16.msra.mxu0 %v3088_v11 }
  0xb0   :  { %2811 = vmatprep.subr.bf16.mxu0 %v3091_v14 }
  0xb1   :  { %2832 = vmatpush3.bf16.msra.mxu1 %v3090_v13 }
  0xb2   :  { %2833 = vmatprep.subr.bf16.mxu1 %v3093_v16 }
  0xb3   :  { %2812 = vmatpush3.bf16.msra.mxu0 %v3092_v15 }
  0xb4   :  { %2813 = vmatprep.subr.bf16.mxu0 %v3095_v18 }
  0xb5   :  { %2834 = vmatpush3.bf16.msra.mxu1 %v3094_v17 }
  0xb6   :  { %2835 = vmatprep.subr.bf16.mxu1 %v3097_v20 }
  0xb7   :  { %2814 = vmatpush3.bf16.msra.mxu0 %v3096_v19 }
  0xb8   :  { %2815 = vmatprep.subr.bf16.mxu0 %v3099_v22 }
  0xb9   :  { %2836 = vmatpush3.bf16.msra.mxu1 %v3098_v21 }
  0xba   :  { %2837 = vmatprep.subr.bf16.mxu1 %v3101_v24 }
  0xbb   :  { %2816 = vmatpush3.bf16.msra.mxu0 %v3100_v23 }
  0xbc   :  { %2817 = vmatprep.subr.bf16.mxu0 %v3103_v26 }
  0xbd   :  { %2838 = vmatpush3.bf16.msra.mxu1 %v3102_v25 }
  0xbe   :  { %2839 = vmatprep.subr.bf16.mxu1 %v3105_v28 }
  0xbf   :  { %2818 = vmatpush3.bf16.msra.mxu0 %v3104_v27 }
  0xc0   :  { %2861 = vmatprep.subr.bf16.mxu0 %v3128_v34 }
  0xc1   :  { %2840 = vmatpush3.bf16.msra.mxu1 %v3108_v32 }
  0xc2   :  { %2133 = vmatmul.mubr.bf16.vlgmr.msra.gmra.mrb[20].mxu0 %v2372_v30  ;;  %2873 = vmatprep.subr.bf16.mxu1 %v3128_v34 }
  0xc3   :  { %2862 = vmatpush3.bf16.msra.mxu0 %v3111_v37  ;;  %2869 = vmatprep.mubr.msk.bf16.mxu0 %vm3129_vm0, %v3128_v34 }
  0xc4   :  { %2173 = vmatmul.mubr.bf16.vlgmr.msra.gmra.mrb[20].mxu1 %v2374_v35  ;;  %2863 = vmatprep.subr.bf16.mxu0 %v3128_v34 }
  0xc5   :  { %2889 = vmatprep.mubr.msk.bf16.mxu1 %vm3129_vm0, %v3128_v34  ;;  %2874 = vmatpush3.bf16.msra.mxu1 %v3116_v55 }
  0xc6   :  { %2875 = vmatprep.subr.bf16.mxu1 %v3128_v34 }
  0xc7   :  { %2864 = vmatpush3.bf16.msra.mxu0 %v3112_v38 }
  0xc8   :  { %2865 = vmatprep.subr.bf16.mxu0 %v3128_v34 }
  0xc9   :  { %2876 = vmatpush3.bf16.msra.mxu1 %v3117_v56 }
  0xca   :  { %2877 = vmatprep.subr.bf16.mxu1 %v3128_v34 }
  0xcb   :  { %2866 = vmatpush3.bf16.msra.mxu0 %v3113_v39 }
  0xcc   :  { %2867 = vmatprep.subr.bf16.mxu0 %v3128_v34 }
  0xcd   :  { %2878 = vmatpush3.bf16.msra.mxu1 %v3118_v59 }
  0xce   :  { %2879 = vmatprep.subr.bf16.mxu1 %v3128_v34 }
  0xcf   :  { %2868 = vmatpush3.bf16.msra.mxu0 %v3114_v40 }
  0xd1   :  { %2880 = vmatpush3.bf16.msra.mxu1 %v3119_v4 }
  0xd2   :  { %2870 = vmatmul.mubr.msk.bf16.vlgmr.msra.gmra.mrb[24].mxu0 %vm1696_vm1, %v3115_v41  ;;  %2881 = vmatprep.subr.bf16.mxu1 %v3128_v34 }
  0xd5   :  { %2882 = vmatpush3.bf16.msra.mxu1 %v3120_v7 }
  0xd6   :  { %2883 = vmatprep.subr.bf16.mxu1 %v3128_v34 }
  0xd9   :  { %2884 = vmatpush3.bf16.msra.mxu1 %v3121_v8 }
  0xda   :  { %2885 = vmatprep.subr.bf16.mxu1 %v3128_v34 }
  0xdd   :  { %2886 = vmatpush3.bf16.msra.mxu1 %v3122_v9 }
  0xde   :  { %2887 = vmatprep.subr.bf16.mxu1 %v3128_v34 }
  0xe1   :  { %2888 = vmatpush3.bf16.msra.mxu1 %v3123_v10 }
  0xf5   :  { %v2599_v42 = vpop.f32.mrb[0].mxu0 }
  0xf6   :  { %v2600_v44 = vpop.f32.mrb[1].mxu0 }
  0xf7   :  { %v2601_v45 = vadd.f32 %v2600_v44, %v2599_v42  ;;  %v2602_v46 = vpop.f32.mrb[2].mxu0  ;;  %v2621_v47 = vpop.f32.mrb[0].mxu1 }
  0xf8   :  { %v2603_v48 = vpop.f32.mrb[3].mxu0  ;;  %v2622_v49 = vpop.f32.mrb[1].mxu1 }
  0xf9   :  { %v1735_v50 = vadd.f32 %v2601_v45, %v2351_v43  ;;  %v2623_v51 = vadd.f32 %v2622_v49, %v2621_v47  ;;  %v2624_v52 = vpop.f32.mrb[2].mxu1 }
  0xfa   :  { %v2625_v53 = vpop.f32.mrb[3].mxu1 }
  0xfb   :  { %v1775_v54 = vadd.f32 %v2623_v51, %v1735_v50 }
 0x115   :  { %v2643_v57 = vpop.f32.mrb[4].mxu0 }
 0x116   :  { %v2644_v58 = vpop.f32.mrb[5].mxu0 }
 0x117   :  { %v2645_v60 = vadd.f32 %v2644_v58, %v2643_v57  ;;  %v2646_v61 = vpop.f32.mrb[6].mxu0  ;;  %v2665_v62 = vpop.f32.mrb[4].mxu1 }
 0x118   :  { %v2647_v63 = vpop.f32.mrb[7].mxu0  ;;  %v2666_v1 = vpop.f32.mrb[5].mxu1 }
 0x119   :  { %v1815_v0 = vadd.f32 %v2645_v60, %v1775_v54  ;;  %v2667_v2 = vadd.f32 %v2666_v1, %v2665_v62  ;;  %v2668_v3 = vpop.f32.mrb[6].mxu1 }
 0x11a   :  { %v2669_v5 = vpop.f32.mrb[7].mxu1 }
 0x11b   :  { %v1855_v6 = vadd.f32 %v2667_v2, %v1815_v0  ;;  %v2574_v2 = vld [vmem:[%s3841_s4] ss:$0 sm:$0xff] }
 0x135   :  { %v2687_v11 = vpop.f32.mrb[8].mxu0 }
 0x136   :  { %v2688_v12 = vpop.f32.mrb[9].mxu0 }
 0x137   :  { %v2689_v13 = vadd.f32 %v2688_v12, %v2687_v11  ;;  %v2690_v14 = vpop.f32.mrb[10].mxu0  ;;  %v2709_v15 = vpop.f32.mrb[8].mxu1 }
 0x138   :  { %v2691_v16 = vpop.f32.mrb[11].mxu0  ;;  %v2710_v17 = vpop.f32.mrb[9].mxu1 }
 0x139   :  { %v1895_v18 = vadd.f32 %v2689_v13, %v1855_v6  ;;  %v2711_v19 = vadd.f32 %v2710_v17, %v2709_v15  ;;  %v2712_v20 = vpop.f32.mrb[10].mxu1 }
 0x13a   :  { %v2713_v21 = vpop.f32.mrb[11].mxu1 }
 0x13b   :  { %v1935_v22 = vadd.f32 %v2711_v19, %v1895_v18 }
 0x155   :  { %v2731_v23 = vpop.f32.mrb[12].mxu0 }
 0x156   :  { %v2732_v24 = vpop.f32.mrb[13].mxu0 }
 0x157   :  { %v2733_v25 = vadd.f32 %v2732_v24, %v2731_v23  ;;  %v2734_v26 = vpop.f32.mrb[14].mxu0  ;;  %v2753_v27 = vpop.f32.mrb[12].mxu1 }
 0x158   :  { %v2735_v28 = vpop.f32.mrb[15].mxu0  ;;  %v2754_v29 = vpop.f32.mrb[13].mxu1 }
 0x159   :  { %v1975_v30 = vadd.f32 %v2733_v25, %v1935_v22  ;;  %v2755_v31 = vadd.f32 %v2754_v29, %v2753_v27  ;;  %v2756_v32 = vpop.f32.mrb[14].mxu1 }
 0x15a   :  { %v2757_v33 = vpop.f32.mrb[15].mxu1 }
 0x15b   :  { %v2015_v34 = vadd.f32 %v2755_v31, %v1975_v30 }
 0x175   :  { %v2775_v35 = vpop.f32.mrb[16].mxu0 }
 0x176   :  { %v2776_v36 = vpop.f32.mrb[17].mxu0 }
 0x177   :  { %v2777_v37 = vadd.f32 %v2776_v36, %v2775_v35  ;;  %v2778_v38 = vpop.f32.mrb[18].mxu0  ;;  %v2797_v39 = vpop.f32.mrb[16].mxu1 }
 0x178   :  { %v2779_v40 = vpop.f32.mrb[19].mxu0  ;;  %v2798_v42 = vpop.f32.mrb[17].mxu1 }
 0x179   :  { %v2055_v41 = vadd.f32 %v2777_v37, %v2015_v34  ;;  %v2799_v43 = vadd.f32 %v2798_v42, %v2797_v39  ;;  %v2800_v44 = vpop.f32.mrb[18].mxu1 }
 0x17a   :  { %v2801_v45 = vpop.f32.mrb[19].mxu1 }
 0x17b   :  { %v2095_v46 = vadd.f32 %v2799_v43, %v2055_v41 }
 0x195   :  { %v2819_v47 = vpop.f32.mrb[20].mxu0 }
 0x196   :  { %v2820_v48 = vpop.f32.mrb[21].mxu0 }
 0x197   :  { %v2821_v49 = vadd.f32 %v2820_v48, %v2819_v47  ;;  %v2822_v50 = vpop.f32.mrb[22].mxu0  ;;  %v2841_v51 = vpop.f32.mrb[20].mxu1 }
 0x198   :  { %v2823_v52 = vpop.f32.mrb[23].mxu0  ;;  %v2842_v53 = vpop.f32.mrb[21].mxu1 }
 0x199   :  { %v2135_v54 = vadd.f32 %v2821_v49, %v2095_v46  ;;  %v2843_v55 = vadd.f32 %v2842_v53, %v2841_v51  ;;  %v2844_v56 = vpop.f32.mrb[22].mxu1 }
 0x19a   :  { %v2845_v57 = vpop.f32.mrb[23].mxu1 }
 0x19b   :  { %v2175_v58 = vadd.f32 %v2843_v55, %v2135_v54 }
 0x1a5   :  { %v2214_v59 = vpop.f32.mrb[24].mxu0 }
 0x1a6   :  { %v2215_v60 = vadd.f32 %v2214_v59, %v2175_v58  ;;  %v2871_v61 = vpop.f32.mrb[25].mxu0 }
 0x1a7   :  { %v2217_v62 = vpop.f32.mrb[26].mxu0 }
 0x1a8   :  { %v2220_v63 = vmax.f32 %v2215_v60, 0.0  ;;  %v2872_v0 = vpop.f32.mrb[27].mxu0 }
 0x1aa   :  { %v2221_v1 = vpack.c.bf16 %v2220_v63, %v2220_v63 }
 0x1ac   :  { %2890 = vmatmul.mubr.bf16.vlgmr.msra.gmra.mrb[24].mxu1 %v2221_v1 }
 0x27f   :  { %v2327_v3 = vpop.f32.mrb[24].mxu1 }
 0x280   :  { %v2328_v4 = vadd.f32 %v2574_v2, %v2327_v3  ;;  %v2891_v5 = vpop.f32.mrb[25].mxu1 }
 0x281   :  { %v2330_v6 = vpop.f32.mrb[26].mxu1 }
 0x282   :  { %v2892_v7 = vpop.f32.mrb[27].mxu1  ;;  %v2334_v8 = vsel %vm2333_vm2, %v2328_v4, -inf }
 0x283   :  { %2335 = vmax.xlane.f32.xlu0 %v2334_v8 }
 0x310   :  { %v2336_v9 = vpop.xlane.xlu0 %2335 }
 0x311   :  { %v2337_v10 = vsub.f32 %v2328_v4, %v2336_v9 }
 0x313   :  { %v2338_v11 = vmul.f32 1.442695, %v2337_v10 }
 0x315   :  { %3124 = vpow2.f32 %v2338_v11 }
 0x31f   :  { %v3125_v12 = vpop.eup %3124 }
 0x320   :  { %v2340_v13 = vsel %vm2333_vm2, %v3125_v12, 0.0 }
 0x321   :  { %2341 = vadd.xlane.f32.xlu0 %v2340_v13 }
 0x3ae   :  { %v2342_v14 = vpop.xlane.xlu0 %2341 }
 0x3af   :  { %3126 = vlog2.f32 %v2342_v14 }
 0x3b9   :  { %v3127_v15 = vpop.eup %3126 }
 0x3ba   :  { %v2344_v16 = vmul.f32 0.6931472, %v3127_v15 }
 0x3bc   :  { %v2345_v17 = vsub.f32 %v2337_v10, %v2344_v16 }
 0x3be   :  { %2346 = vst.msk [vmem:[%s3842_s5] sm:$0xff] %vm2333_vm2, %v2345_v17 }

// kernel: a_call__.4
= control target key start
LH: loop header
LB: loop body
LE: loop exit
PB: predicated region body
PF: predicated region fallthrough
CT: control target
= control target key end

     0   :  { %s10627_s24 = smov 0   ;;  %s15509_s0 = inlined_call_operand.vmem [shape: bf16[16,512], index: 0, kind: input, shape index: {}]   ;;  %s15510_s1 = inlined_call_operand.vmem [shape: bf16[16,512], index: 1, kind: input, shape index: {}]   ;;  %s15511_s2 = inlined_call_operand.vmem [shape: bf16[16,512], index: 2, kind: input, shape index: {}]   ;;  %s15512_s3 = inlined_call_operand.vmem [shape: bf16[16,512], index: 3, kind: input, shape index: {}]   ;;  %s15513_s4 = inlined_call_operand.vmem [shape: bf16[3,512,448], index: 4, kind: input, shape index: {}]   ;;  %s15514_s5 = inlined_call_operand.vmem [shape: bf16[3,512,448], index: 5, kind: input, shape index: {}]   ;;  %s15515_s6 = inlined_call_operand.vmem [shape: f32[1,448], index: 6, kind: input, shape index: {}]   ;;  %s15516_s7 = inlined_call_operand.vmem [shape: bf16[16,448], index: 7, kind: output, shape index: {}]  }
   0x1 LB: > { %s7153_s25 = sadd.s32 4294967295, %s10585_s24   ;;  %p7157_p0 = scmp.ge.s32.totalorder %s10585_s24, 1  ;;  %s10585_s24 = sphi %s10627_s24, %s17_s24  }
   0x2   : > { %p267_p1 = scmp.lt.s32.totalorder %s10585_s24, 3 }
   0x4   : > { %p268_p2 = pnand %p7157_p0, %p267_p1 }
   0x5   : > { %v8643_v0 = vld [vmem:[%s15513_s4 + $0x404] ss:$16 sps:$4 sm:$0xff] (!%p268_p2)   ;;  %v8645_v1 = vld [vmem:[%s15513_s4 + $0x40c] ss:$16 sps:$4 sm:$0xff] (!%p268_p2)   ;;  %v8647_v2 = vld [vmem:[%s15513_s4 + $0x400] ss:$16 sps:$4 sm:$0xff] (!%p268_p2)  }
   0x6   : > { %271 = sbr.rel (%p268_p2) target bundleno = 1766 (0x6e6), region = 48  ;;  %1258 = vmatprep.subr.bf16.mxu0 (!%p268_p2), %v8643_v0  ;;  %v8648_v3 = vld [vmem:[%s15513_s4 + $0x408] ss:$16 sps:$4 sm:$0xff] (!%p268_p2)   ;;  %1340 = vmatprep.subr.bf16.mxu1 (!%p268_p2), %v8645_v1  ;;  %v8649_v4 = vld [vmem:[%s15513_s4 + $0x424] ss:$16 sps:$4 sm:$0xff] (!%p268_p2)   ;;  %p314_p3 = scmp.lt.s32.totalorder (!%p268_p2), %s7153_s25, 1 }
   0x7   : > { %1259 = vmatpush1.bf16.msra.mxu0 (!%p268_p2), %v8647_v2  ;;  %1341 = vmatpush1.bf16.msra.mxu1 (!%p268_p2), %v8648_v3  ;;  %v8651_v5 = vld [vmem:[%s15513_s4 + $0x42c] ss:$16 sps:$4 sm:$0xff] (!%p268_p2)   ;;  %v8653_v6 = vld [vmem:[%s15513_s4 + $0x420] ss:$16 sps:$4 sm:$0xff] (!%p268_p2)   ;;  %v8654_v7 = vld [vmem:[%s15513_s4 + $0x428] ss:$16 sps:$4 sm:$0xff] (!%p268_p2)  }
   0x8   : > { %1260 = vmatprep.subr.bf16.mxu0 (!%p268_p2), %v8649_v4  ;;  %1342 = vmatprep.subr.bf16.mxu1 (!%p268_p2), %v8651_v5  ;;  %v8655_v8 = vld [vmem:[%s15513_s4 + $0x444] ss:$16 sps:$4 sm:$0xff] (!%p268_p2)   ;;  %v8657_v9 = vld [vmem:[%s15513_s4 + $0x44c] ss:$16 sps:$4 sm:$0xff] (!%p268_p2)   ;;  %v8659_v10 = vld [vmem:[%s15513_s4 + $0x440] ss:$16 sps:$4 sm:$0xff] (!%p268_p2)  }
   0x9   : > { %v8660_v11 = vld [vmem:[%s15513_s4 + $0x448] ss:$16 sps:$4 sm:$0xff] (!%p268_p2)   ;;  %v8661_v12 = vld [vmem:[%s15513_s4 + $0x464] ss:$16 sps:$4 sm:$0xff] (!%p268_p2)   ;;  %v8663_v13 = vld [vmem:[%s15513_s4 + $0x46c] ss:$16 sps:$4 sm:$0xff] (!%p268_p2)  }
   0xa   : > { %v8665_v14 = vld [vmem:[%s15513_s4 + $0x460] ss:$16 sps:$4 sm:$0xff] (!%p268_p2)   ;;  %v8666_v15 = vld [vmem:[%s15513_s4 + $0x468] ss:$16 sps:$4 sm:$0xff] (!%p268_p2)   ;;  %v8667_v16 = vld [vmem:[%s15513_s4 + $0x484] ss:$16 sps:$4 sm:$0xff] (!%p268_p2)  }
   0xb   : > { %1261 = vmatpush1.bf16.msra.mxu0 (!%p268_p2), %v8653_v6  ;;  %1343 = vmatpush1.bf16.msra.mxu1 (!%p268_p2), %v8654_v7  ;;  %v8669_v17 = vld [vmem:[%s15513_s4 + $0x48c] ss:$16 sps:$4 sm:$0xff] (!%p268_p2)   ;;  %v8671_v18 = vld [vmem:[%s15513_s4 + $0x480] ss:$16 sps:$4 sm:$0xff] (!%p268_p2)   ;;  %v8672_v19 = vld [vmem:[%s15513_s4 + $0x488] ss:$16 sps:$4 sm:$0xff] (!%p268_p2)  }
   0xc   : > { %1262 = vmatprep.subr.bf16.mxu0 (!%p268_p2), %v8655_v8  ;;  %1344 = vmatprep.subr.bf16.mxu1 (!%p268_p2), %v8657_v9  ;;  %v8673_v20 = vld [vmem:[%s15513_s4 + $0x4a4] ss:$16 sps:$4 sm:$0xff] (!%p268_p2)   ;;  %v8675_v21 = vld [vmem:[%s15513_s4 + $0x4ac] ss:$16 sps:$4 sm:$0xff] (!%p268_p2)   ;;  %v8677_v22 = vld [vmem:[%s15513_s4 + $0x4a0] ss:$16 sps:$4 sm:$0xff] (!%p268_p2)  }
   0xd   : > { %v8678_v23 = vld [vmem:[%s15513_s4 + $0x4a8] ss:$16 sps:$4 sm:$0xff]   ;;  %v8679_v24 = vld [vmem:[%s15513_s4 + $0x4c4] ss:$16 sps:$4 sm:$0xff]   ;;  %v8681_v25 = vld [vmem:[%s15513_s4 + $0x4cc] ss:$16 sps:$4 sm:$0xff]  }
   0xe   : > { %v8683_v26 = vld [vmem:[%s15513_s4 + $0x4c0] ss:$16 sps:$4 sm:$0xff]   ;;  %v8684_v27 = vld [vmem:[%s15513_s4 + $0x4c8] ss:$16 sps:$4 sm:$0xff]   ;;  %v8685_v28 = vld [vmem:[%s15513_s4 + $0x4e4] ss:$16 sps:$4 sm:$0xff]  }
   0xf   : > { %1263 = vmatpush1.bf16.msra.mxu0 %v8659_v10  ;;  %1345 = vmatpush1.bf16.msra.mxu1 %v8660_v11  ;;  %v8687_v29 = vld [vmem:[%s15513_s4 + $0x4ec] ss:$16 sps:$4 sm:$0xff]   ;;  %v8689_v30 = vld [vmem:[%s15513_s4 + $0x4e0] ss:$16 sps:$4 sm:$0xff]   ;;  %v8690_v31 = vld [vmem:[%s15513_s4 + $0x4e8] ss:$16 sps:$4 sm:$0xff]  }
  0x10   : > { %1264 = vmatprep.subr.bf16.mxu0 %v8661_v12  ;;  %1346 = vmatprep.subr.bf16.mxu1 %v8663_v13  ;;  %v8691_v32 = vld [vmem:[%s15513_s4 + $0x504] ss:$16 sps:$4 sm:$0xff]   ;;  %v8693_v33 = vld [vmem:[%s15513_s4 + $0x50c] ss:$16 sps:$4 sm:$0xff]   ;;  %v8695_v34 = vld [vmem:[%s15513_s4 + $0x500] ss:$16 sps:$4 sm:$0xff]  }
  0x11   : > { %v8696_v35 = vld [vmem:[%s15513_s4 + $0x508] ss:$16 sps:$4 sm:$0xff]   ;;  %v8697_v36 = vld [vmem:[%s15513_s4 + $0x524] ss:$16 sps:$4 sm:$0xff]   ;;  %s15518_s25 = smov (!%p314_p3, %s7153_s25), 1  ;;  %vm7058_vm0 = vcmask 1043456  }
  0x12   : > { %v8699_v37 = vld [vmem:[%s15513_s4 + $0x52c] ss:$16 sps:$4 sm:$0xff]   ;;  %v8701_v38 = vld [vmem:[%s15513_s4 + $0x520] ss:$16 sps:$4 sm:$0xff]   ;;  %v8702_v39 = vld [vmem:[%s15513_s4 + $0x528] ss:$16 sps:$4 sm:$0xff]  }
  0x13   : > { %1265 = vmatpush1.bf16.msra.mxu0 %v8665_v14  ;;  %1347 = vmatpush1.bf16.msra.mxu1 %v8666_v15  ;;  %v8703_v40 = vld [vmem:[%s15513_s4 + $0x544] ss:$16 sps:$4 sm:$0xff]   ;;  %s10762_s22 = sshll.u32 %s15518_s25, 4  ;;  %v8705_v41 = vld [vmem:[%s15513_s4 + $0x54c] ss:$16 sps:$4 sm:$0xff]   ;;  %vm7059_vm1 = vcmask 523268  }
  0x14   : > { %1266 = vmatprep.subr.bf16.mxu0 %v8667_v16  ;;  %1348 = vmatprep.subr.bf16.mxu1 %v8669_v17  ;;  %v8707_v42 = vld [vmem:[%s15513_s4 + $0x540] ss:$16 sps:$4 sm:$0xff]   ;;  %v8708_v43 = vld [vmem:[%s15513_s4 + $0x548] ss:$16 sps:$4 sm:$0xff]   ;;  %s10777_s25 = scalar_lea.vmem %s15510_s1, %s10762_s22  ;;  %v8709_v44 = vld [vmem:[%s15513_s4 + $0x564] ss:$16 sps:$4 sm:$0xff]   ;;  %s11059_s20 = scalar_lea.vmem %s15509_s0, %s10762_s22 }
  0x15   : > { %v8711_v45 = vld [vmem:[%s15513_s4 + $0x56c] ss:$16 sps:$4 sm:$0xff]   ;;  %v341_v46 = vld [vmem:[%s10777_s25] sm:$0xff]  ;;  %v8714_v49 = vld [vmem:[%s15513_s4 + $0x568] ss:$16 sps:$4 sm:$0xff]   ;;  %s11473_s8 = scalar_lea.vmem %s15511_s2, %s10762_s22  ;;  %s13869_s12 = scalar_lea.vmem %s15512_s3, %s10762_s22 }
  0x16   : > { %v8713_v47 = vld [vmem:[%s15513_s4 + $0x560] ss:$16 sps:$4 sm:$0xff]   ;;  %v10789_v48 = vcombine.high %v341_v46, %v341_v46  ;;  %v8715_v50 = vld [vmem:[%s15513_s4 + $0x584] ss:$16 sps:$4 sm:$0xff]   ;;  %v8717_v51 = vld [vmem:[%s15513_s4 + $0x58c] ss:$16 sps:$4 sm:$0xff]   ;;  %v10853_v5 = vcombine.low %v341_v46, %v341_v46  ;;  %s338_s29 = scalar_lea.vmem %s15516_s7, %s10762_s22 }
  0x17   : > { %1267 = vmatpush1.bf16.msra.mxu0 %v8671_v18  ;;  %1349 = vmatpush1.bf16.msra.mxu1 %v8672_v19  ;;  %v8719_v52 = vld [vmem:[%s15513_s4 + $0x580] ss:$16 sps:$4 sm:$0xff]   ;;  %v8720_v53 = vld [vmem:[%s15513_s4 + $0x588] ss:$16 sps:$4 sm:$0xff]   ;;  %v8721_v54 = vld [vmem:[%s15513_s4 + $0x5a4] ss:$16 sps:$4 sm:$0xff]  }
  0x18   : > { %1268 = vmatprep.subr.bf16.mxu0 %v8673_v20  ;;  %1350 = vmatprep.subr.bf16.mxu1 %v8675_v21  ;;  %v8723_v55 = vld [vmem:[%s15513_s4 + $0x5ac] ss:$16 sps:$4 sm:$0xff]   ;;  %v8725_v56 = vld [vmem:[%s15513_s4 + $0x5a0] ss:$16 sps:$4 sm:$0xff]   ;;  %v8726_v57 = vld [vmem:[%s15513_s4 + $0x5a8] ss:$16 sps:$4 sm:$0xff]  }
  0x19   : > { %1290 = vmatprep.mubr.bf16.mxu0 %v10789_v48  ;;  %1372 = vmatprep.mubr.bf16.mxu1 %v10789_v48  ;;  %v8727_v58 = vld [vmem:[%s15513_s4 + $0x5c4] ss:$16 sps:$4 sm:$0xff]   ;;  %v8729_v59 = vld [vmem:[%s15513_s4 + $0x5cc] ss:$16 sps:$4 sm:$0xff]   ;;  %v8731_v60 = vld [vmem:[%s15513_s4 + $0x5c0] ss:$16 sps:$4 sm:$0xff]  }
  0x1a   : > { %v8732_v61 = vld [vmem:[%s15513_s4 + $0x5c8] ss:$16 sps:$4 sm:$0xff]   ;;  %v8733_v62 = vld [vmem:[%s15513_s4 + $0x5e4] ss:$16 sps:$4 sm:$0xff]   ;;  %v8735_v63 = vld [vmem:[%s15513_s4 + $0x5ec] ss:$16 sps:$4 sm:$0xff]  }
  0x1b   : > { %1269 = vmatpush1.bf16.msra.mxu0 %v8677_v22  ;;  %1351 = vmatpush1.bf16.msra.mxu1 %v8678_v23  ;;  %v8737_v0 = vld [vmem:[%s15513_s4 + $0x5e0] ss:$16 sps:$4 sm:$0xff]   ;;  %v8738_v1 = vld [vmem:[%s15513_s4 + $0x5e8] ss:$16 sps:$4 sm:$0xff]   ;;  %v8742_v2 = vld [vmem:[%s15513_s4 + $0x604] ss:$16 sps:$4 sm:$0xff]  }
  0x1c   : > { %1270 = vmatprep.subr.bf16.mxu0 %v8679_v24  ;;  %1352 = vmatprep.subr.bf16.mxu1 %v8681_v25  ;;  %v8745_v3 = vld [vmem:[%s15513_s4 + $0x60c] ss:$16 sps:$4 sm:$0xff]   ;;  %v8740_v4 = vld [vmem:[%s15513_s4 + $0x600] ss:$16 sps:$4 sm:$0xff]   ;;  %v8743_v6 = vld [vmem:[%s15513_s4 + $0x608] ss:$16 sps:$4 sm:$0xff]  }
  0x1d   : > { %v8749_v7 = vld [vmem:[%s15513_s4 + $0x624] ss:$16 sps:$4 sm:$0xff]   ;;  %v8752_v8 = vld [vmem:[%s15513_s4 + $0x62c] ss:$16 sps:$4 sm:$0xff]   ;;  %v8747_v9 = vld [vmem:[%s15513_s4 + $0x620] ss:$16 sps:$4 sm:$0xff]  }
  0x1e   : > { %v8750_v10 = vld [vmem:[%s15513_s4 + $0x628] ss:$16 sps:$4 sm:$0xff]   ;;  %v8755_v11 = vld [vmem:[%s15513_s4 + $0x644] ss:$16 sps:$4 sm:$0xff]   ;;  %v8758_v12 = vld [vmem:[%s15513_s4 + $0x64c] ss:$16 sps:$4 sm:$0xff]  }
  0x1f   : > { %1271 = vmatpush1.bf16.msra.mxu0 %v8683_v26  ;;  %1353 = vmatpush1.bf16.msra.mxu1 %v8684_v27  ;;  %v8753_v13 = vld [vmem:[%s15513_s4 + $0x640] ss:$16 sps:$4 sm:$0xff]   ;;  %v8756_v14 = vld [vmem:[%s15513_s4 + $0x648] ss:$16 sps:$4 sm:$0xff]   ;;  %v8761_v15 = vld [vmem:[%s15513_s4 + $0x664] ss:$16 sps:$4 sm:$0xff]  }
  0x20   : > { %1272 = vmatprep.subr.bf16.mxu0 %v8685_v28  ;;  %1354 = vmatprep.subr.bf16.mxu1 %v8687_v29  ;;  %v8764_v16 = vld [vmem:[%s15513_s4 + $0x66c] ss:$16 sps:$4 sm:$0xff]   ;;  %v8759_v17 = vld [vmem:[%s15513_s4 + $0x660] ss:$16 sps:$4 sm:$0xff]   ;;  %v8762_v18 = vld [vmem:[%s15513_s4 + $0x668] ss:$16 sps:$4 sm:$0xff]  }
  0x21   : > { %v8767_v19 = vld [vmem:[%s15513_s4 + $0x684] ss:$16 sps:$4 sm:$0xff]   ;;  %v8770_v20 = vld [vmem:[%s15513_s4 + $0x68c] ss:$16 sps:$4 sm:$0xff]   ;;  %v8765_v21 = vld [vmem:[%s15513_s4 + $0x680] ss:$16 sps:$4 sm:$0xff]  }
  0x22   : > { %v8768_v22 = vld [vmem:[%s15513_s4 + $0x688] ss:$16 sps:$4 sm:$0xff]   ;;  %v8773_v23 = vld [vmem:[%s15513_s4 + $0x6a4] ss:$16 sps:$4 sm:$0xff]   ;;  %v8776_v24 = vld [vmem:[%s15513_s4 + $0x6ac] ss:$16 sps:$4 sm:$0xff]  }
  0x23   : > { %1273 = vmatpush1.bf16.msra.mxu0 %v8689_v30  ;;  %1355 = vmatpush1.bf16.msra.mxu1 %v8690_v31  ;;  %v8771_v25 = vld [vmem:[%s15513_s4 + $0x6a0] ss:$16 sps:$4 sm:$0xff]   ;;  %v8774_v26 = vld [vmem:[%s15513_s4 + $0x6a8] ss:$16 sps:$4 sm:$0xff]   ;;  %v8779_v27 = vld [vmem:[%s15513_s4 + $0x6c4] ss:$16 sps:$4 sm:$0xff]  }
  0x24   : > { %1274 = vmatprep.subr.bf16.mxu0 %v8691_v32  ;;  %1356 = vmatprep.subr.bf16.mxu1 %v8693_v33  ;;  %v8782_v28 = vld [vmem:[%s15513_s4 + $0x6cc] ss:$16 sps:$4 sm:$0xff]   ;;  %v8777_v31 = vld [vmem:[%s15513_s4 + $0x6c0] ss:$16 sps:$4 sm:$0xff]   ;;  %v8780_v32 = vld [vmem:[%s15513_s4 + $0x6c8] ss:$16 sps:$4 sm:$0xff]  }
  0x25   : > { %v10927_v29 = vld [vmem:[%s10777_s25 + $0x8] sm:$0xff]  ;;  %v8785_v33 = vld [vmem:[%s15513_s4 + $0x6e4] ss:$16 sps:$4 sm:$0xff]   ;;  %vm7060_vm2 = vmor %vm7059_vm1, %vm7058_vm0 }
  0x26   : > { %v10931_v30 = vcombine.high %v10927_v29, %v10927_v29  ;;  %v8806_v46 = vld [vmem:[%s15513_s4 + $0x74c] ss:$16 sps:$4 sm:$0xff]  }
  0x27   : > { %1275 = vmatpush1.bf16.msra.mxu0 %v8695_v34  ;;  %1357 = vmatpush1.bf16.msra.mxu1 %v8696_v35  ;;  %v8788_v34 = vld [vmem:[%s15513_s4 + $0x6ec] ss:$16 sps:$4 sm:$0xff]   ;;  %v8783_v35 = vld [vmem:[%s15513_s4 + $0x6e0] ss:$16 sps:$4 sm:$0xff]  }
  0x28   : > { %1276 = vmatprep.subr.bf16.mxu0 %v8697_v36  ;;  %1358 = vmatprep.subr.bf16.mxu1 %v8699_v37  ;;  %v8786_v36 = vld [vmem:[%s15513_s4 + $0x6e8] ss:$16 sps:$4 sm:$0xff]   ;;  %v8791_v37 = vld [vmem:[%s15513_s4 + $0x704] ss:$16 sps:$4 sm:$0xff]  }
  0x2b   : > { %1277 = vmatpush1.bf16.msra.mxu0 %v8701_v38  ;;  %1359 = vmatpush1.bf16.msra.mxu1 %v8702_v39  ;;  %v8794_v38 = vld [vmem:[%s15513_s4 + $0x70c] ss:$16 sps:$4 sm:$0xff]   ;;  %v8789_v39 = vld [vmem:[%s15513_s4 + $0x700] ss:$16 sps:$4 sm:$0xff]  }
  0x2c   : > { %1278 = vmatprep.subr.bf16.mxu0 %v8703_v40  ;;  %1360 = vmatprep.subr.bf16.mxu1 %v8705_v41  ;;  %v8792_v40 = vld [vmem:[%s15513_s4 + $0x708] ss:$16 sps:$4 sm:$0xff]   ;;  %v8797_v41 = vld [vmem:[%s15513_s4 + $0x724] ss:$16 sps:$4 sm:$0xff]  }
  0x2f   : > { %1279 = vmatpush1.bf16.msra.mxu0 %v8707_v42  ;;  %1361 = vmatpush1.bf16.msra.mxu1 %v8708_v43  ;;  %v8800_v42 = vld [vmem:[%s15513_s4 + $0x72c] ss:$16 sps:$4 sm:$0xff]   ;;  %v8795_v43 = vld [vmem:[%s15513_s4 + $0x720] ss:$16 sps:$4 sm:$0xff]  }
  0x30   : > { %1280 = vmatprep.subr.bf16.mxu0 %v8709_v44  ;;  %1362 = vmatprep.subr.bf16.mxu1 %v8711_v45  ;;  %v8798_v44 = vld [vmem:[%s15513_s4 + $0x728] ss:$16 sps:$4 sm:$0xff]   ;;  %v8803_v45 = vld [vmem:[%s15513_s4 + $0x744] ss:$16 sps:$4 sm:$0xff]  }
  0x33   : > { %1281 = vmatpush1.bf16.msra.mxu0 %v8713_v47  ;;  %1363 = vmatpush1.bf16.msra.mxu1 %v8714_v49  ;;  %v8801_v47 = vld [vmem:[%s15513_s4 + $0x740] ss:$16 sps:$4 sm:$0xff]   ;;  %v8804_v49 = vld [vmem:[%s15513_s4 + $0x748] ss:$16 sps:$4 sm:$0xff]  }
  0x34   : > { %1282 = vmatprep.subr.bf16.mxu0 %v8715_v50  ;;  %1364 = vmatprep.subr.bf16.mxu1 %v8717_v51  ;;  %v8809_v50 = vld [vmem:[%s15513_s4 + $0x764] ss:$16 sps:$4 sm:$0xff]   ;;  %v8812_v51 = vld [vmem:[%s15513_s4 + $0x76c] ss:$16 sps:$4 sm:$0xff]  }
  0x37   : > { %1283 = vmatpush1.bf16.msra.mxu0 %v8719_v52  ;;  %1365 = vmatpush1.bf16.msra.mxu1 %v8720_v53  ;;  %v8807_v52 = vld [vmem:[%s15513_s4 + $0x760] ss:$16 sps:$4 sm:$0xff]   ;;  %v8810_v53 = vld [vmem:[%s15513_s4 + $0x768] ss:$16 sps:$4 sm:$0xff]  }
  0x38   : > { %1284 = vmatprep.subr.bf16.mxu0 %v8721_v54  ;;  %1366 = vmatprep.subr.bf16.mxu1 %v8723_v55  ;;  %v8815_v54 = vld [vmem:[%s15513_s4 + $0x784] ss:$16 sps:$4 sm:$0xff]   ;;  %v8818_v55 = vld [vmem:[%s15513_s4 + $0x78c] ss:$16 sps:$4 sm:$0xff]  }
  0x3b   : > { %1285 = vmatpush1.bf16.msra.mxu0 %v8725_v56  ;;  %1367 = vmatpush1.bf16.msra.mxu1 %v8726_v57  ;;  %v8813_v56 = vld [vmem:[%s15513_s4 + $0x780] ss:$16 sps:$4 sm:$0xff]   ;;  %v8816_v57 = vld [vmem:[%s15513_s4 + $0x788] ss:$16 sps:$4 sm:$0xff]  }
  0x3c   : > { %1286 = vmatprep.subr.bf16.mxu0 %v8727_v58  ;;  %1368 = vmatprep.subr.bf16.mxu1 %v8729_v59  ;;  %v8821_v58 = vld [vmem:[%s15513_s4 + $0x7a4] ss:$16 sps:$4 sm:$0xff]   ;;  %v8824_v59 = vld [vmem:[%s15513_s4 + $0x7ac] ss:$16 sps:$4 sm:$0xff]  }
  0x3f   : > { %1287 = vmatpush1.bf16.msra.mxu0 %v8731_v60  ;;  %1369 = vmatpush1.bf16.msra.mxu1 %v8732_v61  ;;  %v8819_v60 = vld [vmem:[%s15513_s4 + $0x7a0] ss:$16 sps:$4 sm:$0xff]   ;;  %v8822_v61 = vld [vmem:[%s15513_s4 + $0x7a8] ss:$16 sps:$4 sm:$0xff]  }
  0x40   : > { %1288 = vmatprep.subr.bf16.mxu0 %v8733_v62  ;;  %1370 = vmatprep.subr.bf16.mxu1 %v8735_v63  ;;  %v8827_v62 = vld [vmem:[%s15513_s4 + $0x7c4] ss:$16 sps:$4 sm:$0xff]   ;;  %v8830_v63 = vld [vmem:[%s15513_s4 + $0x7cc] ss:$16 sps:$4 sm:$0xff]  }
  0x43   : > { %1289 = vmatpush1.bf16.msra.mxu0 %v8737_v0  ;;  %1371 = vmatpush1.bf16.msra.mxu1 %v8738_v1  ;;  %v8825_v0 = vld [vmem:[%s15513_s4 + $0x7c0] ss:$16 sps:$4 sm:$0xff]   ;;  %v8828_v1 = vld [vmem:[%s15513_s4 + $0x7c8] ss:$16 sps:$4 sm:$0xff]  }
  0x44   : > { %1299 = vmatprep.subr.bf16.mxu0 %v8742_v2  ;;  %1381 = vmatprep.subr.bf16.mxu1 %v8745_v3  ;;  %v8833_v2 = vld [vmem:[%s15513_s4 + $0x7e4] ss:$16 sps:$4 sm:$0xff]   ;;  %v8836_v3 = vld [vmem:[%s15513_s4 + $0x7ec] ss:$16 sps:$4 sm:$0xff]  }
  0x46   : > { %1291 = vmatmul.mubr.bf16.vlgmr.msra.gmra.mrb[0].mxu0 %v10853_v5  ;;  %1373 = vmatmul.mubr.bf16.vlgmr.msra.gmra.mrb[0].mxu1 %v10853_v5 }
  0x47   : > { %1300 = vmatpush1.bf16.msra.mxu0 %v8740_v4  ;;  %1382 = vmatpush1.bf16.msra.mxu1 %v8743_v6  ;;  %v8831_v4 = vld [vmem:[%s15513_s4 + $0x7e0] ss:$16 sps:$4 sm:$0xff]   ;;  %v8834_v6 = vld [vmem:[%s15513_s4 + $0x7e8] ss:$16 sps:$4 sm:$0xff]  }
  0x48   : > { %1301 = vmatprep.subr.bf16.mxu0 %v8749_v7  ;;  %1383 = vmatprep.subr.bf16.mxu1 %v8752_v8  ;;  %v8840_v7 = vld [vmem:[%s15513_s4 + $0x4] ss:$16 sps:$4 sm:$0xff]   ;;  %v8843_v8 = vld [vmem:[%s15513_s4 + $0xc] ss:$16 sps:$4 sm:$0xff]  }
  0x49   : > { %1331 = vmatprep.mubr.bf16.mxu0 %v10931_v30  ;;  %1413 = vmatprep.mubr.bf16.mxu1 %v10931_v30 }
  0x4b   : > { %1302 = vmatpush1.bf16.msra.mxu0 %v8747_v9  ;;  %1384 = vmatpush1.bf16.msra.mxu1 %v8750_v10  ;;  %v8838_v9 = vld [vmem:[%s15513_s4] ss:$16 sps:$4 sm:$0xff]   ;;  %v11066_v10 = vcombine.low %v10927_v29, %v10927_v29  ;;  %v8866_v29 = vld [vmem:[%s15513_s4 + $0x88] ss:$16 sps:$4 sm:$0xff]  }
  0x4c   : > { %1303 = vmatprep.subr.bf16.mxu0 %v8755_v11  ;;  %1385 = vmatprep.subr.bf16.mxu1 %v8758_v12  ;;  %v8841_v11 = vld [vmem:[%s15513_s4 + $0x8] ss:$16 sps:$4 sm:$0xff]   ;;  %v8847_v12 = vld [vmem:[%s15513_s4 + $0x24] ss:$16 sps:$4 sm:$0xff]  }
  0x4f   : > { %1304 = vmatpush1.bf16.msra.mxu0 %v8753_v13  ;;  %1386 = vmatpush1.bf16.msra.mxu1 %v8756_v14  ;;  %v11075_v13 = vld [vmem:[%s11059_s20] sm:$0xff]  ;;  %v8850_v14 = vld [vmem:[%s15513_s4 + $0x2c] ss:$16 sps:$4 sm:$0xff]  }
  0x50   : > { %1305 = vmatprep.subr.bf16.mxu0 %v8761_v15  ;;  %1387 = vmatprep.subr.bf16.mxu1 %v8764_v16  ;;  %v11082_v15 = vcombine.high %v11075_v13, %v11075_v13  ;;  %v8845_v16 = vld [vmem:[%s15513_s4 + $0x20] ss:$16 sps:$4 sm:$0xff]  }
  0x53   : > { %1306 = vmatpush1.bf16.msra.mxu0 %v8759_v17  ;;  %1388 = vmatpush1.bf16.msra.mxu1 %v8762_v18  ;;  %v8848_v17 = vld [vmem:[%s15513_s4 + $0x28] ss:$16 sps:$4 sm:$0xff]   ;;  %v8853_v18 = vld [vmem:[%s15513_s4 + $0x44] ss:$16 sps:$4 sm:$0xff]  }
  0x54   : > { %1307 = vmatprep.subr.bf16.mxu0 %v8767_v19  ;;  %1389 = vmatprep.subr.bf16.mxu1 %v8770_v20  ;;  %v8856_v19 = vld [vmem:[%s15513_s4 + $0x4c] ss:$16 sps:$4 sm:$0xff]   ;;  %v8851_v20 = vld [vmem:[%s15513_s4 + $0x40] ss:$16 sps:$4 sm:$0xff]  }
  0x57   : > { %1308 = vmatpush1.bf16.msra.mxu0 %v8765_v21  ;;  %1390 = vmatpush1.bf16.msra.mxu1 %v8768_v22  ;;  %v8854_v21 = vld [vmem:[%s15513_s4 + $0x48] ss:$16 sps:$4 sm:$0xff]   ;;  %v8859_v22 = vld [vmem:[%s15513_s4 + $0x64] ss:$16 sps:$4 sm:$0xff]  }
  0x58   : > { %1309 = vmatprep.subr.bf16.mxu0 %v8773_v23  ;;  %1391 = vmatprep.subr.bf16.mxu1 %v8776_v24  ;;  %v8862_v23 = vld [vmem:[%s15513_s4 + $0x6c] ss:$16 sps:$4 sm:$0xff]   ;;  %v8857_v24 = vld [vmem:[%s15513_s4 + $0x60] ss:$16 sps:$4 sm:$0xff]  }
  0x5b   : > { %1310 = vmatpush1.bf16.msra.mxu0 %v8771_v25  ;;  %1392 = vmatpush1.bf16.msra.mxu1 %v8774_v26  ;;  %v8860_v25 = vld [vmem:[%s15513_s4 + $0x68] ss:$16 sps:$4 sm:$0xff]   ;;  %v8865_v26 = vld [vmem:[%s15513_s4 + $0x84] ss:$16 sps:$4 sm:$0xff]  }
  0x5c   : > { %1311 = vmatprep.subr.bf16.mxu0 %v8779_v27  ;;  %1393 = vmatprep.subr.bf16.mxu1 %v8782_v28  ;;  %v8868_v27 = vld [vmem:[%s15513_s4 + $0x8c] ss:$16 sps:$4 sm:$0xff]   ;;  %v8863_v28 = vld [vmem:[%s15513_s4 + $0x80] ss:$16 sps:$4 sm:$0xff]  }
  0x5f   : > { %1312 = vmatpush1.bf16.msra.mxu0 %v8777_v31  ;;  %1394 = vmatpush1.bf16.msra.mxu1 %v8780_v32  ;;  %v8871_v31 = vld [vmem:[%s15513_s4 + $0xa4] ss:$16 sps:$4 sm:$0xff]   ;;  %v8874_v32 = vld [vmem:[%s15513_s4 + $0xac] ss:$16 sps:$4 sm:$0xff]  }
  0x60   : > { %1313 = vmatprep.subr.bf16.mxu0 %v8785_v33  ;;  %1395 = vmatprep.subr.bf16.mxu1 %v8788_v34  ;;  %v8869_v33 = vld [vmem:[%s15513_s4 + $0xa0] ss:$16 sps:$4 sm:$0xff]   ;;  %v8872_v34 = vld [vmem:[%s15513_s4 + $0xa8] ss:$16 sps:$4 sm:$0xff]  }
  0x63   : > { %1314 = vmatpush1.bf16.msra.mxu0 %v8783_v35  ;;  %1396 = vmatpush1.bf16.msra.mxu1 %v8786_v36  ;;  %v8877_v35 = vld [vmem:[%s15513_s4 + $0xc4] ss:$16 sps:$4 sm:$0xff]   ;;  %v8880_v36 = vld [vmem:[%s15513_s4 + $0xcc] ss:$16 sps:$4 sm:$0xff]  }
  0x64   : > { %1315 = vmatprep.subr.bf16.mxu0 %v8791_v37  ;;  %1397 = vmatprep.subr.bf16.mxu1 %v8794_v38  ;;  %v8875_v37 = vld [vmem:[%s15513_s4 + $0xc0] ss:$16 sps:$4 sm:$0xff]   ;;  %v8878_v38 = vld [vmem:[%s15513_s4 + $0xc8] ss:$16 sps:$4 sm:$0xff]  }
  0x67   : > { %1316 = vmatpush1.bf16.msra.mxu0 %v8789_v39  ;;  %1398 = vmatpush1.bf16.msra.mxu1 %v8792_v40  ;;  %v8883_v39 = vld [vmem:[%s15513_s4 + $0xe4] ss:$16 sps:$4 sm:$0xff]   ;;  %v8886_v40 = vld [vmem:[%s15513_s4 + $0xec] ss:$16 sps:$4 sm:$0xff]  }
  0x68   : > { %1317 = vmatprep.subr.bf16.mxu0 %v8797_v41  ;;  %1399 = vmatprep.subr.bf16.mxu1 %v8800_v42  ;;  %v8881_v41 = vld [vmem:[%s15513_s4 + $0xe0] ss:$16 sps:$4 sm:$0xff]   ;;  %v8884_v42 = vld [vmem:[%s15513_s4 + $0xe8] ss:$16 sps:$4 sm:$0xff]  }
  0x6b   : > { %1318 = vmatpush1.bf16.msra.mxu0 %v8795_v43  ;;  %1400 = vmatpush1.bf16.msra.mxu1 %v8798_v44  ;;  %v8889_v43 = vld [vmem:[%s15513_s4 + $0x104] ss:$16 sps:$4 sm:$0xff]   ;;  %v8892_v44 = vld [vmem:[%s15513_s4 + $0x10c] ss:$16 sps:$4 sm:$0xff]  }
  0x6c   : > { %1319 = vmatprep.subr.bf16.mxu0 %v8803_v45  ;;  %1401 = vmatprep.subr.bf16.mxu1 %v8806_v46  ;;  %v8887_v45 = vld [vmem:[%s15513_s4 + $0x100] ss:$16 sps:$4 sm:$0xff]   ;;  %v8890_v46 = vld [vmem:[%s15513_s4 + $0x108] ss:$16 sps:$4 sm:$0xff]  }
  0x6f   : > { %1320 = vmatpush1.bf16.msra.mxu0 %v8801_v47  ;;  %1402 = vmatpush1.bf16.msra.mxu1 %v8804_v49  ;;  %v8895_v47 = vld [vmem:[%s15513_s4 + $0x124] ss:$16 sps:$4 sm:$0xff]   ;;  %v8898_v49 = vld [vmem:[%s15513_s4 + $0x12c] ss:$16 sps:$4 sm:$0xff]  }
  0x70   : > { %1321 = vmatprep.subr.bf16.mxu0 %v8809_v50  ;;  %1403 = vmatprep.subr.bf16.mxu1 %v8812_v51  ;;  %v8893_v50 = vld [vmem:[%s15513_s4 + $0x120] ss:$16 sps:$4 sm:$0xff]   ;;  %v8896_v51 = vld [vmem:[%s15513_s4 + $0x128] ss:$16 sps:$4 sm:$0xff]  }
  0x73   : > { %1322 = vmatpush1.bf16.msra.mxu0 %v8807_v52  ;;  %1404 = vmatpush1.bf16.msra.mxu1 %v8810_v53  ;;  %v8901_v52 = vld [vmem:[%s15513_s4 + $0x144] ss:$16 sps:$4 sm:$0xff]   ;;  %v8904_v53 = vld [vmem:[%s15513_s4 + $0x14c] ss:$16 sps:$4 sm:$0xff]  }
  0x74   : > { %1323 = vmatprep.subr.bf16.mxu0 %v8815_v54  ;;  %1405 = vmatprep.subr.bf16.mxu1 %v8818_v55  ;;  %v8899_v54 = vld [vmem:[%s15513_s4 + $0x140] ss:$16 sps:$4 sm:$0xff]   ;;  %v8902_v55 = vld [vmem:[%s15513_s4 + $0x148] ss:$16 sps:$4 sm:$0xff]  }
  0x77   : > { %1324 = vmatpush1.bf16.msra.mxu0 %v8813_v56  ;;  %1406 = vmatpush1.bf16.msra.mxu1 %v8816_v57  ;;  %v8907_v56 = vld [vmem:[%s15513_s4 + $0x164] ss:$16 sps:$4 sm:$0xff]   ;;  %v8910_v57 = vld [vmem:[%s15513_s4 + $0x16c] ss:$16 sps:$4 sm:$0xff]  }
  0x78   : > { %1325 = vmatprep.subr.bf16.mxu0 %v8821_v58  ;;  %1407 = vmatprep.subr.bf16.mxu1 %v8824_v59  ;;  %v8905_v58 = vld [vmem:[%s15513_s4 + $0x160] ss:$16 sps:$4 sm:$0xff]   ;;  %v8908_v59 = vld [vmem:[%s15513_s4 + $0x168] ss:$16 sps:$4 sm:$0xff]  }
  0x7b   : > { %1326 = vmatpush1.bf16.msra.mxu0 %v8819_v60  ;;  %1408 = vmatpush1.bf16.msra.mxu1 %v8822_v61  ;;  %v8913_v60 = vld [vmem:[%s15513_s4 + $0x184] ss:$16 sps:$4 sm:$0xff]   ;;  %v8916_v61 = vld [vmem:[%s15513_s4 + $0x18c] ss:$16 sps:$4 sm:$0xff]  }
  0x7c   : > { %1327 = vmatprep.subr.bf16.mxu0 %v8827_v62  ;;  %1409 = vmatprep.subr.bf16.mxu1 %v8830_v63  ;;  %v8911_v62 = vld [vmem:[%s15513_s4 + $0x180] ss:$16 sps:$4 sm:$0xff]   ;;  %v8914_v63 = vld [vmem:[%s15513_s4 + $0x188] ss:$16 sps:$4 sm:$0xff]  }
  0x7f   : > { %1328 = vmatpush1.bf16.msra.mxu0 %v8825_v0  ;;  %1410 = vmatpush1.bf16.msra.mxu1 %v8828_v1  ;;  %v8919_v0 = vld [vmem:[%s15513_s4 + $0x1a4] ss:$16 sps:$4 sm:$0xff]   ;;  %v8922_v1 = vld [vmem:[%s15513_s4 + $0x1ac] ss:$16 sps:$4 sm:$0xff]  }
  0x80   : > { %1329 = vmatprep.subr.bf16.mxu0 %v8833_v2  ;;  %1411 = vmatprep.subr.bf16.mxu1 %v8836_v3  ;;  %v8917_v2 = vld [vmem:[%s15513_s4 + $0x1a0] ss:$16 sps:$4 sm:$0xff]   ;;  %v8920_v3 = vld [vmem:[%s15513_s4 + $0x1a8] ss:$16 sps:$4 sm:$0xff]  }
  0x83   : > { %1330 = vmatpush1.bf16.msra.mxu0 %v8831_v4  ;;  %1412 = vmatpush1.bf16.msra.mxu1 %v8834_v6  ;;  %v8925_v4 = vld [vmem:[%s15513_s4 + $0x1c4] ss:$16 sps:$4 sm:$0xff]   ;;  %v8928_v6 = vld [vmem:[%s15513_s4 + $0x1cc] ss:$16 sps:$4 sm:$0xff]  }
  0x84   : > { %2076 = vmatprep.subr.bf16.mxu0 %v8840_v7  ;;  %2158 = vmatprep.subr.bf16.mxu1 %v8843_v8  ;;  %v8923_v7 = vld [vmem:[%s15513_s4 + $0x1c0] ss:$16 sps:$4 sm:$0xff]   ;;  %v8926_v8 = vld [vmem:[%s15513_s4 + $0x1c8] ss:$16 sps:$4 sm:$0xff]  }
  0x86   : > { %1332 = vmatmul.mubr.bf16.vlgmr.msra.gmra.mrb[0].mxu0 %v11066_v10  ;;  %1414 = vmatmul.mubr.bf16.vlgmr.msra.gmra.mrb[0].mxu1 %v11066_v10 }
  0x87   : > { %2077 = vmatpush1.bf16.msra.mxu0 %v8838_v9  ;;  %2159 = vmatpush1.bf16.msra.mxu1 %v8841_v11  ;;  %v8931_v9 = vld [vmem:[%s15513_s4 + $0x1e4] ss:$16 sps:$4 sm:$0xff]   ;;  %v8934_v11 = vld [vmem:[%s15513_s4 + $0x1ec] ss:$16 sps:$4 sm:$0xff]  }
  0x88   : > { %2078 = vmatprep.subr.bf16.mxu0 %v8847_v12  ;;  %2160 = vmatprep.subr.bf16.mxu1 %v8850_v14  ;;  %v8929_v12 = vld [vmem:[%s15513_s4 + $0x1e0] ss:$16 sps:$4 sm:$0xff]   ;;  %v8932_v14 = vld [vmem:[%s15513_s4 + $0x1e8] ss:$16 sps:$4 sm:$0xff]  }
  0x89   : > { %2108 = vmatprep.mubr.bf16.mxu0 %v11082_v15  ;;  %2190 = vmatprep.mubr.bf16.mxu1 %v11082_v15 }
  0x8b   : > { %2079 = vmatpush1.bf16.msra.mxu0 %v8845_v16  ;;  %2161 = vmatpush1.bf16.msra.mxu1 %v8848_v17  ;;  %v8938_v16 = vld [vmem:[%s15513_s4 + $0x204] ss:$16 sps:$4 sm:$0xff]   ;;  %v8941_v17 = vld [vmem:[%s15513_s4 + $0x20c] ss:$16 sps:$4 sm:$0xff]  }
  0x8c   : > { %2080 = vmatprep.subr.bf16.mxu0 %v8853_v18  ;;  %2162 = vmatprep.subr.bf16.mxu1 %v8856_v19  ;;  %v8936_v18 = vld [vmem:[%s15513_s4 + $0x200] ss:$16 sps:$4 sm:$0xff]   ;;  %v8939_v19 = vld [vmem:[%s15513_s4 + $0x208] ss:$16 sps:$4 sm:$0xff]  }
  0x8f   : > { %2081 = vmatpush1.bf16.msra.mxu0 %v8851_v20  ;;  %2163 = vmatpush1.bf16.msra.mxu1 %v8854_v21  ;;  %v11276_v20 = vcombine.low %v11075_v13, %v11075_v13  ;;  %v11279_v21 = vld [vmem:[%s11059_s20 + $0x8] sm:$0xff]  ;;  %v8943_v13 = vld [vmem:[%s15513_s4 + $0x220] ss:$16 sps:$4 sm:$0xff]  }
  0x90   : > { %2082 = vmatprep.subr.bf16.mxu0 %v8859_v22  ;;  %2164 = vmatprep.subr.bf16.mxu1 %v8862_v23  ;;  %v8945_v22 = vld [vmem:[%s15513_s4 + $0x224] ss:$16 sps:$4 sm:$0xff]   ;;  %v8948_v23 = vld [vmem:[%s15513_s4 + $0x22c] ss:$16 sps:$4 sm:$0xff]  }
  0x93   : > { %2083 = vmatpush1.bf16.msra.mxu0 %v8857_v24  ;;  %2165 = vmatpush1.bf16.msra.mxu1 %v8860_v25  ;;  %v11289_v24 = vcombine.high %v11279_v21, %v11279_v21  ;;  %v8946_v25 = vld [vmem:[%s15513_s4 + $0x228] ss:$16 sps:$4 sm:$0xff]  }
  0x94   : > { %2084 = vmatprep.subr.bf16.mxu0 %v8865_v26  ;;  %2166 = vmatprep.subr.bf16.mxu1 %v8868_v27  ;;  %v8951_v26 = vld [vmem:[%s15513_s4 + $0x244] ss:$16 sps:$4 sm:$0xff]   ;;  %v8954_v27 = vld [vmem:[%s15513_s4 + $0x24c] ss:$16 sps:$4 sm:$0xff]  }
  0x97   : > { %2085 = vmatpush1.bf16.msra.mxu0 %v8863_v28  ;;  %2167 = vmatpush1.bf16.msra.mxu1 %v8866_v29  ;;  %v8949_v28 = vld [vmem:[%s15513_s4 + $0x240] ss:$16 sps:$4 sm:$0xff]   ;;  %v8952_v29 = vld [vmem:[%s15513_s4 + $0x248] ss:$16 sps:$4 sm:$0xff]  }
  0x98   : > { %2086 = vmatprep.subr.bf16.mxu0 %v8871_v31  ;;  %2168 = vmatprep.subr.bf16.mxu1 %v8874_v32  ;;  %v8957_v31 = vld [vmem:[%s15513_s4 + $0x264] ss:$16 sps:$4 sm:$0xff]   ;;  %v8960_v32 = vld [vmem:[%s15513_s4 + $0x26c] ss:$16 sps:$4 sm:$0xff]  }
  0x9b   : > { %2087 = vmatpush1.bf16.msra.mxu0 %v8869_v33  ;;  %2169 = vmatpush1.bf16.msra.mxu1 %v8872_v34  ;;  %v8955_v33 = vld [vmem:[%s15513_s4 + $0x260] ss:$16 sps:$4 sm:$0xff]   ;;  %v8958_v34 = vld [vmem:[%s15513_s4 + $0x268] ss:$16 sps:$4 sm:$0xff]  }
  0x9c   : > { %2088 = vmatprep.subr.bf16.mxu0 %v8877_v35  ;;  %2170 = vmatprep.subr.bf16.mxu1 %v8880_v36  ;;  %v8963_v35 = vld [vmem:[%s15513_s4 + $0x284] ss:$16 sps:$4 sm:$0xff]   ;;  %v8966_v36 = vld [vmem:[%s15513_s4 + $0x28c] ss:$16 sps:$4 sm:$0xff]  }
  0x9f   : > { %2089 = vmatpush1.bf16.msra.mxu0 %v8875_v37  ;;  %2171 = vmatpush1.bf16.msra.mxu1 %v8878_v38  ;;  %v8961_v37 = vld [vmem:[%s15513_s4 + $0x280] ss:$16 sps:$4 sm:$0xff]   ;;  %v8964_v38 = vld [vmem:[%s15513_s4 + $0x288] ss:$16 sps:$4 sm:$0xff]  }
  0xa0   : > { %2090 = vmatprep.subr.bf16.mxu0 %v8883_v39  ;;  %2172 = vmatprep.subr.bf16.mxu1 %v8886_v40  ;;  %v8969_v39 = vld [vmem:[%s15513_s4 + $0x2a4] ss:$16 sps:$4 sm:$0xff]   ;;  %v8972_v40 = vld [vmem:[%s15513_s4 + $0x2ac] ss:$16 sps:$4 sm:$0xff]  }
  0xa3   : > { %2091 = vmatpush1.bf16.msra.mxu0 %v8881_v41  ;;  %2173 = vmatpush1.bf16.msra.mxu1 %v8884_v42  ;;  %v8967_v41 = vld [vmem:[%s15513_s4 + $0x2a0] ss:$16 sps:$4 sm:$0xff]   ;;  %v8970_v42 = vld [vmem:[%s15513_s4 + $0x2a8] ss:$16 sps:$4 sm:$0xff]  }
  0xa4   : > { %2092 = vmatprep.subr.bf16.mxu0 %v8889_v43  ;;  %2174 = vmatprep.subr.bf16.mxu1 %v8892_v44  ;;  %v8975_v43 = vld [vmem:[%s15513_s4 + $0x2c4] ss:$16 sps:$4 sm:$0xff]   ;;  %v8978_v44 = vld [vmem:[%s15513_s4 + $0x2cc] ss:$16 sps:$4 sm:$0xff]  }
  0xa7   : > { %2093 = vmatpush1.bf16.msra.mxu0 %v8887_v45  ;;  %2175 = vmatpush1.bf16.msra.mxu1 %v8890_v46  ;;  %v8973_v45 = vld [vmem:[%s15513_s4 + $0x2c0] ss:$16 sps:$4 sm:$0xff]   ;;  %v8976_v46 = vld [vmem:[%s15513_s4 + $0x2c8] ss:$16 sps:$4 sm:$0xff]  }
  0xa8   : > { %2094 = vmatprep.subr.bf16.mxu0 %v8895_v47  ;;  %2176 = vmatprep.subr.bf16.mxu1 %v8898_v49  ;;  %v8981_v47 = vld [vmem:[%s15513_s4 + $0x2e4] ss:$16 sps:$4 sm:$0xff]   ;;  %v8984_v49 = vld [vmem:[%s15513_s4 + $0x2ec] ss:$16 sps:$4 sm:$0xff]  }
  0xab   : > { %2095 = vmatpush1.bf16.msra.mxu0 %v8893_v50  ;;  %2177 = vmatpush1.bf16.msra.mxu1 %v8896_v51  ;;  %v8979_v50 = vld [vmem:[%s15513_s4 + $0x2e0] ss:$16 sps:$4 sm:$0xff]   ;;  %v8982_v51 = vld [vmem:[%s15513_s4 + $0x2e8] ss:$16 sps:$4 sm:$0xff]  }
  0xac   : > { %2096 = vmatprep.subr.bf16.mxu0 %v8901_v52  ;;  %2178 = vmatprep.subr.bf16.mxu1 %v8904_v53  ;;  %v8987_v52 = vld [vmem:[%s15513_s4 + $0x304] ss:$16 sps:$4 sm:$0xff]   ;;  %v8990_v53 = vld [vmem:[%s15513_s4 + $0x30c] ss:$16 sps:$4 sm:$0xff]  }
  0xaf   : > { %2097 = vmatpush1.bf16.msra.mxu0 %v8899_v54  ;;  %2179 = vmatpush1.bf16.msra.mxu1 %v8902_v55  ;;  %v8985_v54 = vld [vmem:[%s15513_s4 + $0x300] ss:$16 sps:$4 sm:$0xff]   ;;  %v8988_v55 = vld [vmem:[%s15513_s4 + $0x308] ss:$16 sps:$4 sm:$0xff]  }
  0xb0   : > { %2098 = vmatprep.subr.bf16.mxu0 %v8907_v56  ;;  %2180 = vmatprep.subr.bf16.mxu1 %v8910_v57  ;;  %v8993_v56 = vld [vmem:[%s15513_s4 + $0x324] ss:$16 sps:$4 sm:$0xff]   ;;  %v8996_v57 = vld [vmem:[%s15513_s4 + $0x32c] ss:$16 sps:$4 sm:$0xff]  }
  0xb3   : > { %2099 = vmatpush1.bf16.msra.mxu0 %v8905_v58  ;;  %2181 = vmatpush1.bf16.msra.mxu1 %v8908_v59  ;;  %v8991_v58 = vld [vmem:[%s15513_s4 + $0x320] ss:$16 sps:$4 sm:$0xff]   ;;  %v8994_v59 = vld [vmem:[%s15513_s4 + $0x328] ss:$16 sps:$4 sm:$0xff]  }
  0xb4   : > { %2100 = vmatprep.subr.bf16.mxu0 %v8913_v60  ;;  %2182 = vmatprep.subr.bf16.mxu1 %v8916_v61  ;;  %v8999_v60 = vld [vmem:[%s15513_s4 + $0x344] ss:$16 sps:$4 sm:$0xff]   ;;  %v9002_v61 = vld [vmem:[%s15513_s4 + $0x34c] ss:$16 sps:$4 sm:$0xff]  }
  0xb7   : > { %2101 = vmatpush1.bf16.msra.mxu0 %v8911_v62  ;;  %2183 = vmatpush1.bf16.msra.mxu1 %v8914_v63  ;;  %v8997_v62 = vld [vmem:[%s15513_s4 + $0x340] ss:$16 sps:$4 sm:$0xff]   ;;  %v9000_v63 = vld [vmem:[%s15513_s4 + $0x348] ss:$16 sps:$4 sm:$0xff]  }
  0xb8   : > { %2102 = vmatprep.subr.bf16.mxu0 %v8919_v0  ;;  %2184 = vmatprep.subr.bf16.mxu1 %v8922_v1  ;;  %v9005_v0 = vld [vmem:[%s15513_s4 + $0x364] ss:$16 sps:$4 sm:$0xff]   ;;  %v9008_v1 = vld [vmem:[%s15513_s4 + $0x36c] ss:$16 sps:$4 sm:$0xff]  }
  0xbb   : > { %2103 = vmatpush1.bf16.msra.mxu0 %v8917_v2  ;;  %2185 = vmatpush1.bf16.msra.mxu1 %v8920_v3  ;;  %v9003_v2 = vld [vmem:[%s15513_s4 + $0x360] ss:$16 sps:$4 sm:$0xff]   ;;  %v9006_v3 = vld [vmem:[%s15513_s4 + $0x368] ss:$16 sps:$4 sm:$0xff]  }
  0xbc   : > { %2104 = vmatprep.subr.bf16.mxu0 %v8925_v4  ;;  %2186 = vmatprep.subr.bf16.mxu1 %v8928_v6  ;;  %v9011_v4 = vld [vmem:[%s15513_s4 + $0x384] ss:$16 sps:$4 sm:$0xff]   ;;  %v9014_v6 = vld [vmem:[%s15513_s4 + $0x38c] ss:$16 sps:$4 sm:$0xff]  }
  0xbf   : > { %2105 = vmatpush1.bf16.msra.mxu0 %v8923_v7  ;;  %2187 = vmatpush1.bf16.msra.mxu1 %v8926_v8  ;;  %v9009_v7 = vld [vmem:[%s15513_s4 + $0x380] ss:$16 sps:$4 sm:$0xff]   ;;  %v9012_v8 = vld [vmem:[%s15513_s4 + $0x388] ss:$16 sps:$4 sm:$0xff]  }
  0xc0   : > { %2106 = vmatprep.subr.bf16.mxu0 %v8931_v9  ;;  %2188 = vmatprep.subr.bf16.mxu1 %v8934_v11  ;;  %v9017_v9 = vld [vmem:[%s15513_s4 + $0x3a4] ss:$16 sps:$4 sm:$0xff]   ;;  %v9020_v11 = vld [vmem:[%s15513_s4 + $0x3ac] ss:$16 sps:$4 sm:$0xff]  }
  0xc3   : > { %2107 = vmatpush1.bf16.msra.mxu0 %v8929_v12  ;;  %2189 = vmatpush1.bf16.msra.mxu1 %v8932_v14  ;;  %v9015_v12 = vld [vmem:[%s15513_s4 + $0x3a0] ss:$16 sps:$4 sm:$0xff]   ;;  %v9018_v14 = vld [vmem:[%s15513_s4 + $0x3a8] ss:$16 sps:$4 sm:$0xff]  }
  0xc4   : > { %2117 = vmatprep.subr.bf16.mxu0 %v8938_v16  ;;  %2199 = vmatprep.subr.bf16.mxu1 %v8941_v17  ;;  %v9023_v16 = vld [vmem:[%s15513_s4 + $0x3c4] ss:$16 sps:$4 sm:$0xff]   ;;  %v9026_v17 = vld [vmem:[%s15513_s4 + $0x3cc] ss:$16 sps:$4 sm:$0xff]  }
  0xc6   : > { %2109 = vmatmul.mubr.bf16.vlgmr.msra.gmra.mrb[0].mxu0 %v11276_v20  ;;  %2191 = vmatmul.mubr.bf16.vlgmr.msra.gmra.mrb[0].mxu1 %v11276_v20 }
  0xc7   : > { %2118 = vmatpush1.bf16.msra.mxu0 %v8936_v18  ;;  %2200 = vmatpush1.bf16.msra.mxu1 %v8939_v19  ;;  %v9021_v18 = vld [vmem:[%s15513_s4 + $0x3c0] ss:$16 sps:$4 sm:$0xff]   ;;  %v9024_v19 = vld [vmem:[%s15513_s4 + $0x3c8] ss:$16 sps:$4 sm:$0xff]  }
  0xc8   : > { %2119 = vmatprep.subr.bf16.mxu0 %v8945_v22  ;;  %2201 = vmatprep.subr.bf16.mxu1 %v8948_v23  ;;  %v9029_v22 = vld [vmem:[%s15513_s4 + $0x3e4] ss:$16 sps:$4 sm:$0xff]   ;;  %v9032_v23 = vld [vmem:[%s15513_s4 + $0x3ec] ss:$16 sps:$4 sm:$0xff]  }
  0xc9   : > { %2149 = vmatprep.mubr.bf16.mxu0 %v11289_v24  ;;  %2231 = vmatprep.mubr.bf16.mxu1 %v11289_v24 }
  0xcb   : > { %2120 = vmatpush1.bf16.msra.mxu0 %v8943_v13  ;;  %2202 = vmatpush1.bf16.msra.mxu1 %v8946_v25  ;;  %v9027_v13 = vld [vmem:[%s15513_s4 + $0x3e0] ss:$16 sps:$4 sm:$0xff]   ;;  %v9030_v25 = vld [vmem:[%s15513_s4 + $0x3e8] ss:$16 sps:$4 sm:$0xff]  }
  0xcc   : > { %2121 = vmatprep.subr.bf16.mxu0 %v8951_v26  ;;  %2203 = vmatprep.subr.bf16.mxu1 %v8954_v27  ;;  %v9036_v26 = vld [vmem:[%s15513_s4 + $0x804] ss:$16 sps:$4 sm:$0xff]   ;;  %v9039_v27 = vld [vmem:[%s15513_s4 + $0x80c] ss:$16 sps:$4 sm:$0xff]  }
  0xcf   : > { %2122 = vmatpush1.bf16.msra.mxu0 %v8949_v28  ;;  %2204 = vmatpush1.bf16.msra.mxu1 %v8952_v29  ;;  %v9034_v28 = vld [vmem:[%s15513_s4 + $0x800] ss:$16 sps:$4 sm:$0xff]   ;;  %v11486_v29 = vcombine.low %v11279_v21, %v11279_v21 }
  0xd0   : > { %2123 = vmatprep.subr.bf16.mxu0 %v8957_v31  ;;  %2205 = vmatprep.subr.bf16.mxu1 %v8960_v32  ;;  %v11489_v31 = vld [vmem:[%s11473_s8] sm:$0xff]  ;;  %v9037_v32 = vld [vmem:[%s15513_s4 + $0x808] ss:$16 sps:$4 sm:$0xff]  }
  0xd1   : > { %v11502_v21 = vcombine.high %v11489_v31, %v11489_v31 }
  0xd3   : > { %2124 = vmatpush1.bf16.msra.mxu0 %v8955_v33  ;;  %2206 = vmatpush1.bf16.msra.mxu1 %v8958_v34  ;;  %v9043_v33 = vld [vmem:[%s15513_s4 + $0x824] ss:$16 sps:$4 sm:$0xff]   ;;  %v9046_v34 = vld [vmem:[%s15513_s4 + $0x82c] ss:$16 sps:$4 sm:$0xff]  }
  0xd4   : > { %2125 = vmatprep.subr.bf16.mxu0 %v8963_v35  ;;  %2207 = vmatprep.subr.bf16.mxu1 %v8966_v36  ;;  %v9041_v35 = vld [vmem:[%s15513_s4 + $0x820] ss:$16 sps:$4 sm:$0xff]   ;;  %v9044_v36 = vld [vmem:[%s15513_s4 + $0x828] ss:$16 sps:$4 sm:$0xff]  }
  0xd7   : > { %2126 = vmatpush1.bf16.msra.mxu0 %v8961_v37  ;;  %2208 = vmatpush1.bf16.msra.mxu1 %v8964_v38  ;;  %v9049_v37 = vld [vmem:[%s15513_s4 + $0x844] ss:$16 sps:$4 sm:$0xff]   ;;  %v9052_v38 = vld [vmem:[%s15513_s4 + $0x84c] ss:$16 sps:$4 sm:$0xff]  }
  0xd8   : > { %2127 = vmatprep.subr.bf16.mxu0 %v8969_v39  ;;  %2209 = vmatprep.subr.bf16.mxu1 %v8972_v40  ;;  %v9047_v39 = vld [vmem:[%s15513_s4 + $0x840] ss:$16 sps:$4 sm:$0xff]   ;;  %v9050_v40 = vld [vmem:[%s15513_s4 + $0x848] ss:$16 sps:$4 sm:$0xff]  }
  0xdb   : > { %2128 = vmatpush1.bf16.msra.mxu0 %v8967_v41  ;;  %2210 = vmatpush1.bf16.msra.mxu1 %v8970_v42  ;;  %v9055_v41 = vld [vmem:[%s15513_s4 + $0x864] ss:$16 sps:$4 sm:$0xff]   ;;  %v9058_v42 = vld [vmem:[%s15513_s4 + $0x86c] ss:$16 sps:$4 sm:$0xff]  }
  0xdc   : > { %2129 = vmatprep.subr.bf16.mxu0 %v8975_v43  ;;  %2211 = vmatprep.subr.bf16.mxu1 %v8978_v44  ;;  %v9053_v43 = vld [vmem:[%s15513_s4 + $0x860] ss:$16 sps:$4 sm:$0xff]   ;;  %v9056_v44 = vld [vmem:[%s15513_s4 + $0x868] ss:$16 sps:$4 sm:$0xff]  }
  0xdf   : > { %2130 = vmatpush1.bf16.msra.mxu0 %v8973_v45  ;;  %2212 = vmatpush1.bf16.msra.mxu1 %v8976_v46  ;;  %v9061_v45 = vld [vmem:[%s15513_s4 + $0x884] ss:$16 sps:$4 sm:$0xff]   ;;  %v9064_v46 = vld [vmem:[%s15513_s4 + $0x88c] ss:$16 sps:$4 sm:$0xff]  }
  0xe0   : > { %2131 = vmatprep.subr.bf16.mxu0 %v8981_v47  ;;  %2213 = vmatprep.subr.bf16.mxu1 %v8984_v49  ;;  %v9059_v47 = vld [vmem:[%s15513_s4 + $0x880] ss:$16 sps:$4 sm:$0xff]   ;;  %v9062_v49 = vld [vmem:[%s15513_s4 + $0x888] ss:$16 sps:$4 sm:$0xff]  }
  0xe3   : > { %2132 = vmatpush1.bf16.msra.mxu0 %v8979_v50  ;;  %2214 = vmatpush1.bf16.msra.mxu1 %v8982_v51  ;;  %v9067_v50 = vld [vmem:[%s15513_s4 + $0x8a4] ss:$16 sps:$4 sm:$0xff]   ;;  %v9070_v51 = vld [vmem:[%s15513_s4 + $0x8ac] ss:$16 sps:$4 sm:$0xff]  }
  0xe4   : > { %2133 = vmatprep.subr.bf16.mxu0 %v8987_v52  ;;  %2215 = vmatprep.subr.bf16.mxu1 %v8990_v53  ;;  %v9065_v52 = vld [vmem:[%s15513_s4 + $0x8a0] ss:$16 sps:$4 sm:$0xff]   ;;  %v9068_v53 = vld [vmem:[%s15513_s4 + $0x8a8] ss:$16 sps:$4 sm:$0xff]  }
  0xe7   : > { %2134 = vmatpush1.bf16.msra.mxu0 %v8985_v54  ;;  %2216 = vmatpush1.bf16.msra.mxu1 %v8988_v55  ;;  %v9073_v54 = vld [vmem:[%s15513_s4 + $0x8c4] ss:$16 sps:$4 sm:$0xff]   ;;  %v9076_v55 = vld [vmem:[%s15513_s4 + $0x8cc] ss:$16 sps:$4 sm:$0xff]  }
  0xe8   : > { %2135 = vmatprep.subr.bf16.mxu0 %v8993_v56  ;;  %2217 = vmatprep.subr.bf16.mxu1 %v8996_v57  ;;  %v9071_v56 = vld [vmem:[%s15513_s4 + $0x8c0] ss:$16 sps:$4 sm:$0xff]   ;;  %v9074_v57 = vld [vmem:[%s15513_s4 + $0x8c8] ss:$16 sps:$4 sm:$0xff]  }
  0xeb   : > { %2136 = vmatpush1.bf16.msra.mxu0 %v8991_v58  ;;  %2218 = vmatpush1.bf16.msra.mxu1 %v8994_v59  ;;  %v9079_v58 = vld [vmem:[%s15513_s4 + $0x8e4] ss:$16 sps:$4 sm:$0xff]   ;;  %v9082_v59 = vld [vmem:[%s15513_s4 + $0x8ec] ss:$16 sps:$4 sm:$0xff]  }
  0xec   : > { %2137 = vmatprep.subr.bf16.mxu0 %v8999_v60  ;;  %2219 = vmatprep.subr.bf16.mxu1 %v9002_v61  ;;  %v9077_v60 = vld [vmem:[%s15513_s4 + $0x8e0] ss:$16 sps:$4 sm:$0xff]   ;;  %v9080_v61 = vld [vmem:[%s15513_s4 + $0x8e8] ss:$16 sps:$4 sm:$0xff]  }
  0xef   : > { %2138 = vmatpush1.bf16.msra.mxu0 %v8997_v62  ;;  %2220 = vmatpush1.bf16.msra.mxu1 %v9000_v63  ;;  %v9085_v62 = vld [vmem:[%s15513_s4 + $0x904] ss:$16 sps:$4 sm:$0xff]   ;;  %v9088_v63 = vld [vmem:[%s15513_s4 + $0x90c] ss:$16 sps:$4 sm:$0xff]  }
  0xf0   : > { %2139 = vmatprep.subr.bf16.mxu0 %v9005_v0  ;;  %2221 = vmatprep.subr.bf16.mxu1 %v9008_v1  ;;  %v9083_v0 = vld [vmem:[%s15513_s4 + $0x900] ss:$16 sps:$4 sm:$0xff]   ;;  %v9086_v1 = vld [vmem:[%s15513_s4 + $0x908] ss:$16 sps:$4 sm:$0xff]  }
  0xf3   : > { %2140 = vmatpush1.bf16.msra.mxu0 %v9003_v2  ;;  %2222 = vmatpush1.bf16.msra.mxu1 %v9006_v3  ;;  %v9091_v2 = vld [vmem:[%s15513_s4 + $0x924] ss:$16 sps:$4 sm:$0xff]   ;;  %v9094_v3 = vld [vmem:[%s15513_s4 + $0x92c] ss:$16 sps:$4 sm:$0xff]  }
  0xf4   : > { %2141 = vmatprep.subr.bf16.mxu0 %v9011_v4  ;;  %2223 = vmatprep.subr.bf16.mxu1 %v9014_v6  ;;  %v9089_v4 = vld [vmem:[%s15513_s4 + $0x920] ss:$16 sps:$4 sm:$0xff]   ;;  %v9092_v6 = vld [vmem:[%s15513_s4 + $0x928] ss:$16 sps:$4 sm:$0xff]  }
  0xf7   : > { %2142 = vmatpush1.bf16.msra.mxu0 %v9009_v7  ;;  %2224 = vmatpush1.bf16.msra.mxu1 %v9012_v8  ;;  %v9097_v7 = vld [vmem:[%s15513_s4 + $0x944] ss:$16 sps:$4 sm:$0xff]   ;;  %v9100_v8 = vld [vmem:[%s15513_s4 + $0x94c] ss:$16 sps:$4 sm:$0xff]  }
  0xf8   : > { %2143 = vmatprep.subr.bf16.mxu0 %v9017_v9  ;;  %2225 = vmatprep.subr.bf16.mxu1 %v9020_v11  ;;  %v9095_v9 = vld [vmem:[%s15513_s4 + $0x940] ss:$16 sps:$4 sm:$0xff]   ;;  %v9098_v11 = vld [vmem:[%s15513_s4 + $0x948] ss:$16 sps:$4 sm:$0xff]  }
  0xfb   : > { %2144 = vmatpush1.bf16.msra.mxu0 %v9015_v12  ;;  %2226 = vmatpush1.bf16.msra.mxu1 %v9018_v14  ;;  %v9103_v12 = vld [vmem:[%s15513_s4 + $0x964] ss:$16 sps:$4 sm:$0xff]   ;;  %v9106_v14 = vld [vmem:[%s15513_s4 + $0x96c] ss:$16 sps:$4 sm:$0xff]  }
  0xfc   : > { %2145 = vmatprep.subr.bf16.mxu0 %v9023_v16  ;;  %2227 = vmatprep.subr.bf16.mxu1 %v9026_v17  ;;  %v9101_v16 = vld [vmem:[%s15513_s4 + $0x960] ss:$16 sps:$4 sm:$0xff]   ;;  %v9104_v17 = vld [vmem:[%s15513_s4 + $0x968] ss:$16 sps:$4 sm:$0xff]  }
  0xff   : > { %2146 = vmatpush1.bf16.msra.mxu0 %v9021_v18  ;;  %2228 = vmatpush1.bf16.msra.mxu1 %v9024_v19  ;;  %v9109_v18 = vld [vmem:[%s15513_s4 + $0x984] ss:$16 sps:$4 sm:$0xff]   ;;  %v9112_v19 = vld [vmem:[%s15513_s4 + $0x98c] ss:$16 sps:$4 sm:$0xff]  }
 0x100   : > { %2147 = vmatprep.subr.bf16.mxu0 %v9029_v22  ;;  %2229 = vmatprep.subr.bf16.mxu1 %v9032_v23  ;;  %v9107_v22 = vld [vmem:[%s15513_s4 + $0x980] ss:$16 sps:$4 sm:$0xff]   ;;  %v9110_v23 = vld [vmem:[%s15513_s4 + $0x988] ss:$16 sps:$4 sm:$0xff]  }
 0x103   : > { %2148 = vmatpush1.bf16.msra.mxu0 %v9027_v13  ;;  %2230 = vmatpush1.bf16.msra.mxu1 %v9030_v25  ;;  %v9115_v13 = vld [vmem:[%s15513_s4 + $0x9a4] ss:$16 sps:$4 sm:$0xff]   ;;  %v9118_v25 = vld [vmem:[%s15513_s4 + $0x9ac] ss:$16 sps:$4 sm:$0xff]  }
 0x104   : > { %3023 = vmatprep.subr.bf16.mxu0 %v9036_v26  ;;  %3105 = vmatprep.subr.bf16.mxu1 %v9039_v27  ;;  %v9113_v26 = vld [vmem:[%s15513_s4 + $0x9a0] ss:$16 sps:$4 sm:$0xff]   ;;  %v9116_v27 = vld [vmem:[%s15513_s4 + $0x9a8] ss:$16 sps:$4 sm:$0xff]  }
 0x106   : > { %2150 = vmatmul.mubr.bf16.vlgmr.msra.gmra.mrb[0].mxu0 %v11486_v29  ;;  %2232 = vmatmul.mubr.bf16.vlgmr.msra.gmra.mrb[0].mxu1 %v11486_v29 }
 0x107   : > { %3024 = vmatpush1.bf16.msra.mxu0 %v9034_v28  ;;  %3106 = vmatpush1.bf16.msra.mxu1 %v9037_v32  ;;  %v9121_v28 = vld [vmem:[%s15513_s4 + $0x9c4] ss:$16 sps:$4 sm:$0xff]   ;;  %v9124_v32 = vld [vmem:[%s15513_s4 + $0x9cc] ss:$16 sps:$4 sm:$0xff]  }
 0x108   : > { %3025 = vmatprep.subr.bf16.mxu0 %v9043_v33  ;;  %3107 = vmatprep.subr.bf16.mxu1 %v9046_v34  ;;  %v9119_v33 = vld [vmem:[%s15513_s4 + $0x9c0] ss:$16 sps:$4 sm:$0xff]   ;;  %v9122_v34 = vld [vmem:[%s15513_s4 + $0x9c8] ss:$16 sps:$4 sm:$0xff]  }
 0x109   : > { %3055 = vmatprep.mubr.bf16.mxu0 %v11502_v21  ;;  %3137 = vmatprep.mubr.bf16.mxu1 %v11502_v21 }
 0x10b   : > { %3026 = vmatpush1.bf16.msra.mxu0 %v9041_v35  ;;  %3108 = vmatpush1.bf16.msra.mxu1 %v9044_v36  ;;  %v9127_v35 = vld [vmem:[%s15513_s4 + $0x9e4] ss:$16 sps:$4 sm:$0xff]   ;;  %v9130_v36 = vld [vmem:[%s15513_s4 + $0x9ec] ss:$16 sps:$4 sm:$0xff]  }
 0x10c   : > { %3027 = vmatprep.subr.bf16.mxu0 %v9049_v37  ;;  %3109 = vmatprep.subr.bf16.mxu1 %v9052_v38  ;;  %v9125_v37 = vld [vmem:[%s15513_s4 + $0x9e0] ss:$16 sps:$4 sm:$0xff]   ;;  %v9128_v38 = vld [vmem:[%s15513_s4 + $0x9e8] ss:$16 sps:$4 sm:$0xff]  }
 0x10f   : > { %3028 = vmatpush1.bf16.msra.mxu0 %v9047_v39  ;;  %3110 = vmatpush1.bf16.msra.mxu1 %v9050_v40  ;;  %v9134_v39 = vld [vmem:[%s15513_s4 + $0xa04] ss:$16 sps:$4 sm:$0xff]   ;;  %v9137_v40 = vld [vmem:[%s15513_s4 + $0xa0c] ss:$16 sps:$4 sm:$0xff]  }
 0x110   : > { %3029 = vmatprep.subr.bf16.mxu0 %v9055_v41  ;;  %3111 = vmatprep.subr.bf16.mxu1 %v9058_v42  ;;  %v11689_v41 = vld [vmem:[%s11473_s8 + $0x8] sm:$0xff]  ;;  %v11693_v42 = vcombine.low %v11489_v31, %v11489_v31 }
 0x111   : > { %v9144_v31 = vld [vmem:[%s15513_s4 + $0xa2c] ss:$16 sps:$4 sm:$0xff]  }
 0x113   : > { %3030 = vmatpush1.bf16.msra.mxu0 %v9053_v43  ;;  %3112 = vmatpush1.bf16.msra.mxu1 %v9056_v44  ;;  %v9132_v43 = vld [vmem:[%s15513_s4 + $0xa00] ss:$16 sps:$4 sm:$0xff]   ;;  %v9135_v44 = vld [vmem:[%s15513_s4 + $0xa08] ss:$16 sps:$4 sm:$0xff]  }
 0x114   : > { %3031 = vmatprep.subr.bf16.mxu0 %v9061_v45  ;;  %3113 = vmatprep.subr.bf16.mxu1 %v9064_v46  ;;  %v9141_v45 = vld [vmem:[%s15513_s4 + $0xa24] ss:$16 sps:$4 sm:$0xff]   ;;  %v11709_v46 = vcombine.high %v11689_v41, %v11689_v41 }
 0x117   : > { %3032 = vmatpush1.bf16.msra.mxu0 %v9059_v47  ;;  %3114 = vmatpush1.bf16.msra.mxu1 %v9062_v49  ;;  %v9139_v47 = vld [vmem:[%s15513_s4 + $0xa20] ss:$16 sps:$4 sm:$0xff]   ;;  %v9142_v49 = vld [vmem:[%s15513_s4 + $0xa28] ss:$16 sps:$4 sm:$0xff]  }
 0x118   : > { %3033 = vmatprep.subr.bf16.mxu0 %v9067_v50  ;;  %3115 = vmatprep.subr.bf16.mxu1 %v9070_v51  ;;  %v9147_v50 = vld [vmem:[%s15513_s4 + $0xa44] ss:$16 sps:$4 sm:$0xff]   ;;  %v9150_v51 = vld [vmem:[%s15513_s4 + $0xa4c] ss:$16 sps:$4 sm:$0xff]  }
 0x11b   : > { %3034 = vmatpush1.bf16.msra.mxu0 %v9065_v52  ;;  %3116 = vmatpush1.bf16.msra.mxu1 %v9068_v53  ;;  %v9145_v52 = vld [vmem:[%s15513_s4 + $0xa40] ss:$16 sps:$4 sm:$0xff]   ;;  %v9148_v53 = vld [vmem:[%s15513_s4 + $0xa48] ss:$16 sps:$4 sm:$0xff]  }
 0x11c   : > { %3035 = vmatprep.subr.bf16.mxu0 %v9073_v54  ;;  %3117 = vmatprep.subr.bf16.mxu1 %v9076_v55  ;;  %v9153_v54 = vld [vmem:[%s15513_s4 + $0xa64] ss:$16 sps:$4 sm:$0xff]   ;;  %v9156_v55 = vld [vmem:[%s15513_s4 + $0xa6c] ss:$16 sps:$4 sm:$0xff]  }
 0x11f   : > { %3036 = vmatpush1.bf16.msra.mxu0 %v9071_v56  ;;  %3118 = vmatpush1.bf16.msra.mxu1 %v9074_v57  ;;  %v9151_v56 = vld [vmem:[%s15513_s4 + $0xa60] ss:$16 sps:$4 sm:$0xff]   ;;  %v9154_v57 = vld [vmem:[%s15513_s4 + $0xa68] ss:$16 sps:$4 sm:$0xff]  }
 0x120   : > { %3037 = vmatprep.subr.bf16.mxu0 %v9079_v58  ;;  %3119 = vmatprep.subr.bf16.mxu1 %v9082_v59  ;;  %v9159_v58 = vld [vmem:[%s15513_s4 + $0xa84] ss:$16 sps:$4 sm:$0xff]   ;;  %v9162_v59 = vld [vmem:[%s15513_s4 + $0xa8c] ss:$16 sps:$4 sm:$0xff]  }
 0x123   : > { %3038 = vmatpush1.bf16.msra.mxu0 %v9077_v60  ;;  %3120 = vmatpush1.bf16.msra.mxu1 %v9080_v61  ;;  %v9157_v60 = vld [vmem:[%s15513_s4 + $0xa80] ss:$16 sps:$4 sm:$0xff]   ;;  %v9160_v61 = vld [vmem:[%s15513_s4 + $0xa88] ss:$16 sps:$4 sm:$0xff]  }
 0x124   : > { %3039 = vmatprep.subr.bf16.mxu0 %v9085_v62  ;;  %3121 = vmatprep.subr.bf16.mxu1 %v9088_v63  ;;  %v9165_v62 = vld [vmem:[%s15513_s4 + $0xaa4] ss:$16 sps:$4 sm:$0xff]   ;;  %v9168_v63 = vld [vmem:[%s15513_s4 + $0xaac] ss:$16 sps:$4 sm:$0xff]  }
 0x127   : > { %3040 = vmatpush1.bf16.msra.mxu0 %v9083_v0  ;;  %3122 = vmatpush1.bf16.msra.mxu1 %v9086_v1  ;;  %v9163_v0 = vld [vmem:[%s15513_s4 + $0xaa0] ss:$16 sps:$4 sm:$0xff]   ;;  %v9166_v1 = vld [vmem:[%s15513_s4 + $0xaa8] ss:$16 sps:$4 sm:$0xff]  }
 0x128   : > { %3041 = vmatprep.subr.bf16.mxu0 %v9091_v2  ;;  %3123 = vmatprep.subr.bf16.mxu1 %v9094_v3  ;;  %v9171_v2 = vld [vmem:[%s15513_s4 + $0xac4] ss:$16 sps:$4 sm:$0xff]   ;;  %v9174_v3 = vld [vmem:[%s15513_s4 + $0xacc] ss:$16 sps:$4 sm:$0xff]  }
 0x12b   : > { %3042 = vmatpush1.bf16.msra.mxu0 %v9089_v4  ;;  %3124 = vmatpush1.bf16.msra.mxu1 %v9092_v6  ;;  %v9169_v4 = vld [vmem:[%s15513_s4 + $0xac0] ss:$16 sps:$4 sm:$0xff]   ;;  %v9172_v6 = vld [vmem:[%s15513_s4 + $0xac8] ss:$16 sps:$4 sm:$0xff]  }
 0x12c   : > { %3043 = vmatprep.subr.bf16.mxu0 %v9097_v7  ;;  %3125 = vmatprep.subr.bf16.mxu1 %v9100_v8  ;;  %v9177_v7 = vld [vmem:[%s15513_s4 + $0xae4] ss:$16 sps:$4 sm:$0xff]   ;;  %v9180_v8 = vld [vmem:[%s15513_s4 + $0xaec] ss:$16 sps:$4 sm:$0xff]  }
 0x12f   : > { %3044 = vmatpush1.bf16.msra.mxu0 %v9095_v9  ;;  %3126 = vmatpush1.bf16.msra.mxu1 %v9098_v11  ;;  %v9175_v9 = vld [vmem:[%s15513_s4 + $0xae0] ss:$16 sps:$4 sm:$0xff]   ;;  %v9178_v11 = vld [vmem:[%s15513_s4 + $0xae8] ss:$16 sps:$4 sm:$0xff]  }
 0x130   : > { %3045 = vmatprep.subr.bf16.mxu0 %v9103_v12  ;;  %3127 = vmatprep.subr.bf16.mxu1 %v9106_v14  ;;  %v9183_v12 = vld [vmem:[%s15513_s4 + $0xb04] ss:$16 sps:$4 sm:$0xff]   ;;  %v9186_v14 = vld [vmem:[%s15513_s4 + $0xb0c] ss:$16 sps:$4 sm:$0xff]  }
 0x133   : > { %3046 = vmatpush1.bf16.msra.mxu0 %v9101_v16  ;;  %3128 = vmatpush1.bf16.msra.mxu1 %v9104_v17  ;;  %v9181_v16 = vld [vmem:[%s15513_s4 + $0xb00] ss:$16 sps:$4 sm:$0xff]   ;;  %v9184_v17 = vld [vmem:[%s15513_s4 + $0xb08] ss:$16 sps:$4 sm:$0xff]  }
 0x134   : > { %3047 = vmatprep.subr.bf16.mxu0 %v9109_v18  ;;  %3129 = vmatprep.subr.bf16.mxu1 %v9112_v19  ;;  %v9189_v18 = vld [vmem:[%s15513_s4 + $0xb24] ss:$16 sps:$4 sm:$0xff]   ;;  %v9192_v19 = vld [vmem:[%s15513_s4 + $0xb2c] ss:$16 sps:$4 sm:$0xff]  }
 0x137   : > { %3048 = vmatpush1.bf16.msra.mxu0 %v9107_v22  ;;  %3130 = vmatpush1.bf16.msra.mxu1 %v9110_v23  ;;  %v9187_v22 = vld [vmem:[%s15513_s4 + $0xb20] ss:$16 sps:$4 sm:$0xff]   ;;  %v9190_v23 = vld [vmem:[%s15513_s4 + $0xb28] ss:$16 sps:$4 sm:$0xff]  }
 0x138   : > { %3049 = vmatprep.subr.bf16.mxu0 %v9115_v13  ;;  %3131 = vmatprep.subr.bf16.mxu1 %v9118_v25  ;;  %v9195_v13 = vld [vmem:[%s15513_s4 + $0xb44] ss:$16 sps:$4 sm:$0xff]   ;;  %v9198_v25 = vld [vmem:[%s15513_s4 + $0xb4c] ss:$16 sps:$4 sm:$0xff]  }
 0x13b   : > { %3050 = vmatpush1.bf16.msra.mxu0 %v9113_v26  ;;  %3132 = vmatpush1.bf16.msra.mxu1 %v9116_v27  ;;  %v9193_v26 = vld [vmem:[%s15513_s4 + $0xb40] ss:$16 sps:$4 sm:$0xff]   ;;  %v9196_v27 = vld [vmem:[%s15513_s4 + $0xb48] ss:$16 sps:$4 sm:$0xff]  }
 0x13c   : > { %3051 = vmatprep.subr.bf16.mxu0 %v9121_v28  ;;  %3133 = vmatprep.subr.bf16.mxu1 %v9124_v32  ;;  %v9201_v28 = vld [vmem:[%s15513_s4 + $0xb64] ss:$16 sps:$4 sm:$0xff]   ;;  %v9204_v32 = vld [vmem:[%s15513_s4 + $0xb6c] ss:$16 sps:$4 sm:$0xff]  }
 0x13f   : > { %3052 = vmatpush1.bf16.msra.mxu0 %v9119_v33  ;;  %3134 = vmatpush1.bf16.msra.mxu1 %v9122_v34  ;;  %v9199_v33 = vld [vmem:[%s15513_s4 + $0xb60] ss:$16 sps:$4 sm:$0xff]   ;;  %v9202_v34 = vld [vmem:[%s15513_s4 + $0xb68] ss:$16 sps:$4 sm:$0xff]  }
 0x140   : > { %3053 = vmatprep.subr.bf16.mxu0 %v9127_v35  ;;  %3135 = vmatprep.subr.bf16.mxu1 %v9130_v36  ;;  %v9207_v35 = vld [vmem:[%s15513_s4 + $0xb84] ss:$16 sps:$4 sm:$0xff]   ;;  %v9210_v36 = vld [vmem:[%s15513_s4 + $0xb8c] ss:$16 sps:$4 sm:$0xff]  }
 0x143   : > { %3054 = vmatpush1.bf16.msra.mxu0 %v9125_v37  ;;  %3136 = vmatpush1.bf16.msra.mxu1 %v9128_v38  ;;  %v9205_v37 = vld [vmem:[%s15513_s4 + $0xb80] ss:$16 sps:$4 sm:$0xff]   ;;  %v9208_v38 = vld [vmem:[%s15513_s4 + $0xb88] ss:$16 sps:$4 sm:$0xff]  }
 0x144   : > { %3064 = vmatprep.subr.bf16.mxu0 %v9134_v39  ;;  %3146 = vmatprep.subr.bf16.mxu1 %v9137_v40  ;;  %v9213_v39 = vld [vmem:[%s15513_s4 + $0xba4] ss:$16 sps:$4 sm:$0xff]   ;;  %v9216_v40 = vld [vmem:[%s15513_s4 + $0xbac] ss:$16 sps:$4 sm:$0xff]  }
 0x146   : > { %3056 = vmatmul.mubr.bf16.vlgmr.msra.gmra.mrb[0].mxu0 %v11693_v42  ;;  %3138 = vmatmul.mubr.bf16.vlgmr.msra.gmra.mrb[0].mxu1 %v11693_v42 }
 0x147   : > { %3065 = vmatpush1.bf16.msra.mxu0 %v9132_v43  ;;  %3147 = vmatpush1.bf16.msra.mxu1 %v9135_v44  ;;  %v9211_v43 = vld [vmem:[%s15513_s4 + $0xba0] ss:$16 sps:$4 sm:$0xff]   ;;  %v9214_v44 = vld [vmem:[%s15513_s4 + $0xba8] ss:$16 sps:$4 sm:$0xff]  }
 0x148   : > { %3066 = vmatprep.subr.bf16.mxu0 %v9141_v45  ;;  %3148 = vmatprep.subr.bf16.mxu1 %v9144_v31  ;;  %v9219_v45 = vld [vmem:[%s15513_s4 + $0xbc4] ss:$16 sps:$4 sm:$0xff]   ;;  %v9222_v31 = vld [vmem:[%s15513_s4 + $0xbcc] ss:$16 sps:$4 sm:$0xff]  }
 0x149   : > { %3096 = vmatprep.mubr.bf16.mxu0 %v11709_v46  ;;  %3178 = vmatprep.mubr.bf16.mxu1 %v11709_v46 }
 0x14b   : > { %3067 = vmatpush1.bf16.msra.mxu0 %v9139_v47  ;;  %3149 = vmatpush1.bf16.msra.mxu1 %v9142_v49  ;;  %v9217_v47 = vld [vmem:[%s15513_s4 + $0xbc0] ss:$16 sps:$4 sm:$0xff]   ;;  %v9220_v49 = vld [vmem:[%s15513_s4 + $0xbc8] ss:$16 sps:$4 sm:$0xff]  }
 0x14c   : > { %3068 = vmatprep.subr.bf16.mxu0 %v9147_v50  ;;  %3150 = vmatprep.subr.bf16.mxu1 %v9150_v51  ;;  %v9225_v50 = vld [vmem:[%s15513_s4 + $0xbe4] ss:$16 sps:$4 sm:$0xff]   ;;  %v9228_v51 = vld [vmem:[%s15513_s4 + $0xbec] ss:$16 sps:$4 sm:$0xff]  }
 0x14f   : > { %3069 = vmatpush1.bf16.msra.mxu0 %v9145_v52  ;;  %3151 = vmatpush1.bf16.msra.mxu1 %v9148_v53  ;;  %v9223_v52 = vld [vmem:[%s15513_s4 + $0xbe0] ss:$16 sps:$4 sm:$0xff]   ;;  %v9226_v53 = vld [vmem:[%s15513_s4 + $0xbe8] ss:$16 sps:$4 sm:$0xff]  }
 0x150   : > { %3070 = vmatprep.subr.bf16.mxu0 %v9153_v54  ;;  %3152 = vmatprep.subr.bf16.mxu1 %v9156_v55  ;;  %v9233_v54 = vld [vmem:[%s15514_s5 + $0x404] ss:$16 sps:$4 sm:$0xff]   ;;  %v9236_v55 = vld [vmem:[%s15514_s5 + $0x40c] ss:$16 sps:$4 sm:$0xff]  }
 0x153   : > { %3071 = vmatpush1.bf16.msra.mxu0 %v9151_v56  ;;  %3153 = vmatpush1.bf16.msra.mxu1 %v9154_v57  ;;  %v11897_v56 = vcombine.low %v11689_v41, %v11689_v41  ;;  %v9231_v57 = vld [vmem:[%s15514_s5 + $0x400] ss:$16 sps:$4 sm:$0xff]   ;;  %v9242_v41 = vld [vmem:[%s15514_s5 + $0x42c] ss:$16 sps:$4 sm:$0xff]  }
 0x154   : > { %3072 = vmatprep.subr.bf16.mxu0 %v9159_v58  ;;  %3154 = vmatprep.subr.bf16.mxu1 %v9162_v59  ;;  %v9234_v58 = vld [vmem:[%s15514_s5 + $0x408] ss:$16 sps:$4 sm:$0xff]   ;;  %v9239_v59 = vld [vmem:[%s15514_s5 + $0x424] ss:$16 sps:$4 sm:$0xff]  }
 0x157   : > { %3073 = vmatpush1.bf16.msra.mxu0 %v9157_v60  ;;  %3155 = vmatpush1.bf16.msra.mxu1 %v9160_v61  ;;  %v9237_v60 = vld [vmem:[%s15514_s5 + $0x420] ss:$16 sps:$4 sm:$0xff]   ;;  %v9240_v61 = vld [vmem:[%s15514_s5 + $0x428] ss:$16 sps:$4 sm:$0xff]  }
 0x158   : > { %3074 = vmatprep.subr.bf16.mxu0 %v9165_v62  ;;  %3156 = vmatprep.subr.bf16.mxu1 %v9168_v63  ;;  %v9245_v62 = vld [vmem:[%s15514_s5 + $0x444] ss:$16 sps:$4 sm:$0xff]   ;;  %v9248_v63 = vld [vmem:[%s15514_s5 + $0x44c] ss:$16 sps:$4 sm:$0xff]  }
 0x15b   : > { %3075 = vmatpush1.bf16.msra.mxu0 %v9163_v0  ;;  %3157 = vmatpush1.bf16.msra.mxu1 %v9166_v1  ;;  %v9243_v0 = vld [vmem:[%s15514_s5 + $0x440] ss:$16 sps:$4 sm:$0xff]   ;;  %v9246_v1 = vld [vmem:[%s15514_s5 + $0x448] ss:$16 sps:$4 sm:$0xff]  }
 0x15c   : > { %3076 = vmatprep.subr.bf16.mxu0 %v9171_v2  ;;  %3158 = vmatprep.subr.bf16.mxu1 %v9174_v3  ;;  %v9251_v2 = vld [vmem:[%s15514_s5 + $0x464] ss:$16 sps:$4 sm:$0xff]   ;;  %v9254_v3 = vld [vmem:[%s15514_s5 + $0x46c] ss:$16 sps:$4 sm:$0xff]  }
 0x15f   : > { %3077 = vmatpush1.bf16.msra.mxu0 %v9169_v4  ;;  %3159 = vmatpush1.bf16.msra.mxu1 %v9172_v6  ;;  %v9249_v4 = vld [vmem:[%s15514_s5 + $0x460] ss:$16 sps:$4 sm:$0xff]   ;;  %v9252_v6 = vld [vmem:[%s15514_s5 + $0x468] ss:$16 sps:$4 sm:$0xff]  }
 0x160   : > { %3078 = vmatprep.subr.bf16.mxu0 %v9177_v7  ;;  %3160 = vmatprep.subr.bf16.mxu1 %v9180_v8  ;;  %v9257_v7 = vld [vmem:[%s15514_s5 + $0x484] ss:$16 sps:$4 sm:$0xff]   ;;  %v9260_v8 = vld [vmem:[%s15514_s5 + $0x48c] ss:$16 sps:$4 sm:$0xff]  }
 0x163   : > { %3079 = vmatpush1.bf16.msra.mxu0 %v9175_v9  ;;  %3161 = vmatpush1.bf16.msra.mxu1 %v9178_v11  ;;  %v9255_v9 = vld [vmem:[%s15514_s5 + $0x480] ss:$16 sps:$4 sm:$0xff]   ;;  %v9258_v11 = vld [vmem:[%s15514_s5 + $0x488] ss:$16 sps:$4 sm:$0xff]  }
 0x164   : > { %3080 = vmatprep.subr.bf16.mxu0 %v9183_v12  ;;  %3162 = vmatprep.subr.bf16.mxu1 %v9186_v14  ;;  %v9263_v12 = vld [vmem:[%s15514_s5 + $0x4a4] ss:$16 sps:$4 sm:$0xff]   ;;  %v9266_v14 = vld [vmem:[%s15514_s5 + $0x4ac] ss:$16 sps:$4 sm:$0xff]  }
 0x167   : > { %3081 = vmatpush1.bf16.msra.mxu0 %v9181_v16  ;;  %3163 = vmatpush1.bf16.msra.mxu1 %v9184_v17  ;;  %v9261_v16 = vld [vmem:[%s15514_s5 + $0x4a0] ss:$16 sps:$4 sm:$0xff]   ;;  %v9264_v17 = vld [vmem:[%s15514_s5 + $0x4a8] ss:$16 sps:$4 sm:$0xff]  }
 0x168   : > { %3082 = vmatprep.subr.bf16.mxu0 %v9189_v18  ;;  %3164 = vmatprep.subr.bf16.mxu1 %v9192_v19  ;;  %v9269_v18 = vld [vmem:[%s15514_s5 + $0x4c4] ss:$16 sps:$4 sm:$0xff]   ;;  %v9272_v19 = vld [vmem:[%s15514_s5 + $0x4cc] ss:$16 sps:$4 sm:$0xff]  }
 0x16b   : > { %3083 = vmatpush1.bf16.msra.mxu0 %v9187_v22  ;;  %3165 = vmatpush1.bf16.msra.mxu1 %v9190_v23  ;;  %v9267_v22 = vld [vmem:[%s15514_s5 + $0x4c0] ss:$16 sps:$4 sm:$0xff]   ;;  %v9270_v23 = vld [vmem:[%s15514_s5 + $0x4c8] ss:$16 sps:$4 sm:$0xff]  }
 0x16c   : > { %3084 = vmatprep.subr.bf16.mxu0 %v9195_v13  ;;  %3166 = vmatprep.subr.bf16.mxu1 %v9198_v25  ;;  %v9275_v13 = vld [vmem:[%s15514_s5 + $0x4e4] ss:$16 sps:$4 sm:$0xff]   ;;  %v9278_v25 = vld [vmem:[%s15514_s5 + $0x4ec] ss:$16 sps:$4 sm:$0xff]  }
 0x16f   : > { %3085 = vmatpush1.bf16.msra.mxu0 %v9193_v26  ;;  %3167 = vmatpush1.bf16.msra.mxu1 %v9196_v27  ;;  %v9273_v26 = vld [vmem:[%s15514_s5 + $0x4e0] ss:$16 sps:$4 sm:$0xff]   ;;  %v9276_v27 = vld [vmem:[%s15514_s5 + $0x4e8] ss:$16 sps:$4 sm:$0xff]  }
 0x170   : > { %3086 = vmatprep.subr.bf16.mxu0 %v9201_v28  ;;  %3168 = vmatprep.subr.bf16.mxu1 %v9204_v32  ;;  %v9281_v28 = vld [vmem:[%s15514_s5 + $0x504] ss:$16 sps:$4 sm:$0xff]   ;;  %v9284_v32 = vld [vmem:[%s15514_s5 + $0x50c] ss:$16 sps:$4 sm:$0xff]  }
 0x173   : > { %3087 = vmatpush1.bf16.msra.mxu0 %v9199_v33  ;;  %3169 = vmatpush1.bf16.msra.mxu1 %v9202_v34  ;;  %v9279_v33 = vld [vmem:[%s15514_s5 + $0x500] ss:$16 sps:$4 sm:$0xff]   ;;  %v9282_v34 = vld [vmem:[%s15514_s5 + $0x508] ss:$16 sps:$4 sm:$0xff]  }
 0x174   : > { %3088 = vmatprep.subr.bf16.mxu0 %v9207_v35  ;;  %3170 = vmatprep.subr.bf16.mxu1 %v9210_v36  ;;  %v9287_v35 = vld [vmem:[%s15514_s5 + $0x524] ss:$16 sps:$4 sm:$0xff]   ;;  %v9290_v36 = vld [vmem:[%s15514_s5 + $0x52c] ss:$16 sps:$4 sm:$0xff]  }
 0x177   : > { %3089 = vmatpush1.bf16.msra.mxu0 %v9205_v37  ;;  %3171 = vmatpush1.bf16.msra.mxu1 %v9208_v38  ;;  %v9285_v37 = vld [vmem:[%s15514_s5 + $0x520] ss:$16 sps:$4 sm:$0xff]   ;;  %v9288_v38 = vld [vmem:[%s15514_s5 + $0x528] ss:$16 sps:$4 sm:$0xff]  }
 0x178   : > { %3090 = vmatprep.subr.bf16.mxu0 %v9213_v39  ;;  %3172 = vmatprep.subr.bf16.mxu1 %v9216_v40  ;;  %v9293_v39 = vld [vmem:[%s15514_s5 + $0x544] ss:$16 sps:$4 sm:$0xff]   ;;  %v9296_v40 = vld [vmem:[%s15514_s5 + $0x54c] ss:$16 sps:$4 sm:$0xff]  }
 0x17b   : > { %3091 = vmatpush1.bf16.msra.mxu0 %v9211_v43  ;;  %3173 = vmatpush1.bf16.msra.mxu1 %v9214_v44  ;;  %v9291_v43 = vld [vmem:[%s15514_s5 + $0x540] ss:$16 sps:$4 sm:$0xff]   ;;  %v9294_v44 = vld [vmem:[%s15514_s5 + $0x548] ss:$16 sps:$4 sm:$0xff]  }
 0x17c   : > { %3092 = vmatprep.subr.bf16.mxu0 %v9219_v45  ;;  %3174 = vmatprep.subr.bf16.mxu1 %v9222_v31  ;;  %v9299_v45 = vld [vmem:[%s15514_s5 + $0x564] ss:$16 sps:$4 sm:$0xff]   ;;  %v9302_v31 = vld [vmem:[%s15514_s5 + $0x56c] ss:$16 sps:$4 sm:$0xff]  }
 0x17f   : > { %3093 = vmatpush1.bf16.msra.mxu0 %v9217_v47  ;;  %3175 = vmatpush1.bf16.msra.mxu1 %v9220_v49  ;;  %v9297_v47 = vld [vmem:[%s15514_s5 + $0x560] ss:$16 sps:$4 sm:$0xff]   ;;  %v9300_v49 = vld [vmem:[%s15514_s5 + $0x568] ss:$16 sps:$4 sm:$0xff]  }
 0x180   : > { %3094 = vmatprep.subr.bf16.mxu0 %v9225_v50  ;;  %3176 = vmatprep.subr.bf16.mxu1 %v9228_v51  ;;  %v9305_v50 = vld [vmem:[%s15514_s5 + $0x584] ss:$16 sps:$4 sm:$0xff]   ;;  %v9308_v51 = vld [vmem:[%s15514_s5 + $0x58c] ss:$16 sps:$4 sm:$0xff]  }
 0x183   : > { %3095 = vmatpush1.bf16.msra.mxu0 %v9223_v52  ;;  %3177 = vmatpush1.bf16.msra.mxu1 %v9226_v53  ;;  %v9303_v52 = vld [vmem:[%s15514_s5 + $0x580] ss:$16 sps:$4 sm:$0xff]   ;;  %v9306_v53 = vld [vmem:[%s15514_s5 + $0x588] ss:$16 sps:$4 sm:$0xff]  }
 0x184   : > { %4088 = vmatprep.subr.bf16.mxu0 %v9233_v54  ;;  %4170 = vmatprep.subr.bf16.mxu1 %v9236_v55  ;;  %v9311_v54 = vld [vmem:[%s15514_s5 + $0x5a4] ss:$16 sps:$4 sm:$0xff]   ;;  %v9314_v55 = vld [vmem:[%s15514_s5 + $0x5ac] ss:$16 sps:$4 sm:$0xff]  }
 0x186   : > { %3097 = vmatmul.mubr.bf16.vlgmr.msra.gmra.mrb[0].mxu0 %v11897_v56  ;;  %3179 = vmatmul.mubr.bf16.vlgmr.msra.gmra.mrb[0].mxu1 %v11897_v56 }
 0x187   : > { %4089 = vmatpush1.bf16.msra.mxu0 %v9231_v57  ;;  %4171 = vmatpush1.bf16.msra.mxu1 %v9234_v58  ;;  %v9309_v57 = vld [vmem:[%s15514_s5 + $0x5a0] ss:$16 sps:$4 sm:$0xff]   ;;  %v9312_v58 = vld [vmem:[%s15514_s5 + $0x5a8] ss:$16 sps:$4 sm:$0xff]  }
 0x188   : > { %4090 = vmatprep.subr.bf16.mxu0 %v9239_v59  ;;  %4172 = vmatprep.subr.bf16.mxu1 %v9242_v41  ;;  %v9317_v59 = vld [vmem:[%s15514_s5 + $0x5c4] ss:$16 sps:$4 sm:$0xff]   ;;  %v9320_v41 = vld [vmem:[%s15514_s5 + $0x5cc] ss:$16 sps:$4 sm:$0xff]  }
 0x189   : > { %4120 = vmatprep.mubr.bf16.mxu0 %v10789_v48  ;;  %4202 = vmatprep.mubr.bf16.mxu1 %v10789_v48 }
 0x18b   : > { %4091 = vmatpush1.bf16.msra.mxu0 %v9237_v60  ;;  %4173 = vmatpush1.bf16.msra.mxu1 %v9240_v61  ;;  %v9315_v60 = vld [vmem:[%s15514_s5 + $0x5c0] ss:$16 sps:$4 sm:$0xff]   ;;  %v9318_v61 = vld [vmem:[%s15514_s5 + $0x5c8] ss:$16 sps:$4 sm:$0xff]  }
 0x18c   : > { %4092 = vmatprep.subr.bf16.mxu0 %v9245_v62  ;;  %4174 = vmatprep.subr.bf16.mxu1 %v9248_v63  ;;  %v9323_v62 = vld [vmem:[%s15514_s5 + $0x5e4] ss:$16 sps:$4 sm:$0xff]   ;;  %v9326_v63 = vld [vmem:[%s15514_s5 + $0x5ec] ss:$16 sps:$4 sm:$0xff]  }
 0x18f   : > { %4093 = vmatpush1.bf16.msra.mxu0 %v9243_v0  ;;  %4175 = vmatpush1.bf16.msra.mxu1 %v9246_v1  ;;  %v9321_v0 = vld [vmem:[%s15514_s5 + $0x5e0] ss:$16 sps:$4 sm:$0xff]   ;;  %v9324_v1 = vld [vmem:[%s15514_s5 + $0x5e8] ss:$16 sps:$4 sm:$0xff]  }
 0x190   : > { %4094 = vmatprep.subr.bf16.mxu0 %v9251_v2  ;;  %4176 = vmatprep.subr.bf16.mxu1 %v9254_v3  ;;  %v9329_v2 = vld [vmem:[%s15514_s5 + $0x604] ss:$16 sps:$4 sm:$0xff]   ;;  %v9332_v3 = vld [vmem:[%s15514_s5 + $0x60c] ss:$16 sps:$4 sm:$0xff]  }
 0x193   : > { %4095 = vmatpush1.bf16.msra.mxu0 %v9249_v4  ;;  %4177 = vmatpush1.bf16.msra.mxu1 %v9252_v6  ;;  %v9327_v4 = vld [vmem:[%s15514_s5 + $0x600] ss:$16 sps:$4 sm:$0xff]   ;;  %v9330_v6 = vld [vmem:[%s15514_s5 + $0x608] ss:$16 sps:$4 sm:$0xff]  }
 0x194   : > { %4096 = vmatprep.subr.bf16.mxu0 %v9257_v7  ;;  %4178 = vmatprep.subr.bf16.mxu1 %v9260_v8  ;;  %v9335_v7 = vld [vmem:[%s15514_s5 + $0x624] ss:$16 sps:$4 sm:$0xff]   ;;  %v9338_v8 = vld [vmem:[%s15514_s5 + $0x62c] ss:$16 sps:$4 sm:$0xff]  }
 0x197   : > { %4097 = vmatpush1.bf16.msra.mxu0 %v9255_v9  ;;  %4179 = vmatpush1.bf16.msra.mxu1 %v9258_v11  ;;  %v9333_v9 = vld [vmem:[%s15514_s5 + $0x620] ss:$16 sps:$4 sm:$0xff]   ;;  %v9336_v11 = vld [vmem:[%s15514_s5 + $0x628] ss:$16 sps:$4 sm:$0xff]  }
 0x198   : > { %4098 = vmatprep.subr.bf16.mxu0 %v9263_v12  ;;  %4180 = vmatprep.subr.bf16.mxu1 %v9266_v14  ;;  %v9341_v12 = vld [vmem:[%s15514_s5 + $0x644] ss:$16 sps:$4 sm:$0xff]   ;;  %v9344_v14 = vld [vmem:[%s15514_s5 + $0x64c] ss:$16 sps:$4 sm:$0xff]  }
 0x19b   : > { %4099 = vmatpush1.bf16.msra.mxu0 %v9261_v16  ;;  %4181 = vmatpush1.bf16.msra.mxu1 %v9264_v17  ;;  %v9339_v16 = vld [vmem:[%s15514_s5 + $0x640] ss:$16 sps:$4 sm:$0xff]   ;;  %v9342_v17 = vld [vmem:[%s15514_s5 + $0x648] ss:$16 sps:$4 sm:$0xff]  }
 0x19c   : > { %4100 = vmatprep.subr.bf16.mxu0 %v9269_v18  ;;  %4182 = vmatprep.subr.bf16.mxu1 %v9272_v19  ;;  %v9347_v18 = vld [vmem:[%s15514_s5 + $0x664] ss:$16 sps:$4 sm:$0xff]   ;;  %v9350_v19 = vld [vmem:[%s15514_s5 + $0x66c] ss:$16 sps:$4 sm:$0xff]  }
 0x19f   : > { %4101 = vmatpush1.bf16.msra.mxu0 %v9267_v22  ;;  %4183 = vmatpush1.bf16.msra.mxu1 %v9270_v23  ;;  %v9345_v22 = vld [vmem:[%s15514_s5 + $0x660] ss:$16 sps:$4 sm:$0xff]   ;;  %v9348_v23 = vld [vmem:[%s15514_s5 + $0x668] ss:$16 sps:$4 sm:$0xff]  }
 0x1a0   : > { %4102 = vmatprep.subr.bf16.mxu0 %v9275_v13  ;;  %4184 = vmatprep.subr.bf16.mxu1 %v9278_v25  ;;  %v9353_v13 = vld [vmem:[%s15514_s5 + $0x684] ss:$16 sps:$4 sm:$0xff]   ;;  %v9356_v25 = vld [vmem:[%s15514_s5 + $0x68c] ss:$16 sps:$4 sm:$0xff]  }
 0x1a3   : > { %4103 = vmatpush1.bf16.msra.mxu0 %v9273_v26  ;;  %4185 = vmatpush1.bf16.msra.mxu1 %v9276_v27  ;;  %v9351_v26 = vld [vmem:[%s15514_s5 + $0x680] ss:$16 sps:$4 sm:$0xff]   ;;  %v9354_v27 = vld [vmem:[%s15514_s5 + $0x688] ss:$16 sps:$4 sm:$0xff]  }
 0x1a4   : > { %4104 = vmatprep.subr.bf16.mxu0 %v9281_v28  ;;  %4186 = vmatprep.subr.bf16.mxu1 %v9284_v32  ;;  %v9359_v28 = vld [vmem:[%s15514_s5 + $0x6a4] ss:$16 sps:$4 sm:$0xff]   ;;  %v9362_v32 = vld [vmem:[%s15514_s5 + $0x6ac] ss:$16 sps:$4 sm:$0xff]  }
 0x1a7   : > { %4105 = vmatpush1.bf16.msra.mxu0 %v9279_v33  ;;  %4187 = vmatpush1.bf16.msra.mxu1 %v9282_v34  ;;  %v9357_v33 = vld [vmem:[%s15514_s5 + $0x6a0] ss:$16 sps:$4 sm:$0xff]   ;;  %v9360_v34 = vld [vmem:[%s15514_s5 + $0x6a8] ss:$16 sps:$4 sm:$0xff]  }
 0x1a8   : > { %4106 = vmatprep.subr.bf16.mxu0 %v9287_v35  ;;  %4188 = vmatprep.subr.bf16.mxu1 %v9290_v36  ;;  %v9365_v35 = vld [vmem:[%s15514_s5 + $0x6c4] ss:$16 sps:$4 sm:$0xff]   ;;  %v9368_v36 = vld [vmem:[%s15514_s5 + $0x6cc] ss:$16 sps:$4 sm:$0xff]  }
 0x1ab   : > { %4107 = vmatpush1.bf16.msra.mxu0 %v9285_v37  ;;  %4189 = vmatpush1.bf16.msra.mxu1 %v9288_v38  ;;  %v9363_v37 = vld [vmem:[%s15514_s5 + $0x6c0] ss:$16 sps:$4 sm:$0xff]   ;;  %v9366_v38 = vld [vmem:[%s15514_s5 + $0x6c8] ss:$16 sps:$4 sm:$0xff]  }
 0x1ac   : > { %4108 = vmatprep.subr.bf16.mxu0 %v9293_v39  ;;  %4190 = vmatprep.subr.bf16.mxu1 %v9296_v40  ;;  %v9371_v39 = vld [vmem:[%s15514_s5 + $0x6e4] ss:$16 sps:$4 sm:$0xff]   ;;  %v9374_v40 = vld [vmem:[%s15514_s5 + $0x6ec] ss:$16 sps:$4 sm:$0xff]  }
 0x1af   : > { %4109 = vmatpush1.bf16.msra.mxu0 %v9291_v43  ;;  %4191 = vmatpush1.bf16.msra.mxu1 %v9294_v44  ;;  %v9369_v43 = vld [vmem:[%s15514_s5 + $0x6e0] ss:$16 sps:$4 sm:$0xff]   ;;  %v9372_v44 = vld [vmem:[%s15514_s5 + $0x6e8] ss:$16 sps:$4 sm:$0xff]  }
 0x1b0   : > { %4110 = vmatprep.subr.bf16.mxu0 %v9299_v45  ;;  %4192 = vmatprep.subr.bf16.mxu1 %v9302_v31  ;;  %v9377_v45 = vld [vmem:[%s15514_s5 + $0x704] ss:$16 sps:$4 sm:$0xff]   ;;  %v9380_v31 = vld [vmem:[%s15514_s5 + $0x70c] ss:$16 sps:$4 sm:$0xff]  }
 0x1b3   : > { %4111 = vmatpush1.bf16.msra.mxu0 %v9297_v47  ;;  %4193 = vmatpush1.bf16.msra.mxu1 %v9300_v49  ;;  %v9375_v47 = vld [vmem:[%s15514_s5 + $0x700] ss:$16 sps:$4 sm:$0xff]   ;;  %v9378_v49 = vld [vmem:[%s15514_s5 + $0x708] ss:$16 sps:$4 sm:$0xff]  }
 0x1b4   : > { %4112 = vmatprep.subr.bf16.mxu0 %v9305_v50  ;;  %4194 = vmatprep.subr.bf16.mxu1 %v9308_v51  ;;  %v9383_v50 = vld [vmem:[%s15514_s5 + $0x724] ss:$16 sps:$4 sm:$0xff]   ;;  %v9386_v51 = vld [vmem:[%s15514_s5 + $0x72c] ss:$16 sps:$4 sm:$0xff]  }
 0x1b7   : > { %4113 = vmatpush1.bf16.msra.mxu0 %v9303_v52  ;;  %4195 = vmatpush1.bf16.msra.mxu1 %v9306_v53  ;;  %v9381_v52 = vld [vmem:[%s15514_s5 + $0x720] ss:$16 sps:$4 sm:$0xff]   ;;  %v9384_v53 = vld [vmem:[%s15514_s5 + $0x728] ss:$16 sps:$4 sm:$0xff]  }
 0x1b8   : > { %4114 = vmatprep.subr.bf16.mxu0 %v9311_v54  ;;  %4196 = vmatprep.subr.bf16.mxu1 %v9314_v55  ;;  %v9389_v54 = vld [vmem:[%s15514_s5 + $0x744] ss:$16 sps:$4 sm:$0xff]   ;;  %v9392_v55 = vld [vmem:[%s15514_s5 + $0x74c] ss:$16 sps:$4 sm:$0xff]  }
 0x1bb   : > { %4115 = vmatpush1.bf16.msra.mxu0 %v9309_v57  ;;  %4197 = vmatpush1.bf16.msra.mxu1 %v9312_v58  ;;  %v9387_v57 = vld [vmem:[%s15514_s5 + $0x740] ss:$16 sps:$4 sm:$0xff]   ;;  %v9390_v58 = vld [vmem:[%s15514_s5 + $0x748] ss:$16 sps:$4 sm:$0xff]  }
 0x1bc   : > { %4116 = vmatprep.subr.bf16.mxu0 %v9317_v59  ;;  %4198 = vmatprep.subr.bf16.mxu1 %v9320_v41  ;;  %v9395_v59 = vld [vmem:[%s15514_s5 + $0x764] ss:$16 sps:$4 sm:$0xff]   ;;  %v9398_v41 = vld [vmem:[%s15514_s5 + $0x76c] ss:$16 sps:$4 sm:$0xff]  }
 0x1bf   : > { %4117 = vmatpush1.bf16.msra.mxu0 %v9315_v60  ;;  %4199 = vmatpush1.bf16.msra.mxu1 %v9318_v61  ;;  %v9393_v60 = vld [vmem:[%s15514_s5 + $0x760] ss:$16 sps:$4 sm:$0xff]   ;;  %v9396_v61 = vld [vmem:[%s15514_s5 + $0x768] ss:$16 sps:$4 sm:$0xff]  }
 0x1c0   : > { %4118 = vmatprep.subr.bf16.mxu0 %v9323_v62  ;;  %4200 = vmatprep.subr.bf16.mxu1 %v9326_v63  ;;  %v9401_v62 = vld [vmem:[%s15514_s5 + $0x784] ss:$16 sps:$4 sm:$0xff]   ;;  %v9404_v63 = vld [vmem:[%s15514_s5 + $0x78c] ss:$16 sps:$4 sm:$0xff]  }
 0x1c3   : > { %4119 = vmatpush1.bf16.msra.mxu0 %v9321_v0  ;;  %4201 = vmatpush1.bf16.msra.mxu1 %v9324_v1  ;;  %v9399_v0 = vld [vmem:[%s15514_s5 + $0x780] ss:$16 sps:$4 sm:$0xff]   ;;  %v9402_v1 = vld [vmem:[%s15514_s5 + $0x788] ss:$16 sps:$4 sm:$0xff]  }
 0x1c4   : > { %4129 = vmatprep.subr.bf16.mxu0 %v9329_v2  ;;  %4211 = vmatprep.subr.bf16.mxu1 %v9332_v3  ;;  %v9407_v2 = vld [vmem:[%s15514_s5 + $0x7a4] ss:$16 sps:$4 sm:$0xff]   ;;  %v9410_v3 = vld [vmem:[%s15514_s5 + $0x7ac] ss:$16 sps:$4 sm:$0xff]  }
 0x1c6   : > { %4121 = vmatmul.mubr.bf16.vlgmr.msra.gmra.mrb[4].mxu0 %v10853_v5  ;;  %4203 = vmatmul.mubr.bf16.vlgmr.msra.gmra.mrb[4].mxu1 %v10853_v5 }
 0x1c7   : > { %4130 = vmatpush1.bf16.msra.mxu0 %v9327_v4  ;;  %4212 = vmatpush1.bf16.msra.mxu1 %v9330_v6  ;;  %v9405_v4 = vld [vmem:[%s15514_s5 + $0x7a0] ss:$16 sps:$4 sm:$0xff]   ;;  %v9408_v6 = vld [vmem:[%s15514_s5 + $0x7a8] ss:$16 sps:$4 sm:$0xff]  }
 0x1c8   : > { %4131 = vmatprep.subr.bf16.mxu0 %v9335_v7  ;;  %4213 = vmatprep.subr.bf16.mxu1 %v9338_v8  ;;  %v9413_v7 = vld [vmem:[%s15514_s5 + $0x7c4] ss:$16 sps:$4 sm:$0xff]   ;;  %v9416_v8 = vld [vmem:[%s15514_s5 + $0x7cc] ss:$16 sps:$4 sm:$0xff]  }
 0x1c9   : > { %4161 = vmatprep.mubr.bf16.mxu0 %v10931_v30  ;;  %4243 = vmatprep.mubr.bf16.mxu1 %v10931_v30 }
 0x1cb   : > { %4132 = vmatpush1.bf16.msra.mxu0 %v9333_v9  ;;  %4214 = vmatpush1.bf16.msra.mxu1 %v9336_v11  ;;  %v9411_v9 = vld [vmem:[%s15514_s5 + $0x7c0] ss:$16 sps:$4 sm:$0xff]   ;;  %v9414_v11 = vld [vmem:[%s15514_s5 + $0x7c8] ss:$16 sps:$4 sm:$0xff]  }
 0x1cc   : > { %4133 = vmatprep.subr.bf16.mxu0 %v9341_v12  ;;  %4215 = vmatprep.subr.bf16.mxu1 %v9344_v14  ;;  %v9419_v12 = vld [vmem:[%s15514_s5 + $0x7e4] ss:$16 sps:$4 sm:$0xff]   ;;  %v9422_v14 = vld [vmem:[%s15514_s5 + $0x7ec] ss:$16 sps:$4 sm:$0xff]  }
 0x1cf   : > { %4134 = vmatpush1.bf16.msra.mxu0 %v9339_v16  ;;  %4216 = vmatpush1.bf16.msra.mxu1 %v9342_v17  ;;  %v9417_v16 = vld [vmem:[%s15514_s5 + $0x7e0] ss:$16 sps:$4 sm:$0xff]   ;;  %v9420_v17 = vld [vmem:[%s15514_s5 + $0x7e8] ss:$16 sps:$4 sm:$0xff]  }
 0x1d0   : > { %4135 = vmatprep.subr.bf16.mxu0 %v9347_v18  ;;  %4217 = vmatprep.subr.bf16.mxu1 %v9350_v19  ;;  %v9425_v18 = vld [vmem:[%s15514_s5 + $0x4] ss:$16 sps:$4 sm:$0xff]   ;;  %v9428_v19 = vld [vmem:[%s15514_s5 + $0xc] ss:$16 sps:$4 sm:$0xff]  }
 0x1d3   : > { %4136 = vmatpush1.bf16.msra.mxu0 %v9345_v22  ;;  %4218 = vmatpush1.bf16.msra.mxu1 %v9348_v23  ;;  %v9423_v22 = vld [vmem:[%s15514_s5] ss:$16 sps:$4 sm:$0xff]   ;;  %v9426_v23 = vld [vmem:[%s15514_s5 + $0x8] ss:$16 sps:$4 sm:$0xff]  }
 0x1d4   : > { %4137 = vmatprep.subr.bf16.mxu0 %v9353_v13  ;;  %4219 = vmatprep.subr.bf16.mxu1 %v9356_v25  ;;  %v9431_v13 = vld [vmem:[%s15514_s5 + $0x24] ss:$16 sps:$4 sm:$0xff]   ;;  %v9434_v25 = vld [vmem:[%s15514_s5 + $0x2c] ss:$16 sps:$4 sm:$0xff]  }
 0x1d7   : > { %4138 = vmatpush1.bf16.msra.mxu0 %v9351_v26  ;;  %4220 = vmatpush1.bf16.msra.mxu1 %v9354_v27  ;;  %v9429_v26 = vld [vmem:[%s15514_s5 + $0x20] ss:$16 sps:$4 sm:$0xff]   ;;  %v9432_v27 = vld [vmem:[%s15514_s5 + $0x28] ss:$16 sps:$4 sm:$0xff]  }
 0x1d8   : > { %4139 = vmatprep.subr.bf16.mxu0 %v9359_v28  ;;  %4221 = vmatprep.subr.bf16.mxu1 %v9362_v32  ;;  %v9437_v28 = vld [vmem:[%s15514_s5 + $0x44] ss:$16 sps:$4 sm:$0xff]   ;;  %v9440_v32 = vld [vmem:[%s15514_s5 + $0x4c] ss:$16 sps:$4 sm:$0xff]  }
 0x1db   : > { %4140 = vmatpush1.bf16.msra.mxu0 %v9357_v33  ;;  %4222 = vmatpush1.bf16.msra.mxu1 %v9360_v34  ;;  %v9435_v33 = vld [vmem:[%s15514_s5 + $0x40] ss:$16 sps:$4 sm:$0xff]   ;;  %v9438_v34 = vld [vmem:[%s15514_s5 + $0x48] ss:$16 sps:$4 sm:$0xff]  }
 0x1dc   : > { %4141 = vmatprep.subr.bf16.mxu0 %v9365_v35  ;;  %4223 = vmatprep.subr.bf16.mxu1 %v9368_v36  ;;  %v9443_v35 = vld [vmem:[%s15514_s5 + $0x64] ss:$16 sps:$4 sm:$0xff]   ;;  %v9441_v36 = vld [vmem:[%s15514_s5 + $0x60] ss:$16 sps:$4 sm:$0xff]  }
 0x1df   : > { %4142 = vmatpush1.bf16.msra.mxu0 %v9363_v37  ;;  %4224 = vmatpush1.bf16.msra.mxu1 %v9366_v38  ;;  %v9444_v37 = vld [vmem:[%s15514_s5 + $0x68] ss:$16 sps:$4 sm:$0xff]   ;;  %v9449_v38 = vld [vmem:[%s15514_s5 + $0x84] ss:$16 sps:$4 sm:$0xff]  }
 0x1e0   : > { %4143 = vmatprep.subr.bf16.mxu0 %v9371_v39  ;;  %4225 = vmatprep.subr.bf16.mxu1 %v9374_v40  ;;  %v9452_v39 = vld [vmem:[%s15514_s5 + $0x8c] ss:$16 sps:$4 sm:$0xff]   ;;  %v9447_v40 = vld [vmem:[%s15514_s5 + $0x80] ss:$16 sps:$4 sm:$0xff]  }
 0x1e3   : > { %4144 = vmatpush1.bf16.msra.mxu0 %v9369_v43  ;;  %4226 = vmatpush1.bf16.msra.mxu1 %v9372_v44  ;;  %v9450_v43 = vld [vmem:[%s15514_s5 + $0x88] ss:$16 sps:$4 sm:$0xff]   ;;  %v9455_v44 = vld [vmem:[%s15514_s5 + $0xa4] ss:$16 sps:$4 sm:$0xff]  }
 0x1e4   : > { %4145 = vmatprep.subr.bf16.mxu0 %v9377_v45  ;;  %4227 = vmatprep.subr.bf16.mxu1 %v9380_v31  ;;  %v9458_v45 = vld [vmem:[%s15514_s5 + $0xac] ss:$16 sps:$4 sm:$0xff]   ;;  %v9453_v31 = vld [vmem:[%s15514_s5 + $0xa0] ss:$16 sps:$4 sm:$0xff]  }
 0x1e7   : > { %4146 = vmatpush1.bf16.msra.mxu0 %v9375_v47  ;;  %4228 = vmatpush1.bf16.msra.mxu1 %v9378_v49  ;;  %v9456_v47 = vld [vmem:[%s15514_s5 + $0xa8] ss:$16 sps:$4 sm:$0xff]   ;;  %v9461_v49 = vld [vmem:[%s15514_s5 + $0xc4] ss:$16 sps:$4 sm:$0xff]  }
 0x1e8   : > { %4147 = vmatprep.subr.bf16.mxu0 %v9383_v50  ;;  %4229 = vmatprep.subr.bf16.mxu1 %v9386_v51  ;;  %v9464_v50 = vld [vmem:[%s15514_s5 + $0xcc] ss:$16 sps:$4 sm:$0xff]   ;;  %v9459_v51 = vld [vmem:[%s15514_s5 + $0xc0] ss:$16 sps:$4 sm:$0xff]  }
 0x1eb   : > { %4148 = vmatpush1.bf16.msra.mxu0 %v9381_v52  ;;  %4230 = vmatpush1.bf16.msra.mxu1 %v9384_v53  ;;  %v9462_v52 = vld [vmem:[%s15514_s5 + $0xc8] ss:$16 sps:$4 sm:$0xff]   ;;  %v9467_v53 = vld [vmem:[%s15514_s5 + $0xe4] ss:$16 sps:$4 sm:$0xff]  }
 0x1ec   : > { %4149 = vmatprep.subr.bf16.mxu0 %v9389_v54  ;;  %4231 = vmatprep.subr.bf16.mxu1 %v9392_v55  ;;  %v9470_v54 = vld [vmem:[%s15514_s5 + $0xec] ss:$16 sps:$4 sm:$0xff]   ;;  %v9465_v55 = vld [vmem:[%s15514_s5 + $0xe0] ss:$16 sps:$4 sm:$0xff]  }
 0x1ef   : > { %4150 = vmatpush1.bf16.msra.mxu0 %v9387_v57  ;;  %4232 = vmatpush1.bf16.msra.mxu1 %v9390_v58  ;;  %v9468_v57 = vld [vmem:[%s15514_s5 + $0xe8] ss:$16 sps:$4 sm:$0xff]   ;;  %v9473_v58 = vld [vmem:[%s15514_s5 + $0x104] ss:$16 sps:$4 sm:$0xff]  }
 0x1f0   : > { %4151 = vmatprep.subr.bf16.mxu0 %v9395_v59  ;;  %4233 = vmatprep.subr.bf16.mxu1 %v9398_v41  ;;  %v9476_v59 = vld [vmem:[%s15514_s5 + $0x10c] ss:$16 sps:$4 sm:$0xff]   ;;  %v9471_v41 = vld [vmem:[%s15514_s5 + $0x100] ss:$16 sps:$4 sm:$0xff]  }
 0x1f3   : > { %4152 = vmatpush1.bf16.msra.mxu0 %v9393_v60  ;;  %4234 = vmatpush1.bf16.msra.mxu1 %v9396_v61  ;;  %v9474_v60 = vld [vmem:[%s15514_s5 + $0x108] ss:$16 sps:$4 sm:$0xff]   ;;  %v9479_v61 = vld [vmem:[%s15514_s5 + $0x124] ss:$16 sps:$4 sm:$0xff]  }
 0x1f4   : > { %4153 = vmatprep.subr.bf16.mxu0 %v9401_v62  ;;  %4235 = vmatprep.subr.bf16.mxu1 %v9404_v63  ;;  %v9482_v62 = vld [vmem:[%s15514_s5 + $0x12c] ss:$16 sps:$4 sm:$0xff]   ;;  %v9477_v63 = vld [vmem:[%s15514_s5 + $0x120] ss:$16 sps:$4 sm:$0xff]  }
 0x1f7   : > { %4154 = vmatpush1.bf16.msra.mxu0 %v9399_v0  ;;  %4236 = vmatpush1.bf16.msra.mxu1 %v9402_v1  ;;  %v9480_v0 = vld [vmem:[%s15514_s5 + $0x128] ss:$16 sps:$4 sm:$0xff]   ;;  %v9485_v1 = vld [vmem:[%s15514_s5 + $0x144] ss:$16 sps:$4 sm:$0xff]  }
 0x1f8   : > { %4155 = vmatprep.subr.bf16.mxu0 %v9407_v2  ;;  %4237 = vmatprep.subr.bf16.mxu1 %v9410_v3  ;;  %v9488_v2 = vld [vmem:[%s15514_s5 + $0x14c] ss:$16 sps:$4 sm:$0xff]   ;;  %v9483_v3 = vld [vmem:[%s15514_s5 + $0x140] ss:$16 sps:$4 sm:$0xff]  }
 0x1fb   : > { %4156 = vmatpush1.bf16.msra.mxu0 %v9405_v4  ;;  %4238 = vmatpush1.bf16.msra.mxu1 %v9408_v6  ;;  %v9486_v4 = vld [vmem:[%s15514_s5 + $0x148] ss:$16 sps:$4 sm:$0xff]   ;;  %v9491_v6 = vld [vmem:[%s15514_s5 + $0x164] ss:$16 sps:$4 sm:$0xff]  }
 0x1fc   : > { %4157 = vmatprep.subr.bf16.mxu0 %v9413_v7  ;;  %4239 = vmatprep.subr.bf16.mxu1 %v9416_v8  ;;  %v9494_v7 = vld [vmem:[%s15514_s5 + $0x16c] ss:$16 sps:$4 sm:$0xff]   ;;  %v9489_v8 = vld [vmem:[%s15514_s5 + $0x160] ss:$16 sps:$4 sm:$0xff]  }
 0x1ff   : > { %4158 = vmatpush1.bf16.msra.mxu0 %v9411_v9  ;;  %4240 = vmatpush1.bf16.msra.mxu1 %v9414_v11  ;;  %v9492_v9 = vld [vmem:[%s15514_s5 + $0x168] ss:$16 sps:$4 sm:$0xff]   ;;  %v9497_v11 = vld [vmem:[%s15514_s5 + $0x184] ss:$16 sps:$4 sm:$0xff]  }
 0x200   : > { %4159 = vmatprep.subr.bf16.mxu0 %v9419_v12  ;;  %4241 = vmatprep.subr.bf16.mxu1 %v9422_v14  ;;  %v9500_v12 = vld [vmem:[%s15514_s5 + $0x18c] ss:$16 sps:$4 sm:$0xff]   ;;  %v9495_v14 = vld [vmem:[%s15514_s5 + $0x180] ss:$16 sps:$4 sm:$0xff]  }
 0x203   : > { %4160 = vmatpush1.bf16.msra.mxu0 %v9417_v16  ;;  %4242 = vmatpush1.bf16.msra.mxu1 %v9420_v17  ;;  %v9498_v16 = vld [vmem:[%s15514_s5 + $0x188] ss:$16 sps:$4 sm:$0xff]   ;;  %v9503_v17 = vld [vmem:[%s15514_s5 + $0x1a4] ss:$16 sps:$4 sm:$0xff]  }
 0x204   : > { %4892 = vmatprep.subr.bf16.mxu0 %v9425_v18  ;;  %4974 = vmatprep.subr.bf16.mxu1 %v9428_v19  ;;  %v9506_v18 = vld [vmem:[%s15514_s5 + $0x1ac] ss:$16 sps:$4 sm:$0xff]   ;;  %v9501_v19 = vld [vmem:[%s15514_s5 + $0x1a0] ss:$16 sps:$4 sm:$0xff]  }
 0x206   : > { %4162 = vmatmul.mubr.bf16.vlgmr.msra.gmra.mrb[4].mxu0 %v11066_v10  ;;  %4244 = vmatmul.mubr.bf16.vlgmr.msra.gmra.mrb[4].mxu1 %v11066_v10 }
 0x207   : > { %4893 = vmatpush1.bf16.msra.mxu0 %v9423_v22  ;;  %4975 = vmatpush1.bf16.msra.mxu1 %v9426_v23  ;;  %v9504_v22 = vld [vmem:[%s15514_s5 + $0x1a8] ss:$16 sps:$4 sm:$0xff]   ;;  %v9509_v23 = vld [vmem:[%s15514_s5 + $0x1c4] ss:$16 sps:$4 sm:$0xff]  }
 0x208   : > { %4894 = vmatprep.subr.bf16.mxu0 %v9431_v13  ;;  %4976 = vmatprep.subr.bf16.mxu1 %v9434_v25  ;;  %v9512_v13 = vld [vmem:[%s15514_s5 + $0x1cc] ss:$16 sps:$4 sm:$0xff]   ;;  %v9507_v25 = vld [vmem:[%s15514_s5 + $0x1c0] ss:$16 sps:$4 sm:$0xff]  }
 0x209   : > { %4924 = vmatprep.mubr.bf16.mxu0 %v11082_v15  ;;  %5006 = vmatprep.mubr.bf16.mxu1 %v11082_v15  ;;  %v9446_v15 = vld [vmem:[%s15514_s5 + $0x6c] ss:$16 sps:$4 sm:$0xff]  }
 0x20b   : > { %4895 = vmatpush1.bf16.msra.mxu0 %v9429_v26  ;;  %4977 = vmatpush1.bf16.msra.mxu1 %v9432_v27  ;;  %v9510_v26 = vld [vmem:[%s15514_s5 + $0x1c8] ss:$16 sps:$4 sm:$0xff]   ;;  %v9515_v27 = vld [vmem:[%s15514_s5 + $0x1e4] ss:$16 sps:$4 sm:$0xff]  }
 0x20c   : > { %4896 = vmatprep.subr.bf16.mxu0 %v9437_v28  ;;  %4978 = vmatprep.subr.bf16.mxu1 %v9440_v32  ;;  %v9518_v28 = vld [vmem:[%s15514_s5 + $0x1ec] ss:$16 sps:$4 sm:$0xff]   ;;  %v9513_v32 = vld [vmem:[%s15514_s5 + $0x1e0] ss:$16 sps:$4 sm:$0xff]  }
 0x20f   : > { %4897 = vmatpush1.bf16.msra.mxu0 %v9435_v33  ;;  %4979 = vmatpush1.bf16.msra.mxu1 %v9438_v34  ;;  %v9516_v33 = vld [vmem:[%s15514_s5 + $0x1e8] ss:$16 sps:$4 sm:$0xff]   ;;  %v9521_v34 = vld [vmem:[%s15514_s5 + $0x204] ss:$16 sps:$4 sm:$0xff]  }
 0x210   : > { %4898 = vmatprep.subr.bf16.mxu0 %v9443_v35  ;;  %4980 = vmatprep.subr.bf16.mxu1 %v9446_v15  ;;  %v9524_v35 = vld [vmem:[%s15514_s5 + $0x20c] ss:$16 sps:$4 sm:$0xff]   ;;  %v9519_v15 = vld [vmem:[%s15514_s5 + $0x200] ss:$16 sps:$4 sm:$0xff]  }
 0x213   : > { %4899 = vmatpush1.bf16.msra.mxu0 %v9441_v36  ;;  %4981 = vmatpush1.bf16.msra.mxu1 %v9444_v37  ;;  %v9522_v36 = vld [vmem:[%s15514_s5 + $0x208] ss:$16 sps:$4 sm:$0xff]   ;;  %v9527_v37 = vld [vmem:[%s15514_s5 + $0x224] ss:$16 sps:$4 sm:$0xff]  }
 0x214   : > { %4900 = vmatprep.subr.bf16.mxu0 %v9449_v38  ;;  %4982 = vmatprep.subr.bf16.mxu1 %v9452_v39  ;;  %v9530_v38 = vld [vmem:[%s15514_s5 + $0x22c] ss:$16 sps:$4 sm:$0xff]   ;;  %v9525_v39 = vld [vmem:[%s15514_s5 + $0x220] ss:$16 sps:$4 sm:$0xff]  }
 0x217   : > { %4901 = vmatpush1.bf16.msra.mxu0 %v9447_v40  ;;  %4983 = vmatpush1.bf16.msra.mxu1 %v9450_v43  ;;  %v9528_v40 = vld [vmem:[%s15514_s5 + $0x228] ss:$16 sps:$4 sm:$0xff]   ;;  %v9533_v43 = vld [vmem:[%s15514_s5 + $0x244] ss:$16 sps:$4 sm:$0xff]  }
 0x218   : > { %4902 = vmatprep.subr.bf16.mxu0 %v9455_v44  ;;  %4984 = vmatprep.subr.bf16.mxu1 %v9458_v45  ;;  %v9531_v44 = vld [vmem:[%s15514_s5 + $0x240] ss:$16 sps:$4 sm:$0xff]   ;;  %v9534_v45 = vld [vmem:[%s15514_s5 + $0x248] ss:$16 sps:$4 sm:$0xff]  }
 0x21b   : > { %4903 = vmatpush1.bf16.msra.mxu0 %v9453_v31  ;;  %4985 = vmatpush1.bf16.msra.mxu1 %v9456_v47  ;;  %v9539_v31 = vld [vmem:[%s15514_s5 + $0x264] ss:$16 sps:$4 sm:$0xff]   ;;  %v9537_v47 = vld [vmem:[%s15514_s5 + $0x260] ss:$16 sps:$4 sm:$0xff]  }
 0x21c   : > { %4904 = vmatprep.subr.bf16.mxu0 %v9461_v49  ;;  %4986 = vmatprep.subr.bf16.mxu1 %v9464_v50  ;;  %v9540_v49 = vld [vmem:[%s15514_s5 + $0x268] ss:$16 sps:$4 sm:$0xff]   ;;  %v9545_v50 = vld [vmem:[%s15514_s5 + $0x284] ss:$16 sps:$4 sm:$0xff]  }
 0x21f   : > { %4905 = vmatpush1.bf16.msra.mxu0 %v9459_v51  ;;  %4987 = vmatpush1.bf16.msra.mxu1 %v9462_v52  ;;  %v9548_v51 = vld [vmem:[%s15514_s5 + $0x28c] ss:$16 sps:$4 sm:$0xff]   ;;  %v9543_v52 = vld [vmem:[%s15514_s5 + $0x280] ss:$16 sps:$4 sm:$0xff]  }
 0x220   : > { %4906 = vmatprep.subr.bf16.mxu0 %v9467_v53  ;;  %4988 = vmatprep.subr.bf16.mxu1 %v9470_v54  ;;  %v9546_v53 = vld [vmem:[%s15514_s5 + $0x288] ss:$16 sps:$4 sm:$0xff]   ;;  %v9551_v54 = vld [vmem:[%s15514_s5 + $0x2a4] ss:$16 sps:$4 sm:$0xff]  }
 0x223   : > { %4907 = vmatpush1.bf16.msra.mxu0 %v9465_v55  ;;  %4989 = vmatpush1.bf16.msra.mxu1 %v9468_v57  ;;  %v9554_v55 = vld [vmem:[%s15514_s5 + $0x2ac] ss:$16 sps:$4 sm:$0xff]   ;;  %v9549_v57 = vld [vmem:[%s15514_s5 + $0x2a0] ss:$16 sps:$4 sm:$0xff]  }
 0x224   : > { %4908 = vmatprep.subr.bf16.mxu0 %v9473_v58  ;;  %4990 = vmatprep.subr.bf16.mxu1 %v9476_v59  ;;  %v9552_v58 = vld [vmem:[%s15514_s5 + $0x2a8] ss:$16 sps:$4 sm:$0xff]   ;;  %v9557_v59 = vld [vmem:[%s15514_s5 + $0x2c4] ss:$16 sps:$4 sm:$0xff]  }
 0x227   : > { %4909 = vmatpush1.bf16.msra.mxu0 %v9471_v41  ;;  %4991 = vmatpush1.bf16.msra.mxu1 %v9474_v60  ;;  %v9560_v41 = vld [vmem:[%s15514_s5 + $0x2cc] ss:$16 sps:$4 sm:$0xff]  }
 0x228   : > { %4910 = vmatprep.subr.bf16.mxu0 %v9479_v61  ;;  %4992 = vmatprep.subr.bf16.mxu1 %v9482_v62 }
 0x22b   : > { %4911 = vmatpush1.bf16.msra.mxu0 %v9477_v63  ;;  %4993 = vmatpush1.bf16.msra.mxu1 %v9480_v0 }
 0x22c   : > { %4912 = vmatprep.subr.bf16.mxu0 %v9485_v1  ;;  %4994 = vmatprep.subr.bf16.mxu1 %v9488_v2  ;;  %v9555_v2 = vld [vmem:[%s15514_s5 + $0x2c0] ss:$16 sps:$4 sm:$0xff]  }
 0x22f   : > { %4913 = vmatpush1.bf16.msra.mxu0 %v9483_v3  ;;  %4995 = vmatpush1.bf16.msra.mxu1 %v9486_v4  ;;  %v9558_v3 = vld [vmem:[%s15514_s5 + $0x2c8] ss:$16 sps:$4 sm:$0xff]  }
 0x230   : > { %4914 = vmatprep.subr.bf16.mxu0 %v9491_v6  ;;  %4996 = vmatprep.subr.bf16.mxu1 %v9494_v7  ;;  %v9563_v7 = vld [vmem:[%s15514_s5 + $0x2e4] ss:$16 sps:$4 sm:$0xff]  }
 0x233   : > { %4915 = vmatpush1.bf16.msra.mxu0 %v9489_v8  ;;  %4997 = vmatpush1.bf16.msra.mxu1 %v9492_v9  ;;  %v9566_v8 = vld [vmem:[%s15514_s5 + $0x2ec] ss:$16 sps:$4 sm:$0xff]   ;;  %v9561_v9 = vld [vmem:[%s15514_s5 + $0x2e0] ss:$16 sps:$4 sm:$0xff]  }
 0x234   : > { %4916 = vmatprep.subr.bf16.mxu0 %v9497_v11  ;;  %4998 = vmatprep.subr.bf16.mxu1 %v9500_v12  ;;  %v9564_v11 = vld [vmem:[%s15514_s5 + $0x2e8] ss:$16 sps:$4 sm:$0xff]   ;;  %v9569_v12 = vld [vmem:[%s15514_s5 + $0x304] ss:$16 sps:$4 sm:$0xff]  }
 0x237   : > { %4917 = vmatpush1.bf16.msra.mxu0 %v9495_v14  ;;  %4999 = vmatpush1.bf16.msra.mxu1 %v9498_v16  ;;  %v9572_v14 = vld [vmem:[%s15514_s5 + $0x30c] ss:$16 sps:$4 sm:$0xff]   ;;  %v9567_v16 = vld [vmem:[%s15514_s5 + $0x300] ss:$16 sps:$4 sm:$0xff]  }
 0x238   : > { %4918 = vmatprep.subr.bf16.mxu0 %v9503_v17  ;;  %5000 = vmatprep.subr.bf16.mxu1 %v9506_v18  ;;  %v9570_v17 = vld [vmem:[%s15514_s5 + $0x308] ss:$16 sps:$4 sm:$0xff]   ;;  %v9575_v18 = vld [vmem:[%s15514_s5 + $0x324] ss:$16 sps:$4 sm:$0xff]  }
 0x23b   : > { %4919 = vmatpush1.bf16.msra.mxu0 %v9501_v19  ;;  %5001 = vmatpush1.bf16.msra.mxu1 %v9504_v22  ;;  %v9578_v19 = vld [vmem:[%s15514_s5 + $0x32c] ss:$16 sps:$4 sm:$0xff]   ;;  %v9573_v22 = vld [vmem:[%s15514_s5 + $0x320] ss:$16 sps:$4 sm:$0xff]  }
 0x23c   : > { %4920 = vmatprep.subr.bf16.mxu0 %v9509_v23  ;;  %5002 = vmatprep.subr.bf16.mxu1 %v9512_v13  ;;  %v9576_v23 = vld [vmem:[%s15514_s5 + $0x328] ss:$16 sps:$4 sm:$0xff]   ;;  %v9581_v13 = vld [vmem:[%s15514_s5 + $0x344] ss:$16 sps:$4 sm:$0xff]  }
 0x23f   : > { %4921 = vmatpush1.bf16.msra.mxu0 %v9507_v25  ;;  %5003 = vmatpush1.bf16.msra.mxu1 %v9510_v26  ;;  %v9584_v25 = vld [vmem:[%s15514_s5 + $0x34c] ss:$16 sps:$4 sm:$0xff]   ;;  %v9579_v26 = vld [vmem:[%s15514_s5 + $0x340] ss:$16 sps:$4 sm:$0xff]  }
 0x240   : > { %4922 = vmatprep.subr.bf16.mxu0 %v9515_v27  ;;  %5004 = vmatprep.subr.bf16.mxu1 %v9518_v28  ;;  %v9582_v27 = vld [vmem:[%s15514_s5 + $0x348] ss:$16 sps:$4 sm:$0xff]   ;;  %v9587_v28 = vld [vmem:[%s15514_s5 + $0x364] ss:$16 sps:$4 sm:$0xff]  }
 0x243   : > { %4923 = vmatpush1.bf16.msra.mxu0 %v9513_v32  ;;  %5005 = vmatpush1.bf16.msra.mxu1 %v9516_v33  ;;  %v9590_v32 = vld [vmem:[%s15514_s5 + $0x36c] ss:$16 sps:$4 sm:$0xff]   ;;  %v9585_v33 = vld [vmem:[%s15514_s5 + $0x360] ss:$16 sps:$4 sm:$0xff]  }
 0x244   : > { %4933 = vmatprep.subr.bf16.mxu0 %v9521_v34  ;;  %5015 = vmatprep.subr.bf16.mxu1 %v9524_v35  ;;  %v9588_v34 = vld [vmem:[%s15514_s5 + $0x368] ss:$16 sps:$4 sm:$0xff]   ;;  %v9593_v35 = vld [vmem:[%s15514_s5 + $0x384] ss:$16 sps:$4 sm:$0xff]  }
 0x246   : > { %4925 = vmatmul.mubr.bf16.vlgmr.msra.gmra.mrb[4].mxu0 %v11276_v20  ;;  %5007 = vmatmul.mubr.bf16.vlgmr.msra.gmra.mrb[4].mxu1 %v11276_v20  ;;  %v9536_v20 = vld [vmem:[%s15514_s5 + $0x24c] ss:$16 sps:$4 sm:$0xff]  }
 0x247   : > { %4934 = vmatpush1.bf16.msra.mxu0 %v9519_v15  ;;  %5016 = vmatpush1.bf16.msra.mxu1 %v9522_v36  ;;  %v9596_v15 = vld [vmem:[%s15514_s5 + $0x38c] ss:$16 sps:$4 sm:$0xff]   ;;  %v9591_v36 = vld [vmem:[%s15514_s5 + $0x380] ss:$16 sps:$4 sm:$0xff]  }
 0x248   : > { %4935 = vmatprep.subr.bf16.mxu0 %v9527_v37  ;;  %5017 = vmatprep.subr.bf16.mxu1 %v9530_v38  ;;  %v9594_v37 = vld [vmem:[%s15514_s5 + $0x388] ss:$16 sps:$4 sm:$0xff]   ;;  %v9599_v38 = vld [vmem:[%s15514_s5 + $0x3a4] ss:$16 sps:$4 sm:$0xff]  }
 0x249   : > { %4965 = vmatprep.mubr.bf16.mxu0 %v11289_v24  ;;  %5047 = vmatprep.mubr.bf16.mxu1 %v11289_v24  ;;  %v9542_v24 = vld [vmem:[%s15514_s5 + $0x26c] ss:$16 sps:$4 sm:$0xff]  }
 0x24b   : > { %4936 = vmatpush1.bf16.msra.mxu0 %v9525_v39  ;;  %5018 = vmatpush1.bf16.msra.mxu1 %v9528_v40  ;;  %v9602_v39 = vld [vmem:[%s15514_s5 + $0x3ac] ss:$16 sps:$4 sm:$0xff]   ;;  %v9597_v40 = vld [vmem:[%s15514_s5 + $0x3a0] ss:$16 sps:$4 sm:$0xff]  }
 0x24c   : > { %4937 = vmatprep.subr.bf16.mxu0 %v9533_v43  ;;  %5019 = vmatprep.subr.bf16.mxu1 %v9536_v20  ;;  %v9600_v43 = vld [vmem:[%s15514_s5 + $0x3a8] ss:$16 sps:$4 sm:$0xff]   ;;  %v9605_v20 = vld [vmem:[%s15514_s5 + $0x3c4] ss:$16 sps:$4 sm:$0xff]  }
 0x24f   : > { %4938 = vmatpush1.bf16.msra.mxu0 %v9531_v44  ;;  %5020 = vmatpush1.bf16.msra.mxu1 %v9534_v45  ;;  %v9608_v44 = vld [vmem:[%s15514_s5 + $0x3cc] ss:$16 sps:$4 sm:$0xff]   ;;  %v9603_v45 = vld [vmem:[%s15514_s5 + $0x3c0] ss:$16 sps:$4 sm:$0xff]  }
 0x250   : > { %4939 = vmatprep.subr.bf16.mxu0 %v9539_v31  ;;  %5021 = vmatprep.subr.bf16.mxu1 %v9542_v24  ;;  %v9606_v31 = vld [vmem:[%s15514_s5 + $0x3c8] ss:$16 sps:$4 sm:$0xff]   ;;  %v9611_v24 = vld [vmem:[%s15514_s5 + $0x3e4] ss:$16 sps:$4 sm:$0xff]  }
 0x253   : > { %4940 = vmatpush1.bf16.msra.mxu0 %v9537_v47  ;;  %5022 = vmatpush1.bf16.msra.mxu1 %v9540_v49  ;;  %v9614_v47 = vld [vmem:[%s15514_s5 + $0x3ec] ss:$16 sps:$4 sm:$0xff]   ;;  %v9609_v49 = vld [vmem:[%s15514_s5 + $0x3e0] ss:$16 sps:$4 sm:$0xff]  }
 0x254   : > { %4941 = vmatprep.subr.bf16.mxu0 %v9545_v50  ;;  %5023 = vmatprep.subr.bf16.mxu1 %v9548_v51  ;;  %v9612_v50 = vld [vmem:[%s15514_s5 + $0x3e8] ss:$16 sps:$4 sm:$0xff]   ;;  %v9617_v51 = vld [vmem:[%s15514_s5 + $0x804] ss:$16 sps:$4 sm:$0xff]  }
 0x257   : > { %4942 = vmatpush1.bf16.msra.mxu0 %v9543_v52  ;;  %5024 = vmatpush1.bf16.msra.mxu1 %v9546_v53  ;;  %v9620_v52 = vld [vmem:[%s15514_s5 + $0x80c] ss:$16 sps:$4 sm:$0xff]   ;;  %v9615_v53 = vld [vmem:[%s15514_s5 + $0x800] ss:$16 sps:$4 sm:$0xff]  }
 0x258   : > { %4943 = vmatprep.subr.bf16.mxu0 %v9551_v54  ;;  %5025 = vmatprep.subr.bf16.mxu1 %v9554_v55  ;;  %v9618_v54 = vld [vmem:[%s15514_s5 + $0x808] ss:$16 sps:$4 sm:$0xff]   ;;  %v9623_v55 = vld [vmem:[%s15514_s5 + $0x824] ss:$16 sps:$4 sm:$0xff]  }
 0x259   : > { %v12563_v60 = vpop.f32.mrb[0].mxu0  ;;  %v12565_v61 = vpop.f32.mrb[0].mxu1 }
 0x25a   : > { %v12567_v62 = vpop.f32.mrb[1].mxu0  ;;  %v12569_v63 = vpop.f32.mrb[1].mxu1 }
 0x25b   : > { %v3102_v0 = vpop.f32.mrb[2].mxu0  ;;  %v3184_v1 = vpop.f32.mrb[2].mxu1  ;;  %4944 = vmatpush1.bf16.msra.mxu0 %v9549_v57  ;;  %5026 = vmatpush1.bf16.msra.mxu1 %v9552_v58  ;;  %v9626_v57 = vld [vmem:[%s15514_s5 + $0x82c] ss:$16 sps:$4 sm:$0xff]   ;;  %v9621_v58 = vld [vmem:[%s15514_s5 + $0x820] ss:$16 sps:$4 sm:$0xff]  }
 0x25c   : > { %v3103_v4 = vpop.f32.mrb[3].mxu0  ;;  %v3185_v6 = vpop.f32.mrb[3].mxu1  ;;  %4945 = vmatprep.subr.bf16.mxu0 %v9557_v59  ;;  %5027 = vmatprep.subr.bf16.mxu1 %v9560_v41  ;;  %v9624_v59 = vld [vmem:[%s15514_s5 + $0x828] ss:$16 sps:$4 sm:$0xff]   ;;  %v9629_v41 = vld [vmem:[%s15514_s5 + $0x844] ss:$16 sps:$4 sm:$0xff]  }
 0x25d   : > { %v9627_v0 = vld [vmem:[%s15514_s5 + $0x840] ss:$16 sps:$4 sm:$0xff]   ;;  %v9630_v1 = vld [vmem:[%s15514_s5 + $0x848] ss:$16 sps:$4 sm:$0xff]  }
 0x25e   : > { %v9633_v4 = vld [vmem:[%s15514_s5 + $0x860] ss:$16 sps:$4 sm:$0xff]   ;;  %v9636_v6 = vld [vmem:[%s15514_s5 + $0x868] ss:$16 sps:$4 sm:$0xff]  }
 0x25f   : > { %4946 = vmatpush1.bf16.msra.mxu0 %v9555_v2  ;;  %5028 = vmatpush1.bf16.msra.mxu1 %v9558_v3  ;;  %v9635_v2 = vld [vmem:[%s15514_s5 + $0x864] ss:$16 sps:$4 sm:$0xff]   ;;  %v9638_v3 = vld [vmem:[%s15514_s5 + $0x86c] ss:$16 sps:$4 sm:$0xff]  }
 0x260   : > { %4947 = vmatprep.subr.bf16.mxu0 %v9563_v7  ;;  %5029 = vmatprep.subr.bf16.mxu1 %v9566_v8  ;;  %v9641_v7 = vld [vmem:[%s15514_s5 + $0x884] ss:$16 sps:$4 sm:$0xff]   ;;  %v9644_v8 = vld [vmem:[%s15514_s5 + $0x88c] ss:$16 sps:$4 sm:$0xff]  }
 0x263   : > { %4948 = vmatpush1.bf16.msra.mxu0 %v9561_v9  ;;  %5030 = vmatpush1.bf16.msra.mxu1 %v9564_v11  ;;  %v9639_v9 = vld [vmem:[%s15514_s5 + $0x880] ss:$16 sps:$4 sm:$0xff]   ;;  %v9642_v11 = vld [vmem:[%s15514_s5 + $0x888] ss:$16 sps:$4 sm:$0xff]  }
 0x264   : > { %4949 = vmatprep.subr.bf16.mxu0 %v9569_v12  ;;  %5031 = vmatprep.subr.bf16.mxu1 %v9572_v14  ;;  %v9647_v12 = vld [vmem:[%s15514_s5 + $0x8a4] ss:$16 sps:$4 sm:$0xff]   ;;  %v9650_v14 = vld [vmem:[%s15514_s5 + $0x8ac] ss:$16 sps:$4 sm:$0xff]  }
 0x267   : > { %4950 = vmatpush1.bf16.msra.mxu0 %v9567_v16  ;;  %5032 = vmatpush1.bf16.msra.mxu1 %v9570_v17  ;;  %v9645_v16 = vld [vmem:[%s15514_s5 + $0x8a0] ss:$16 sps:$4 sm:$0xff]   ;;  %v9648_v17 = vld [vmem:[%s15514_s5 + $0x8a8] ss:$16 sps:$4 sm:$0xff]  }
 0x268   : > { %4951 = vmatprep.subr.bf16.mxu0 %v9575_v18  ;;  %5033 = vmatprep.subr.bf16.mxu1 %v9578_v19  ;;  %v9653_v18 = vld [vmem:[%s15514_s5 + $0x8c4] ss:$16 sps:$4 sm:$0xff]   ;;  %v9656_v19 = vld [vmem:[%s15514_s5 + $0x8cc] ss:$16 sps:$4 sm:$0xff]  }
 0x26b   : > { %4952 = vmatpush1.bf16.msra.mxu0 %v9573_v22  ;;  %5034 = vmatpush1.bf16.msra.mxu1 %v9576_v23  ;;  %v9651_v22 = vld [vmem:[%s15514_s5 + $0x8c0] ss:$16 sps:$4 sm:$0xff]   ;;  %v9654_v23 = vld [vmem:[%s15514_s5 + $0x8c8] ss:$16 sps:$4 sm:$0xff]  }
 0x26c   : > { %4953 = vmatprep.subr.bf16.mxu0 %v9581_v13  ;;  %5035 = vmatprep.subr.bf16.mxu1 %v9584_v25  ;;  %v9659_v13 = vld [vmem:[%s15514_s5 + $0x8e4] ss:$16 sps:$4 sm:$0xff]   ;;  %v9662_v25 = vld [vmem:[%s15514_s5 + $0x8ec] ss:$16 sps:$4 sm:$0xff]  }
 0x26f   : > { %4954 = vmatpush1.bf16.msra.mxu0 %v9579_v26  ;;  %5036 = vmatpush1.bf16.msra.mxu1 %v9582_v27  ;;  %v9657_v26 = vld [vmem:[%s15514_s5 + $0x8e0] ss:$16 sps:$4 sm:$0xff]   ;;  %v9660_v27 = vld [vmem:[%s15514_s5 + $0x8e8] ss:$16 sps:$4 sm:$0xff]  }
 0x270   : > { %4955 = vmatprep.subr.bf16.mxu0 %v9587_v28  ;;  %5037 = vmatprep.subr.bf16.mxu1 %v9590_v32  ;;  %v9665_v28 = vld [vmem:[%s15514_s5 + $0x904] ss:$16 sps:$4 sm:$0xff]   ;;  %v9668_v32 = vld [vmem:[%s15514_s5 + $0x90c] ss:$16 sps:$4 sm:$0xff]  }
 0x273   : > { %4956 = vmatpush1.bf16.msra.mxu0 %v9585_v33  ;;  %5038 = vmatpush1.bf16.msra.mxu1 %v9588_v34  ;;  %v9663_v33 = vld [vmem:[%s15514_s5 + $0x900] ss:$16 sps:$4 sm:$0xff]   ;;  %v9666_v34 = vld [vmem:[%s15514_s5 + $0x908] ss:$16 sps:$4 sm:$0xff]  }
 0x274   : > { %4957 = vmatprep.subr.bf16.mxu0 %v9593_v35  ;;  %5039 = vmatprep.subr.bf16.mxu1 %v9596_v15  ;;  %v9671_v35 = vld [vmem:[%s15514_s5 + $0x924] ss:$16 sps:$4 sm:$0xff]   ;;  %v9674_v15 = vld [vmem:[%s15514_s5 + $0x92c] ss:$16 sps:$4 sm:$0xff]  }
 0x277   : > { %4958 = vmatpush1.bf16.msra.mxu0 %v9591_v36  ;;  %5040 = vmatpush1.bf16.msra.mxu1 %v9594_v37  ;;  %v9669_v36 = vld [vmem:[%s15514_s5 + $0x920] ss:$16 sps:$4 sm:$0xff]   ;;  %v9672_v37 = vld [vmem:[%s15514_s5 + $0x928] ss:$16 sps:$4 sm:$0xff]  }
 0x278   : > { %4959 = vmatprep.subr.bf16.mxu0 %v9599_v38  ;;  %5041 = vmatprep.subr.bf16.mxu1 %v9602_v39  ;;  %v9677_v38 = vld [vmem:[%s15514_s5 + $0x944] ss:$16 sps:$4 sm:$0xff]   ;;  %v9680_v39 = vld [vmem:[%s15514_s5 + $0x94c] ss:$16 sps:$4 sm:$0xff]  }
 0x27b   : > { %4960 = vmatpush1.bf16.msra.mxu0 %v9597_v40  ;;  %5042 = vmatpush1.bf16.msra.mxu1 %v9600_v43  ;;  %v9675_v40 = vld [vmem:[%s15514_s5 + $0x940] ss:$16 sps:$4 sm:$0xff]   ;;  %v9678_v43 = vld [vmem:[%s15514_s5 + $0x948] ss:$16 sps:$4 sm:$0xff]  }
 0x27c   : > { %4961 = vmatprep.subr.bf16.mxu0 %v9605_v20  ;;  %5043 = vmatprep.subr.bf16.mxu1 %v9608_v44  ;;  %v9683_v20 = vld [vmem:[%s15514_s5 + $0x964] ss:$16 sps:$4 sm:$0xff]   ;;  %v9686_v44 = vld [vmem:[%s15514_s5 + $0x96c] ss:$16 sps:$4 sm:$0xff]  }
 0x27f   : > { %4962 = vmatpush1.bf16.msra.mxu0 %v9603_v45  ;;  %5044 = vmatpush1.bf16.msra.mxu1 %v9606_v31  ;;  %v9681_v45 = vld [vmem:[%s15514_s5 + $0x960] ss:$16 sps:$4 sm:$0xff]   ;;  %v9684_v31 = vld [vmem:[%s15514_s5 + $0x968] ss:$16 sps:$4 sm:$0xff]  }
 0x280   : > { %4963 = vmatprep.subr.bf16.mxu0 %v9611_v24  ;;  %5045 = vmatprep.subr.bf16.mxu1 %v9614_v47  ;;  %v9689_v24 = vld [vmem:[%s15514_s5 + $0x984] ss:$16 sps:$4 sm:$0xff]   ;;  %v9692_v47 = vld [vmem:[%s15514_s5 + $0x98c] ss:$16 sps:$4 sm:$0xff]  }
 0x283   : > { %4964 = vmatpush1.bf16.msra.mxu0 %v9609_v49  ;;  %5046 = vmatpush1.bf16.msra.mxu1 %v9612_v50  ;;  %v9687_v49 = vld [vmem:[%s15514_s5 + $0x980] ss:$16 sps:$4 sm:$0xff]   ;;  %v9690_v50 = vld [vmem:[%s15514_s5 + $0x988] ss:$16 sps:$4 sm:$0xff]  }
 0x284   : > { %5825 = vmatprep.subr.bf16.mxu0 %v9617_v51  ;;  %5907 = vmatprep.subr.bf16.mxu1 %v9620_v52  ;;  %v9695_v51 = vld [vmem:[%s15514_s5 + $0x9a4] ss:$16 sps:$4 sm:$0xff]   ;;  %v9698_v52 = vld [vmem:[%s15514_s5 + $0x9ac] ss:$16 sps:$4 sm:$0xff]  }
 0x286   : > { %4966 = vmatmul.mubr.bf16.vlgmr.msra.gmra.mrb[4].mxu0 %v11486_v29  ;;  %5048 = vmatmul.mubr.bf16.vlgmr.msra.gmra.mrb[4].mxu1 %v11486_v29  ;;  %v9632_v29 = vld [vmem:[%s15514_s5 + $0x84c] ss:$16 sps:$4 sm:$0xff]  }
 0x287   : > { %5826 = vmatpush1.bf16.msra.mxu0 %v9615_v53  ;;  %5908 = vmatpush1.bf16.msra.mxu1 %v9618_v54  ;;  %v9693_v53 = vld [vmem:[%s15514_s5 + $0x9a0] ss:$16 sps:$4 sm:$0xff]   ;;  %v9696_v54 = vld [vmem:[%s15514_s5 + $0x9a8] ss:$16 sps:$4 sm:$0xff]  }
 0x288   : > { %5827 = vmatprep.subr.bf16.mxu0 %v9623_v55  ;;  %5909 = vmatprep.subr.bf16.mxu1 %v9626_v57  ;;  %v9701_v55 = vld [vmem:[%s15514_s5 + $0x9c4] ss:$16 sps:$4 sm:$0xff]   ;;  %v9704_v57 = vld [vmem:[%s15514_s5 + $0x9cc] ss:$16 sps:$4 sm:$0xff]  }
 0x289   : > { %5857 = vmatprep.mubr.bf16.mxu0 %v11502_v21  ;;  %5939 = vmatprep.mubr.bf16.mxu1 %v11502_v21 }
 0x28b   : > { %5828 = vmatpush1.bf16.msra.mxu0 %v9621_v58  ;;  %5910 = vmatpush1.bf16.msra.mxu1 %v9624_v59  ;;  %v9699_v58 = vld [vmem:[%s15514_s5 + $0x9c0] ss:$16 sps:$4 sm:$0xff]   ;;  %v9702_v59 = vld [vmem:[%s15514_s5 + $0x9c8] ss:$16 sps:$4 sm:$0xff]  }
 0x28c   : > { %5829 = vmatprep.subr.bf16.mxu0 %v9629_v41  ;;  %5911 = vmatprep.subr.bf16.mxu1 %v9632_v29  ;;  %v9707_v41 = vld [vmem:[%s15514_s5 + $0x9e4] ss:$16 sps:$4 sm:$0xff]   ;;  %v9710_v29 = vld [vmem:[%s15514_s5 + $0x9ec] ss:$16 sps:$4 sm:$0xff]  }
 0x28f   : > { %5830 = vmatpush1.bf16.msra.mxu0 %v9627_v0  ;;  %5912 = vmatpush1.bf16.msra.mxu1 %v9630_v1  ;;  %v9705_v0 = vld [vmem:[%s15514_s5 + $0x9e0] ss:$16 sps:$4 sm:$0xff]   ;;  %v9708_v1 = vld [vmem:[%s15514_s5 + $0x9e8] ss:$16 sps:$4 sm:$0xff]  }
 0x290   : > { %5831 = vmatprep.subr.bf16.mxu0 %v9635_v2  ;;  %5913 = vmatprep.subr.bf16.mxu1 %v9638_v3  ;;  %v9713_v2 = vld [vmem:[%s15514_s5 + $0xa04] ss:$16 sps:$4 sm:$0xff]   ;;  %v9716_v3 = vld [vmem:[%s15514_s5 + $0xa0c] ss:$16 sps:$4 sm:$0xff]  }
 0x293   : > { %5832 = vmatpush1.bf16.msra.mxu0 %v9633_v4  ;;  %5914 = vmatpush1.bf16.msra.mxu1 %v9636_v6  ;;  %v9711_v4 = vld [vmem:[%s15514_s5 + $0xa00] ss:$16 sps:$4 sm:$0xff]   ;;  %v9714_v6 = vld [vmem:[%s15514_s5 + $0xa08] ss:$16 sps:$4 sm:$0xff]  }
 0x294   : > { %5833 = vmatprep.subr.bf16.mxu0 %v9641_v7  ;;  %5915 = vmatprep.subr.bf16.mxu1 %v9644_v8  ;;  %v9719_v7 = vld [vmem:[%s15514_s5 + $0xa24] ss:$16 sps:$4 sm:$0xff]   ;;  %v9722_v8 = vld [vmem:[%s15514_s5 + $0xa2c] ss:$16 sps:$4 sm:$0xff]  }
 0x297   : > { %5834 = vmatpush1.bf16.msra.mxu0 %v9639_v9  ;;  %5916 = vmatpush1.bf16.msra.mxu1 %v9642_v11  ;;  %v9717_v9 = vld [vmem:[%s15514_s5 + $0xa20] ss:$16 sps:$4 sm:$0xff]   ;;  %v9720_v11 = vld [vmem:[%s15514_s5 + $0xa28] ss:$16 sps:$4 sm:$0xff]  }
 0x298   : > { %5835 = vmatprep.subr.bf16.mxu0 %v9647_v12  ;;  %5917 = vmatprep.subr.bf16.mxu1 %v9650_v14  ;;  %v9725_v12 = vld [vmem:[%s15514_s5 + $0xa44] ss:$16 sps:$4 sm:$0xff]   ;;  %v9728_v14 = vld [vmem:[%s15514_s5 + $0xa4c] ss:$16 sps:$4 sm:$0xff]  }
 0x29b   : > { %5836 = vmatpush1.bf16.msra.mxu0 %v9645_v16  ;;  %5918 = vmatpush1.bf16.msra.mxu1 %v9648_v17  ;;  %v9723_v16 = vld [vmem:[%s15514_s5 + $0xa40] ss:$16 sps:$4 sm:$0xff]   ;;  %v9726_v17 = vld [vmem:[%s15514_s5 + $0xa48] ss:$16 sps:$4 sm:$0xff]  }
 0x29c   : > { %5837 = vmatprep.subr.bf16.mxu0 %v9653_v18  ;;  %5919 = vmatprep.subr.bf16.mxu1 %v9656_v19  ;;  %v9731_v18 = vld [vmem:[%s15514_s5 + $0xa64] ss:$16 sps:$4 sm:$0xff]   ;;  %v9734_v19 = vld [vmem:[%s15514_s5 + $0xa6c] ss:$16 sps:$4 sm:$0xff]  }
 0x29f   : > { %5838 = vmatpush1.bf16.msra.mxu0 %v9651_v22  ;;  %5920 = vmatpush1.bf16.msra.mxu1 %v9654_v23  ;;  %v9729_v22 = vld [vmem:[%s15514_s5 + $0xa60] ss:$16 sps:$4 sm:$0xff]   ;;  %v9732_v23 = vld [vmem:[%s15514_s5 + $0xa68] ss:$16 sps:$4 sm:$0xff]  }
 0x2a0   : > { %5839 = vmatprep.subr.bf16.mxu0 %v9659_v13  ;;  %5921 = vmatprep.subr.bf16.mxu1 %v9662_v25  ;;  %v9737_v13 = vld [vmem:[%s15514_s5 + $0xa84] ss:$16 sps:$4 sm:$0xff]   ;;  %v9740_v25 = vld [vmem:[%s15514_s5 + $0xa8c] ss:$16 sps:$4 sm:$0xff]  }
 0x2a3   : > { %5840 = vmatpush1.bf16.msra.mxu0 %v9657_v26  ;;  %5922 = vmatpush1.bf16.msra.mxu1 %v9660_v27  ;;  %v9735_v26 = vld [vmem:[%s15514_s5 + $0xa80] ss:$16 sps:$4 sm:$0xff]   ;;  %v9738_v27 = vld [vmem:[%s15514_s5 + $0xa88] ss:$16 sps:$4 sm:$0xff]  }
 0x2a4   : > { %5841 = vmatprep.subr.bf16.mxu0 %v9665_v28  ;;  %5923 = vmatprep.subr.bf16.mxu1 %v9668_v32  ;;  %v9743_v28 = vld [vmem:[%s15514_s5 + $0xaa4] ss:$16 sps:$4 sm:$0xff]   ;;  %v9746_v32 = vld [vmem:[%s15514_s5 + $0xaac] ss:$16 sps:$4 sm:$0xff]  }
 0x2a7   : > { %5842 = vmatpush1.bf16.msra.mxu0 %v9663_v33  ;;  %5924 = vmatpush1.bf16.msra.mxu1 %v9666_v34  ;;  %v9741_v33 = vld [vmem:[%s15514_s5 + $0xaa0] ss:$16 sps:$4 sm:$0xff]   ;;  %v9744_v34 = vld [vmem:[%s15514_s5 + $0xaa8] ss:$16 sps:$4 sm:$0xff]  }
 0x2a8   : > { %5843 = vmatprep.subr.bf16.mxu0 %v9671_v35  ;;  %5925 = vmatprep.subr.bf16.mxu1 %v9674_v15  ;;  %v9749_v35 = vld [vmem:[%s15514_s5 + $0xac4] ss:$16 sps:$4 sm:$0xff]   ;;  %v9752_v15 = vld [vmem:[%s15514_s5 + $0xacc] ss:$16 sps:$4 sm:$0xff]  }
 0x2ab   : > { %5844 = vmatpush1.bf16.msra.mxu0 %v9669_v36  ;;  %5926 = vmatpush1.bf16.msra.mxu1 %v9672_v37  ;;  %v9747_v36 = vld [vmem:[%s15514_s5 + $0xac0] ss:$16 sps:$4 sm:$0xff]   ;;  %v9750_v37 = vld [vmem:[%s15514_s5 + $0xac8] ss:$16 sps:$4 sm:$0xff]  }
 0x2ac   : > { %5845 = vmatprep.subr.bf16.mxu0 %v9677_v38  ;;  %5927 = vmatprep.subr.bf16.mxu1 %v9680_v39  ;;  %v9755_v38 = vld [vmem:[%s15514_s5 + $0xae4] ss:$16 sps:$4 sm:$0xff]   ;;  %v9758_v39 = vld [vmem:[%s15514_s5 + $0xaec] ss:$16 sps:$4 sm:$0xff]  }
 0x2af   : > { %5846 = vmatpush1.bf16.msra.mxu0 %v9675_v40  ;;  %5928 = vmatpush1.bf16.msra.mxu1 %v9678_v43  ;;  %v9753_v40 = vld [vmem:[%s15514_s5 + $0xae0] ss:$16 sps:$4 sm:$0xff]   ;;  %v9756_v43 = vld [vmem:[%s15514_s5 + $0xae8] ss:$16 sps:$4 sm:$0xff]  }
 0x2b0   : > { %5847 = vmatprep.subr.bf16.mxu0 %v9683_v20  ;;  %5929 = vmatprep.subr.bf16.mxu1 %v9686_v44  ;;  %v9761_v20 = vld [vmem:[%s15514_s5 + $0xb04] ss:$16 sps:$4 sm:$0xff]   ;;  %v9764_v44 = vld [vmem:[%s15514_s5 + $0xb0c] ss:$16 sps:$4 sm:$0xff]  }
 0x2b3   : > { %5848 = vmatpush1.bf16.msra.mxu0 %v9681_v45  ;;  %5930 = vmatpush1.bf16.msra.mxu1 %v9684_v31  ;;  %v9759_v45 = vld [vmem:[%s15514_s5 + $0xb00] ss:$16 sps:$4 sm:$0xff]   ;;  %v9762_v31 = vld [vmem:[%s15514_s5 + $0xb08] ss:$16 sps:$4 sm:$0xff]  }
 0x2b4   : > { %5849 = vmatprep.subr.bf16.mxu0 %v9689_v24  ;;  %5931 = vmatprep.subr.bf16.mxu1 %v9692_v47  ;;  %v9767_v24 = vld [vmem:[%s15514_s5 + $0xb24] ss:$16 sps:$4 sm:$0xff]   ;;  %v9770_v47 = vld [vmem:[%s15514_s5 + $0xb2c] ss:$16 sps:$4 sm:$0xff]  }
 0x2b7   : > { %5850 = vmatpush1.bf16.msra.mxu0 %v9687_v49  ;;  %5932 = vmatpush1.bf16.msra.mxu1 %v9690_v50  ;;  %v9765_v49 = vld [vmem:[%s15514_s5 + $0xb20] ss:$16 sps:$4 sm:$0xff]   ;;  %v9768_v50 = vld [vmem:[%s15514_s5 + $0xb28] ss:$16 sps:$4 sm:$0xff]  }
 0x2b8   : > { %5851 = vmatprep.subr.bf16.mxu0 %v9695_v51  ;;  %5933 = vmatprep.subr.bf16.mxu1 %v9698_v52  ;;  %v9773_v51 = vld [vmem:[%s15514_s5 + $0xb44] ss:$16 sps:$4 sm:$0xff]   ;;  %v9776_v52 = vld [vmem:[%s15514_s5 + $0xb4c] ss:$16 sps:$4 sm:$0xff]  }
 0x2bb   : > { %5852 = vmatpush1.bf16.msra.mxu0 %v9693_v53  ;;  %5934 = vmatpush1.bf16.msra.mxu1 %v9696_v54  ;;  %v9771_v53 = vld [vmem:[%s15514_s5 + $0xb40] ss:$16 sps:$4 sm:$0xff]   ;;  %v9774_v54 = vld [vmem:[%s15514_s5 + $0xb48] ss:$16 sps:$4 sm:$0xff]  }
 0x2bc   : > { %5853 = vmatprep.subr.bf16.mxu0 %v9701_v55  ;;  %5935 = vmatprep.subr.bf16.mxu1 %v9704_v57  ;;  %v9779_v55 = vld [vmem:[%s15514_s5 + $0xb64] ss:$16 sps:$4 sm:$0xff]   ;;  %v9782_v57 = vld [vmem:[%s15514_s5 + $0xb6c] ss:$16 sps:$4 sm:$0xff]  }
 0x2bf   : > { %5854 = vmatpush1.bf16.msra.mxu0 %v9699_v58  ;;  %5936 = vmatpush1.bf16.msra.mxu1 %v9702_v59  ;;  %v9777_v58 = vld [vmem:[%s15514_s5 + $0xb60] ss:$16 sps:$4 sm:$0xff]   ;;  %v9780_v59 = vld [vmem:[%s15514_s5 + $0xb68] ss:$16 sps:$4 sm:$0xff]  }
 0x2c0   : > { %5855 = vmatprep.subr.bf16.mxu0 %v9707_v41  ;;  %5937 = vmatprep.subr.bf16.mxu1 %v9710_v29  ;;  %v9785_v41 = vld [vmem:[%s15514_s5 + $0xb84] ss:$16 sps:$4 sm:$0xff]   ;;  %v9788_v29 = vld [vmem:[%s15514_s5 + $0xb8c] ss:$16 sps:$4 sm:$0xff]  }
 0x2c3   : > { %5856 = vmatpush1.bf16.msra.mxu0 %v9705_v0  ;;  %5938 = vmatpush1.bf16.msra.mxu1 %v9708_v1  ;;  %v9783_v0 = vld [vmem:[%s15514_s5 + $0xb80] ss:$16 sps:$4 sm:$0xff]   ;;  %v9786_v1 = vld [vmem:[%s15514_s5 + $0xb88] ss:$16 sps:$4 sm:$0xff]  }
 0x2c4   : > { %5866 = vmatprep.subr.bf16.mxu0 %v9713_v2  ;;  %5948 = vmatprep.subr.bf16.mxu1 %v9716_v3  ;;  %v9791_v2 = vld [vmem:[%s15514_s5 + $0xba4] ss:$16 sps:$4 sm:$0xff]   ;;  %v9794_v3 = vld [vmem:[%s15514_s5 + $0xbac] ss:$16 sps:$4 sm:$0xff]  }
 0x2c6   : > { %5858 = vmatmul.mubr.bf16.vlgmr.msra.gmra.mrb[4].mxu0 %v11693_v42  ;;  %5940 = vmatmul.mubr.bf16.vlgmr.msra.gmra.mrb[4].mxu1 %v11693_v42 }
 0x2c7   : > { %5867 = vmatpush1.bf16.msra.mxu0 %v9711_v4  ;;  %5949 = vmatpush1.bf16.msra.mxu1 %v9714_v6  ;;  %v9789_v4 = vld [vmem:[%s15514_s5 + $0xba0] ss:$16 sps:$4 sm:$0xff]   ;;  %v9792_v6 = vld [vmem:[%s15514_s5 + $0xba8] ss:$16 sps:$4 sm:$0xff]  }
 0x2c8   : > { %5868 = vmatprep.subr.bf16.mxu0 %v9719_v7  ;;  %5950 = vmatprep.subr.bf16.mxu1 %v9722_v8  ;;  %v9797_v7 = vld [vmem:[%s15514_s5 + $0xbc4] ss:$16 sps:$4 sm:$0xff]   ;;  %v9800_v8 = vld [vmem:[%s15514_s5 + $0xbcc] ss:$16 sps:$4 sm:$0xff]  }
 0x2c9   : > { %5898 = vmatprep.mubr.bf16.mxu0 %v11709_v46  ;;  %5980 = vmatprep.mubr.bf16.mxu1 %v11709_v46 }
 0x2cb   : > { %5869 = vmatpush1.bf16.msra.mxu0 %v9717_v9  ;;  %5951 = vmatpush1.bf16.msra.mxu1 %v9720_v11  ;;  %v9795_v9 = vld [vmem:[%s15514_s5 + $0xbc0] ss:$16 sps:$4 sm:$0xff]   ;;  %v9798_v11 = vld [vmem:[%s15514_s5 + $0xbc8] ss:$16 sps:$4 sm:$0xff]  }
 0x2cc   : > { %5870 = vmatprep.subr.bf16.mxu0 %v9725_v12  ;;  %5952 = vmatprep.subr.bf16.mxu1 %v9728_v14  ;;  %v9803_v12 = vld [vmem:[%s15514_s5 + $0xbe4] ss:$16 sps:$4 sm:$0xff]   ;;  %v9806_v14 = vld [vmem:[%s15514_s5 + $0xbec] ss:$16 sps:$4 sm:$0xff]  }
 0x2cf   : > { %5871 = vmatpush1.bf16.msra.mxu0 %v9723_v16  ;;  %5953 = vmatpush1.bf16.msra.mxu1 %v9726_v17  ;;  %v9801_v16 = vld [vmem:[%s15514_s5 + $0xbe0] ss:$16 sps:$4 sm:$0xff]   ;;  %v9804_v17 = vld [vmem:[%s15514_s5 + $0xbe8] ss:$16 sps:$4 sm:$0xff]  }
 0x2d0   : > { %5872 = vmatprep.subr.bf16.mxu0 %v9731_v18  ;;  %5954 = vmatprep.subr.bf16.mxu1 %v9734_v19  ;;  %v9811_v18 = vld [vmem:[%s15513_s4 + $0x404] ss:$16 sps:$4 sm:$0xff]   ;;  %v9812_v19 = vld [vmem:[%s15513_s4 + $0x40c] ss:$16 sps:$4 sm:$0xff]  }
 0x2d3   : > { %5873 = vmatpush1.bf16.msra.mxu0 %v9729_v22  ;;  %5955 = vmatpush1.bf16.msra.mxu1 %v9732_v23  ;;  %v9813_v22 = vld [vmem:[%s15513_s4 + $0x400] ss:$16 sps:$4 sm:$0xff]   ;;  %v9814_v23 = vld [vmem:[%s15513_s4 + $0x408] ss:$16 sps:$4 sm:$0xff]  }
 0x2d4   : > { %5874 = vmatprep.subr.bf16.mxu0 %v9737_v13  ;;  %5956 = vmatprep.subr.bf16.mxu1 %v9740_v25  ;;  %v9815_v13 = vld [vmem:[%s15513_s4 + $0x424] ss:$16 sps:$4 sm:$0xff]   ;;  %v9816_v25 = vld [vmem:[%s15513_s4 + $0x42c] ss:$16 sps:$4 sm:$0xff]  }
 0x2d7   : > { %5875 = vmatpush1.bf16.msra.mxu0 %v9735_v26  ;;  %5957 = vmatpush1.bf16.msra.mxu1 %v9738_v27  ;;  %v9817_v26 = vld [vmem:[%s15513_s4 + $0x420] ss:$16 sps:$4 sm:$0xff]   ;;  %v9818_v27 = vld [vmem:[%s15513_s4 + $0x428] ss:$16 sps:$4 sm:$0xff]  }
 0x2d8   : > { %5876 = vmatprep.subr.bf16.mxu0 %v9743_v28  ;;  %5958 = vmatprep.subr.bf16.mxu1 %v9746_v32  ;;  %v9819_v28 = vld [vmem:[%s15513_s4 + $0x444] ss:$16 sps:$4 sm:$0xff]   ;;  %v9820_v32 = vld [vmem:[%s15513_s4 + $0x44c] ss:$16 sps:$4 sm:$0xff]  }
 0x2db   : > { %5877 = vmatpush1.bf16.msra.mxu0 %v9741_v33  ;;  %5959 = vmatpush1.bf16.msra.mxu1 %v9744_v34  ;;  %v9821_v33 = vld [vmem:[%s15513_s4 + $0x440] ss:$16 sps:$4 sm:$0xff]   ;;  %v9822_v34 = vld [vmem:[%s15513_s4 + $0x448] ss:$16 sps:$4 sm:$0xff]  }
 0x2dc   : > { %5878 = vmatprep.subr.bf16.mxu0 %v9749_v35  ;;  %5960 = vmatprep.subr.bf16.mxu1 %v9752_v15  ;;  %v9823_v35 = vld [vmem:[%s15513_s4 + $0x464] ss:$16 sps:$4 sm:$0xff]   ;;  %v9824_v15 = vld [vmem:[%s15513_s4 + $0x46c] ss:$16 sps:$4 sm:$0xff]  }
 0x2df   : > { %5879 = vmatpush1.bf16.msra.mxu0 %v9747_v36  ;;  %5961 = vmatpush1.bf16.msra.mxu1 %v9750_v37  ;;  %v9825_v36 = vld [vmem:[%s15513_s4 + $0x460] ss:$16 sps:$4 sm:$0xff]   ;;  %v9826_v37 = vld [vmem:[%s15513_s4 + $0x468] ss:$16 sps:$4 sm:$0xff]  }
 0x2e0   : > { %5880 = vmatprep.subr.bf16.mxu0 %v9755_v38  ;;  %5962 = vmatprep.subr.bf16.mxu1 %v9758_v39  ;;  %v9827_v38 = vld [vmem:[%s15513_s4 + $0x484] ss:$16 sps:$4 sm:$0xff]   ;;  %v9828_v39 = vld [vmem:[%s15513_s4 + $0x48c] ss:$16 sps:$4 sm:$0xff]  }
 0x2e3   : > { %5881 = vmatpush1.bf16.msra.mxu0 %v9753_v40  ;;  %5963 = vmatpush1.bf16.msra.mxu1 %v9756_v43  ;;  %v9829_v40 = vld [vmem:[%s15513_s4 + $0x480] ss:$16 sps:$4 sm:$0xff]   ;;  %v9830_v43 = vld [vmem:[%s15513_s4 + $0x488] ss:$16 sps:$4 sm:$0xff]  }
 0x2e4   : > { %5882 = vmatprep.subr.bf16.mxu0 %v9761_v20  ;;  %5964 = vmatprep.subr.bf16.mxu1 %v9764_v44  ;;  %v9831_v20 = vld [vmem:[%s15513_s4 + $0x4a4] ss:$16 sps:$4 sm:$0xff]   ;;  %v9832_v44 = vld [vmem:[%s15513_s4 + $0x4ac] ss:$16 sps:$4 sm:$0xff]  }
 0x2e7   : > { %5883 = vmatpush1.bf16.msra.mxu0 %v9759_v45  ;;  %5965 = vmatpush1.bf16.msra.mxu1 %v9762_v31  ;;  %v9833_v45 = vld [vmem:[%s15513_s4 + $0x4a0] ss:$16 sps:$4 sm:$0xff]   ;;  %v9834_v31 = vld [vmem:[%s15513_s4 + $0x4a8] ss:$16 sps:$4 sm:$0xff]  }
 0x2e8   : > { %5884 = vmatprep.subr.bf16.mxu0 %v9767_v24  ;;  %5966 = vmatprep.subr.bf16.mxu1 %v9770_v47  ;;  %v9835_v24 = vld [vmem:[%s15513_s4 + $0x4c4] ss:$16 sps:$4 sm:$0xff]   ;;  %v9836_v47 = vld [vmem:[%s15513_s4 + $0x4cc] ss:$16 sps:$4 sm:$0xff]  }
 0x2eb   : > { %5885 = vmatpush1.bf16.msra.mxu0 %v9765_v49  ;;  %5967 = vmatpush1.bf16.msra.mxu1 %v9768_v50  ;;  %v9837_v49 = vld [vmem:[%s15513_s4 + $0x4c0] ss:$16 sps:$4 sm:$0xff]   ;;  %v9838_v50 = vld [vmem:[%s15513_s4 + $0x4c8] ss:$16 sps:$4 sm:$0xff]  }
 0x2ec   : > { %5886 = vmatprep.subr.bf16.mxu0 %v9773_v51  ;;  %5968 = vmatprep.subr.bf16.mxu1 %v9776_v52  ;;  %v9839_v51 = vld [vmem:[%s15513_s4 + $0x4e4] ss:$16 sps:$4 sm:$0xff]   ;;  %v9840_v52 = vld [vmem:[%s15513_s4 + $0x4ec] ss:$16 sps:$4 sm:$0xff]  }
 0x2ef   : > { %5887 = vmatpush1.bf16.msra.mxu0 %v9771_v53  ;;  %5969 = vmatpush1.bf16.msra.mxu1 %v9774_v54  ;;  %v9841_v53 = vld [vmem:[%s15513_s4 + $0x4e0] ss:$16 sps:$4 sm:$0xff]   ;;  %v9842_v54 = vld [vmem:[%s15513_s4 + $0x4e8] ss:$16 sps:$4 sm:$0xff]  }
 0x2f0   : > { %5888 = vmatprep.subr.bf16.mxu0 %v9779_v55  ;;  %5970 = vmatprep.subr.bf16.mxu1 %v9782_v57  ;;  %v9843_v55 = vld [vmem:[%s15513_s4 + $0x504] ss:$16 sps:$4 sm:$0xff]   ;;  %v9844_v57 = vld [vmem:[%s15513_s4 + $0x50c] ss:$16 sps:$4 sm:$0xff]  }
 0x2f3   : > { %5889 = vmatpush1.bf16.msra.mxu0 %v9777_v58  ;;  %5971 = vmatpush1.bf16.msra.mxu1 %v9780_v59  ;;  %v9845_v58 = vld [vmem:[%s15513_s4 + $0x500] ss:$16 sps:$4 sm:$0xff]   ;;  %v9846_v59 = vld [vmem:[%s15513_s4 + $0x508] ss:$16 sps:$4 sm:$0xff]  }
 0x2f4   : > { %5890 = vmatprep.subr.bf16.mxu0 %v9785_v41  ;;  %5972 = vmatprep.subr.bf16.mxu1 %v9788_v29  ;;  %v9847_v41 = vld [vmem:[%s15513_s4 + $0x524] ss:$16 sps:$4 sm:$0xff]   ;;  %v9848_v29 = vld [vmem:[%s15513_s4 + $0x52c] ss:$16 sps:$4 sm:$0xff]  }
 0x2f7   : > { %5891 = vmatpush1.bf16.msra.mxu0 %v9783_v0  ;;  %5973 = vmatpush1.bf16.msra.mxu1 %v9786_v1  ;;  %v9849_v0 = vld [vmem:[%s15513_s4 + $0x520] ss:$16 sps:$4 sm:$0xff]   ;;  %v9850_v1 = vld [vmem:[%s15513_s4 + $0x528] ss:$16 sps:$4 sm:$0xff]  }
 0x2f8   : > { %5892 = vmatprep.subr.bf16.mxu0 %v9791_v2  ;;  %5974 = vmatprep.subr.bf16.mxu1 %v9794_v3  ;;  %v9851_v2 = vld [vmem:[%s15513_s4 + $0x544] ss:$16 sps:$4 sm:$0xff]   ;;  %v9852_v3 = vld [vmem:[%s15513_s4 + $0x54c] ss:$16 sps:$4 sm:$0xff]  }
 0x2fb   : > { %5893 = vmatpush1.bf16.msra.mxu0 %v9789_v4  ;;  %5975 = vmatpush1.bf16.msra.mxu1 %v9792_v6  ;;  %v9853_v4 = vld [vmem:[%s15513_s4 + $0x540] ss:$16 sps:$4 sm:$0xff]   ;;  %v9854_v6 = vld [vmem:[%s15513_s4 + $0x548] ss:$16 sps:$4 sm:$0xff]  }
 0x2fc   : > { %5894 = vmatprep.subr.bf16.mxu0 %v9797_v7  ;;  %5976 = vmatprep.subr.bf16.mxu1 %v9800_v8  ;;  %v9855_v7 = vld [vmem:[%s15513_s4 + $0x564] ss:$16 sps:$4 sm:$0xff]   ;;  %v9856_v8 = vld [vmem:[%s15513_s4 + $0x56c] ss:$16 sps:$4 sm:$0xff]  }
 0x2ff   : > { %5895 = vmatpush1.bf16.msra.mxu0 %v9795_v9  ;;  %5977 = vmatpush1.bf16.msra.mxu1 %v9798_v11  ;;  %v9857_v9 = vld [vmem:[%s15513_s4 + $0x560] ss:$16 sps:$4 sm:$0xff]   ;;  %v9858_v11 = vld [vmem:[%s15513_s4 + $0x568] ss:$16 sps:$4 sm:$0xff]  }
 0x300   : > { %5896 = vmatprep.subr.bf16.mxu0 %v9803_v12  ;;  %5978 = vmatprep.subr.bf16.mxu1 %v9806_v14  ;;  %v9859_v12 = vld [vmem:[%s15513_s4 + $0x584] ss:$16 sps:$4 sm:$0xff]   ;;  %v9860_v14 = vld [vmem:[%s15513_s4 + $0x58c] ss:$16 sps:$4 sm:$0xff]  }
 0x303   : > { %5897 = vmatpush1.bf16.msra.mxu0 %v9801_v16  ;;  %5979 = vmatpush1.bf16.msra.mxu1 %v9804_v17  ;;  %v9861_v16 = vld [vmem:[%s15513_s4 + $0x580] ss:$16 sps:$4 sm:$0xff]   ;;  %v9862_v17 = vld [vmem:[%s15513_s4 + $0x588] ss:$16 sps:$4 sm:$0xff]  }
 0x304   : > { %5997 = vmatprep.subr.bf16.mxu0 %v9811_v18  ;;  %6079 = vmatprep.subr.bf16.mxu1 %v9812_v19  ;;  %v9863_v18 = vld [vmem:[%s15513_s4 + $0x5a4] ss:$16 sps:$4 sm:$0xff]   ;;  %v9864_v19 = vld [vmem:[%s15513_s4 + $0x5ac] ss:$16 sps:$4 sm:$0xff]  }
 0x306   : > { %5899 = vmatmul.mubr.bf16.vlgmr.msra.gmra.mrb[4].mxu0 %v11897_v56  ;;  %5981 = vmatmul.mubr.bf16.vlgmr.msra.gmra.mrb[4].mxu1 %v11897_v56 }
 0x307   : > { %5998 = vmatpush1.bf16.msra.mxu0 %v9813_v22  ;;  %6080 = vmatpush1.bf16.msra.mxu1 %v9814_v23  ;;  %v9865_v22 = vld [vmem:[%s15513_s4 + $0x5a0] ss:$16 sps:$4 sm:$0xff]   ;;  %v9866_v23 = vld [vmem:[%s15513_s4 + $0x5a8] ss:$16 sps:$4 sm:$0xff]  }
 0x308   : > { %5999 = vmatprep.subr.bf16.mxu0 %v9815_v13  ;;  %6081 = vmatprep.subr.bf16.mxu1 %v9816_v25  ;;  %v9867_v13 = vld [vmem:[%s15513_s4 + $0x5c4] ss:$16 sps:$4 sm:$0xff]   ;;  %v9868_v25 = vld [vmem:[%s15513_s4 + $0x5cc] ss:$16 sps:$4 sm:$0xff]  }
 0x309   : > { %6029 = vmatprep.mubr.bf16.mxu0 %v11502_v21  ;;  %6111 = vmatprep.mubr.bf16.mxu1 %v11502_v21 }
 0x30b   : > { %6000 = vmatpush1.bf16.msra.mxu0 %v9817_v26  ;;  %6082 = vmatpush1.bf16.msra.mxu1 %v9818_v27  ;;  %v9869_v26 = vld [vmem:[%s15513_s4 + $0x5c0] ss:$16 sps:$4 sm:$0xff]   ;;  %v9870_v27 = vld [vmem:[%s15513_s4 + $0x5c8] ss:$16 sps:$4 sm:$0xff]  }
 0x30c   : > { %6001 = vmatprep.subr.bf16.mxu0 %v9819_v28  ;;  %6083 = vmatprep.subr.bf16.mxu1 %v9820_v32  ;;  %v9871_v28 = vld [vmem:[%s15513_s4 + $0x5e4] ss:$16 sps:$4 sm:$0xff]   ;;  %v9872_v32 = vld [vmem:[%s15513_s4 + $0x5ec] ss:$16 sps:$4 sm:$0xff]  }
 0x30f   : > { %6002 = vmatpush1.bf16.msra.mxu0 %v9821_v33  ;;  %6084 = vmatpush1.bf16.msra.mxu1 %v9822_v34  ;;  %v9873_v33 = vld [vmem:[%s15513_s4 + $0x5e0] ss:$16 sps:$4 sm:$0xff]   ;;  %v9874_v34 = vld [vmem:[%s15513_s4 + $0x5e8] ss:$16 sps:$4 sm:$0xff]  }
 0x310   : > { %6003 = vmatprep.subr.bf16.mxu0 %v9823_v35  ;;  %6085 = vmatprep.subr.bf16.mxu1 %v9824_v15  ;;  %v9875_v35 = vld [vmem:[%s15513_s4 + $0x604] ss:$16 sps:$4 sm:$0xff]   ;;  %v9876_v15 = vld [vmem:[%s15513_s4 + $0x60c] ss:$16 sps:$4 sm:$0xff]  }
 0x313   : > { %6004 = vmatpush1.bf16.msra.mxu0 %v9825_v36  ;;  %6086 = vmatpush1.bf16.msra.mxu1 %v9826_v37  ;;  %v9877_v36 = vld [vmem:[%s15513_s4 + $0x600] ss:$16 sps:$4 sm:$0xff]   ;;  %v9878_v37 = vld [vmem:[%s15513_s4 + $0x608] ss:$16 sps:$4 sm:$0xff]  }
 0x314   : > { %6005 = vmatprep.subr.bf16.mxu0 %v9827_v38  ;;  %6087 = vmatprep.subr.bf16.mxu1 %v9828_v39  ;;  %v9879_v38 = vld [vmem:[%s15513_s4 + $0x624] ss:$16 sps:$4 sm:$0xff]   ;;  %v9880_v39 = vld [vmem:[%s15513_s4 + $0x62c] ss:$16 sps:$4 sm:$0xff]  }
 0x317   : > { %6006 = vmatpush1.bf16.msra.mxu0 %v9829_v40  ;;  %6088 = vmatpush1.bf16.msra.mxu1 %v9830_v43  ;;  %v9881_v40 = vld [vmem:[%s15513_s4 + $0x620] ss:$16 sps:$4 sm:$0xff]   ;;  %v9882_v43 = vld [vmem:[%s15513_s4 + $0x628] ss:$16 sps:$4 sm:$0xff]  }
 0x318   : > { %6007 = vmatprep.subr.bf16.mxu0 %v9831_v20  ;;  %6089 = vmatprep.subr.bf16.mxu1 %v9832_v44  ;;  %v9883_v20 = vld [vmem:[%s15513_s4 + $0x644] ss:$16 sps:$4 sm:$0xff]   ;;  %v9884_v44 = vld [vmem:[%s15513_s4 + $0x64c] ss:$16 sps:$4 sm:$0xff]  }
 0x31b   : > { %6008 = vmatpush1.bf16.msra.mxu0 %v9833_v45  ;;  %6090 = vmatpush1.bf16.msra.mxu1 %v9834_v31  ;;  %v9885_v45 = vld [vmem:[%s15513_s4 + $0x640] ss:$16 sps:$4 sm:$0xff]   ;;  %v9886_v31 = vld [vmem:[%s15513_s4 + $0x648] ss:$16 sps:$4 sm:$0xff]  }
 0x31c   : > { %6009 = vmatprep.subr.bf16.mxu0 %v9835_v24  ;;  %6091 = vmatprep.subr.bf16.mxu1 %v9836_v47  ;;  %v9887_v24 = vld [vmem:[%s15513_s4 + $0x664] ss:$16 sps:$4 sm:$0xff]   ;;  %v9888_v47 = vld [vmem:[%s15513_s4 + $0x66c] ss:$16 sps:$4 sm:$0xff]  }
 0x31f   : > { %6010 = vmatpush1.bf16.msra.mxu0 %v9837_v49  ;;  %6092 = vmatpush1.bf16.msra.mxu1 %v9838_v50  ;;  %v9889_v49 = vld [vmem:[%s15513_s4 + $0x660] ss:$16 sps:$4 sm:$0xff]   ;;  %v9890_v50 = vld [vmem:[%s15513_s4 + $0x668] ss:$16 sps:$4 sm:$0xff]  }
 0x320   : > { %6011 = vmatprep.subr.bf16.mxu0 %v9839_v51  ;;  %6093 = vmatprep.subr.bf16.mxu1 %v9840_v52  ;;  %v9891_v51 = vld [vmem:[%s15513_s4 + $0x684] ss:$16 sps:$4 sm:$0xff]   ;;  %v9892_v52 = vld [vmem:[%s15513_s4 + $0x68c] ss:$16 sps:$4 sm:$0xff]  }
 0x323   : > { %6012 = vmatpush1.bf16.msra.mxu0 %v9841_v53  ;;  %6094 = vmatpush1.bf16.msra.mxu1 %v9842_v54  ;;  %v9893_v53 = vld [vmem:[%s15513_s4 + $0x680] ss:$16 sps:$4 sm:$0xff]   ;;  %v9894_v54 = vld [vmem:[%s15513_s4 + $0x688] ss:$16 sps:$4 sm:$0xff]  }
 0x324   : > { %6013 = vmatprep.subr.bf16.mxu0 %v9843_v55  ;;  %6095 = vmatprep.subr.bf16.mxu1 %v9844_v57  ;;  %v9895_v55 = vld [vmem:[%s15513_s4 + $0x6a4] ss:$16 sps:$4 sm:$0xff]   ;;  %v9896_v57 = vld [vmem:[%s15513_s4 + $0x6ac] ss:$16 sps:$4 sm:$0xff]  }
 0x327   : > { %6014 = vmatpush1.bf16.msra.mxu0 %v9845_v58  ;;  %6096 = vmatpush1.bf16.msra.mxu1 %v9846_v59  ;;  %v9897_v58 = vld [vmem:[%s15513_s4 + $0x6a0] ss:$16 sps:$4 sm:$0xff]   ;;  %v9898_v59 = vld [vmem:[%s15513_s4 + $0x6a8] ss:$16 sps:$4 sm:$0xff]  }
 0x328   : > { %6015 = vmatprep.subr.bf16.mxu0 %v9847_v41  ;;  %6097 = vmatprep.subr.bf16.mxu1 %v9848_v29  ;;  %v9899_v41 = vld [vmem:[%s15513_s4 + $0x6c4] ss:$16 sps:$4 sm:$0xff]   ;;  %v9900_v29 = vld [vmem:[%s15513_s4 + $0x6cc] ss:$16 sps:$4 sm:$0xff]  }
 0x32b   : > { %6016 = vmatpush1.bf16.msra.mxu0 %v9849_v0  ;;  %6098 = vmatpush1.bf16.msra.mxu1 %v9850_v1  ;;  %v9901_v0 = vld [vmem:[%s15513_s4 + $0x6c0] ss:$16 sps:$4 sm:$0xff]   ;;  %v9902_v1 = vld [vmem:[%s15513_s4 + $0x6c8] ss:$16 sps:$4 sm:$0xff]  }
 0x32c   : > { %6017 = vmatprep.subr.bf16.mxu0 %v9851_v2  ;;  %6099 = vmatprep.subr.bf16.mxu1 %v9852_v3  ;;  %v9903_v2 = vld [vmem:[%s15513_s4 + $0x6e4] ss:$16 sps:$4 sm:$0xff]   ;;  %v9904_v3 = vld [vmem:[%s15513_s4 + $0x6ec] ss:$16 sps:$4 sm:$0xff]  }
 0x32f   : > { %6018 = vmatpush1.bf16.msra.mxu0 %v9853_v4  ;;  %6100 = vmatpush1.bf16.msra.mxu1 %v9854_v6  ;;  %v9905_v4 = vld [vmem:[%s15513_s4 + $0x6e0] ss:$16 sps:$4 sm:$0xff]   ;;  %v9906_v6 = vld [vmem:[%s15513_s4 + $0x6e8] ss:$16 sps:$4 sm:$0xff]  }
 0x330   : > { %6019 = vmatprep.subr.bf16.mxu0 %v9855_v7  ;;  %6101 = vmatprep.subr.bf16.mxu1 %v9856_v8  ;;  %v9907_v7 = vld [vmem:[%s15513_s4 + $0x704] ss:$16 sps:$4 sm:$0xff]   ;;  %v9908_v8 = vld [vmem:[%s15513_s4 + $0x70c] ss:$16 sps:$4 sm:$0xff]  }
 0x333   : > { %6020 = vmatpush1.bf16.msra.mxu0 %v9857_v9  ;;  %6102 = vmatpush1.bf16.msra.mxu1 %v9858_v11  ;;  %v9909_v9 = vld [vmem:[%s15513_s4 + $0x700] ss:$16 sps:$4 sm:$0xff]   ;;  %v9910_v11 = vld [vmem:[%s15513_s4 + $0x708] ss:$16 sps:$4 sm:$0xff]  }
 0x334   : > { %6021 = vmatprep.subr.bf16.mxu0 %v9859_v12  ;;  %6103 = vmatprep.subr.bf16.mxu1 %v9860_v14  ;;  %v9911_v12 = vld [vmem:[%s15513_s4 + $0x724] ss:$16 sps:$4 sm:$0xff]   ;;  %v9912_v14 = vld [vmem:[%s15513_s4 + $0x72c] ss:$16 sps:$4 sm:$0xff]  }
 0x337   : > { %6022 = vmatpush1.bf16.msra.mxu0 %v9861_v16  ;;  %6104 = vmatpush1.bf16.msra.mxu1 %v9862_v17  ;;  %v9913_v16 = vld [vmem:[%s15513_s4 + $0x720] ss:$16 sps:$4 sm:$0xff]   ;;  %v9914_v17 = vld [vmem:[%s15513_s4 + $0x728] ss:$16 sps:$4 sm:$0xff]  }
 0x338   : > { %6023 = vmatprep.subr.bf16.mxu0 %v9863_v18  ;;  %6105 = vmatprep.subr.bf16.mxu1 %v9864_v19  ;;  %v9915_v18 = vld [vmem:[%s15513_s4 + $0x744] ss:$16 sps:$4 sm:$0xff]   ;;  %v9916_v19 = vld [vmem:[%s15513_s4 + $0x74c] ss:$16 sps:$4 sm:$0xff]  }
 0x33b   : > { %6024 = vmatpush1.bf16.msra.mxu0 %v9865_v22  ;;  %6106 = vmatpush1.bf16.msra.mxu1 %v9866_v23  ;;  %v9917_v22 = vld [vmem:[%s15513_s4 + $0x740] ss:$16 sps:$4 sm:$0xff]   ;;  %v9918_v23 = vld [vmem:[%s15513_s4 + $0x748] ss:$16 sps:$4 sm:$0xff]  }
 0x33c   : > { %6025 = vmatprep.subr.bf16.mxu0 %v9867_v13  ;;  %6107 = vmatprep.subr.bf16.mxu1 %v9868_v25  ;;  %v9919_v13 = vld [vmem:[%s15513_s4 + $0x764] ss:$16 sps:$4 sm:$0xff]   ;;  %v9920_v25 = vld [vmem:[%s15513_s4 + $0x76c] ss:$16 sps:$4 sm:$0xff]  }
 0x33f   : > { %6026 = vmatpush1.bf16.msra.mxu0 %v9869_v26  ;;  %6108 = vmatpush1.bf16.msra.mxu1 %v9870_v27  ;;  %v9921_v26 = vld [vmem:[%s15513_s4 + $0x760] ss:$16 sps:$4 sm:$0xff]   ;;  %v9922_v27 = vld [vmem:[%s15513_s4 + $0x768] ss:$16 sps:$4 sm:$0xff]  }
 0x340   : > { %6027 = vmatprep.subr.bf16.mxu0 %v9871_v28  ;;  %6109 = vmatprep.subr.bf16.mxu1 %v9872_v32  ;;  %v9923_v28 = vld [vmem:[%s15513_s4 + $0x784] ss:$16 sps:$4 sm:$0xff]   ;;  %v9924_v32 = vld [vmem:[%s15513_s4 + $0x78c] ss:$16 sps:$4 sm:$0xff]  }
 0x343   : > { %6028 = vmatpush1.bf16.msra.mxu0 %v9873_v33  ;;  %6110 = vmatpush1.bf16.msra.mxu1 %v9874_v34  ;;  %v9925_v33 = vld [vmem:[%s15513_s4 + $0x780] ss:$16 sps:$4 sm:$0xff]   ;;  %v9926_v34 = vld [vmem:[%s15513_s4 + $0x788] ss:$16 sps:$4 sm:$0xff]  }
 0x344   : > { %6038 = vmatprep.subr.bf16.mxu0 %v9875_v35  ;;  %6120 = vmatprep.subr.bf16.mxu1 %v9876_v15  ;;  %v9927_v35 = vld [vmem:[%s15513_s4 + $0x7a4] ss:$16 sps:$4 sm:$0xff]   ;;  %v9928_v15 = vld [vmem:[%s15513_s4 + $0x7ac] ss:$16 sps:$4 sm:$0xff]  }
 0x346   : > { %6030 = vmatmul.mubr.bf16.vlgmr.msra.gmra.mrb[8].mxu0 %v11693_v42  ;;  %6112 = vmatmul.mubr.bf16.vlgmr.msra.gmra.mrb[8].mxu1 %v11693_v42 }
 0x347   : > { %6039 = vmatpush1.bf16.msra.mxu0 %v9877_v36  ;;  %6121 = vmatpush1.bf16.msra.mxu1 %v9878_v37  ;;  %v9929_v36 = vld [vmem:[%s15513_s4 + $0x7a0] ss:$16 sps:$4 sm:$0xff]   ;;  %v9930_v37 = vld [vmem:[%s15513_s4 + $0x7a8] ss:$16 sps:$4 sm:$0xff]  }
 0x348   : > { %6040 = vmatprep.subr.bf16.mxu0 %v9879_v38  ;;  %6122 = vmatprep.subr.bf16.mxu1 %v9880_v39  ;;  %v9931_v38 = vld [vmem:[%s15513_s4 + $0x7c4] ss:$16 sps:$4 sm:$0xff]   ;;  %v9932_v39 = vld [vmem:[%s15513_s4 + $0x7cc] ss:$16 sps:$4 sm:$0xff]  }
 0x349   : > { %6070 = vmatprep.mubr.bf16.mxu0 %v11709_v46  ;;  %6152 = vmatprep.mubr.bf16.mxu1 %v11709_v46 }
 0x34b   : > { %6041 = vmatpush1.bf16.msra.mxu0 %v9881_v40  ;;  %6123 = vmatpush1.bf16.msra.mxu1 %v9882_v43  ;;  %v9933_v40 = vld [vmem:[%s15513_s4 + $0x7c0] ss:$16 sps:$4 sm:$0xff]   ;;  %v9934_v43 = vld [vmem:[%s15513_s4 + $0x7c8] ss:$16 sps:$4 sm:$0xff]  }
 0x34c   : > { %6042 = vmatprep.subr.bf16.mxu0 %v9883_v20  ;;  %6124 = vmatprep.subr.bf16.mxu1 %v9884_v44  ;;  %v9935_v20 = vld [vmem:[%s15513_s4 + $0x7e4] ss:$16 sps:$4 sm:$0xff]   ;;  %v9936_v44 = vld [vmem:[%s15513_s4 + $0x7ec] ss:$16 sps:$4 sm:$0xff]  }
 0x34f   : > { %6043 = vmatpush1.bf16.msra.mxu0 %v9885_v45  ;;  %6125 = vmatpush1.bf16.msra.mxu1 %v9886_v31  ;;  %v9937_v45 = vld [vmem:[%s15513_s4 + $0x7e0] ss:$16 sps:$4 sm:$0xff]   ;;  %v9938_v31 = vld [vmem:[%s15513_s4 + $0x7e8] ss:$16 sps:$4 sm:$0xff]  }
 0x350   : > { %6044 = vmatprep.subr.bf16.mxu0 %v9887_v24  ;;  %6126 = vmatprep.subr.bf16.mxu1 %v9888_v47  ;;  %v9939_v24 = vld [vmem:[%s15513_s4 + $0x4] ss:$16 sps:$4 sm:$0xff]   ;;  %v9940_v47 = vld [vmem:[%s15513_s4 + $0xc] ss:$16 sps:$4 sm:$0xff]  }
 0x353   : > { %6045 = vmatpush1.bf16.msra.mxu0 %v9889_v49  ;;  %6127 = vmatpush1.bf16.msra.mxu1 %v9890_v50  ;;  %v9941_v49 = vld [vmem:[%s15513_s4] ss:$16 sps:$4 sm:$0xff]   ;;  %v9942_v50 = vld [vmem:[%s15513_s4 + $0x8] ss:$16 sps:$4 sm:$0xff]  }
 0x354   : > { %6046 = vmatprep.subr.bf16.mxu0 %v9891_v51  ;;  %6128 = vmatprep.subr.bf16.mxu1 %v9892_v52  ;;  %v9943_v51 = vld [vmem:[%s15513_s4 + $0x24] ss:$16 sps:$4 sm:$0xff]   ;;  %v9944_v52 = vld [vmem:[%s15513_s4 + $0x2c] ss:$16 sps:$4 sm:$0xff]  }
 0x357   : > { %6047 = vmatpush1.bf16.msra.mxu0 %v9893_v53  ;;  %6129 = vmatpush1.bf16.msra.mxu1 %v9894_v54  ;;  %v9945_v53 = vld [vmem:[%s15513_s4 + $0x20] ss:$16 sps:$4 sm:$0xff]   ;;  %v9946_v54 = vld [vmem:[%s15513_s4 + $0x28] ss:$16 sps:$4 sm:$0xff]  }
 0x358   : > { %6048 = vmatprep.subr.bf16.mxu0 %v9895_v55  ;;  %6130 = vmatprep.subr.bf16.mxu1 %v9896_v57  ;;  %v9947_v55 = vld [vmem:[%s15513_s4 + $0x44] ss:$16 sps:$4 sm:$0xff]   ;;  %v9948_v57 = vld [vmem:[%s15513_s4 + $0x4c] ss:$16 sps:$4 sm:$0xff]  }
 0x35b   : > { %6049 = vmatpush1.bf16.msra.mxu0 %v9897_v58  ;;  %6131 = vmatpush1.bf16.msra.mxu1 %v9898_v59  ;;  %v9949_v58 = vld [vmem:[%s15513_s4 + $0x40] ss:$16 sps:$4 sm:$0xff]   ;;  %v9950_v59 = vld [vmem:[%s15513_s4 + $0x48] ss:$16 sps:$4 sm:$0xff]  }
 0x35c   : > { %6050 = vmatprep.subr.bf16.mxu0 %v9899_v41  ;;  %6132 = vmatprep.subr.bf16.mxu1 %v9900_v29  ;;  %v9951_v41 = vld [vmem:[%s15513_s4 + $0x64] ss:$16 sps:$4 sm:$0xff]   ;;  %v9952_v29 = vld [vmem:[%s15513_s4 + $0x6c] ss:$16 sps:$4 sm:$0xff]  }
 0x35f   : > { %6051 = vmatpush1.bf16.msra.mxu0 %v9901_v0  ;;  %6133 = vmatpush1.bf16.msra.mxu1 %v9902_v1  ;;  %v9953_v0 = vld [vmem:[%s15513_s4 + $0x60] ss:$16 sps:$4 sm:$0xff]   ;;  %v9954_v1 = vld [vmem:[%s15513_s4 + $0x68] ss:$16 sps:$4 sm:$0xff]  }
 0x360   : > { %6052 = vmatprep.subr.bf16.mxu0 %v9903_v2  ;;  %6134 = vmatprep.subr.bf16.mxu1 %v9904_v3  ;;  %v9955_v2 = vld [vmem:[%s15513_s4 + $0x84] ss:$16 sps:$4 sm:$0xff]   ;;  %v9956_v3 = vld [vmem:[%s15513_s4 + $0x8c] ss:$16 sps:$4 sm:$0xff]  }
 0x363   : > { %6053 = vmatpush1.bf16.msra.mxu0 %v9905_v4  ;;  %6135 = vmatpush1.bf16.msra.mxu1 %v9906_v6  ;;  %v9957_v4 = vld [vmem:[%s15513_s4 + $0x80] ss:$16 sps:$4 sm:$0xff]   ;;  %v9958_v6 = vld [vmem:[%s15513_s4 + $0x88] ss:$16 sps:$4 sm:$0xff]  }
 0x364   : > { %6054 = vmatprep.subr.bf16.mxu0 %v9907_v7  ;;  %6136 = vmatprep.subr.bf16.mxu1 %v9908_v8  ;;  %v9959_v7 = vld [vmem:[%s15513_s4 + $0xa4] ss:$16 sps:$4 sm:$0xff]   ;;  %v9960_v8 = vld [vmem:[%s15513_s4 + $0xac] ss:$16 sps:$4 sm:$0xff]  }
 0x367   : > { %6055 = vmatpush1.bf16.msra.mxu0 %v9909_v9  ;;  %6137 = vmatpush1.bf16.msra.mxu1 %v9910_v11  ;;  %v9961_v9 = vld [vmem:[%s15513_s4 + $0xa0] ss:$16 sps:$4 sm:$0xff]   ;;  %v9962_v11 = vld [vmem:[%s15513_s4 + $0xa8] ss:$16 sps:$4 sm:$0xff]  }
 0x368   : > { %6056 = vmatprep.subr.bf16.mxu0 %v9911_v12  ;;  %6138 = vmatprep.subr.bf16.mxu1 %v9912_v14  ;;  %v9963_v12 = vld [vmem:[%s15513_s4 + $0xc4] ss:$16 sps:$4 sm:$0xff]   ;;  %v9964_v14 = vld [vmem:[%s15513_s4 + $0xcc] ss:$16 sps:$4 sm:$0xff]  }
 0x36b   : > { %6057 = vmatpush1.bf16.msra.mxu0 %v9913_v16  ;;  %6139 = vmatpush1.bf16.msra.mxu1 %v9914_v17  ;;  %v9965_v16 = vld [vmem:[%s15513_s4 + $0xc0] ss:$16 sps:$4 sm:$0xff]   ;;  %v9966_v17 = vld [vmem:[%s15513_s4 + $0xc8] ss:$16 sps:$4 sm:$0xff]  }
 0x36c   : > { %6058 = vmatprep.subr.bf16.mxu0 %v9915_v18  ;;  %6140 = vmatprep.subr.bf16.mxu1 %v9916_v19  ;;  %v9967_v18 = vld [vmem:[%s15513_s4 + $0xe4] ss:$16 sps:$4 sm:$0xff]   ;;  %v9968_v19 = vld [vmem:[%s15513_s4 + $0xec] ss:$16 sps:$4 sm:$0xff]  }
 0x36f   : > { %6059 = vmatpush1.bf16.msra.mxu0 %v9917_v22  ;;  %6141 = vmatpush1.bf16.msra.mxu1 %v9918_v23  ;;  %v9969_v22 = vld [vmem:[%s15513_s4 + $0xe0] ss:$16 sps:$4 sm:$0xff]   ;;  %v9970_v23 = vld [vmem:[%s15513_s4 + $0xe8] ss:$16 sps:$4 sm:$0xff]  }
 0x370   : > { %6060 = vmatprep.subr.bf16.mxu0 %v9919_v13  ;;  %6142 = vmatprep.subr.bf16.mxu1 %v9920_v25  ;;  %v9971_v13 = vld [vmem:[%s15513_s4 + $0x104] ss:$16 sps:$4 sm:$0xff]   ;;  %v9972_v25 = vld [vmem:[%s15513_s4 + $0x10c] ss:$16 sps:$4 sm:$0xff]  }
 0x373   : > { %6061 = vmatpush1.bf16.msra.mxu0 %v9921_v26  ;;  %6143 = vmatpush1.bf16.msra.mxu1 %v9922_v27  ;;  %v9973_v26 = vld [vmem:[%s15513_s4 + $0x100] ss:$16 sps:$4 sm:$0xff]   ;;  %v9974_v27 = vld [vmem:[%s15513_s4 + $0x108] ss:$16 sps:$4 sm:$0xff]  }
 0x374   : > { %6062 = vmatprep.subr.bf16.mxu0 %v9923_v28  ;;  %6144 = vmatprep.subr.bf16.mxu1 %v9924_v32  ;;  %v9975_v28 = vld [vmem:[%s15513_s4 + $0x124] ss:$16 sps:$4 sm:$0xff]   ;;  %v9976_v32 = vld [vmem:[%s15513_s4 + $0x12c] ss:$16 sps:$4 sm:$0xff]  }
 0x377   : > { %6063 = vmatpush1.bf16.msra.mxu0 %v9925_v33  ;;  %6145 = vmatpush1.bf16.msra.mxu1 %v9926_v34  ;;  %v9977_v33 = vld [vmem:[%s15513_s4 + $0x120] ss:$16 sps:$4 sm:$0xff]   ;;  %v9978_v34 = vld [vmem:[%s15513_s4 + $0x128] ss:$16 sps:$4 sm:$0xff]  }
 0x378   : > { %6064 = vmatprep.subr.bf16.mxu0 %v9927_v35  ;;  %6146 = vmatprep.subr.bf16.mxu1 %v9928_v15  ;;  %v9979_v35 = vld [vmem:[%s15513_s4 + $0x144] ss:$16 sps:$4 sm:$0xff]   ;;  %v9980_v15 = vld [vmem:[%s15513_s4 + $0x14c] ss:$16 sps:$4 sm:$0xff]  }
 0x37b   : > { %6065 = vmatpush1.bf16.msra.mxu0 %v9929_v36  ;;  %6147 = vmatpush1.bf16.msra.mxu1 %v9930_v37  ;;  %v9981_v36 = vld [vmem:[%s15513_s4 + $0x140] ss:$16 sps:$4 sm:$0xff]   ;;  %v9982_v37 = vld [vmem:[%s15513_s4 + $0x148] ss:$16 sps:$4 sm:$0xff]  }
 0x37c   : > { %6066 = vmatprep.subr.bf16.mxu0 %v9931_v38  ;;  %6148 = vmatprep.subr.bf16.mxu1 %v9932_v39  ;;  %v9983_v38 = vld [vmem:[%s15513_s4 + $0x164] ss:$16 sps:$4 sm:$0xff]   ;;  %v9984_v39 = vld [vmem:[%s15513_s4 + $0x16c] ss:$16 sps:$4 sm:$0xff]  }
 0x37f   : > { %6067 = vmatpush1.bf16.msra.mxu0 %v9933_v40  ;;  %6149 = vmatpush1.bf16.msra.mxu1 %v9934_v43  ;;  %v9985_v40 = vld [vmem:[%s15513_s4 + $0x160] ss:$16 sps:$4 sm:$0xff]   ;;  %v9986_v43 = vld [vmem:[%s15513_s4 + $0x168] ss:$16 sps:$4 sm:$0xff]  }
 0x380   : > { %6068 = vmatprep.subr.bf16.mxu0 %v9935_v20  ;;  %6150 = vmatprep.subr.bf16.mxu1 %v9936_v44  ;;  %v9987_v20 = vld [vmem:[%s15513_s4 + $0x184] ss:$16 sps:$4 sm:$0xff]   ;;  %v9988_v44 = vld [vmem:[%s15513_s4 + $0x18c] ss:$16 sps:$4 sm:$0xff]  }
 0x383   : > { %6069 = vmatpush1.bf16.msra.mxu0 %v9937_v45  ;;  %6151 = vmatpush1.bf16.msra.mxu1 %v9938_v31  ;;  %v9989_v45 = vld [vmem:[%s15513_s4 + $0x180] ss:$16 sps:$4 sm:$0xff]   ;;  %v9990_v31 = vld [vmem:[%s15513_s4 + $0x188] ss:$16 sps:$4 sm:$0xff]  }
 0x384   : > { %6161 = vmatprep.subr.bf16.mxu0 %v9939_v24  ;;  %6243 = vmatprep.subr.bf16.mxu1 %v9940_v47  ;;  %v9991_v24 = vld [vmem:[%s15513_s4 + $0x1a4] ss:$16 sps:$4 sm:$0xff]   ;;  %v9992_v47 = vld [vmem:[%s15513_s4 + $0x1ac] ss:$16 sps:$4 sm:$0xff]  }
 0x386   : > { %6071 = vmatmul.mubr.bf16.vlgmr.msra.gmra.mrb[8].mxu0 %v11897_v56  ;;  %6153 = vmatmul.mubr.bf16.vlgmr.msra.gmra.mrb[8].mxu1 %v11897_v56 }
 0x387   : > { %6162 = vmatpush1.bf16.msra.mxu0 %v9941_v49  ;;  %6244 = vmatpush1.bf16.msra.mxu1 %v9942_v50  ;;  %v9993_v49 = vld [vmem:[%s15513_s4 + $0x1a0] ss:$16 sps:$4 sm:$0xff]   ;;  %v9994_v50 = vld [vmem:[%s15513_s4 + $0x1a8] ss:$16 sps:$4 sm:$0xff]  }
 0x388   : > { %6163 = vmatprep.subr.bf16.mxu0 %v9943_v51  ;;  %6245 = vmatprep.subr.bf16.mxu1 %v9944_v52  ;;  %v9995_v51 = vld [vmem:[%s15513_s4 + $0x1c4] ss:$16 sps:$4 sm:$0xff]   ;;  %v9996_v52 = vld [vmem:[%s15513_s4 + $0x1cc] ss:$16 sps:$4 sm:$0xff]  }
 0x389   : > { %6193 = vmatprep.mubr.bf16.mxu0 %v10789_v48  ;;  %6275 = vmatprep.mubr.bf16.mxu1 %v10789_v48 }
 0x38b   : > { %6164 = vmatpush1.bf16.msra.mxu0 %v9945_v53  ;;  %6246 = vmatpush1.bf16.msra.mxu1 %v9946_v54  ;;  %v9997_v53 = vld [vmem:[%s15513_s4 + $0x1c0] ss:$16 sps:$4 sm:$0xff]   ;;  %v9998_v54 = vld [vmem:[%s15513_s4 + $0x1c8] ss:$16 sps:$4 sm:$0xff]  }
 0x38c   : > { %6165 = vmatprep.subr.bf16.mxu0 %v9947_v55  ;;  %6247 = vmatprep.subr.bf16.mxu1 %v9948_v57  ;;  %v9999_v55 = vld [vmem:[%s15513_s4 + $0x1e4] ss:$16 sps:$4 sm:$0xff]   ;;  %v10000_v57 = vld [vmem:[%s15513_s4 + $0x1ec] ss:$16 sps:$4 sm:$0xff]  }
 0x38f   : > { %6166 = vmatpush1.bf16.msra.mxu0 %v9949_v58  ;;  %6248 = vmatpush1.bf16.msra.mxu1 %v9950_v59  ;;  %v10001_v58 = vld [vmem:[%s15513_s4 + $0x1e0] ss:$16 sps:$4 sm:$0xff]   ;;  %v10002_v59 = vld [vmem:[%s15513_s4 + $0x1e8] ss:$16 sps:$4 sm:$0xff]  }
 0x390   : > { %6167 = vmatprep.subr.bf16.mxu0 %v9951_v41  ;;  %6249 = vmatprep.subr.bf16.mxu1 %v9952_v29  ;;  %v10003_v41 = vld [vmem:[%s15513_s4 + $0x204] ss:$16 sps:$4 sm:$0xff]   ;;  %v10004_v29 = vld [vmem:[%s15513_s4 + $0x20c] ss:$16 sps:$4 sm:$0xff]  }
 0x393   : > { %6168 = vmatpush1.bf16.msra.mxu0 %v9953_v0  ;;  %6250 = vmatpush1.bf16.msra.mxu1 %v9954_v1  ;;  %v10005_v0 = vld [vmem:[%s15513_s4 + $0x200] ss:$16 sps:$4 sm:$0xff]   ;;  %v10006_v1 = vld [vmem:[%s15513_s4 + $0x208] ss:$16 sps:$4 sm:$0xff]  }
 0x394   : > { %6169 = vmatprep.subr.bf16.mxu0 %v9955_v2  ;;  %6251 = vmatprep.subr.bf16.mxu1 %v9956_v3  ;;  %v10007_v2 = vld [vmem:[%s15513_s4 + $0x224] ss:$16 sps:$4 sm:$0xff]   ;;  %v10008_v3 = vld [vmem:[%s15513_s4 + $0x22c] ss:$16 sps:$4 sm:$0xff]  }
 0x397   : > { %6170 = vmatpush1.bf16.msra.mxu0 %v9957_v4  ;;  %6252 = vmatpush1.bf16.msra.mxu1 %v9958_v6  ;;  %v10009_v4 = vld [vmem:[%s15513_s4 + $0x220] ss:$16 sps:$4 sm:$0xff]   ;;  %v10010_v6 = vld [vmem:[%s15513_s4 + $0x228] ss:$16 sps:$4 sm:$0xff]  }
 0x398   : > { %6171 = vmatprep.subr.bf16.mxu0 %v9959_v7  ;;  %6253 = vmatprep.subr.bf16.mxu1 %v9960_v8  ;;  %v10011_v7 = vld [vmem:[%s15513_s4 + $0x244] ss:$16 sps:$4 sm:$0xff]   ;;  %v10012_v8 = vld [vmem:[%s15513_s4 + $0x24c] ss:$16 sps:$4 sm:$0xff]  }
 0x39b   : > { %6172 = vmatpush1.bf16.msra.mxu0 %v9961_v9  ;;  %6254 = vmatpush1.bf16.msra.mxu1 %v9962_v11  ;;  %v10013_v9 = vld [vmem:[%s15513_s4 + $0x240] ss:$16 sps:$4 sm:$0xff]   ;;  %v10014_v11 = vld [vmem:[%s15513_s4 + $0x248] ss:$16 sps:$4 sm:$0xff]  }
 0x39c   : > { %6173 = vmatprep.subr.bf16.mxu0 %v9963_v12  ;;  %6255 = vmatprep.subr.bf16.mxu1 %v9964_v14  ;;  %v10015_v12 = vld [vmem:[%s15513_s4 + $0x264] ss:$16 sps:$4 sm:$0xff]   ;;  %v10016_v14 = vld [vmem:[%s15513_s4 + $0x26c] ss:$16 sps:$4 sm:$0xff]  }
 0x39f   : > { %6174 = vmatpush1.bf16.msra.mxu0 %v9965_v16  ;;  %6256 = vmatpush1.bf16.msra.mxu1 %v9966_v17  ;;  %v10017_v16 = vld [vmem:[%s15513_s4 + $0x260] ss:$16 sps:$4 sm:$0xff]   ;;  %v10018_v17 = vld [vmem:[%s15513_s4 + $0x268] ss:$16 sps:$4 sm:$0xff]  }
 0x3a0   : > { %6175 = vmatprep.subr.bf16.mxu0 %v9967_v18  ;;  %6257 = vmatprep.subr.bf16.mxu1 %v9968_v19  ;;  %v10019_v18 = vld [vmem:[%s15513_s4 + $0x284] ss:$16 sps:$4 sm:$0xff]   ;;  %v10020_v19 = vld [vmem:[%s15513_s4 + $0x28c] ss:$16 sps:$4 sm:$0xff]  }
 0x3a3   : > { %6176 = vmatpush1.bf16.msra.mxu0 %v9969_v22  ;;  %6258 = vmatpush1.bf16.msra.mxu1 %v9970_v23  ;;  %v10021_v22 = vld [vmem:[%s15513_s4 + $0x280] ss:$16 sps:$4 sm:$0xff]   ;;  %v10022_v23 = vld [vmem:[%s15513_s4 + $0x288] ss:$16 sps:$4 sm:$0xff]  }
 0x3a4   : > { %6177 = vmatprep.subr.bf16.mxu0 %v9971_v13  ;;  %6259 = vmatprep.subr.bf16.mxu1 %v9972_v25  ;;  %v10023_v13 = vld [vmem:[%s15513_s4 + $0x2a4] ss:$16 sps:$4 sm:$0xff]   ;;  %v10024_v25 = vld [vmem:[%s15513_s4 + $0x2ac] ss:$16 sps:$4 sm:$0xff]  }
 0x3a7   : > { %6178 = vmatpush1.bf16.msra.mxu0 %v9973_v26  ;;  %6260 = vmatpush1.bf16.msra.mxu1 %v9974_v27 }
 0x3a8   : > { %6179 = vmatprep.subr.bf16.mxu0 %v9975_v28  ;;  %6261 = vmatprep.subr.bf16.mxu1 %v9976_v32 }
 0x3ab   : > { %6180 = vmatpush1.bf16.msra.mxu0 %v9977_v33  ;;  %6262 = vmatpush1.bf16.msra.mxu1 %v9978_v34 }
 0x3ac   : > { %6181 = vmatprep.subr.bf16.mxu0 %v9979_v35  ;;  %6263 = vmatprep.subr.bf16.mxu1 %v9980_v15 }
 0x3af   : > { %6182 = vmatpush1.bf16.msra.mxu0 %v9981_v36  ;;  %6264 = vmatpush1.bf16.msra.mxu1 %v9982_v37 }
 0x3b0   : > { %6183 = vmatprep.subr.bf16.mxu0 %v9983_v38  ;;  %6265 = vmatprep.subr.bf16.mxu1 %v9984_v39  ;;  %v10025_v38 = vld [vmem:[%s15513_s4 + $0x2a0] ss:$16 sps:$4 sm:$0xff]   ;;  %v10026_v39 = vld [vmem:[%s15513_s4 + $0x2a8] ss:$16 sps:$4 sm:$0xff]  }
 0x3b3   : > { %6184 = vmatpush1.bf16.msra.mxu0 %v9985_v40  ;;  %6266 = vmatpush1.bf16.msra.mxu1 %v9986_v43 }
 0x3b4   : > { %6185 = vmatprep.subr.bf16.mxu0 %v9987_v20  ;;  %6267 = vmatprep.subr.bf16.mxu1 %v9988_v44  ;;  %v10027_v20 = vld [vmem:[%s15513_s4 + $0x2c4] ss:$16 sps:$4 sm:$0xff]   ;;  %v10028_v44 = vld [vmem:[%s15513_s4 + $0x2cc] ss:$16 sps:$4 sm:$0xff]  }
 0x3b7   : > { %6186 = vmatpush1.bf16.msra.mxu0 %v9989_v45  ;;  %6268 = vmatpush1.bf16.msra.mxu1 %v9990_v31  ;;  %v10029_v45 = vld [vmem:[%s15513_s4 + $0x2c0] ss:$16 sps:$4 sm:$0xff]   ;;  %v10030_v31 = vld [vmem:[%s15513_s4 + $0x2c8] ss:$16 sps:$4 sm:$0xff]  }
 0x3b8   : > { %6187 = vmatprep.subr.bf16.mxu0 %v9991_v24  ;;  %6269 = vmatprep.subr.bf16.mxu1 %v9992_v47  ;;  %v10031_v24 = vld [vmem:[%s15513_s4 + $0x2e4] ss:$16 sps:$4 sm:$0xff]   ;;  %v10032_v47 = vld [vmem:[%s15513_s4 + $0x2ec] ss:$16 sps:$4 sm:$0xff]  }
 0x3bb   : > { %6188 = vmatpush1.bf16.msra.mxu0 %v9993_v49  ;;  %6270 = vmatpush1.bf16.msra.mxu1 %v9994_v50  ;;  %v10033_v49 = vld [vmem:[%s15513_s4 + $0x2e0] ss:$16 sps:$4 sm:$0xff]   ;;  %v10034_v50 = vld [vmem:[%s15513_s4 + $0x2e8] ss:$16 sps:$4 sm:$0xff]  }
 0x3bc   : > { %6189 = vmatprep.subr.bf16.mxu0 %v9995_v51  ;;  %6271 = vmatprep.subr.bf16.mxu1 %v9996_v52  ;;  %v10035_v51 = vld [vmem:[%s15513_s4 + $0x304] ss:$16 sps:$4 sm:$0xff]   ;;  %v10036_v52 = vld [vmem:[%s15513_s4 + $0x30c] ss:$16 sps:$4 sm:$0xff]  }
 0x3bf   : > { %6190 = vmatpush1.bf16.msra.mxu0 %v9997_v53  ;;  %6272 = vmatpush1.bf16.msra.mxu1 %v9998_v54  ;;  %v10037_v53 = vld [vmem:[%s15513_s4 + $0x300] ss:$16 sps:$4 sm:$0xff]   ;;  %v10038_v54 = vld [vmem:[%s15513_s4 + $0x308] ss:$16 sps:$4 sm:$0xff]  }
 0x3c0   : > { %6191 = vmatprep.subr.bf16.mxu0 %v9999_v55  ;;  %6273 = vmatprep.subr.bf16.mxu1 %v10000_v57  ;;  %v10039_v55 = vld [vmem:[%s15513_s4 + $0x324] ss:$16 sps:$4 sm:$0xff]   ;;  %v10040_v57 = vld [vmem:[%s15513_s4 + $0x32c] ss:$16 sps:$4 sm:$0xff]  }
 0x3c3   : > { %6192 = vmatpush1.bf16.msra.mxu0 %v10001_v58  ;;  %6274 = vmatpush1.bf16.msra.mxu1 %v10002_v59  ;;  %v10041_v58 = vld [vmem:[%s15513_s4 + $0x320] ss:$16 sps:$4 sm:$0xff]   ;;  %v10042_v59 = vld [vmem:[%s15513_s4 + $0x328] ss:$16 sps:$4 sm:$0xff]  }
 0x3c4   : > { %6202 = vmatprep.subr.bf16.mxu0 %v10003_v41  ;;  %6284 = vmatprep.subr.bf16.mxu1 %v10004_v29  ;;  %v10043_v41 = vld [vmem:[%s15513_s4 + $0x344] ss:$16 sps:$4 sm:$0xff]   ;;  %v10044_v29 = vld [vmem:[%s15513_s4 + $0x34c] ss:$16 sps:$4 sm:$0xff]  }
 0x3c6   : > { %6194 = vmatmul.mubr.bf16.vlgmr.msra.gmra.mrb[8].mxu0 %v10853_v5  ;;  %6276 = vmatmul.mubr.bf16.vlgmr.msra.gmra.mrb[8].mxu1 %v10853_v5 }
 0x3c7   : > { %6203 = vmatpush1.bf16.msra.mxu0 %v10005_v0  ;;  %6285 = vmatpush1.bf16.msra.mxu1 %v10006_v1  ;;  %v10045_v0 = vld [vmem:[%s15513_s4 + $0x340] ss:$16 sps:$4 sm:$0xff]   ;;  %v10046_v1 = vld [vmem:[%s15513_s4 + $0x348] ss:$16 sps:$4 sm:$0xff]  }
 0x3c8   : > { %6204 = vmatprep.subr.bf16.mxu0 %v10007_v2  ;;  %6286 = vmatprep.subr.bf16.mxu1 %v10008_v3  ;;  %v10047_v2 = vld [vmem:[%s15513_s4 + $0x364] ss:$16 sps:$4 sm:$0xff]   ;;  %v10048_v3 = vld [vmem:[%s15513_s4 + $0x36c] ss:$16 sps:$4 sm:$0xff]  }
 0x3c9   : > { %6234 = vmatprep.mubr.bf16.mxu0 %v10931_v30  ;;  %6316 = vmatprep.mubr.bf16.mxu1 %v10931_v30 }
 0x3cb   : > { %6205 = vmatpush1.bf16.msra.mxu0 %v10009_v4  ;;  %6287 = vmatpush1.bf16.msra.mxu1 %v10010_v6  ;;  %v10049_v4 = vld [vmem:[%s15513_s4 + $0x360] ss:$16 sps:$4 sm:$0xff]   ;;  %v10050_v6 = vld [vmem:[%s15513_s4 + $0x368] ss:$16 sps:$4 sm:$0xff]  }
 0x3cc   : > { %6206 = vmatprep.subr.bf16.mxu0 %v10011_v7  ;;  %6288 = vmatprep.subr.bf16.mxu1 %v10012_v8  ;;  %v10051_v7 = vld [vmem:[%s15513_s4 + $0x384] ss:$16 sps:$4 sm:$0xff]   ;;  %v10052_v8 = vld [vmem:[%s15513_s4 + $0x38c] ss:$16 sps:$4 sm:$0xff]  }
 0x3cf   : > { %6207 = vmatpush1.bf16.msra.mxu0 %v10013_v9  ;;  %6289 = vmatpush1.bf16.msra.mxu1 %v10014_v11  ;;  %v10053_v9 = vld [vmem:[%s15513_s4 + $0x380] ss:$16 sps:$4 sm:$0xff]   ;;  %v10054_v11 = vld [vmem:[%s15513_s4 + $0x388] ss:$16 sps:$4 sm:$0xff]  }
 0x3d0   : > { %6208 = vmatprep.subr.bf16.mxu0 %v10015_v12  ;;  %6290 = vmatprep.subr.bf16.mxu1 %v10016_v14  ;;  %v10055_v12 = vld [vmem:[%s15513_s4 + $0x3a4] ss:$16 sps:$4 sm:$0xff]   ;;  %v10056_v14 = vld [vmem:[%s15513_s4 + $0x3ac] ss:$16 sps:$4 sm:$0xff]  }
 0x3d3   : > { %6209 = vmatpush1.bf16.msra.mxu0 %v10017_v16  ;;  %6291 = vmatpush1.bf16.msra.mxu1 %v10018_v17  ;;  %v10057_v16 = vld [vmem:[%s15513_s4 + $0x3a0] ss:$16 sps:$4 sm:$0xff]   ;;  %v10058_v17 = vld [vmem:[%s15513_s4 + $0x3a8] ss:$16 sps:$4 sm:$0xff]  }
 0x3d4   : > { %6210 = vmatprep.subr.bf16.mxu0 %v10019_v18  ;;  %6292 = vmatprep.subr.bf16.mxu1 %v10020_v19  ;;  %v10059_v18 = vld [vmem:[%s15513_s4 + $0x3c4] ss:$16 sps:$4 sm:$0xff]   ;;  %v10060_v19 = vld [vmem:[%s15513_s4 + $0x3cc] ss:$16 sps:$4 sm:$0xff]  }
 0x3d7   : > { %6211 = vmatpush1.bf16.msra.mxu0 %v10021_v22  ;;  %6293 = vmatpush1.bf16.msra.mxu1 %v10022_v23  ;;  %v10061_v22 = vld [vmem:[%s15513_s4 + $0x3c0] ss:$16 sps:$4 sm:$0xff]   ;;  %v10062_v23 = vld [vmem:[%s15513_s4 + $0x3c8] ss:$16 sps:$4 sm:$0xff]  }
 0x3d8   : > { %6212 = vmatprep.subr.bf16.mxu0 %v10023_v13  ;;  %6294 = vmatprep.subr.bf16.mxu1 %v10024_v25  ;;  %v10063_v13 = vld [vmem:[%s15513_s4 + $0x3e4] ss:$16 sps:$4 sm:$0xff]   ;;  %v10064_v25 = vld [vmem:[%s15513_s4 + $0x3ec] ss:$16 sps:$4 sm:$0xff]  }
 0x3d9   : > { %v13735_v26 = vpop.f32.mrb[4].mxu0  ;;  %v13737_v27 = vpop.f32.mrb[4].mxu1 }
 0x3da   : > { %v5993_v28 = vmax.f32 %v12563_v60, %v13735_v26  ;;  %v5995_v32 = vmax.f32 %v12565_v61, %v13737_v27  ;;  %v13743_v33 = vpop.f32.mrb[5].mxu0  ;;  %v13745_v34 = vpop.f32.mrb[5].mxu1 }
 0x3db   : > { %v5994_v35 = vmax.f32 %v12567_v62, %v13743_v33  ;;  %v5996_v15 = vmax.f32 %v12569_v63, %v13745_v34  ;;  %v5904_v36 = vpop.f32.mrb[6].mxu0  ;;  %v5986_v37 = vpop.f32.mrb[6].mxu1  ;;  %6213 = vmatpush1.bf16.msra.mxu0 %v10025_v38  ;;  %6295 = vmatpush1.bf16.msra.mxu1 %v10026_v39  ;;  %v10066_v38 = vld [vmem:[%s15513_s4 + $0x3e8] ss:$16 sps:$4 sm:$0xff]   ;;  %v10067_v39 = vld [vmem:[%s15513_s4 + $0x804] ss:$16 sps:$4 sm:$0xff]  }
 0x3dc   : > { %v5905_v40 = vpop.f32.mrb[7].mxu0  ;;  %v5987_v43 = vpop.f32.mrb[7].mxu1  ;;  %6214 = vmatprep.subr.bf16.mxu0 %v10027_v20  ;;  %6296 = vmatprep.subr.bf16.mxu1 %v10028_v44  ;;  %v13878_v36 = vld [vmem:[%s13869_s12] sm:$0xff]  ;;  %v10070_v44 = vld [vmem:[%s15513_s4 + $0x808] ss:$16 sps:$4 sm:$0xff]  }
 0x3dd   : > { %v10065_v37 = vld [vmem:[%s15513_s4 + $0x3e0] ss:$16 sps:$4 sm:$0xff]   ;;  %v10068_v40 = vld [vmem:[%s15513_s4 + $0x80c] ss:$16 sps:$4 sm:$0xff]   ;;  %v13894_v43 = vcombine.high %v13878_v36, %v13878_v36 }
 0x3de   : > { %v10069_v20 = vld [vmem:[%s15513_s4 + $0x800] ss:$16 sps:$4 sm:$0xff]  }
 0x3df   : > { %6215 = vmatpush1.bf16.msra.mxu0 %v10029_v45  ;;  %6297 = vmatpush1.bf16.msra.mxu1 %v10030_v31  ;;  %v10071_v45 = vld [vmem:[%s15513_s4 + $0x824] ss:$16 sps:$4 sm:$0xff]   ;;  %v10072_v31 = vld [vmem:[%s15513_s4 + $0x82c] ss:$16 sps:$4 sm:$0xff]  }
 0x3e0   : > { %6216 = vmatprep.subr.bf16.mxu0 %v10031_v24  ;;  %6298 = vmatprep.subr.bf16.mxu1 %v10032_v47  ;;  %v10073_v24 = vld [vmem:[%s15513_s4 + $0x820] ss:$16 sps:$4 sm:$0xff]   ;;  %v10074_v47 = vld [vmem:[%s15513_s4 + $0x828] ss:$16 sps:$4 sm:$0xff]  }
 0x3e3   : > { %6217 = vmatpush1.bf16.msra.mxu0 %v10033_v49  ;;  %6299 = vmatpush1.bf16.msra.mxu1 %v10034_v50  ;;  %v10075_v49 = vld [vmem:[%s15513_s4 + $0x844] ss:$16 sps:$4 sm:$0xff]   ;;  %v10076_v50 = vld [vmem:[%s15513_s4 + $0x84c] ss:$16 sps:$4 sm:$0xff]  }
 0x3e4   : > { %6218 = vmatprep.subr.bf16.mxu0 %v10035_v51  ;;  %6300 = vmatprep.subr.bf16.mxu1 %v10036_v52  ;;  %v10077_v51 = vld [vmem:[%s15513_s4 + $0x840] ss:$16 sps:$4 sm:$0xff]   ;;  %v10078_v52 = vld [vmem:[%s15513_s4 + $0x848] ss:$16 sps:$4 sm:$0xff]  }
 0x3e7   : > { %6219 = vmatpush1.bf16.msra.mxu0 %v10037_v53  ;;  %6301 = vmatpush1.bf16.msra.mxu1 %v10038_v54  ;;  %v10079_v53 = vld [vmem:[%s15513_s4 + $0x864] ss:$16 sps:$4 sm:$0xff]   ;;  %v10080_v54 = vld [vmem:[%s15513_s4 + $0x86c] ss:$16 sps:$4 sm:$0xff]  }
 0x3e8   : > { %6220 = vmatprep.subr.bf16.mxu0 %v10039_v55  ;;  %6302 = vmatprep.subr.bf16.mxu1 %v10040_v57  ;;  %v10081_v55 = vld [vmem:[%s15513_s4 + $0x860] ss:$16 sps:$4 sm:$0xff]   ;;  %v10082_v57 = vld [vmem:[%s15513_s4 + $0x868] ss:$16 sps:$4 sm:$0xff]  }
 0x3eb   : > { %6221 = vmatpush1.bf16.msra.mxu0 %v10041_v58  ;;  %6303 = vmatpush1.bf16.msra.mxu1 %v10042_v59  ;;  %v10083_v58 = vld [vmem:[%s15513_s4 + $0x884] ss:$16 sps:$4 sm:$0xff]   ;;  %v10084_v59 = vld [vmem:[%s15513_s4 + $0x88c] ss:$16 sps:$4 sm:$0xff]  }
 0x3ec   : > { %6222 = vmatprep.subr.bf16.mxu0 %v10043_v41  ;;  %6304 = vmatprep.subr.bf16.mxu1 %v10044_v29  ;;  %v10085_v41 = vld [vmem:[%s15513_s4 + $0x880] ss:$16 sps:$4 sm:$0xff]   ;;  %v10086_v29 = vld [vmem:[%s15513_s4 + $0x888] ss:$16 sps:$4 sm:$0xff]  }
 0x3ef   : > { %6223 = vmatpush1.bf16.msra.mxu0 %v10045_v0  ;;  %6305 = vmatpush1.bf16.msra.mxu1 %v10046_v1  ;;  %v10087_v0 = vld [vmem:[%s15513_s4 + $0x8a4] ss:$16 sps:$4 sm:$0xff]   ;;  %v10088_v1 = vld [vmem:[%s15513_s4 + $0x8ac] ss:$16 sps:$4 sm:$0xff]  }
 0x3f0   : > { %6224 = vmatprep.subr.bf16.mxu0 %v10047_v2  ;;  %6306 = vmatprep.subr.bf16.mxu1 %v10048_v3  ;;  %v10089_v2 = vld [vmem:[%s15513_s4 + $0x8a0] ss:$16 sps:$4 sm:$0xff]   ;;  %v10090_v3 = vld [vmem:[%s15513_s4 + $0x8a8] ss:$16 sps:$4 sm:$0xff]  }
 0x3f3   : > { %6225 = vmatpush1.bf16.msra.mxu0 %v10049_v4  ;;  %6307 = vmatpush1.bf16.msra.mxu1 %v10050_v6  ;;  %v10091_v4 = vld [vmem:[%s15513_s4 + $0x8c4] ss:$16 sps:$4 sm:$0xff]   ;;  %v10092_v6 = vld [vmem:[%s15513_s4 + $0x8cc] ss:$16 sps:$4 sm:$0xff]  }
 0x3f4   : > { %6226 = vmatprep.subr.bf16.mxu0 %v10051_v7  ;;  %6308 = vmatprep.subr.bf16.mxu1 %v10052_v8  ;;  %v10093_v7 = vld [vmem:[%s15513_s4 + $0x8c0] ss:$16 sps:$4 sm:$0xff]   ;;  %v10094_v8 = vld [vmem:[%s15513_s4 + $0x8c8] ss:$16 sps:$4 sm:$0xff]  }
 0x3f7   : > { %6227 = vmatpush1.bf16.msra.mxu0 %v10053_v9  ;;  %6309 = vmatpush1.bf16.msra.mxu1 %v10054_v11  ;;  %v10095_v9 = vld [vmem:[%s15513_s4 + $0x8e4] ss:$16 sps:$4 sm:$0xff]   ;;  %v10096_v11 = vld [vmem:[%s15513_s4 + $0x8ec] ss:$16 sps:$4 sm:$0xff]  }
 0x3f8   : > { %6228 = vmatprep.subr.bf16.mxu0 %v10055_v12  ;;  %6310 = vmatprep.subr.bf16.mxu1 %v10056_v14  ;;  %v10097_v12 = vld [vmem:[%s15513_s4 + $0x8e0] ss:$16 sps:$4 sm:$0xff]   ;;  %v10098_v14 = vld [vmem:[%s15513_s4 + $0x8e8] ss:$16 sps:$4 sm:$0xff]  }
 0x3fb   : > { %6229 = vmatpush1.bf16.msra.mxu0 %v10057_v16  ;;  %6311 = vmatpush1.bf16.msra.mxu1 %v10058_v17  ;;  %v10099_v16 = vld [vmem:[%s15513_s4 + $0x904] ss:$16 sps:$4 sm:$0xff]   ;;  %v10100_v17 = vld [vmem:[%s15513_s4 + $0x90c] ss:$16 sps:$4 sm:$0xff]  }
 0x3fc   : > { %6230 = vmatprep.subr.bf16.mxu0 %v10059_v18  ;;  %6312 = vmatprep.subr.bf16.mxu1 %v10060_v19  ;;  %v10101_v18 = vld [vmem:[%s15513_s4 + $0x900] ss:$16 sps:$4 sm:$0xff]   ;;  %v10102_v19 = vld [vmem:[%s15513_s4 + $0x908] ss:$16 sps:$4 sm:$0xff]  }
 0x3ff   : > { %6231 = vmatpush1.bf16.msra.mxu0 %v10061_v22  ;;  %6313 = vmatpush1.bf16.msra.mxu1 %v10062_v23  ;;  %v10103_v22 = vld [vmem:[%s15513_s4 + $0x924] ss:$16 sps:$4 sm:$0xff]   ;;  %v10104_v23 = vld [vmem:[%s15513_s4 + $0x92c] ss:$16 sps:$4 sm:$0xff]  }
 0x400   : > { %6232 = vmatprep.subr.bf16.mxu0 %v10063_v13  ;;  %6314 = vmatprep.subr.bf16.mxu1 %v10064_v25  ;;  %v10105_v13 = vld [vmem:[%s15513_s4 + $0x920] ss:$16 sps:$4 sm:$0xff]   ;;  %v10106_v25 = vld [vmem:[%s15513_s4 + $0x928] ss:$16 sps:$4 sm:$0xff]  }
 0x403   : > { %6233 = vmatpush1.bf16.msra.mxu0 %v10065_v37  ;;  %6315 = vmatpush1.bf16.msra.mxu1 %v10066_v38  ;;  %v10107_v37 = vld [vmem:[%s15513_s4 + $0x944] ss:$16 sps:$4 sm:$0xff]   ;;  %v10108_v38 = vld [vmem:[%s15513_s4 + $0x94c] ss:$16 sps:$4 sm:$0xff]  }
 0x404   : > { %6339 = vmatprep.subr.bf16.mxu0 %v10067_v39  ;;  %6421 = vmatprep.subr.bf16.mxu1 %v10068_v40  ;;  %v10109_v39 = vld [vmem:[%s15513_s4 + $0x940] ss:$16 sps:$4 sm:$0xff]   ;;  %v10110_v40 = vld [vmem:[%s15513_s4 + $0x948] ss:$16 sps:$4 sm:$0xff]  }
 0x406   : > { %6235 = vmatmul.mubr.bf16.vlgmr.msra.gmra.mrb[8].mxu0 %v11066_v10  ;;  %6317 = vmatmul.mubr.bf16.vlgmr.msra.gmra.mrb[8].mxu1 %v11066_v10 }
 0x407   : > { %6340 = vmatpush1.bf16.msra.mxu0 %v10069_v20  ;;  %6422 = vmatpush1.bf16.msra.mxu1 %v10070_v44  ;;  %v10111_v20 = vld [vmem:[%s15513_s4 + $0x964] ss:$16 sps:$4 sm:$0xff]   ;;  %v10112_v44 = vld [vmem:[%s15513_s4 + $0x96c] ss:$16 sps:$4 sm:$0xff]  }
 0x408   : > { %6341 = vmatprep.subr.bf16.mxu0 %v10071_v45  ;;  %6423 = vmatprep.subr.bf16.mxu1 %v10072_v31  ;;  %v10113_v45 = vld [vmem:[%s15513_s4 + $0x960] ss:$16 sps:$4 sm:$0xff]   ;;  %v10114_v31 = vld [vmem:[%s15513_s4 + $0x968] ss:$16 sps:$4 sm:$0xff]  }
 0x409   : > { %6371 = vmatprep.mubr.bf16.mxu0 %v13894_v43  ;;  %6453 = vmatprep.mubr.bf16.mxu1 %v13894_v43 }
 0x40b   : > { %6342 = vmatpush1.bf16.msra.mxu0 %v10073_v24  ;;  %6424 = vmatpush1.bf16.msra.mxu1 %v10074_v47  ;;  %v10115_v24 = vld [vmem:[%s15513_s4 + $0x984] ss:$16 sps:$4 sm:$0xff]   ;;  %v10116_v47 = vld [vmem:[%s15513_s4 + $0x98c] ss:$16 sps:$4 sm:$0xff]  }
 0x40c   : > { %6343 = vmatprep.subr.bf16.mxu0 %v10075_v49  ;;  %6425 = vmatprep.subr.bf16.mxu1 %v10076_v50  ;;  %v10117_v49 = vld [vmem:[%s15513_s4 + $0x980] ss:$16 sps:$4 sm:$0xff]   ;;  %v10118_v50 = vld [vmem:[%s15513_s4 + $0x988] ss:$16 sps:$4 sm:$0xff]  }
 0x40f   : > { %6344 = vmatpush1.bf16.msra.mxu0 %v10077_v51  ;;  %6426 = vmatpush1.bf16.msra.mxu1 %v10078_v52  ;;  %v10119_v51 = vld [vmem:[%s15513_s4 + $0x9a4] ss:$16 sps:$4 sm:$0xff]   ;;  %v10120_v52 = vld [vmem:[%s15513_s4 + $0x9ac] ss:$16 sps:$4 sm:$0xff]  }
 0x410   : > { %6345 = vmatprep.subr.bf16.mxu0 %v10079_v53  ;;  %6427 = vmatprep.subr.bf16.mxu1 %v10080_v54  ;;  %v10121_v53 = vld [vmem:[%s15513_s4 + $0x9a0] ss:$16 sps:$4 sm:$0xff]   ;;  %v10122_v54 = vld [vmem:[%s15513_s4 + $0x9a8] ss:$16 sps:$4 sm:$0xff]  }
 0x413   : > { %6346 = vmatpush1.bf16.msra.mxu0 %v10081_v55  ;;  %6428 = vmatpush1.bf16.msra.mxu1 %v10082_v57  ;;  %v10123_v55 = vld [vmem:[%s15513_s4 + $0x9c4] ss:$16 sps:$4 sm:$0xff]   ;;  %v10124_v57 = vld [vmem:[%s15513_s4 + $0x9cc] ss:$16 sps:$4 sm:$0xff]  }
 0x414   : > { %6347 = vmatprep.subr.bf16.mxu0 %v10083_v58  ;;  %6429 = vmatprep.subr.bf16.mxu1 %v10084_v59  ;;  %v10125_v58 = vld [vmem:[%s15513_s4 + $0x9c0] ss:$16 sps:$4 sm:$0xff]   ;;  %v10126_v59 = vld [vmem:[%s15513_s4 + $0x9c8] ss:$16 sps:$4 sm:$0xff]  }
 0x417   : > { %6348 = vmatpush1.bf16.msra.mxu0 %v10085_v41  ;;  %6430 = vmatpush1.bf16.msra.mxu1 %v10086_v29  ;;  %v10127_v41 = vld [vmem:[%s15513_s4 + $0x9e4] ss:$16 sps:$4 sm:$0xff]   ;;  %v10128_v29 = vld [vmem:[%s15513_s4 + $0x9ec] ss:$16 sps:$4 sm:$0xff]  }
 0x418   : > { %6349 = vmatprep.subr.bf16.mxu0 %v10087_v0  ;;  %6431 = vmatprep.subr.bf16.mxu1 %v10088_v1  ;;  %v14082_v0 = vcombine.low %v13878_v36, %v13878_v36  ;;  %v14085_v1 = vld [vmem:[%s13869_s12 + $0x8] sm:$0xff] }
 0x419   : > { %v10132_v36 = vld [vmem:[%s15513_s4 + $0xa0c] ss:$16 sps:$4 sm:$0xff]  }
 0x41b   : > { %6350 = vmatpush1.bf16.msra.mxu0 %v10089_v2  ;;  %6432 = vmatpush1.bf16.msra.mxu1 %v10090_v3  ;;  %v10129_v2 = vld [vmem:[%s15513_s4 + $0x9e0] ss:$16 sps:$4 sm:$0xff]   ;;  %v10130_v3 = vld [vmem:[%s15513_s4 + $0x9e8] ss:$16 sps:$4 sm:$0xff]  }
 0x41c   : > { %6351 = vmatprep.subr.bf16.mxu0 %v10091_v4  ;;  %6433 = vmatprep.subr.bf16.mxu1 %v10092_v6  ;;  %v10131_v4 = vld [vmem:[%s15513_s4 + $0xa04] ss:$16 sps:$4 sm:$0xff]   ;;  %v14101_v6 = vcombine.high %v14085_v1, %v14085_v1 }
 0x41f   : > { %6352 = vmatpush1.bf16.msra.mxu0 %v10093_v7  ;;  %6434 = vmatpush1.bf16.msra.mxu1 %v10094_v8  ;;  %v10133_v7 = vld [vmem:[%s15513_s4 + $0xa00] ss:$16 sps:$4 sm:$0xff]   ;;  %v10134_v8 = vld [vmem:[%s15513_s4 + $0xa08] ss:$16 sps:$4 sm:$0xff]  }
 0x420   : > { %6353 = vmatprep.subr.bf16.mxu0 %v10095_v9  ;;  %6435 = vmatprep.subr.bf16.mxu1 %v10096_v11  ;;  %v10135_v9 = vld [vmem:[%s15513_s4 + $0xa24] ss:$16 sps:$4 sm:$0xff]   ;;  %v10136_v11 = vld [vmem:[%s15513_s4 + $0xa2c] ss:$16 sps:$4 sm:$0xff]  }
 0x423   : > { %6354 = vmatpush1.bf16.msra.mxu0 %v10097_v12  ;;  %6436 = vmatpush1.bf16.msra.mxu1 %v10098_v14  ;;  %v10137_v12 = vld [vmem:[%s15513_s4 + $0xa20] ss:$16 sps:$4 sm:$0xff]   ;;  %v10138_v14 = vld [vmem:[%s15513_s4 + $0xa28] ss:$16 sps:$4 sm:$0xff]  }
 0x424   : > { %6355 = vmatprep.subr.bf16.mxu0 %v10099_v16  ;;  %6437 = vmatprep.subr.bf16.mxu1 %v10100_v17  ;;  %v10139_v16 = vld [vmem:[%s15513_s4 + $0xa44] ss:$16 sps:$4 sm:$0xff]   ;;  %v10140_v17 = vld [vmem:[%s15513_s4 + $0xa4c] ss:$16 sps:$4 sm:$0xff]  }
 0x427   : > { %6356 = vmatpush1.bf16.msra.mxu0 %v10101_v18  ;;  %6438 = vmatpush1.bf16.msra.mxu1 %v10102_v19  ;;  %v10141_v18 = vld [vmem:[%s15513_s4 + $0xa40] ss:$16 sps:$4 sm:$0xff]   ;;  %v10142_v19 = vld [vmem:[%s15513_s4 + $0xa48] ss:$16 sps:$4 sm:$0xff]  }
 0x428   : > { %6357 = vmatprep.subr.bf16.mxu0 %v10103_v22  ;;  %6439 = vmatprep.subr.bf16.mxu1 %v10104_v23  ;;  %v10143_v22 = vld [vmem:[%s15513_s4 + $0xa64] ss:$16 sps:$4 sm:$0xff]   ;;  %v10144_v23 = vld [vmem:[%s15513_s4 + $0xa6c] ss:$16 sps:$4 sm:$0xff]  }
 0x42b   : > { %6358 = vmatpush1.bf16.msra.mxu0 %v10105_v13  ;;  %6440 = vmatpush1.bf16.msra.mxu1 %v10106_v25  ;;  %v10145_v13 = vld [vmem:[%s15513_s4 + $0xa60] ss:$16 sps:$4 sm:$0xff]   ;;  %v10146_v25 = vld [vmem:[%s15513_s4 + $0xa68] ss:$16 sps:$4 sm:$0xff]  }
 0x42c   : > { %6359 = vmatprep.subr.bf16.mxu0 %v10107_v37  ;;  %6441 = vmatprep.subr.bf16.mxu1 %v10108_v38  ;;  %v10147_v37 = vld [vmem:[%s15513_s4 + $0xa84] ss:$16 sps:$4 sm:$0xff]   ;;  %v10148_v38 = vld [vmem:[%s15513_s4 + $0xa8c] ss:$16 sps:$4 sm:$0xff]  }
 0x42f   : > { %6360 = vmatpush1.bf16.msra.mxu0 %v10109_v39  ;;  %6442 = vmatpush1.bf16.msra.mxu1 %v10110_v40  ;;  %v10149_v39 = vld [vmem:[%s15513_s4 + $0xa80] ss:$16 sps:$4 sm:$0xff]   ;;  %v10150_v40 = vld [vmem:[%s15513_s4 + $0xa88] ss:$16 sps:$4 sm:$0xff]  }
 0x430   : > { %6361 = vmatprep.subr.bf16.mxu0 %v10111_v20  ;;  %6443 = vmatprep.subr.bf16.mxu1 %v10112_v44  ;;  %v10151_v20 = vld [vmem:[%s15513_s4 + $0xaa4] ss:$16 sps:$4 sm:$0xff]   ;;  %v10152_v44 = vld [vmem:[%s15513_s4 + $0xaac] ss:$16 sps:$4 sm:$0xff]  }
 0x433   : > { %6362 = vmatpush1.bf16.msra.mxu0 %v10113_v45  ;;  %6444 = vmatpush1.bf16.msra.mxu1 %v10114_v31  ;;  %v10153_v45 = vld [vmem:[%s15513_s4 + $0xaa0] ss:$16 sps:$4 sm:$0xff]   ;;  %v10154_v31 = vld [vmem:[%s15513_s4 + $0xaa8] ss:$16 sps:$4 sm:$0xff]  }
 0x434   : > { %6363 = vmatprep.subr.bf16.mxu0 %v10115_v24  ;;  %6445 = vmatprep.subr.bf16.mxu1 %v10116_v47  ;;  %v10155_v24 = vld [vmem:[%s15513_s4 + $0xac4] ss:$16 sps:$4 sm:$0xff]   ;;  %v10156_v47 = vld [vmem:[%s15513_s4 + $0xacc] ss:$16 sps:$4 sm:$0xff]  }
 0x437   : > { %6364 = vmatpush1.bf16.msra.mxu0 %v10117_v49  ;;  %6446 = vmatpush1.bf16.msra.mxu1 %v10118_v50  ;;  %v10157_v49 = vld [vmem:[%s15513_s4 + $0xac0] ss:$16 sps:$4 sm:$0xff]   ;;  %v10158_v50 = vld [vmem:[%s15513_s4 + $0xac8] ss:$16 sps:$4 sm:$0xff]  }
 0x438   : > { %6365 = vmatprep.subr.bf16.mxu0 %v10119_v51  ;;  %6447 = vmatprep.subr.bf16.mxu1 %v10120_v52  ;;  %v10159_v51 = vld [vmem:[%s15513_s4 + $0xae4] ss:$16 sps:$4 sm:$0xff]   ;;  %v10160_v52 = vld [vmem:[%s15513_s4 + $0xaec] ss:$16 sps:$4 sm:$0xff]  }
 0x43b   : > { %6366 = vmatpush1.bf16.msra.mxu0 %v10121_v53  ;;  %6448 = vmatpush1.bf16.msra.mxu1 %v10122_v54  ;;  %v10161_v53 = vld [vmem:[%s15513_s4 + $0xae0] ss:$16 sps:$4 sm:$0xff]   ;;  %v10162_v54 = vld [vmem:[%s15513_s4 + $0xae8] ss:$16 sps:$4 sm:$0xff]  }
 0x43c   : > { %6367 = vmatprep.subr.bf16.mxu0 %v10123_v55  ;;  %6449 = vmatprep.subr.bf16.mxu1 %v10124_v57  ;;  %v10163_v55 = vld [vmem:[%s15513_s4 + $0xb04] ss:$16 sps:$4 sm:$0xff]   ;;  %v10164_v57 = vld [vmem:[%s15513_s4 + $0xb0c] ss:$16 sps:$4 sm:$0xff]  }
 0x43f   : > { %6368 = vmatpush1.bf16.msra.mxu0 %v10125_v58  ;;  %6450 = vmatpush1.bf16.msra.mxu1 %v10126_v59  ;;  %v10165_v58 = vld [vmem:[%s15513_s4 + $0xb00] ss:$16 sps:$4 sm:$0xff]   ;;  %v10166_v59 = vld [vmem:[%s15513_s4 + $0xb08] ss:$16 sps:$4 sm:$0xff]  }
 0x440   : > { %6369 = vmatprep.subr.bf16.mxu0 %v10127_v41  ;;  %6451 = vmatprep.subr.bf16.mxu1 %v10128_v29  ;;  %v10167_v41 = vld [vmem:[%s15513_s4 + $0xb24] ss:$16 sps:$4 sm:$0xff]   ;;  %v10168_v29 = vld [vmem:[%s15513_s4 + $0xb2c] ss:$16 sps:$4 sm:$0xff]  }
 0x443   : > { %6370 = vmatpush1.bf16.msra.mxu0 %v10129_v2  ;;  %6452 = vmatpush1.bf16.msra.mxu1 %v10130_v3  ;;  %v10169_v2 = vld [vmem:[%s15513_s4 + $0xb20] ss:$16 sps:$4 sm:$0xff]   ;;  %v10170_v3 = vld [vmem:[%s15513_s4 + $0xb28] ss:$16 sps:$4 sm:$0xff]  }
 0x444   : > { %6380 = vmatprep.subr.bf16.mxu0 %v10131_v4  ;;  %6462 = vmatprep.subr.bf16.mxu1 %v10132_v36  ;;  %v10171_v4 = vld [vmem:[%s15513_s4 + $0xb44] ss:$16 sps:$4 sm:$0xff]   ;;  %v10172_v36 = vld [vmem:[%s15513_s4 + $0xb4c] ss:$16 sps:$4 sm:$0xff]  }
 0x446   : > { %6372 = vmatmul.mubr.bf16.vlgmr.msra.gmra.mrb[8].mxu0 %v14082_v0  ;;  %6454 = vmatmul.mubr.bf16.vlgmr.msra.gmra.mrb[8].mxu1 %v14082_v0 }
 0x447   : > { %6381 = vmatpush1.bf16.msra.mxu0 %v10133_v7  ;;  %6463 = vmatpush1.bf16.msra.mxu1 %v10134_v8  ;;  %v10173_v7 = vld [vmem:[%s15513_s4 + $0xb40] ss:$16 sps:$4 sm:$0xff]   ;;  %v10174_v8 = vld [vmem:[%s15513_s4 + $0xb48] ss:$16 sps:$4 sm:$0xff]  }
 0x448   : > { %6382 = vmatprep.subr.bf16.mxu0 %v10135_v9  ;;  %6464 = vmatprep.subr.bf16.mxu1 %v10136_v11  ;;  %v10175_v9 = vld [vmem:[%s15513_s4 + $0xb64] ss:$16 sps:$4 sm:$0xff]   ;;  %v10176_v11 = vld [vmem:[%s15513_s4 + $0xb6c] ss:$16 sps:$4 sm:$0xff]  }
 0x449   : > { %6412 = vmatprep.mubr.bf16.mxu0 %v14101_v6  ;;  %6494 = vmatprep.mubr.bf16.mxu1 %v14101_v6 }
 0x44b   : > { %6383 = vmatpush1.bf16.msra.mxu0 %v10137_v12  ;;  %6465 = vmatpush1.bf16.msra.mxu1 %v10138_v14  ;;  %v10177_v12 = vld [vmem:[%s15513_s4 + $0xb60] ss:$16 sps:$4 sm:$0xff]   ;;  %v10178_v14 = vld [vmem:[%s15513_s4 + $0xb68] ss:$16 sps:$4 sm:$0xff]  }
 0x44c   : > { %6384 = vmatprep.subr.bf16.mxu0 %v10139_v16  ;;  %6466 = vmatprep.subr.bf16.mxu1 %v10140_v17  ;;  %v10179_v16 = vld [vmem:[%s15513_s4 + $0xb84] ss:$16 sps:$4 sm:$0xff]   ;;  %v10180_v17 = vld [vmem:[%s15513_s4 + $0xb8c] ss:$16 sps:$4 sm:$0xff]  }
 0x44f   : > { %6385 = vmatpush1.bf16.msra.mxu0 %v10141_v18  ;;  %6467 = vmatpush1.bf16.msra.mxu1 %v10142_v19  ;;  %v10181_v18 = vld [vmem:[%s15513_s4 + $0xb80] ss:$16 sps:$4 sm:$0xff]   ;;  %v10182_v19 = vld [vmem:[%s15513_s4 + $0xb88] ss:$16 sps:$4 sm:$0xff]  }
 0x450   : > { %6386 = vmatprep.subr.bf16.mxu0 %v10143_v22  ;;  %6468 = vmatprep.subr.bf16.mxu1 %v10144_v23  ;;  %v10183_v22 = vld [vmem:[%s15513_s4 + $0xba4] ss:$16 sps:$4 sm:$0xff]   ;;  %v10184_v23 = vld [vmem:[%s15513_s4 + $0xbac] ss:$16 sps:$4 sm:$0xff]  }
 0x453   : > { %6387 = vmatpush1.bf16.msra.mxu0 %v10145_v13  ;;  %6469 = vmatpush1.bf16.msra.mxu1 %v10146_v25  ;;  %v10185_v13 = vld [vmem:[%s15513_s4 + $0xba0] ss:$16 sps:$4 sm:$0xff]   ;;  %v10186_v25 = vld [vmem:[%s15513_s4 + $0xba8] ss:$16 sps:$4 sm:$0xff]  }
 0x454   : > { %6388 = vmatprep.subr.bf16.mxu0 %v10147_v37  ;;  %6470 = vmatprep.subr.bf16.mxu1 %v10148_v38  ;;  %v10187_v37 = vld [vmem:[%s15513_s4 + $0xbc4] ss:$16 sps:$4 sm:$0xff]   ;;  %v10188_v38 = vld [vmem:[%s15513_s4 + $0xbcc] ss:$16 sps:$4 sm:$0xff]  }
 0x457   : > { %6389 = vmatpush1.bf16.msra.mxu0 %v10149_v39  ;;  %6471 = vmatpush1.bf16.msra.mxu1 %v10150_v40  ;;  %v10189_v39 = vld [vmem:[%s15513_s4 + $0xbc0] ss:$16 sps:$4 sm:$0xff]   ;;  %v10190_v40 = vld [vmem:[%s15513_s4 + $0xbc8] ss:$16 sps:$4 sm:$0xff]  }
 0x458   : > { %6390 = vmatprep.subr.bf16.mxu0 %v10151_v20  ;;  %6472 = vmatprep.subr.bf16.mxu1 %v10152_v44  ;;  %v10191_v20 = vld [vmem:[%s15513_s4 + $0xbe4] ss:$16 sps:$4 sm:$0xff]   ;;  %v10192_v44 = vld [vmem:[%s15513_s4 + $0xbec] ss:$16 sps:$4 sm:$0xff]  }
 0x45b   : > { %6391 = vmatpush1.bf16.msra.mxu0 %v10153_v45  ;;  %6473 = vmatpush1.bf16.msra.mxu1 %v10154_v31  ;;  %v14289_v45 = vcombine.low %v14085_v1, %v14085_v1  ;;  %v10193_v31 = vld [vmem:[%s15513_s4 + $0xbe0] ss:$16 sps:$4 sm:$0xff]   ;;  %v10196_v1 = vld [vmem:[%s15514_s5 + $0x40c] ss:$16 sps:$4 sm:$0xff]  }
 0x45c   : > { %6392 = vmatprep.subr.bf16.mxu0 %v10155_v24  ;;  %6474 = vmatprep.subr.bf16.mxu1 %v10156_v47  ;;  %v10194_v24 = vld [vmem:[%s15513_s4 + $0xbe8] ss:$16 sps:$4 sm:$0xff]   ;;  %v10195_v47 = vld [vmem:[%s15514_s5 + $0x404] ss:$16 sps:$4 sm:$0xff]  }
 0x45f   : > { %6393 = vmatpush1.bf16.msra.mxu0 %v10157_v49  ;;  %6475 = vmatpush1.bf16.msra.mxu1 %v10158_v50  ;;  %v10197_v49 = vld [vmem:[%s15514_s5 + $0x400] ss:$16 sps:$4 sm:$0xff]   ;;  %v10198_v50 = vld [vmem:[%s15514_s5 + $0x408] ss:$16 sps:$4 sm:$0xff]  }
 0x460   : > { %6394 = vmatprep.subr.bf16.mxu0 %v10159_v51  ;;  %6476 = vmatprep.subr.bf16.mxu1 %v10160_v52  ;;  %v10199_v51 = vld [vmem:[%s15514_s5 + $0x424] ss:$16 sps:$4 sm:$0xff]   ;;  %v10200_v52 = vld [vmem:[%s15514_s5 + $0x42c] ss:$16 sps:$4 sm:$0xff]  }
 0x463   : > { %6395 = vmatpush1.bf16.msra.mxu0 %v10161_v53  ;;  %6477 = vmatpush1.bf16.msra.mxu1 %v10162_v54  ;;  %v10201_v53 = vld [vmem:[%s15514_s5 + $0x420] ss:$16 sps:$4 sm:$0xff]   ;;  %v10202_v54 = vld [vmem:[%s15514_s5 + $0x428] ss:$16 sps:$4 sm:$0xff]  }
 0x464   : > { %6396 = vmatprep.subr.bf16.mxu0 %v10163_v55  ;;  %6478 = vmatprep.subr.bf16.mxu1 %v10164_v57  ;;  %v10203_v55 = vld [vmem:[%s15514_s5 + $0x444] ss:$16 sps:$4 sm:$0xff]   ;;  %v10204_v57 = vld [vmem:[%s15514_s5 + $0x44c] ss:$16 sps:$4 sm:$0xff]  }
 0x467   : > { %6397 = vmatpush1.bf16.msra.mxu0 %v10165_v58  ;;  %6479 = vmatpush1.bf16.msra.mxu1 %v10166_v59  ;;  %v10206_v58 = vld [vmem:[%s15514_s5 + $0x448] ss:$16 sps:$4 sm:$0xff]   ;;  %v10207_v59 = vld [vmem:[%s15514_s5 + $0x464] ss:$16 sps:$4 sm:$0xff]  }
 0x468   : > { %6398 = vmatprep.subr.bf16.mxu0 %v10167_v41  ;;  %6480 = vmatprep.subr.bf16.mxu1 %v10168_v29  ;;  %v10208_v41 = vld [vmem:[%s15514_s5 + $0x46c] ss:$16 sps:$4 sm:$0xff]   ;;  %v10209_v29 = vld [vmem:[%s15514_s5 + $0x460] ss:$16 sps:$4 sm:$0xff]  }
 0x46b   : > { %6399 = vmatpush1.bf16.msra.mxu0 %v10169_v2  ;;  %6481 = vmatpush1.bf16.msra.mxu1 %v10170_v3  ;;  %v10210_v2 = vld [vmem:[%s15514_s5 + $0x468] ss:$16 sps:$4 sm:$0xff]   ;;  %v10211_v3 = vld [vmem:[%s15514_s5 + $0x484] ss:$16 sps:$4 sm:$0xff]  }
 0x46c   : > { %6400 = vmatprep.subr.bf16.mxu0 %v10171_v4  ;;  %6482 = vmatprep.subr.bf16.mxu1 %v10172_v36  ;;  %v10212_v4 = vld [vmem:[%s15514_s5 + $0x48c] ss:$16 sps:$4 sm:$0xff]   ;;  %v10213_v36 = vld [vmem:[%s15514_s5 + $0x480] ss:$16 sps:$4 sm:$0xff]  }
 0x46f   : > { %6401 = vmatpush1.bf16.msra.mxu0 %v10173_v7  ;;  %6483 = vmatpush1.bf16.msra.mxu1 %v10174_v8  ;;  %v10214_v7 = vld [vmem:[%s15514_s5 + $0x488] ss:$16 sps:$4 sm:$0xff]   ;;  %v10215_v8 = vld [vmem:[%s15514_s5 + $0x4a4] ss:$16 sps:$4 sm:$0xff]  }
 0x470   : > { %6402 = vmatprep.subr.bf16.mxu0 %v10175_v9  ;;  %6484 = vmatprep.subr.bf16.mxu1 %v10176_v11  ;;  %v10216_v9 = vld [vmem:[%s15514_s5 + $0x4ac] ss:$16 sps:$4 sm:$0xff]   ;;  %v10217_v11 = vld [vmem:[%s15514_s5 + $0x4a0] ss:$16 sps:$4 sm:$0xff]  }
 0x473   : > { %6403 = vmatpush1.bf16.msra.mxu0 %v10177_v12  ;;  %6485 = vmatpush1.bf16.msra.mxu1 %v10178_v14  ;;  %v10218_v12 = vld [vmem:[%s15514_s5 + $0x4a8] ss:$16 sps:$4 sm:$0xff]   ;;  %v10219_v14 = vld [vmem:[%s15514_s5 + $0x4c4] ss:$16 sps:$4 sm:$0xff]  }
 0x474   : > { %6404 = vmatprep.subr.bf16.mxu0 %v10179_v16  ;;  %6486 = vmatprep.subr.bf16.mxu1 %v10180_v17  ;;  %v10220_v16 = vld [vmem:[%s15514_s5 + $0x4cc] ss:$16 sps:$4 sm:$0xff]   ;;  %v10221_v17 = vld [vmem:[%s15514_s5 + $0x4c0] ss:$16 sps:$4 sm:$0xff]  }
 0x477   : > { %6405 = vmatpush1.bf16.msra.mxu0 %v10181_v18  ;;  %6487 = vmatpush1.bf16.msra.mxu1 %v10182_v19  ;;  %v10222_v18 = vld [vmem:[%s15514_s5 + $0x4c8] ss:$16 sps:$4 sm:$0xff]   ;;  %v10223_v19 = vld [vmem:[%s15514_s5 + $0x4e4] ss:$16 sps:$4 sm:$0xff]  }
 0x478   : > { %6406 = vmatprep.subr.bf16.mxu0 %v10183_v22  ;;  %6488 = vmatprep.subr.bf16.mxu1 %v10184_v23  ;;  %v10224_v22 = vld [vmem:[%s15514_s5 + $0x4ec] ss:$16 sps:$4 sm:$0xff]   ;;  %v10225_v23 = vld [vmem:[%s15514_s5 + $0x4e0] ss:$16 sps:$4 sm:$0xff]  }
 0x47b   : > { %6407 = vmatpush1.bf16.msra.mxu0 %v10185_v13  ;;  %6489 = vmatpush1.bf16.msra.mxu1 %v10186_v25  ;;  %v10226_v13 = vld [vmem:[%s15514_s5 + $0x4e8] ss:$16 sps:$4 sm:$0xff]   ;;  %v10227_v25 = vld [vmem:[%s15514_s5 + $0x504] ss:$16 sps:$4 sm:$0xff]  }
 0x47c   : > { %6408 = vmatprep.subr.bf16.mxu0 %v10187_v37  ;;  %6490 = vmatprep.subr.bf16.mxu1 %v10188_v38  ;;  %v10228_v37 = vld [vmem:[%s15514_s5 + $0x50c] ss:$16 sps:$4 sm:$0xff]   ;;  %v10229_v38 = vld [vmem:[%s15514_s5 + $0x500] ss:$16 sps:$4 sm:$0xff]  }
 0x47f   : > { %6409 = vmatpush1.bf16.msra.mxu0 %v10189_v39  ;;  %6491 = vmatpush1.bf16.msra.mxu1 %v10190_v40  ;;  %v10230_v39 = vld [vmem:[%s15514_s5 + $0x508] ss:$16 sps:$4 sm:$0xff]   ;;  %v10231_v40 = vld [vmem:[%s15514_s5 + $0x524] ss:$16 sps:$4 sm:$0xff]  }
 0x480   : > { %6410 = vmatprep.subr.bf16.mxu0 %v10191_v20  ;;  %6492 = vmatprep.subr.bf16.mxu1 %v10192_v44  ;;  %v10232_v20 = vld [vmem:[%s15514_s5 + $0x52c] ss:$16 sps:$4 sm:$0xff]   ;;  %v10233_v44 = vld [vmem:[%s15514_s5 + $0x520] ss:$16 sps:$4 sm:$0xff]  }
 0x483   : > { %6411 = vmatpush1.bf16.msra.mxu0 %v10193_v31  ;;  %6493 = vmatpush1.bf16.msra.mxu1 %v10194_v24  ;;  %v10234_v31 = vld [vmem:[%s15514_s5 + $0x528] ss:$16 sps:$4 sm:$0xff]   ;;  %v10235_v24 = vld [vmem:[%s15514_s5 + $0x544] ss:$16 sps:$4 sm:$0xff]  }
 0x484   : > { %6507 = vmatprep.subr.bf16.mxu0 %v10195_v47  ;;  %6589 = vmatprep.subr.bf16.mxu1 %v10196_v1  ;;  %v10236_v47 = vld [vmem:[%s15514_s5 + $0x54c] ss:$16 sps:$4 sm:$0xff]   ;;  %v10237_v1 = vld [vmem:[%s15514_s5 + $0x540] ss:$16 sps:$4 sm:$0xff]  }
 0x486   : > { %6413 = vmatmul.mubr.bf16.vlgmr.msra.gmra.mrb[8].mxu0 %v14289_v45  ;;  %6495 = vmatmul.mubr.bf16.vlgmr.msra.gmra.mrb[8].mxu1 %v14289_v45 }
 0x487   : > { %6508 = vmatpush1.bf16.msra.mxu0 %v10197_v49  ;;  %6590 = vmatpush1.bf16.msra.mxu1 %v10198_v50  ;;  %v10238_v49 = vld [vmem:[%s15514_s5 + $0x548] ss:$16 sps:$4 sm:$0xff]   ;;  %v10239_v50 = vld [vmem:[%s15514_s5 + $0x564] ss:$16 sps:$4 sm:$0xff]  }
 0x488   : > { %6509 = vmatprep.subr.bf16.mxu0 %v10199_v51  ;;  %6591 = vmatprep.subr.bf16.mxu1 %v10200_v52  ;;  %v10240_v51 = vld [vmem:[%s15514_s5 + $0x56c] ss:$16 sps:$4 sm:$0xff]   ;;  %v10241_v52 = vld [vmem:[%s15514_s5 + $0x560] ss:$16 sps:$4 sm:$0xff]  }
 0x489   : > { %6539 = vmatprep.mubr.bf16.mxu0 %v11502_v21  ;;  %6621 = vmatprep.mubr.bf16.mxu1 %v11502_v21  ;;  %v10205_v21 = vld [vmem:[%s15514_s5 + $0x440] ss:$16 sps:$4 sm:$0xff]  }
 0x48b   : > { %6510 = vmatpush1.bf16.msra.mxu0 %v10201_v53  ;;  %6592 = vmatpush1.bf16.msra.mxu1 %v10202_v54  ;;  %v10242_v53 = vld [vmem:[%s15514_s5 + $0x568] ss:$16 sps:$4 sm:$0xff]   ;;  %v10243_v54 = vld [vmem:[%s15514_s5 + $0x584] ss:$16 sps:$4 sm:$0xff]  }
 0x48c   : > { %6511 = vmatprep.subr.bf16.mxu0 %v10203_v55  ;;  %6593 = vmatprep.subr.bf16.mxu1 %v10204_v57  ;;  %v10244_v55 = vld [vmem:[%s15514_s5 + $0x58c] ss:$16 sps:$4 sm:$0xff]   ;;  %v10245_v57 = vld [vmem:[%s15514_s5 + $0x580] ss:$16 sps:$4 sm:$0xff]  }
 0x48f   : > { %6512 = vmatpush1.bf16.msra.mxu0 %v10205_v21  ;;  %6594 = vmatpush1.bf16.msra.mxu1 %v10206_v58  ;;  %v10246_v21 = vld [vmem:[%s15514_s5 + $0x588] ss:$16 sps:$4 sm:$0xff]   ;;  %v10247_v58 = vld [vmem:[%s15514_s5 + $0x5a4] ss:$16 sps:$4 sm:$0xff]  }
 0x490   : > { %6513 = vmatprep.subr.bf16.mxu0 %v10207_v59  ;;  %6595 = vmatprep.subr.bf16.mxu1 %v10208_v41  ;;  %v10248_v59 = vld [vmem:[%s15514_s5 + $0x5ac] ss:$16 sps:$4 sm:$0xff]   ;;  %v10249_v41 = vld [vmem:[%s15514_s5 + $0x5a0] ss:$16 sps:$4 sm:$0xff]  }
 0x493   : > { %6514 = vmatpush1.bf16.msra.mxu0 %v10209_v29  ;;  %6596 = vmatpush1.bf16.msra.mxu1 %v10210_v2  ;;  %v10250_v29 = vld [vmem:[%s15514_s5 + $0x5a8] ss:$16 sps:$4 sm:$0xff]   ;;  %v10251_v2 = vld [vmem:[%s15514_s5 + $0x5c4] ss:$16 sps:$4 sm:$0xff]  }
 0x494   : > { %6515 = vmatprep.subr.bf16.mxu0 %v10211_v3  ;;  %6597 = vmatprep.subr.bf16.mxu1 %v10212_v4  ;;  %v10252_v3 = vld [vmem:[%s15514_s5 + $0x5cc] ss:$16 sps:$4 sm:$0xff]   ;;  %v10253_v4 = vld [vmem:[%s15514_s5 + $0x5c0] ss:$16 sps:$4 sm:$0xff]  }
 0x497   : > { %6516 = vmatpush1.bf16.msra.mxu0 %v10213_v36  ;;  %6598 = vmatpush1.bf16.msra.mxu1 %v10214_v7  ;;  %v10254_v36 = vld [vmem:[%s15514_s5 + $0x5c8] ss:$16 sps:$4 sm:$0xff]   ;;  %v10255_v7 = vld [vmem:[%s15514_s5 + $0x5e4] ss:$16 sps:$4 sm:$0xff]  }
 0x498   : > { %6517 = vmatprep.subr.bf16.mxu0 %v10215_v8  ;;  %6599 = vmatprep.subr.bf16.mxu1 %v10216_v9  ;;  %v10256_v8 = vld [vmem:[%s15514_s5 + $0x5ec] ss:$16 sps:$4 sm:$0xff]   ;;  %v10257_v9 = vld [vmem:[%s15514_s5 + $0x5e0] ss:$16 sps:$4 sm:$0xff]  }
 0x49b   : > { %6518 = vmatpush1.bf16.msra.mxu0 %v10217_v11  ;;  %6600 = vmatpush1.bf16.msra.mxu1 %v10218_v12  ;;  %v10258_v11 = vld [vmem:[%s15514_s5 + $0x5e8] ss:$16 sps:$4 sm:$0xff]   ;;  %v10259_v12 = vld [vmem:[%s15514_s5 + $0x604] ss:$16 sps:$4 sm:$0xff]  }
 0x49c   : > { %6519 = vmatprep.subr.bf16.mxu0 %v10219_v14  ;;  %6601 = vmatprep.subr.bf16.mxu1 %v10220_v16  ;;  %v10260_v14 = vld [vmem:[%s15514_s5 + $0x60c] ss:$16 sps:$4 sm:$0xff]   ;;  %v10261_v16 = vld [vmem:[%s15514_s5 + $0x600] ss:$16 sps:$4 sm:$0xff]  }
 0x49f   : > { %6520 = vmatpush1.bf16.msra.mxu0 %v10221_v17  ;;  %6602 = vmatpush1.bf16.msra.mxu1 %v10222_v18  ;;  %v10262_v17 = vld [vmem:[%s15514_s5 + $0x608] ss:$16 sps:$4 sm:$0xff]   ;;  %v10263_v18 = vld [vmem:[%s15514_s5 + $0x624] ss:$16 sps:$4 sm:$0xff]  }
 0x4a0   : > { %6521 = vmatprep.subr.bf16.mxu0 %v10223_v19  ;;  %6603 = vmatprep.subr.bf16.mxu1 %v10224_v22  ;;  %v10264_v19 = vld [vmem:[%s15514_s5 + $0x62c] ss:$16 sps:$4 sm:$0xff]   ;;  %v10266_v22 = vld [vmem:[%s15514_s5 + $0x628] ss:$16 sps:$4 sm:$0xff]  }
 0x4a3   : > { %6522 = vmatpush1.bf16.msra.mxu0 %v10225_v23  ;;  %6604 = vmatpush1.bf16.msra.mxu1 %v10226_v13  ;;  %v10267_v23 = vld [vmem:[%s15514_s5 + $0x644] ss:$16 sps:$4 sm:$0xff]   ;;  %v10268_v13 = vld [vmem:[%s15514_s5 + $0x64c] ss:$16 sps:$4 sm:$0xff]  }
 0x4a4   : > { %6523 = vmatprep.subr.bf16.mxu0 %v10227_v25  ;;  %6605 = vmatprep.subr.bf16.mxu1 %v10228_v37  ;;  %v10270_v25 = vld [vmem:[%s15514_s5 + $0x648] ss:$16 sps:$4 sm:$0xff]   ;;  %v10271_v37 = vld [vmem:[%s15514_s5 + $0x664] ss:$16 sps:$4 sm:$0xff]  }
 0x4a7   : > { %6524 = vmatpush1.bf16.msra.mxu0 %v10229_v38  ;;  %6606 = vmatpush1.bf16.msra.mxu1 %v10230_v39  ;;  %v10272_v38 = vld [vmem:[%s15514_s5 + $0x66c] ss:$16 sps:$4 sm:$0xff]   ;;  %v10273_v39 = vld [vmem:[%s15514_s5 + $0x660] ss:$16 sps:$4 sm:$0xff]  }
 0x4a8   : > { %6525 = vmatprep.subr.bf16.mxu0 %v10231_v40  ;;  %6607 = vmatprep.subr.bf16.mxu1 %v10232_v20  ;;  %v10274_v40 = vld [vmem:[%s15514_s5 + $0x668] ss:$16 sps:$4 sm:$0xff]   ;;  %v10275_v20 = vld [vmem:[%s15514_s5 + $0x684] ss:$16 sps:$4 sm:$0xff]  }
 0x4ab   : > { %6526 = vmatpush1.bf16.msra.mxu0 %v10233_v44  ;;  %6608 = vmatpush1.bf16.msra.mxu1 %v10234_v31  ;;  %v10276_v44 = vld [vmem:[%s15514_s5 + $0x68c] ss:$16 sps:$4 sm:$0xff]   ;;  %v10277_v31 = vld [vmem:[%s15514_s5 + $0x680] ss:$16 sps:$4 sm:$0xff]  }
 0x4ac   : > { %6527 = vmatprep.subr.bf16.mxu0 %v10235_v24  ;;  %6609 = vmatprep.subr.bf16.mxu1 %v10236_v47  ;;  %v10278_v24 = vld [vmem:[%s15514_s5 + $0x688] ss:$16 sps:$4 sm:$0xff]   ;;  %v10279_v47 = vld [vmem:[%s15514_s5 + $0x6a4] ss:$16 sps:$4 sm:$0xff]  }
 0x4af   : > { %6528 = vmatpush1.bf16.msra.mxu0 %v10237_v1  ;;  %6610 = vmatpush1.bf16.msra.mxu1 %v10238_v49  ;;  %v10280_v1 = vld [vmem:[%s15514_s5 + $0x6ac] ss:$16 sps:$4 sm:$0xff]   ;;  %v10281_v49 = vld [vmem:[%s15514_s5 + $0x6a0] ss:$16 sps:$4 sm:$0xff]  }
 0x4b0   : > { %6529 = vmatprep.subr.bf16.mxu0 %v10239_v50  ;;  %6611 = vmatprep.subr.bf16.mxu1 %v10240_v51  ;;  %v10282_v50 = vld [vmem:[%s15514_s5 + $0x6a8] ss:$16 sps:$4 sm:$0xff]   ;;  %v10283_v51 = vld [vmem:[%s15514_s5 + $0x6c4] ss:$16 sps:$4 sm:$0xff]  }
 0x4b3   : > { %6530 = vmatpush1.bf16.msra.mxu0 %v10241_v52  ;;  %6612 = vmatpush1.bf16.msra.mxu1 %v10242_v53  ;;  %v10284_v52 = vld [vmem:[%s15514_s5 + $0x6cc] ss:$16 sps:$4 sm:$0xff]   ;;  %v10285_v53 = vld [vmem:[%s15514_s5 + $0x6c0] ss:$16 sps:$4 sm:$0xff]  }
 0x4b4   : > { %6531 = vmatprep.subr.bf16.mxu0 %v10243_v54  ;;  %6613 = vmatprep.subr.bf16.mxu1 %v10244_v55  ;;  %v10286_v54 = vld [vmem:[%s15514_s5 + $0x6c8] ss:$16 sps:$4 sm:$0xff]   ;;  %v10287_v55 = vld [vmem:[%s15514_s5 + $0x6e4] ss:$16 sps:$4 sm:$0xff]  }
 0x4b7   : > { %6532 = vmatpush1.bf16.msra.mxu0 %v10245_v57  ;;  %6614 = vmatpush1.bf16.msra.mxu1 %v10246_v21  ;;  %v10288_v57 = vld [vmem:[%s15514_s5 + $0x6ec] ss:$16 sps:$4 sm:$0xff]   ;;  %v10289_v21 = vld [vmem:[%s15514_s5 + $0x6e0] ss:$16 sps:$4 sm:$0xff]  }
 0x4b8   : > { %6533 = vmatprep.subr.bf16.mxu0 %v10247_v58  ;;  %6615 = vmatprep.subr.bf16.mxu1 %v10248_v59  ;;  %v10290_v58 = vld [vmem:[%s15514_s5 + $0x6e8] ss:$16 sps:$4 sm:$0xff]   ;;  %v10291_v59 = vld [vmem:[%s15514_s5 + $0x704] ss:$16 sps:$4 sm:$0xff]  }
 0x4bb   : > { %6534 = vmatpush1.bf16.msra.mxu0 %v10249_v41  ;;  %6616 = vmatpush1.bf16.msra.mxu1 %v10250_v29  ;;  %v10292_v41 = vld [vmem:[%s15514_s5 + $0x70c] ss:$16 sps:$4 sm:$0xff]   ;;  %v10293_v29 = vld [vmem:[%s15514_s5 + $0x700] ss:$16 sps:$4 sm:$0xff]  }
 0x4bc   : > { %6535 = vmatprep.subr.bf16.mxu0 %v10251_v2  ;;  %6617 = vmatprep.subr.bf16.mxu1 %v10252_v3  ;;  %v10294_v2 = vld [vmem:[%s15514_s5 + $0x708] ss:$16 sps:$4 sm:$0xff]   ;;  %v10295_v3 = vld [vmem:[%s15514_s5 + $0x724] ss:$16 sps:$4 sm:$0xff]  }
 0x4bf   : > { %6536 = vmatpush1.bf16.msra.mxu0 %v10253_v4  ;;  %6618 = vmatpush1.bf16.msra.mxu1 %v10254_v36  ;;  %v10296_v4 = vld [vmem:[%s15514_s5 + $0x72c] ss:$16 sps:$4 sm:$0xff]   ;;  %v10297_v36 = vld [vmem:[%s15514_s5 + $0x720] ss:$16 sps:$4 sm:$0xff]  }
 0x4c0   : > { %6537 = vmatprep.subr.bf16.mxu0 %v10255_v7  ;;  %6619 = vmatprep.subr.bf16.mxu1 %v10256_v8  ;;  %v10298_v7 = vld [vmem:[%s15514_s5 + $0x728] ss:$16 sps:$4 sm:$0xff]   ;;  %v10299_v8 = vld [vmem:[%s15514_s5 + $0x744] ss:$16 sps:$4 sm:$0xff]  }
 0x4c3   : > { %6538 = vmatpush1.bf16.msra.mxu0 %v10257_v9  ;;  %6620 = vmatpush1.bf16.msra.mxu1 %v10258_v11  ;;  %v10300_v9 = vld [vmem:[%s15514_s5 + $0x74c] ss:$16 sps:$4 sm:$0xff]   ;;  %v10301_v11 = vld [vmem:[%s15514_s5 + $0x740] ss:$16 sps:$4 sm:$0xff]  }
 0x4c4   : > { %6548 = vmatprep.subr.bf16.mxu0 %v10259_v12  ;;  %6630 = vmatprep.subr.bf16.mxu1 %v10260_v14  ;;  %v10302_v12 = vld [vmem:[%s15514_s5 + $0x748] ss:$16 sps:$4 sm:$0xff]   ;;  %v10303_v14 = vld [vmem:[%s15514_s5 + $0x764] ss:$16 sps:$4 sm:$0xff]  }
 0x4c6   : > { %6540 = vmatmul.mubr.bf16.vlgmr.msra.gmra.mrb[12].mxu0 %v11693_v42  ;;  %6622 = vmatmul.mubr.bf16.vlgmr.msra.gmra.mrb[12].mxu1 %v11693_v42  ;;  %v10265_v42 = vld [vmem:[%s15514_s5 + $0x620] ss:$16 sps:$4 sm:$0xff]  }
 0x4c7   : > { %6549 = vmatpush1.bf16.msra.mxu0 %v10261_v16  ;;  %6631 = vmatpush1.bf16.msra.mxu1 %v10262_v17  ;;  %v10304_v16 = vld [vmem:[%s15514_s5 + $0x76c] ss:$16 sps:$4 sm:$0xff]   ;;  %v10305_v17 = vld [vmem:[%s15514_s5 + $0x760] ss:$16 sps:$4 sm:$0xff]  }
 0x4c8   : > { %6550 = vmatprep.subr.bf16.mxu0 %v10263_v18  ;;  %6632 = vmatprep.subr.bf16.mxu1 %v10264_v19  ;;  %v10306_v18 = vld [vmem:[%s15514_s5 + $0x768] ss:$16 sps:$4 sm:$0xff]   ;;  %v10307_v19 = vld [vmem:[%s15514_s5 + $0x784] ss:$16 sps:$4 sm:$0xff]  }
 0x4c9   : > { %6580 = vmatprep.mubr.bf16.mxu0 %v11709_v46  ;;  %6662 = vmatprep.mubr.bf16.mxu1 %v11709_v46  ;;  %v10269_v46 = vld [vmem:[%s15514_s5 + $0x640] ss:$16 sps:$4 sm:$0xff]  }
 0x4cb   : > { %6551 = vmatpush1.bf16.msra.mxu0 %v10265_v42  ;;  %6633 = vmatpush1.bf16.msra.mxu1 %v10266_v22  ;;  %v10308_v42 = vld [vmem:[%s15514_s5 + $0x78c] ss:$16 sps:$4 sm:$0xff]   ;;  %v10309_v22 = vld [vmem:[%s15514_s5 + $0x780] ss:$16 sps:$4 sm:$0xff]  }
 0x4cc   : > { %6552 = vmatprep.subr.bf16.mxu0 %v10267_v23  ;;  %6634 = vmatprep.subr.bf16.mxu1 %v10268_v13  ;;  %v10310_v23 = vld [vmem:[%s15514_s5 + $0x788] ss:$16 sps:$4 sm:$0xff]   ;;  %v10311_v13 = vld [vmem:[%s15514_s5 + $0x7a4] ss:$16 sps:$4 sm:$0xff]  }
 0x4cf   : > { %6553 = vmatpush1.bf16.msra.mxu0 %v10269_v46  ;;  %6635 = vmatpush1.bf16.msra.mxu1 %v10270_v25  ;;  %v10312_v46 = vld [vmem:[%s15514_s5 + $0x7ac] ss:$16 sps:$4 sm:$0xff]   ;;  %v10313_v25 = vld [vmem:[%s15514_s5 + $0x7a0] ss:$16 sps:$4 sm:$0xff]  }
 0x4d0   : > { %6554 = vmatprep.subr.bf16.mxu0 %v10271_v37  ;;  %6636 = vmatprep.subr.bf16.mxu1 %v10272_v38  ;;  %v10314_v37 = vld [vmem:[%s15514_s5 + $0x7a8] ss:$16 sps:$4 sm:$0xff]   ;;  %v10315_v38 = vld [vmem:[%s15514_s5 + $0x7c4] ss:$16 sps:$4 sm:$0xff]  }
 0x4d3   : > { %6555 = vmatpush1.bf16.msra.mxu0 %v10273_v39  ;;  %6637 = vmatpush1.bf16.msra.mxu1 %v10274_v40  ;;  %v10316_v39 = vld [vmem:[%s15514_s5 + $0x7cc] ss:$16 sps:$4 sm:$0xff]   ;;  %v10317_v40 = vld [vmem:[%s15514_s5 + $0x7c0] ss:$16 sps:$4 sm:$0xff]  }
 0x4d4   : > { %6556 = vmatprep.subr.bf16.mxu0 %v10275_v20  ;;  %6638 = vmatprep.subr.bf16.mxu1 %v10276_v44  ;;  %v10318_v20 = vld [vmem:[%s15514_s5 + $0x7c8] ss:$16 sps:$4 sm:$0xff]   ;;  %v10319_v44 = vld [vmem:[%s15514_s5 + $0x7e4] ss:$16 sps:$4 sm:$0xff]  }
 0x4d7   : > { %6557 = vmatpush1.bf16.msra.mxu0 %v10277_v31  ;;  %6639 = vmatpush1.bf16.msra.mxu1 %v10278_v24  ;;  %v10320_v31 = vld [vmem:[%s15514_s5 + $0x7ec] ss:$16 sps:$4 sm:$0xff]   ;;  %v10321_v24 = vld [vmem:[%s15514_s5 + $0x7e0] ss:$16 sps:$4 sm:$0xff]  }
 0x4d8   : > { %6558 = vmatprep.subr.bf16.mxu0 %v10279_v47  ;;  %6640 = vmatprep.subr.bf16.mxu1 %v10280_v1  ;;  %v10322_v47 = vld [vmem:[%s15514_s5 + $0x7e8] ss:$16 sps:$4 sm:$0xff]   ;;  %v10323_v1 = vld [vmem:[%s15514_s5 + $0x4] ss:$16 sps:$4 sm:$0xff]  }
 0x4db   : > { %6559 = vmatpush1.bf16.msra.mxu0 %v10281_v49  ;;  %6641 = vmatpush1.bf16.msra.mxu1 %v10282_v50  ;;  %v10324_v49 = vld [vmem:[%s15514_s5 + $0xc] ss:$16 sps:$4 sm:$0xff]   ;;  %v10325_v50 = vld [vmem:[%s15514_s5] ss:$16 sps:$4 sm:$0xff]  }
 0x4dc   : > { %6560 = vmatprep.subr.bf16.mxu0 %v10283_v51  ;;  %6642 = vmatprep.subr.bf16.mxu1 %v10284_v52  ;;  %v10326_v51 = vld [vmem:[%s15514_s5 + $0x8] ss:$16 sps:$4 sm:$0xff]   ;;  %v10327_v52 = vld [vmem:[%s15514_s5 + $0x24] ss:$16 sps:$4 sm:$0xff]  }
 0x4df   : > { %6561 = vmatpush1.bf16.msra.mxu0 %v10285_v53  ;;  %6643 = vmatpush1.bf16.msra.mxu1 %v10286_v54  ;;  %v10328_v53 = vld [vmem:[%s15514_s5 + $0x2c] ss:$16 sps:$4 sm:$0xff]   ;;  %v10330_v54 = vld [vmem:[%s15514_s5 + $0x28] ss:$16 sps:$4 sm:$0xff]  }
 0x4e0   : > { %6562 = vmatprep.subr.bf16.mxu0 %v10287_v55  ;;  %6644 = vmatprep.subr.bf16.mxu1 %v10288_v57  ;;  %v10331_v55 = vld [vmem:[%s15514_s5 + $0x44] ss:$16 sps:$4 sm:$0xff]   ;;  %v10332_v57 = vld [vmem:[%s15514_s5 + $0x4c] ss:$16 sps:$4 sm:$0xff]  }
 0x4e3   : > { %6563 = vmatpush1.bf16.msra.mxu0 %v10289_v21  ;;  %6645 = vmatpush1.bf16.msra.mxu1 %v10290_v58  ;;  %v10334_v21 = vld [vmem:[%s15514_s5 + $0x48] ss:$16 sps:$4 sm:$0xff]   ;;  %v10335_v58 = vld [vmem:[%s15514_s5 + $0x64] ss:$16 sps:$4 sm:$0xff]  }
 0x4e4   : > { %6564 = vmatprep.subr.bf16.mxu0 %v10291_v59  ;;  %6646 = vmatprep.subr.bf16.mxu1 %v10292_v41  ;;  %v10336_v59 = vld [vmem:[%s15514_s5 + $0x6c] ss:$16 sps:$4 sm:$0xff]   ;;  %v10337_v41 = vld [vmem:[%s15514_s5 + $0x60] ss:$16 sps:$4 sm:$0xff]  }
 0x4e7   : > { %6565 = vmatpush1.bf16.msra.mxu0 %v10293_v29  ;;  %6647 = vmatpush1.bf16.msra.mxu1 %v10294_v2  ;;  %v10338_v29 = vld [vmem:[%s15514_s5 + $0x68] ss:$16 sps:$4 sm:$0xff]   ;;  %v10339_v2 = vld [vmem:[%s15514_s5 + $0x84] ss:$16 sps:$4 sm:$0xff]  }
 0x4e8   : > { %6566 = vmatprep.subr.bf16.mxu0 %v10295_v3  ;;  %6648 = vmatprep.subr.bf16.mxu1 %v10296_v4  ;;  %v10340_v3 = vld [vmem:[%s15514_s5 + $0x8c] ss:$16 sps:$4 sm:$0xff]   ;;  %v10341_v4 = vld [vmem:[%s15514_s5 + $0x80] ss:$16 sps:$4 sm:$0xff]  }
 0x4eb   : > { %6567 = vmatpush1.bf16.msra.mxu0 %v10297_v36  ;;  %6649 = vmatpush1.bf16.msra.mxu1 %v10298_v7  ;;  %v10342_v36 = vld [vmem:[%s15514_s5 + $0x88] ss:$16 sps:$4 sm:$0xff]   ;;  %v10343_v7 = vld [vmem:[%s15514_s5 + $0xa4] ss:$16 sps:$4 sm:$0xff]  }
 0x4ec   : > { %6568 = vmatprep.subr.bf16.mxu0 %v10299_v8  ;;  %6650 = vmatprep.subr.bf16.mxu1 %v10300_v9  ;;  %v10344_v8 = vld [vmem:[%s15514_s5 + $0xac] ss:$16 sps:$4 sm:$0xff]   ;;  %v10345_v9 = vld [vmem:[%s15514_s5 + $0xa0] ss:$16 sps:$4 sm:$0xff]  }
 0x4ef   : > { %6569 = vmatpush1.bf16.msra.mxu0 %v10301_v11  ;;  %6651 = vmatpush1.bf16.msra.mxu1 %v10302_v12  ;;  %v10346_v11 = vld [vmem:[%s15514_s5 + $0xa8] ss:$16 sps:$4 sm:$0xff]   ;;  %v10347_v12 = vld [vmem:[%s15514_s5 + $0xc4] ss:$16 sps:$4 sm:$0xff]  }
 0x4f0   : > { %6570 = vmatprep.subr.bf16.mxu0 %v10303_v14  ;;  %6652 = vmatprep.subr.bf16.mxu1 %v10304_v16  ;;  %v10348_v14 = vld [vmem:[%s15514_s5 + $0xcc] ss:$16 sps:$4 sm:$0xff]   ;;  %v10349_v16 = vld [vmem:[%s15514_s5 + $0xc0] ss:$16 sps:$4 sm:$0xff]  }
 0x4f3   : > { %6571 = vmatpush1.bf16.msra.mxu0 %v10305_v17  ;;  %6653 = vmatpush1.bf16.msra.mxu1 %v10306_v18  ;;  %v10350_v17 = vld [vmem:[%s15514_s5 + $0xc8] ss:$16 sps:$4 sm:$0xff]   ;;  %v10351_v18 = vld [vmem:[%s15514_s5 + $0xe4] ss:$16 sps:$4 sm:$0xff]  }
 0x4f4   : > { %6572 = vmatprep.subr.bf16.mxu0 %v10307_v19  ;;  %6654 = vmatprep.subr.bf16.mxu1 %v10308_v42  ;;  %v10352_v19 = vld [vmem:[%s15514_s5 + $0xec] ss:$16 sps:$4 sm:$0xff]   ;;  %v10353_v42 = vld [vmem:[%s15514_s5 + $0xe0] ss:$16 sps:$4 sm:$0xff]  }
 0x4f7   : > { %6573 = vmatpush1.bf16.msra.mxu0 %v10309_v22  ;;  %6655 = vmatpush1.bf16.msra.mxu1 %v10310_v23  ;;  %v10354_v22 = vld [vmem:[%s15514_s5 + $0xe8] ss:$16 sps:$4 sm:$0xff]   ;;  %v10355_v23 = vld [vmem:[%s15514_s5 + $0x104] ss:$16 sps:$4 sm:$0xff]  }
 0x4f8   : > { %6574 = vmatprep.subr.bf16.mxu0 %v10311_v13  ;;  %6656 = vmatprep.subr.bf16.mxu1 %v10312_v46  ;;  %v10356_v13 = vld [vmem:[%s15514_s5 + $0x10c] ss:$16 sps:$4 sm:$0xff]   ;;  %v10357_v46 = vld [vmem:[%s15514_s5 + $0x100] ss:$16 sps:$4 sm:$0xff]  }
 0x4fb   : > { %6575 = vmatpush1.bf16.msra.mxu0 %v10313_v25  ;;  %6657 = vmatpush1.bf16.msra.mxu1 %v10314_v37  ;;  %v10358_v25 = vld [vmem:[%s15514_s5 + $0x108] ss:$16 sps:$4 sm:$0xff]   ;;  %v10359_v37 = vld [vmem:[%s15514_s5 + $0x124] ss:$16 sps:$4 sm:$0xff]  }
 0x4fc   : > { %6576 = vmatprep.subr.bf16.mxu0 %v10315_v38  ;;  %6658 = vmatprep.subr.bf16.mxu1 %v10316_v39  ;;  %v10360_v38 = vld [vmem:[%s15514_s5 + $0x12c] ss:$16 sps:$4 sm:$0xff]   ;;  %v10361_v39 = vld [vmem:[%s15514_s5 + $0x120] ss:$16 sps:$4 sm:$0xff]  }
 0x4ff   : > { %6577 = vmatpush1.bf16.msra.mxu0 %v10317_v40  ;;  %6659 = vmatpush1.bf16.msra.mxu1 %v10318_v20  ;;  %v10362_v40 = vld [vmem:[%s15514_s5 + $0x128] ss:$16 sps:$4 sm:$0xff]   ;;  %v10363_v20 = vld [vmem:[%s15514_s5 + $0x144] ss:$16 sps:$4 sm:$0xff]  }
 0x500   : > { %6578 = vmatprep.subr.bf16.mxu0 %v10319_v44  ;;  %6660 = vmatprep.subr.bf16.mxu1 %v10320_v31  ;;  %v10364_v44 = vld [vmem:[%s15514_s5 + $0x14c] ss:$16 sps:$4 sm:$0xff]   ;;  %v10365_v31 = vld [vmem:[%s15514_s5 + $0x140] ss:$16 sps:$4 sm:$0xff]  }
 0x503   : > { %6579 = vmatpush1.bf16.msra.mxu0 %v10321_v24  ;;  %6661 = vmatpush1.bf16.msra.mxu1 %v10322_v47  ;;  %v10366_v24 = vld [vmem:[%s15514_s5 + $0x148] ss:$16 sps:$4 sm:$0xff]   ;;  %v10367_v47 = vld [vmem:[%s15514_s5 + $0x164] ss:$16 sps:$4 sm:$0xff]  }
 0x504   : > { %6671 = vmatprep.subr.bf16.mxu0 %v10323_v1  ;;  %6753 = vmatprep.subr.bf16.mxu1 %v10324_v49  ;;  %v10368_v1 = vld [vmem:[%s15514_s5 + $0x16c] ss:$16 sps:$4 sm:$0xff]   ;;  %v10369_v49 = vld [vmem:[%s15514_s5 + $0x160] ss:$16 sps:$4 sm:$0xff]  }
 0x506   : > { %6581 = vmatmul.mubr.bf16.vlgmr.msra.gmra.mrb[12].mxu0 %v11897_v56  ;;  %6663 = vmatmul.mubr.bf16.vlgmr.msra.gmra.mrb[12].mxu1 %v11897_v56  ;;  %v10329_v56 = vld [vmem:[%s15514_s5 + $0x20] ss:$16 sps:$4 sm:$0xff]  }
 0x507   : > { %6672 = vmatpush1.bf16.msra.mxu0 %v10325_v50  ;;  %6754 = vmatpush1.bf16.msra.mxu1 %v10326_v51  ;;  %v10370_v50 = vld [vmem:[%s15514_s5 + $0x168] ss:$16 sps:$4 sm:$0xff]   ;;  %v10371_v51 = vld [vmem:[%s15514_s5 + $0x184] ss:$16 sps:$4 sm:$0xff]  }
 0x508   : > { %6673 = vmatprep.subr.bf16.mxu0 %v10327_v52  ;;  %6755 = vmatprep.subr.bf16.mxu1 %v10328_v53  ;;  %v10372_v52 = vld [vmem:[%s15514_s5 + $0x18c] ss:$16 sps:$4 sm:$0xff]   ;;  %v10373_v53 = vld [vmem:[%s15514_s5 + $0x180] ss:$16 sps:$4 sm:$0xff]  }
 0x509   : > { %6703 = vmatprep.mubr.bf16.mxu0 %v10789_v48  ;;  %6785 = vmatprep.mubr.bf16.mxu1 %v10789_v48  ;;  %v10333_v48 = vld [vmem:[%s15514_s5 + $0x40] ss:$16 sps:$4 sm:$0xff]  }
 0x50b   : > { %6674 = vmatpush1.bf16.msra.mxu0 %v10329_v56  ;;  %6756 = vmatpush1.bf16.msra.mxu1 %v10330_v54  ;;  %v10374_v56 = vld [vmem:[%s15514_s5 + $0x188] ss:$16 sps:$4 sm:$0xff]   ;;  %v10375_v54 = vld [vmem:[%s15514_s5 + $0x1a4] ss:$16 sps:$4 sm:$0xff]  }
 0x50c   : > { %6675 = vmatprep.subr.bf16.mxu0 %v10331_v55  ;;  %6757 = vmatprep.subr.bf16.mxu1 %v10332_v57  ;;  %v10376_v55 = vld [vmem:[%s15514_s5 + $0x1ac] ss:$16 sps:$4 sm:$0xff]   ;;  %v10377_v57 = vld [vmem:[%s15514_s5 + $0x1a0] ss:$16 sps:$4 sm:$0xff]  }
 0x50f   : > { %6676 = vmatpush1.bf16.msra.mxu0 %v10333_v48  ;;  %6758 = vmatpush1.bf16.msra.mxu1 %v10334_v21  ;;  %v10378_v48 = vld [vmem:[%s15514_s5 + $0x1a8] ss:$16 sps:$4 sm:$0xff]   ;;  %v10379_v21 = vld [vmem:[%s15514_s5 + $0x1c4] ss:$16 sps:$4 sm:$0xff]  }
 0x510   : > { %6677 = vmatprep.subr.bf16.mxu0 %v10335_v58  ;;  %6759 = vmatprep.subr.bf16.mxu1 %v10336_v59  ;;  %v10380_v58 = vld [vmem:[%s15514_s5 + $0x1cc] ss:$16 sps:$4 sm:$0xff]   ;;  %v10381_v59 = vld [vmem:[%s15514_s5 + $0x1c0] ss:$16 sps:$4 sm:$0xff]  }
 0x513   : > { %6678 = vmatpush1.bf16.msra.mxu0 %v10337_v41  ;;  %6760 = vmatpush1.bf16.msra.mxu1 %v10338_v29  ;;  %v10382_v41 = vld [vmem:[%s15514_s5 + $0x1c8] ss:$16 sps:$4 sm:$0xff]   ;;  %v10383_v29 = vld [vmem:[%s15514_s5 + $0x1e4] ss:$16 sps:$4 sm:$0xff]  }
 0x514   : > { %6679 = vmatprep.subr.bf16.mxu0 %v10339_v2  ;;  %6761 = vmatprep.subr.bf16.mxu1 %v10340_v3  ;;  %v10384_v2 = vld [vmem:[%s15514_s5 + $0x1ec] ss:$16 sps:$4 sm:$0xff]   ;;  %v10385_v3 = vld [vmem:[%s15514_s5 + $0x1e0] ss:$16 sps:$4 sm:$0xff]  }
 0x517   : > { %6680 = vmatpush1.bf16.msra.mxu0 %v10341_v4  ;;  %6762 = vmatpush1.bf16.msra.mxu1 %v10342_v36  ;;  %v10386_v4 = vld [vmem:[%s15514_s5 + $0x1e8] ss:$16 sps:$4 sm:$0xff]   ;;  %v10387_v36 = vld [vmem:[%s15514_s5 + $0x204] ss:$16 sps:$4 sm:$0xff]  }
 0x518   : > { %6681 = vmatprep.subr.bf16.mxu0 %v10343_v7  ;;  %6763 = vmatprep.subr.bf16.mxu1 %v10344_v8  ;;  %v10388_v7 = vld [vmem:[%s15514_s5 + $0x20c] ss:$16 sps:$4 sm:$0xff]   ;;  %v10389_v8 = vld [vmem:[%s15514_s5 + $0x200] ss:$16 sps:$4 sm:$0xff]  }
 0x51b   : > { %6682 = vmatpush1.bf16.msra.mxu0 %v10345_v9  ;;  %6764 = vmatpush1.bf16.msra.mxu1 %v10346_v11  ;;  %v10390_v9 = vld [vmem:[%s15514_s5 + $0x208] ss:$16 sps:$4 sm:$0xff]   ;;  %v10391_v11 = vld [vmem:[%s15514_s5 + $0x224] ss:$16 sps:$4 sm:$0xff]  }
 0x51c   : > { %6683 = vmatprep.subr.bf16.mxu0 %v10347_v12  ;;  %6765 = vmatprep.subr.bf16.mxu1 %v10348_v14  ;;  %v10392_v12 = vld [vmem:[%s15514_s5 + $0x22c] ss:$16 sps:$4 sm:$0xff]   ;;  %v10394_v14 = vld [vmem:[%s15514_s5 + $0x228] ss:$16 sps:$4 sm:$0xff]  }
 0x51f   : > { %6684 = vmatpush1.bf16.msra.mxu0 %v10349_v16  ;;  %6766 = vmatpush1.bf16.msra.mxu1 %v10350_v17  ;;  %v10395_v16 = vld [vmem:[%s15514_s5 + $0x244] ss:$16 sps:$4 sm:$0xff]   ;;  %v10396_v17 = vld [vmem:[%s15514_s5 + $0x24c] ss:$16 sps:$4 sm:$0xff]  }
 0x520   : > { %6685 = vmatprep.subr.bf16.mxu0 %v10351_v18  ;;  %6767 = vmatprep.subr.bf16.mxu1 %v10352_v19  ;;  %v10398_v18 = vld [vmem:[%s15514_s5 + $0x248] ss:$16 sps:$4 sm:$0xff]   ;;  %v10399_v19 = vld [vmem:[%s15514_s5 + $0x264] ss:$16 sps:$4 sm:$0xff]  }
 0x523   : > { %6686 = vmatpush1.bf16.msra.mxu0 %v10353_v42  ;;  %6768 = vmatpush1.bf16.msra.mxu1 %v10354_v22  ;;  %v10400_v42 = vld [vmem:[%s15514_s5 + $0x26c] ss:$16 sps:$4 sm:$0xff]   ;;  %v10401_v22 = vld [vmem:[%s15514_s5 + $0x260] ss:$16 sps:$4 sm:$0xff]  }
 0x524   : > { %6687 = vmatprep.subr.bf16.mxu0 %v10355_v23  ;;  %6769 = vmatprep.subr.bf16.mxu1 %v10356_v13  ;;  %v10402_v23 = vld [vmem:[%s15514_s5 + $0x268] ss:$16 sps:$4 sm:$0xff]   ;;  %v10403_v13 = vld [vmem:[%s15514_s5 + $0x284] ss:$16 sps:$4 sm:$0xff]  }
 0x527   : > { %6688 = vmatpush1.bf16.msra.mxu0 %v10357_v46  ;;  %6770 = vmatpush1.bf16.msra.mxu1 %v10358_v25  ;;  %v10404_v46 = vld [vmem:[%s15514_s5 + $0x28c] ss:$16 sps:$4 sm:$0xff]   ;;  %v10405_v25 = vld [vmem:[%s15514_s5 + $0x280] ss:$16 sps:$4 sm:$0xff]  }
 0x528   : > { %6689 = vmatprep.subr.bf16.mxu0 %v10359_v37  ;;  %6771 = vmatprep.subr.bf16.mxu1 %v10360_v38  ;;  %v10406_v37 = vld [vmem:[%s15514_s5 + $0x288] ss:$16 sps:$4 sm:$0xff]   ;;  %v10407_v38 = vld [vmem:[%s15514_s5 + $0x2a4] ss:$16 sps:$4 sm:$0xff]  }
 0x52b   : > { %6690 = vmatpush1.bf16.msra.mxu0 %v10361_v39  ;;  %6772 = vmatpush1.bf16.msra.mxu1 %v10362_v40  ;;  %v10408_v39 = vld [vmem:[%s15514_s5 + $0x2ac] ss:$16 sps:$4 sm:$0xff]  }
 0x52c   : > { %6691 = vmatprep.subr.bf16.mxu0 %v10363_v20  ;;  %6773 = vmatprep.subr.bf16.mxu1 %v10364_v44 }
 0x52f   : > { %6692 = vmatpush1.bf16.msra.mxu0 %v10365_v31  ;;  %6774 = vmatpush1.bf16.msra.mxu1 %v10366_v24 }
 0x530   : > { %6693 = vmatprep.subr.bf16.mxu0 %v10367_v47  ;;  %6775 = vmatprep.subr.bf16.mxu1 %v10368_v1  ;;  %v10409_v1 = vld [vmem:[%s15514_s5 + $0x2a0] ss:$16 sps:$4 sm:$0xff]  }
 0x533   : > { %6694 = vmatpush1.bf16.msra.mxu0 %v10369_v49  ;;  %6776 = vmatpush1.bf16.msra.mxu1 %v10370_v50  ;;  %v10410_v49 = vld [vmem:[%s15514_s5 + $0x2a8] ss:$16 sps:$4 sm:$0xff]  }
 0x534   : > { %6695 = vmatprep.subr.bf16.mxu0 %v10371_v51  ;;  %6777 = vmatprep.subr.bf16.mxu1 %v10372_v52  ;;  %v10411_v52 = vld [vmem:[%s15514_s5 + $0x2c4] ss:$16 sps:$4 sm:$0xff]  }
 0x537   : > { %6696 = vmatpush1.bf16.msra.mxu0 %v10373_v53  ;;  %6778 = vmatpush1.bf16.msra.mxu1 %v10374_v56  ;;  %v10412_v53 = vld [vmem:[%s15514_s5 + $0x2cc] ss:$16 sps:$4 sm:$0xff]   ;;  %v10413_v56 = vld [vmem:[%s15514_s5 + $0x2c0] ss:$16 sps:$4 sm:$0xff]  }
 0x538   : > { %6697 = vmatprep.subr.bf16.mxu0 %v10375_v54  ;;  %6779 = vmatprep.subr.bf16.mxu1 %v10376_v55  ;;  %v10414_v54 = vld [vmem:[%s15514_s5 + $0x2c8] ss:$16 sps:$4 sm:$0xff]   ;;  %v10415_v55 = vld [vmem:[%s15514_s5 + $0x2e4] ss:$16 sps:$4 sm:$0xff]  }
 0x53b   : > { %6698 = vmatpush1.bf16.msra.mxu0 %v10377_v57  ;;  %6780 = vmatpush1.bf16.msra.mxu1 %v10378_v48  ;;  %v10416_v57 = vld [vmem:[%s15514_s5 + $0x2ec] ss:$16 sps:$4 sm:$0xff]   ;;  %v10417_v48 = vld [vmem:[%s15514_s5 + $0x2e0] ss:$16 sps:$4 sm:$0xff]  }
 0x53c   : > { %6699 = vmatprep.subr.bf16.mxu0 %v10379_v21  ;;  %6781 = vmatprep.subr.bf16.mxu1 %v10380_v58  ;;  %v10418_v21 = vld [vmem:[%s15514_s5 + $0x2e8] ss:$16 sps:$4 sm:$0xff]   ;;  %v10419_v58 = vld [vmem:[%s15514_s5 + $0x304] ss:$16 sps:$4 sm:$0xff]  }
 0x53f   : > { %6700 = vmatpush1.bf16.msra.mxu0 %v10381_v59  ;;  %6782 = vmatpush1.bf16.msra.mxu1 %v10382_v41  ;;  %v10420_v59 = vld [vmem:[%s15514_s5 + $0x30c] ss:$16 sps:$4 sm:$0xff]   ;;  %v10421_v41 = vld [vmem:[%s15514_s5 + $0x300] ss:$16 sps:$4 sm:$0xff]  }
 0x540   : > { %6701 = vmatprep.subr.bf16.mxu0 %v10383_v29  ;;  %6783 = vmatprep.subr.bf16.mxu1 %v10384_v2  ;;  %v10422_v29 = vld [vmem:[%s15514_s5 + $0x308] ss:$16 sps:$4 sm:$0xff]   ;;  %v10423_v2 = vld [vmem:[%s15514_s5 + $0x324] ss:$16 sps:$4 sm:$0xff]  }
 0x543   : > { %6702 = vmatpush1.bf16.msra.mxu0 %v10385_v3  ;;  %6784 = vmatpush1.bf16.msra.mxu1 %v10386_v4  ;;  %v10424_v3 = vld [vmem:[%s15514_s5 + $0x32c] ss:$16 sps:$4 sm:$0xff]   ;;  %v10425_v4 = vld [vmem:[%s15514_s5 + $0x320] ss:$16 sps:$4 sm:$0xff]  }
 0x544   : > { %6712 = vmatprep.subr.bf16.mxu0 %v10387_v36  ;;  %6794 = vmatprep.subr.bf16.mxu1 %v10388_v7  ;;  %v10426_v36 = vld [vmem:[%s15514_s5 + $0x328] ss:$16 sps:$4 sm:$0xff]   ;;  %v10427_v7 = vld [vmem:[%s15514_s5 + $0x344] ss:$16 sps:$4 sm:$0xff]  }
 0x546   : > { %6704 = vmatmul.mubr.bf16.vlgmr.msra.gmra.mrb[12].mxu0 %v10853_v5  ;;  %6786 = vmatmul.mubr.bf16.vlgmr.msra.gmra.mrb[12].mxu1 %v10853_v5  ;;  %v10393_v5 = vld [vmem:[%s15514_s5 + $0x220] ss:$16 sps:$4 sm:$0xff]  }
 0x547   : > { %6713 = vmatpush1.bf16.msra.mxu0 %v10389_v8  ;;  %6795 = vmatpush1.bf16.msra.mxu1 %v10390_v9  ;;  %v10428_v8 = vld [vmem:[%s15514_s5 + $0x34c] ss:$16 sps:$4 sm:$0xff]   ;;  %v10429_v9 = vld [vmem:[%s15514_s5 + $0x340] ss:$16 sps:$4 sm:$0xff]  }
 0x548   : > { %6714 = vmatprep.subr.bf16.mxu0 %v10391_v11  ;;  %6796 = vmatprep.subr.bf16.mxu1 %v10392_v12  ;;  %v10430_v11 = vld [vmem:[%s15514_s5 + $0x348] ss:$16 sps:$4 sm:$0xff]   ;;  %v10431_v12 = vld [vmem:[%s15514_s5 + $0x364] ss:$16 sps:$4 sm:$0xff]  }
 0x549   : > { %6744 = vmatprep.mubr.bf16.mxu0 %v10931_v30  ;;  %6826 = vmatprep.mubr.bf16.mxu1 %v10931_v30  ;;  %v10397_v30 = vld [vmem:[%s15514_s5 + $0x240] ss:$16 sps:$4 sm:$0xff]  }
 0x54b   : > { %6715 = vmatpush1.bf16.msra.mxu0 %v10393_v5  ;;  %6797 = vmatpush1.bf16.msra.mxu1 %v10394_v14  ;;  %v10432_v5 = vld [vmem:[%s15514_s5 + $0x36c] ss:$16 sps:$4 sm:$0xff]   ;;  %v10433_v14 = vld [vmem:[%s15514_s5 + $0x360] ss:$16 sps:$4 sm:$0xff]  }
 0x54c   : > { %6716 = vmatprep.subr.bf16.mxu0 %v10395_v16  ;;  %6798 = vmatprep.subr.bf16.mxu1 %v10396_v17  ;;  %v10434_v16 = vld [vmem:[%s15514_s5 + $0x368] ss:$16 sps:$4 sm:$0xff]   ;;  %v10435_v17 = vld [vmem:[%s15514_s5 + $0x384] ss:$16 sps:$4 sm:$0xff]  }
 0x54f   : > { %6717 = vmatpush1.bf16.msra.mxu0 %v10397_v30  ;;  %6799 = vmatpush1.bf16.msra.mxu1 %v10398_v18  ;;  %v10436_v30 = vld [vmem:[%s15514_s5 + $0x38c] ss:$16 sps:$4 sm:$0xff]   ;;  %v10437_v18 = vld [vmem:[%s15514_s5 + $0x380] ss:$16 sps:$4 sm:$0xff]  }
 0x550   : > { %6718 = vmatprep.subr.bf16.mxu0 %v10399_v19  ;;  %6800 = vmatprep.subr.bf16.mxu1 %v10400_v42  ;;  %v10438_v19 = vld [vmem:[%s15514_s5 + $0x388] ss:$16 sps:$4 sm:$0xff]   ;;  %v10439_v42 = vld [vmem:[%s15514_s5 + $0x3a4] ss:$16 sps:$4 sm:$0xff]  }
 0x553   : > { %6719 = vmatpush1.bf16.msra.mxu0 %v10401_v22  ;;  %6801 = vmatpush1.bf16.msra.mxu1 %v10402_v23  ;;  %v10440_v22 = vld [vmem:[%s15514_s5 + $0x3ac] ss:$16 sps:$4 sm:$0xff]   ;;  %v10441_v23 = vld [vmem:[%s15514_s5 + $0x3a0] ss:$16 sps:$4 sm:$0xff]  }
 0x554   : > { %6720 = vmatprep.subr.bf16.mxu0 %v10403_v13  ;;  %6802 = vmatprep.subr.bf16.mxu1 %v10404_v46  ;;  %v10442_v13 = vld [vmem:[%s15514_s5 + $0x3a8] ss:$16 sps:$4 sm:$0xff]   ;;  %v10443_v46 = vld [vmem:[%s15514_s5 + $0x3c4] ss:$16 sps:$4 sm:$0xff]  }
 0x557   : > { %6721 = vmatpush1.bf16.msra.mxu0 %v10405_v25  ;;  %6803 = vmatpush1.bf16.msra.mxu1 %v10406_v37  ;;  %v10444_v25 = vld [vmem:[%s15514_s5 + $0x3cc] ss:$16 sps:$4 sm:$0xff]   ;;  %v10445_v37 = vld [vmem:[%s15514_s5 + $0x3c0] ss:$16 sps:$4 sm:$0xff]  }
 0x558   : > { %6722 = vmatprep.subr.bf16.mxu0 %v10407_v38  ;;  %6804 = vmatprep.subr.bf16.mxu1 %v10408_v39  ;;  %v10446_v38 = vld [vmem:[%s15514_s5 + $0x3c8] ss:$16 sps:$4 sm:$0xff]   ;;  %v10447_v39 = vld [vmem:[%s15514_s5 + $0x3e4] ss:$16 sps:$4 sm:$0xff]  }
 0x559   : > { %v14955_v40 = vpop.f32.mrb[8].mxu0  ;;  %v14957_v20 = vpop.f32.mrb[8].mxu1 }
 0x55a   : > { %v14959_v44 = vpop.f32.mrb[9].mxu0  ;;  %v14961_v31 = vpop.f32.mrb[9].mxu1 }
 0x55b   : > { %v6418_v24 = vpop.f32.mrb[10].mxu0  ;;  %v6500_v47 = vpop.f32.mrb[10].mxu1  ;;  %6723 = vmatpush1.bf16.msra.mxu0 %v10409_v1  ;;  %6805 = vmatpush1.bf16.msra.mxu1 %v10410_v49  ;;  %v10450_v1 = vld [vmem:[%s15514_s5 + $0x3e8] ss:$16 sps:$4 sm:$0xff]   ;;  %v10451_v49 = vld [vmem:[%s15514_s5 + $0x804] ss:$16 sps:$4 sm:$0xff]  }
 0x55c   : > { %v6419_v50 = vpop.f32.mrb[11].mxu0  ;;  %v6501_v51 = vpop.f32.mrb[11].mxu1  ;;  %6724 = vmatprep.subr.bf16.mxu0 %v10411_v52  ;;  %6806 = vmatprep.subr.bf16.mxu1 %v10412_v53  ;;  %v10448_v24 = vld [vmem:[%s15514_s5 + $0x3ec] ss:$16 sps:$4 sm:$0xff]   ;;  %v10449_v47 = vld [vmem:[%s15514_s5 + $0x3e0] ss:$16 sps:$4 sm:$0xff]  }
 0x55d   : > { %v10452_v50 = vld [vmem:[%s15514_s5 + $0x80c] ss:$16 sps:$4 sm:$0xff]   ;;  %v10453_v51 = vld [vmem:[%s15514_s5 + $0x800] ss:$16 sps:$4 sm:$0xff]   ;;  %v10454_v52 = vld [vmem:[%s15514_s5 + $0x808] ss:$16 sps:$4 sm:$0xff]  }
 0x55e   : > { %v10455_v53 = vld [vmem:[%s15514_s5 + $0x824] ss:$16 sps:$4 sm:$0xff]  }
 0x55f   : > { %6725 = vmatpush1.bf16.msra.mxu0 %v10413_v56  ;;  %6807 = vmatpush1.bf16.msra.mxu1 %v10414_v54  ;;  %v10456_v56 = vld [vmem:[%s15514_s5 + $0x82c] ss:$16 sps:$4 sm:$0xff]   ;;  %v10458_v54 = vld [vmem:[%s15514_s5 + $0x828] ss:$16 sps:$4 sm:$0xff]  }
 0x560   : > { %6726 = vmatprep.subr.bf16.mxu0 %v10415_v55  ;;  %6808 = vmatprep.subr.bf16.mxu1 %v10416_v57  ;;  %v10459_v55 = vld [vmem:[%s15514_s5 + $0x844] ss:$16 sps:$4 sm:$0xff]   ;;  %v10460_v57 = vld [vmem:[%s15514_s5 + $0x84c] ss:$16 sps:$4 sm:$0xff]  }
 0x563   : > { %6727 = vmatpush1.bf16.msra.mxu0 %v10417_v48  ;;  %6809 = vmatpush1.bf16.msra.mxu1 %v10418_v21  ;;  %v10462_v48 = vld [vmem:[%s15514_s5 + $0x848] ss:$16 sps:$4 sm:$0xff]   ;;  %v10463_v21 = vld [vmem:[%s15514_s5 + $0x864] ss:$16 sps:$4 sm:$0xff]  }
 0x564   : > { %6728 = vmatprep.subr.bf16.mxu0 %v10419_v58  ;;  %6810 = vmatprep.subr.bf16.mxu1 %v10420_v59  ;;  %v10464_v58 = vld [vmem:[%s15514_s5 + $0x86c] ss:$16 sps:$4 sm:$0xff]   ;;  %v10465_v59 = vld [vmem:[%s15514_s5 + $0x860] ss:$16 sps:$4 sm:$0xff]  }
 0x567   : > { %6729 = vmatpush1.bf16.msra.mxu0 %v10421_v41  ;;  %6811 = vmatpush1.bf16.msra.mxu1 %v10422_v29  ;;  %v10466_v41 = vld [vmem:[%s15514_s5 + $0x868] ss:$16 sps:$4 sm:$0xff]   ;;  %v10467_v29 = vld [vmem:[%s15514_s5 + $0x884] ss:$16 sps:$4 sm:$0xff]  }
 0x568   : > { %6730 = vmatprep.subr.bf16.mxu0 %v10423_v2  ;;  %6812 = vmatprep.subr.bf16.mxu1 %v10424_v3  ;;  %v10468_v2 = vld [vmem:[%s15514_s5 + $0x88c] ss:$16 sps:$4 sm:$0xff]   ;;  %v10469_v3 = vld [vmem:[%s15514_s5 + $0x880] ss:$16 sps:$4 sm:$0xff]  }
 0x56b   : > { %6731 = vmatpush1.bf16.msra.mxu0 %v10425_v4  ;;  %6813 = vmatpush1.bf16.msra.mxu1 %v10426_v36  ;;  %v10470_v4 = vld [vmem:[%s15514_s5 + $0x888] ss:$16 sps:$4 sm:$0xff]   ;;  %v10471_v36 = vld [vmem:[%s15514_s5 + $0x8a4] ss:$16 sps:$4 sm:$0xff]  }
 0x56c   : > { %6732 = vmatprep.subr.bf16.mxu0 %v10427_v7  ;;  %6814 = vmatprep.subr.bf16.mxu1 %v10428_v8  ;;  %v10472_v7 = vld [vmem:[%s15514_s5 + $0x8ac] ss:$16 sps:$4 sm:$0xff]   ;;  %v10473_v8 = vld [vmem:[%s15514_s5 + $0x8a0] ss:$16 sps:$4 sm:$0xff]  }
 0x56f   : > { %6733 = vmatpush1.bf16.msra.mxu0 %v10429_v9  ;;  %6815 = vmatpush1.bf16.msra.mxu1 %v10430_v11  ;;  %v10474_v9 = vld [vmem:[%s15514_s5 + $0x8a8] ss:$16 sps:$4 sm:$0xff]   ;;  %v10475_v11 = vld [vmem:[%s15514_s5 + $0x8c4] ss:$16 sps:$4 sm:$0xff]  }
 0x570   : > { %6734 = vmatprep.subr.bf16.mxu0 %v10431_v12  ;;  %6816 = vmatprep.subr.bf16.mxu1 %v10432_v5  ;;  %v10476_v12 = vld [vmem:[%s15514_s5 + $0x8cc] ss:$16 sps:$4 sm:$0xff]   ;;  %v10477_v5 = vld [vmem:[%s15514_s5 + $0x8c0] ss:$16 sps:$4 sm:$0xff]  }
 0x573   : > { %6735 = vmatpush1.bf16.msra.mxu0 %v10433_v14  ;;  %6817 = vmatpush1.bf16.msra.mxu1 %v10434_v16  ;;  %v10478_v14 = vld [vmem:[%s15514_s5 + $0x8c8] ss:$16 sps:$4 sm:$0xff]   ;;  %v10479_v16 = vld [vmem:[%s15514_s5 + $0x8e4] ss:$16 sps:$4 sm:$0xff]  }
 0x574   : > { %6736 = vmatprep.subr.bf16.mxu0 %v10435_v17  ;;  %6818 = vmatprep.subr.bf16.mxu1 %v10436_v30  ;;  %v10480_v17 = vld [vmem:[%s15514_s5 + $0x8ec] ss:$16 sps:$4 sm:$0xff]   ;;  %v10481_v30 = vld [vmem:[%s15514_s5 + $0x8e0] ss:$16 sps:$4 sm:$0xff]  }
 0x577   : > { %6737 = vmatpush1.bf16.msra.mxu0 %v10437_v18  ;;  %6819 = vmatpush1.bf16.msra.mxu1 %v10438_v19  ;;  %v10482_v18 = vld [vmem:[%s15514_s5 + $0x8e8] ss:$16 sps:$4 sm:$0xff]   ;;  %v10483_v19 = vld [vmem:[%s15514_s5 + $0x904] ss:$16 sps:$4 sm:$0xff]  }
 0x578   : > { %6738 = vmatprep.subr.bf16.mxu0 %v10439_v42  ;;  %6820 = vmatprep.subr.bf16.mxu1 %v10440_v22  ;;  %v10484_v42 = vld [vmem:[%s15514_s5 + $0x90c] ss:$16 sps:$4 sm:$0xff]   ;;  %v10485_v22 = vld [vmem:[%s15514_s5 + $0x900] ss:$16 sps:$4 sm:$0xff]  }
 0x57b   : > { %6739 = vmatpush1.bf16.msra.mxu0 %v10441_v23  ;;  %6821 = vmatpush1.bf16.msra.mxu1 %v10442_v13  ;;  %v10486_v23 = vld [vmem:[%s15514_s5 + $0x908] ss:$16 sps:$4 sm:$0xff]   ;;  %v10487_v13 = vld [vmem:[%s15514_s5 + $0x924] ss:$16 sps:$4 sm:$0xff]  }
 0x57c   : > { %6740 = vmatprep.subr.bf16.mxu0 %v10443_v46  ;;  %6822 = vmatprep.subr.bf16.mxu1 %v10444_v25  ;;  %v10488_v46 = vld [vmem:[%s15514_s5 + $0x92c] ss:$16 sps:$4 sm:$0xff]   ;;  %v10489_v25 = vld [vmem:[%s15514_s5 + $0x920] ss:$16 sps:$4 sm:$0xff]  }
 0x57f   : > { %6741 = vmatpush1.bf16.msra.mxu0 %v10445_v37  ;;  %6823 = vmatpush1.bf16.msra.mxu1 %v10446_v38  ;;  %v10490_v37 = vld [vmem:[%s15514_s5 + $0x928] ss:$16 sps:$4 sm:$0xff]   ;;  %v10491_v38 = vld [vmem:[%s15514_s5 + $0x944] ss:$16 sps:$4 sm:$0xff]  }
 0x580   : > { %6742 = vmatprep.subr.bf16.mxu0 %v10447_v39  ;;  %6824 = vmatprep.subr.bf16.mxu1 %v10448_v24  ;;  %v10492_v39 = vld [vmem:[%s15514_s5 + $0x94c] ss:$16 sps:$4 sm:$0xff]   ;;  %v10493_v24 = vld [vmem:[%s15514_s5 + $0x940] ss:$16 sps:$4 sm:$0xff]  }
 0x583   : > { %6743 = vmatpush1.bf16.msra.mxu0 %v10449_v47  ;;  %6825 = vmatpush1.bf16.msra.mxu1 %v10450_v1  ;;  %v10494_v47 = vld [vmem:[%s15514_s5 + $0x948] ss:$16 sps:$4 sm:$0xff]   ;;  %v10495_v1 = vld [vmem:[%s15514_s5 + $0x964] ss:$16 sps:$4 sm:$0xff]  }
 0x584   : > { %6835 = vmatprep.subr.bf16.mxu0 %v10451_v49  ;;  %6917 = vmatprep.subr.bf16.mxu1 %v10452_v50  ;;  %v10496_v49 = vld [vmem:[%s15514_s5 + $0x96c] ss:$16 sps:$4 sm:$0xff]   ;;  %v10497_v50 = vld [vmem:[%s15514_s5 + $0x960] ss:$16 sps:$4 sm:$0xff]  }
 0x586   : > { %6745 = vmatmul.mubr.bf16.vlgmr.msra.gmra.mrb[12].mxu0 %v11066_v10  ;;  %6827 = vmatmul.mubr.bf16.vlgmr.msra.gmra.mrb[12].mxu1 %v11066_v10  ;;  %v10457_v10 = vld [vmem:[%s15514_s5 + $0x820] ss:$16 sps:$4 sm:$0xff]  }
 0x587   : > { %6836 = vmatpush1.bf16.msra.mxu0 %v10453_v51  ;;  %6918 = vmatpush1.bf16.msra.mxu1 %v10454_v52  ;;  %v10498_v51 = vld [vmem:[%s15514_s5 + $0x968] ss:$16 sps:$4 sm:$0xff]   ;;  %v10499_v52 = vld [vmem:[%s15514_s5 + $0x984] ss:$16 sps:$4 sm:$0xff]  }
 0x588   : > { %6837 = vmatprep.subr.bf16.mxu0 %v10455_v53  ;;  %6919 = vmatprep.subr.bf16.mxu1 %v10456_v56  ;;  %v10500_v53 = vld [vmem:[%s15514_s5 + $0x98c] ss:$16 sps:$4 sm:$0xff]   ;;  %v10501_v56 = vld [vmem:[%s15514_s5 + $0x980] ss:$16 sps:$4 sm:$0xff]  }
 0x589   : > { %6867 = vmatprep.mubr.bf16.mxu0 %v13894_v43  ;;  %6949 = vmatprep.mubr.bf16.mxu1 %v13894_v43  ;;  %v10461_v43 = vld [vmem:[%s15514_s5 + $0x840] ss:$16 sps:$4 sm:$0xff]  }
 0x58b   : > { %6838 = vmatpush1.bf16.msra.mxu0 %v10457_v10  ;;  %6920 = vmatpush1.bf16.msra.mxu1 %v10458_v54  ;;  %v10502_v10 = vld [vmem:[%s15514_s5 + $0x988] ss:$16 sps:$4 sm:$0xff]   ;;  %v10503_v54 = vld [vmem:[%s15514_s5 + $0x9a4] ss:$16 sps:$4 sm:$0xff]  }
 0x58c   : > { %6839 = vmatprep.subr.bf16.mxu0 %v10459_v55  ;;  %6921 = vmatprep.subr.bf16.mxu1 %v10460_v57  ;;  %v10504_v55 = vld [vmem:[%s15514_s5 + $0x9ac] ss:$16 sps:$4 sm:$0xff]   ;;  %v10505_v57 = vld [vmem:[%s15514_s5 + $0x9a0] ss:$16 sps:$4 sm:$0xff]  }
 0x58f   : > { %6840 = vmatpush1.bf16.msra.mxu0 %v10461_v43  ;;  %6922 = vmatpush1.bf16.msra.mxu1 %v10462_v48  ;;  %v10506_v43 = vld [vmem:[%s15514_s5 + $0x9a8] ss:$16 sps:$4 sm:$0xff]   ;;  %v10507_v48 = vld [vmem:[%s15514_s5 + $0x9c4] ss:$16 sps:$4 sm:$0xff]  }
 0x590   : > { %6841 = vmatprep.subr.bf16.mxu0 %v10463_v21  ;;  %6923 = vmatprep.subr.bf16.mxu1 %v10464_v58  ;;  %v10508_v21 = vld [vmem:[%s15514_s5 + $0x9cc] ss:$16 sps:$4 sm:$0xff]   ;;  %v10509_v58 = vld [vmem:[%s15514_s5 + $0x9c0] ss:$16 sps:$4 sm:$0xff]  }
 0x593   : > { %6842 = vmatpush1.bf16.msra.mxu0 %v10465_v59  ;;  %6924 = vmatpush1.bf16.msra.mxu1 %v10466_v41  ;;  %v10510_v59 = vld [vmem:[%s15514_s5 + $0x9c8] ss:$16 sps:$4 sm:$0xff]   ;;  %v10511_v41 = vld [vmem:[%s15514_s5 + $0x9e4] ss:$16 sps:$4 sm:$0xff]  }
 0x594   : > { %6843 = vmatprep.subr.bf16.mxu0 %v10467_v29  ;;  %6925 = vmatprep.subr.bf16.mxu1 %v10468_v2  ;;  %v10512_v29 = vld [vmem:[%s15514_s5 + $0x9ec] ss:$16 sps:$4 sm:$0xff]   ;;  %v10513_v2 = vld [vmem:[%s15514_s5 + $0x9e0] ss:$16 sps:$4 sm:$0xff]  }
 0x597   : > { %6844 = vmatpush1.bf16.msra.mxu0 %v10469_v3  ;;  %6926 = vmatpush1.bf16.msra.mxu1 %v10470_v4  ;;  %v10514_v3 = vld [vmem:[%s15514_s5 + $0x9e8] ss:$16 sps:$4 sm:$0xff]   ;;  %v10515_v4 = vld [vmem:[%s15514_s5 + $0xa04] ss:$16 sps:$4 sm:$0xff]  }
 0x598   : > { %6845 = vmatprep.subr.bf16.mxu0 %v10471_v36  ;;  %6927 = vmatprep.subr.bf16.mxu1 %v10472_v7  ;;  %v10516_v36 = vld [vmem:[%s15514_s5 + $0xa0c] ss:$16 sps:$4 sm:$0xff]   ;;  %v10517_v7 = vld [vmem:[%s15514_s5 + $0xa00] ss:$16 sps:$4 sm:$0xff]  }
 0x59b   : > { %6846 = vmatpush1.bf16.msra.mxu0 %v10473_v8  ;;  %6928 = vmatpush1.bf16.msra.mxu1 %v10474_v9  ;;  %v10518_v8 = vld [vmem:[%s15514_s5 + $0xa08] ss:$16 sps:$4 sm:$0xff]   ;;  %v10519_v9 = vld [vmem:[%s15514_s5 + $0xa24] ss:$16 sps:$4 sm:$0xff]  }
 0x59c   : > { %6847 = vmatprep.subr.bf16.mxu0 %v10475_v11  ;;  %6929 = vmatprep.subr.bf16.mxu1 %v10476_v12  ;;  %v10520_v11 = vld [vmem:[%s15514_s5 + $0xa2c] ss:$16 sps:$4 sm:$0xff]   ;;  %v10522_v12 = vld [vmem:[%s15514_s5 + $0xa28] ss:$16 sps:$4 sm:$0xff]  }
 0x59f   : > { %6848 = vmatpush1.bf16.msra.mxu0 %v10477_v5  ;;  %6930 = vmatpush1.bf16.msra.mxu1 %v10478_v14  ;;  %v10523_v5 = vld [vmem:[%s15514_s5 + $0xa44] ss:$16 sps:$4 sm:$0xff]   ;;  %v10524_v14 = vld [vmem:[%s15514_s5 + $0xa4c] ss:$16 sps:$4 sm:$0xff]  }
 0x5a0   : > { %6849 = vmatprep.subr.bf16.mxu0 %v10479_v16  ;;  %6931 = vmatprep.subr.bf16.mxu1 %v10480_v17  ;;  %v10526_v16 = vld [vmem:[%s15514_s5 + $0xa48] ss:$16 sps:$4 sm:$0xff]   ;;  %v10527_v17 = vld [vmem:[%s15514_s5 + $0xa64] ss:$16 sps:$4 sm:$0xff]  }
 0x5a3   : > { %6850 = vmatpush1.bf16.msra.mxu0 %v10481_v30  ;;  %6932 = vmatpush1.bf16.msra.mxu1 %v10482_v18  ;;  %v10528_v30 = vld [vmem:[%s15514_s5 + $0xa6c] ss:$16 sps:$4 sm:$0xff]   ;;  %v10529_v18 = vld [vmem:[%s15514_s5 + $0xa60] ss:$16 sps:$4 sm:$0xff]  }
 0x5a4   : > { %6851 = vmatprep.subr.bf16.mxu0 %v10483_v19  ;;  %6933 = vmatprep.subr.bf16.mxu1 %v10484_v42  ;;  %v10530_v19 = vld [vmem:[%s15514_s5 + $0xa68] ss:$16 sps:$4 sm:$0xff]   ;;  %v10531_v42 = vld [vmem:[%s15514_s5 + $0xa84] ss:$16 sps:$4 sm:$0xff]  }
 0x5a7   : > { %6852 = vmatpush1.bf16.msra.mxu0 %v10485_v22  ;;  %6934 = vmatpush1.bf16.msra.mxu1 %v10486_v23  ;;  %v10532_v22 = vld [vmem:[%s15514_s5 + $0xa8c] ss:$16 sps:$4 sm:$0xff]   ;;  %v10533_v23 = vld [vmem:[%s15514_s5 + $0xa80] ss:$16 sps:$4 sm:$0xff]  }
 0x5a8   : > { %6853 = vmatprep.subr.bf16.mxu0 %v10487_v13  ;;  %6935 = vmatprep.subr.bf16.mxu1 %v10488_v46  ;;  %v10534_v13 = vld [vmem:[%s15514_s5 + $0xa88] ss:$16 sps:$4 sm:$0xff]   ;;  %v10535_v46 = vld [vmem:[%s15514_s5 + $0xaa4] ss:$16 sps:$4 sm:$0xff]  }
 0x5ab   : > { %6854 = vmatpush1.bf16.msra.mxu0 %v10489_v25  ;;  %6936 = vmatpush1.bf16.msra.mxu1 %v10490_v37  ;;  %v10536_v25 = vld [vmem:[%s15514_s5 + $0xaac] ss:$16 sps:$4 sm:$0xff]   ;;  %v10537_v37 = vld [vmem:[%s15514_s5 + $0xaa0] ss:$16 sps:$4 sm:$0xff]  }
 0x5ac   : > { %6855 = vmatprep.subr.bf16.mxu0 %v10491_v38  ;;  %6937 = vmatprep.subr.bf16.mxu1 %v10492_v39  ;;  %v10538_v38 = vld [vmem:[%s15514_s5 + $0xaa8] ss:$16 sps:$4 sm:$0xff]   ;;  %v10539_v39 = vld [vmem:[%s15514_s5 + $0xac4] ss:$16 sps:$4 sm:$0xff]  }
 0x5af   : > { %6856 = vmatpush1.bf16.msra.mxu0 %v10493_v24  ;;  %6938 = vmatpush1.bf16.msra.mxu1 %v10494_v47  ;;  %v10540_v24 = vld [vmem:[%s15514_s5 + $0xacc] ss:$16 sps:$4 sm:$0xff]   ;;  %v10541_v47 = vld [vmem:[%s15514_s5 + $0xac0] ss:$16 sps:$4 sm:$0xff]  }
 0x5b0   : > { %6857 = vmatprep.subr.bf16.mxu0 %v10495_v1  ;;  %6939 = vmatprep.subr.bf16.mxu1 %v10496_v49  ;;  %v10542_v1 = vld [vmem:[%s15514_s5 + $0xac8] ss:$16 sps:$4 sm:$0xff]   ;;  %v10543_v49 = vld [vmem:[%s15514_s5 + $0xae4] ss:$16 sps:$4 sm:$0xff]  }
 0x5b3   : > { %6858 = vmatpush1.bf16.msra.mxu0 %v10497_v50  ;;  %6940 = vmatpush1.bf16.msra.mxu1 %v10498_v51  ;;  %v10544_v50 = vld [vmem:[%s15514_s5 + $0xaec] ss:$16 sps:$4 sm:$0xff]   ;;  %v10545_v51 = vld [vmem:[%s15514_s5 + $0xae0] ss:$16 sps:$4 sm:$0xff]  }
 0x5b4   : > { %6859 = vmatprep.subr.bf16.mxu0 %v10499_v52  ;;  %6941 = vmatprep.subr.bf16.mxu1 %v10500_v53  ;;  %v10546_v52 = vld [vmem:[%s15514_s5 + $0xae8] ss:$16 sps:$4 sm:$0xff]   ;;  %v10547_v53 = vld [vmem:[%s15514_s5 + $0xb04] ss:$16 sps:$4 sm:$0xff]  }
 0x5b7   : > { %6860 = vmatpush1.bf16.msra.mxu0 %v10501_v56  ;;  %6942 = vmatpush1.bf16.msra.mxu1 %v10502_v10  ;;  %v10548_v56 = vld [vmem:[%s15514_s5 + $0xb0c] ss:$16 sps:$4 sm:$0xff]   ;;  %v10549_v10 = vld [vmem:[%s15514_s5 + $0xb00] ss:$16 sps:$4 sm:$0xff]  }
 0x5b8   : > { %6861 = vmatprep.subr.bf16.mxu0 %v10503_v54  ;;  %6943 = vmatprep.subr.bf16.mxu1 %v10504_v55  ;;  %v10550_v54 = vld [vmem:[%s15514_s5 + $0xb08] ss:$16 sps:$4 sm:$0xff]   ;;  %v10551_v55 = vld [vmem:[%s15514_s5 + $0xb24] ss:$16 sps:$4 sm:$0xff]  }
 0x5bb   : > { %6862 = vmatpush1.bf16.msra.mxu0 %v10505_v57  ;;  %6944 = vmatpush1.bf16.msra.mxu1 %v10506_v43  ;;  %v10552_v57 = vld [vmem:[%s15514_s5 + $0xb2c] ss:$16 sps:$4 sm:$0xff]   ;;  %v10553_v43 = vld [vmem:[%s15514_s5 + $0xb20] ss:$16 sps:$4 sm:$0xff]  }
 0x5bc   : > { %6863 = vmatprep.subr.bf16.mxu0 %v10507_v48  ;;  %6945 = vmatprep.subr.bf16.mxu1 %v10508_v21  ;;  %v10554_v48 = vld [vmem:[%s15514_s5 + $0xb28] ss:$16 sps:$4 sm:$0xff]   ;;  %v10555_v21 = vld [vmem:[%s15514_s5 + $0xb44] ss:$16 sps:$4 sm:$0xff]  }
 0x5bf   : > { %6864 = vmatpush1.bf16.msra.mxu0 %v10509_v58  ;;  %6946 = vmatpush1.bf16.msra.mxu1 %v10510_v59  ;;  %v10556_v58 = vld [vmem:[%s15514_s5 + $0xb4c] ss:$16 sps:$4 sm:$0xff]   ;;  %v10557_v59 = vld [vmem:[%s15514_s5 + $0xb40] ss:$16 sps:$4 sm:$0xff]  }
 0x5c0   : > { %6865 = vmatprep.subr.bf16.mxu0 %v10511_v41  ;;  %6947 = vmatprep.subr.bf16.mxu1 %v10512_v29  ;;  %v10558_v41 = vld [vmem:[%s15514_s5 + $0xb48] ss:$16 sps:$4 sm:$0xff]   ;;  %v10559_v29 = vld [vmem:[%s15514_s5 + $0xb64] ss:$16 sps:$4 sm:$0xff]  }
 0x5c3   : > { %6866 = vmatpush1.bf16.msra.mxu0 %v10513_v2  ;;  %6948 = vmatpush1.bf16.msra.mxu1 %v10514_v3  ;;  %v10560_v2 = vld [vmem:[%s15514_s5 + $0xb6c] ss:$16 sps:$4 sm:$0xff]   ;;  %v10561_v3 = vld [vmem:[%s15514_s5 + $0xb60] ss:$16 sps:$4 sm:$0xff]  }
 0x5c4   : > { %6876 = vmatprep.subr.bf16.mxu0 %v10515_v4  ;;  %6958 = vmatprep.subr.bf16.mxu1 %v10516_v36  ;;  %v10562_v4 = vld [vmem:[%s15514_s5 + $0xb68] ss:$16 sps:$4 sm:$0xff]   ;;  %v10563_v36 = vld [vmem:[%s15514_s5 + $0xb84] ss:$16 sps:$4 sm:$0xff]  }
 0x5c6   : > { %6868 = vmatmul.mubr.bf16.vlgmr.msra.gmra.mrb[12].mxu0 %v14082_v0  ;;  %6950 = vmatmul.mubr.bf16.vlgmr.msra.gmra.mrb[12].mxu1 %v14082_v0  ;;  %v10521_v0 = vld [vmem:[%s15514_s5 + $0xa20] ss:$16 sps:$4 sm:$0xff]  }
 0x5c7   : > { %6877 = vmatpush1.bf16.msra.mxu0 %v10517_v7  ;;  %6959 = vmatpush1.bf16.msra.mxu1 %v10518_v8  ;;  %v10564_v7 = vld [vmem:[%s15514_s5 + $0xb8c] ss:$16 sps:$4 sm:$0xff]   ;;  %v10565_v8 = vld [vmem:[%s15514_s5 + $0xb80] ss:$16 sps:$4 sm:$0xff]  }
 0x5c8   : > { %6878 = vmatprep.subr.bf16.mxu0 %v10519_v9  ;;  %6960 = vmatprep.subr.bf16.mxu1 %v10520_v11  ;;  %v10566_v9 = vld [vmem:[%s15514_s5 + $0xb88] ss:$16 sps:$4 sm:$0xff]   ;;  %v10567_v11 = vld [vmem:[%s15514_s5 + $0xba4] ss:$16 sps:$4 sm:$0xff]  }
 0x5c9   : > { %6908 = vmatprep.mubr.bf16.mxu0 %v14101_v6  ;;  %6990 = vmatprep.mubr.bf16.mxu1 %v14101_v6  ;;  %v10525_v6 = vld [vmem:[%s15514_s5 + $0xa40] ss:$16 sps:$4 sm:$0xff]  }
 0x5cb   : > { %6879 = vmatpush1.bf16.msra.mxu0 %v10521_v0  ;;  %6961 = vmatpush1.bf16.msra.mxu1 %v10522_v12  ;;  %v10568_v0 = vld [vmem:[%s15514_s5 + $0xbac] ss:$16 sps:$4 sm:$0xff]   ;;  %v10569_v12 = vld [vmem:[%s15514_s5 + $0xba0] ss:$16 sps:$4 sm:$0xff]  }
 0x5cc   : > { %6880 = vmatprep.subr.bf16.mxu0 %v10523_v5  ;;  %6962 = vmatprep.subr.bf16.mxu1 %v10524_v14  ;;  %v10570_v5 = vld [vmem:[%s15514_s5 + $0xba8] ss:$16 sps:$4 sm:$0xff]   ;;  %v10571_v14 = vld [vmem:[%s15514_s5 + $0xbc4] ss:$16 sps:$4 sm:$0xff]  }
 0x5cf   : > { %6881 = vmatpush1.bf16.msra.mxu0 %v10525_v6  ;;  %6963 = vmatpush1.bf16.msra.mxu1 %v10526_v16  ;;  %v10572_v6 = vld [vmem:[%s15514_s5 + $0xbcc] ss:$16 sps:$4 sm:$0xff]   ;;  %v10573_v16 = vld [vmem:[%s15514_s5 + $0xbc0] ss:$16 sps:$4 sm:$0xff]  }
 0x5d0   : > { %6882 = vmatprep.subr.bf16.mxu0 %v10527_v17  ;;  %6964 = vmatprep.subr.bf16.mxu1 %v10528_v30  ;;  %v10574_v17 = vld [vmem:[%s15514_s5 + $0xbc8] ss:$16 sps:$4 sm:$0xff]   ;;  %v10575_v30 = vld [vmem:[%s15514_s5 + $0xbe4] ss:$16 sps:$4 sm:$0xff]  }
 0x5d3   : > { %6883 = vmatpush1.bf16.msra.mxu0 %v10529_v18  ;;  %6965 = vmatpush1.bf16.msra.mxu1 %v10530_v19  ;;  %v10576_v18 = vld [vmem:[%s15514_s5 + $0xbec] ss:$16 sps:$4 sm:$0xff]   ;;  %v10577_v19 = vld [vmem:[%s15514_s5 + $0xbe0] ss:$16 sps:$4 sm:$0xff]  }
 0x5d4   : > { %6884 = vmatprep.subr.bf16.mxu0 %v10531_v42  ;;  %6966 = vmatprep.subr.bf16.mxu1 %v10532_v22  ;;  %v10578_v42 = vld [vmem:[%s15514_s5 + $0xbe8] ss:$16 sps:$4 sm:$0xff]   ;;  %v7013_v22 = vlaneseq }
 0x5d7   : > { %6885 = vmatpush1.bf16.msra.mxu0 %v10533_v23  ;;  %6967 = vmatpush1.bf16.msra.mxu1 %v10534_v13  ;;  %v7014_v23 = vshrl.u32 %v7013_v22, 7 }
 0x5d8   : > { %6886 = vmatprep.subr.bf16.mxu0 %v10535_v46  ;;  %6968 = vmatprep.subr.bf16.mxu1 %v10536_v25  ;;  %v7011_v25 = vld [vmem:[%s15515_s6] sm:$0xf] }
 0x5d9   : > { %v7015_v13 = vsub.s32 0, %v7014_v23  ;;  %v7023_v46 = vsub.s32 2, %v7014_v23 }
 0x5db   : > { %6887 = vmatpush1.bf16.msra.mxu0 %v10537_v37  ;;  %6969 = vmatpush1.bf16.msra.mxu1 %v10538_v38  ;;  %v7019_v37 = vsub.s32 1, %v7014_v23  ;;  %v7027_v38 = vsub.s32 3, %v7014_v23 }
 0x5dc   : > { %6888 = vmatprep.subr.bf16.mxu0 %v10539_v39  ;;  %6970 = vmatprep.subr.bf16.mxu1 %v10540_v24 }
 0x5df   : > { %6889 = vmatpush1.bf16.msra.mxu0 %v10541_v47  ;;  %6971 = vmatpush1.bf16.msra.mxu1 %v10542_v1  ;;  %v7016_v1 = vrot.slane %v7011_v25, %v7015_v13 }
 0x5e0   : > { %6890 = vmatprep.subr.bf16.mxu0 %v10543_v49  ;;  %6972 = vmatprep.subr.bf16.mxu1 %v10544_v50  ;;  %v7024_v50 = vrot.slane %v7011_v25, %v7023_v46 }
 0x5e3   : > { %6891 = vmatpush1.bf16.msra.mxu0 %v10545_v51  ;;  %6973 = vmatpush1.bf16.msra.mxu1 %v10546_v52 }
 0x5e4   : > { %6892 = vmatprep.subr.bf16.mxu0 %v10547_v53  ;;  %6974 = vmatprep.subr.bf16.mxu1 %v10548_v56  ;;  %v7020_v53 = vrot.slane %v7011_v25, %v7019_v37 }
 0x5e7   : > { %6893 = vmatpush1.bf16.msra.mxu0 %v10549_v10  ;;  %6975 = vmatpush1.bf16.msra.mxu1 %v10550_v54  ;;  %v7028_v10 = vrot.slane %v7011_v25, %v7027_v38 }
 0x5e8   : > { %6894 = vmatprep.subr.bf16.mxu0 %v10551_v55  ;;  %6976 = vmatprep.subr.bf16.mxu1 %v10552_v57 }
 0x5eb   : > { %6895 = vmatpush1.bf16.msra.mxu0 %v10553_v43  ;;  %6977 = vmatpush1.bf16.msra.mxu1 %v10554_v48 }
 0x5ec   : > { %6896 = vmatprep.subr.bf16.mxu0 %v10555_v21  ;;  %6978 = vmatprep.subr.bf16.mxu1 %v10556_v58 }
 0x5ef   : > { %6897 = vmatpush1.bf16.msra.mxu0 %v10557_v59  ;;  %6979 = vmatpush1.bf16.msra.mxu1 %v10558_v41 }
 0x5f0   : > { %6898 = vmatprep.subr.bf16.mxu0 %v10559_v29  ;;  %6980 = vmatprep.subr.bf16.mxu1 %v10560_v2 }
 0x5f3   : > { %6899 = vmatpush1.bf16.msra.mxu0 %v10561_v3  ;;  %6981 = vmatpush1.bf16.msra.mxu1 %v10562_v4 }
 0x5f4   : > { %6900 = vmatprep.subr.bf16.mxu0 %v10563_v36  ;;  %6982 = vmatprep.subr.bf16.mxu1 %v10564_v7 }
 0x5f7   : > { %6901 = vmatpush1.bf16.msra.mxu0 %v10565_v8  ;;  %6983 = vmatpush1.bf16.msra.mxu1 %v10566_v9 }
 0x5f8   : > { %6902 = vmatprep.subr.bf16.mxu0 %v10567_v11  ;;  %6984 = vmatprep.subr.bf16.mxu1 %v10568_v0 }
 0x5fb   : > { %6903 = vmatpush1.bf16.msra.mxu0 %v10569_v12  ;;  %6985 = vmatpush1.bf16.msra.mxu1 %v10570_v5 }
 0x5fc   : > { %6904 = vmatprep.subr.bf16.mxu0 %v10571_v14  ;;  %6986 = vmatprep.subr.bf16.mxu1 %v10572_v6 }
 0x5ff   : > { %6905 = vmatpush1.bf16.msra.mxu0 %v10573_v16  ;;  %6987 = vmatpush1.bf16.msra.mxu1 %v10574_v17 }
 0x600   : > { %6906 = vmatprep.subr.bf16.mxu0 %v10575_v30  ;;  %6988 = vmatprep.subr.bf16.mxu1 %v10576_v18 }
 0x603   : > { %6907 = vmatpush1.bf16.msra.mxu0 %v10577_v19  ;;  %6989 = vmatpush1.bf16.msra.mxu1 %v10578_v42 }
 0x606   : > { %6909 = vmatmul.mubr.bf16.vlgmr.msra.gmra.mrb[12].mxu0 %v14289_v45  ;;  %6991 = vmatmul.mubr.bf16.vlgmr.msra.gmra.mrb[12].mxu1 %v14289_v45 }
 0x6d9   : > { %v6910_v39 = vpop.f32.mrb[12].mxu0  ;;  %v6992_v24 = vpop.f32.mrb[12].mxu1 }
 0x6da   : > { %v7003_v47 = vmax.f32 %v14955_v40, %v6910_v39  ;;  %v7005_v49 = vmax.f32 %v14957_v20, %v6992_v24  ;;  %v6912_v51 = vpop.f32.mrb[13].mxu0  ;;  %v6994_v45 = vpop.f32.mrb[13].mxu1 }
 0x6db   : > { %v7004_v52 = vmax.f32 %v14959_v44, %v6912_v51  ;;  %v7006_v56 = vmax.f32 %v14961_v31, %v6994_v45  ;;  %v6914_v54 = vpop.f32.mrb[14].mxu0  ;;  %v6996_v55 = vpop.f32.mrb[14].mxu1 }
 0x6dc   : > { %v7007_v57 = vmax.f32 %v5993_v28, %v7003_v47  ;;  %v7009_v40 = vmax.f32 %v5995_v32, %v7005_v49  ;;  %v6915_v20 = vpop.f32.mrb[15].mxu0  ;;  %v6997_v43 = vpop.f32.mrb[15].mxu1 }
 0x6dd   : > { %v7008_v44 = vmax.f32 %v5994_v35, %v7004_v52  ;;  %v7010_v31 = vmax.f32 %v5996_v15, %v7006_v56 }
 0x6de   : > { %v7033_v48 = vadd.f32 %v7016_v1, %v7007_v57  ;;  %v7035_v21 = vadd.f32 %v7024_v50, %v7009_v40 }
 0x6df   : > { %v7034_v58 = vadd.f32 %v7020_v53, %v7008_v44  ;;  %v7036_v60 = vadd.f32 %v7028_v10, %v7010_v31 }
 0x6e0   : > { %v7037_v26 = vmax.f32 %v7033_v48, 0.0  ;;  %v7039_v61 = vmax.f32 %v7035_v21, 0.0 }
 0x6e1   : > { %v7038_v27 = vmax.f32 %v7034_v58, 0.0  ;;  %v7040_v28 = vmax.f32 %v7036_v60, 0.0 }
 0x6e3   : > { %v8473_v62 = vpack.c.bf16 %v7038_v27, %v7037_v26  ;;  %v8474_v32 = vpack.c.bf16 %v7040_v28, %v7039_v61 }
 0x6e5   : > { %7057 = vst [vmem:[%s338_s29] sm:$0xff] %v8473_v62  ;;  %7061 = vst.msk [vmem:[%s338_s29 + $0x8] sm:$0xff] %vm7060_vm2, %v8474_v32 }
 0x6e6 PF: > { %s17_s24 = sadd.s32 1, %s10585_s24  }
 0x6e7   : > { %p14_p4 = scmp.ge.s32.totalorder %s17_s24, 4  }
 0x6e9   :  { %16 = sbr.rel (!%p14_p4) target bundleno = 1 (0x1), region = 91 }

</bundles_post_ra>
